<compile_context>
chip_gen: v5e
topology: v5e:2x2
jax: 0.10.0
libtpu: 0.0.40
codegen_flags: <defaults>
</compile_context>

<pallas_src>
import jax
import jax.numpy as jnp
from jax import lax
from jax.experimental import pallas as pl
from jax.experimental.pallas import tpu as pltpu
import numpy as np

EPS = 1e-5
K = 5  # depthwise kernel size


def make_fused_kernel(N, H, W, Cin, CB, Ho, Wo):
    """Builds the fused kernel for one 128-channel block of the output."""
    Hh, Wh = H // 2, W // 2          # per-phase interior size (14, 14)
    P = N * H * W                    # number of real pixels (BN population)
    inv_P = 1.0 / float(P)

    def kernel(x_ref, w1_ref, g_ref, b_ref, w2_ref, o_ref, z_ref, yph_ref):
        # x_ref : [P, Cin]           phase-major flattened input
        # w1_ref: [Cin, CB]          1x1-conv weights (this channel block)
        # g_ref / b_ref: [1, CB]     BN gamma / beta
        # w2_ref: [K*K, 1, 1, CB]    depthwise tap weights
        # o_ref : [N, Ho, Wo, CB]    output block (NHWC, lane-dense)
        # z_ref : [P, CB]            VMEM scratch: raw 1x1-conv output
        # yph_ref: [N, 4, Hh+2, Wh+2, CB]  VMEM scratch: padded stride-2 phases

        # ---- 1x1 conv (MXU) + one-pass BN statistics ----
        y = jnp.dot(x_ref[...], w1_ref[...], preferred_element_type=jnp.float32)
        z_ref[...] = y
        s1 = jnp.sum(y, axis=0, keepdims=True)          # [1, CB]
        s2 = jnp.sum(y * y, axis=0, keepdims=True)      # [1, CB]
        mean = s1 * inv_P
        var = s2 * inv_P - mean * mean                  # biased (train-mode) variance
        inv = lax.rsqrt(var + EPS)
        scale = inv * g_ref[...]                        # [1, CB]
        shift = b_ref[...] - mean * scale               # [1, CB]

        # ---- zero padded phase scratch (borders stay zero = conv padding) ----
        yph_ref[...] = jnp.zeros_like(yph_ref)

        # ---- normalize + ReLU + scatter rows into the padded stride-2 phases ----
        for n in range(N):
            for p in range(4):                           # p = 2*(row parity) + col parity
                for u in range(Hh):
                    off = (n * 4 + p) * (Hh * Wh) + u * Wh
                    row = z_ref[off:off + Wh, :]                       # [Wh, CB]
                    yn = jnp.maximum(row * scale + shift, 0.0)
                    yph_ref[n, p, u + 1, 1:Wh + 1, :] = yn

        # ---- depthwise 5x5 stride-2 conv: 25 taps, contiguous phase slices ----
        for n in range(N):
            acc = jnp.zeros((Ho, Wo, CB), jnp.float32)
            for rp in range(2):
                for cp in range(2):
                    p = 2 * rp + cp
                    for b in range(3 - cp):              # kw = 2*b + cp <= 4
                        # pre-shifted view, reused for every kh with this (phase, b)
                        view = yph_ref[n, p, :, b:b + Wo, :]           # [Hh+2, Wo, CB]
                        for a in range(3 - rp):          # kh = 2*a + rp <= 4
                            kh = 2 * a + rp
                            kw = 2 * b + cp
                            w_tap = w2_ref[kh * K + kw]                # [1, 1, CB]
                            acc = acc + view[a:a + Ho] * w_tap
            o_ref[n] = acc

    return kernel


def forward(x_nchw, w1, gamma, beta, w2):
    """x_nchw: [N, 40, H, W]; w1: [240, 40, 1, 1]; w2: [240, 1, 5, 5] -> NCHW output."""
    N, Cin, H, W = x_nchw.shape
    Cout = w1.shape[0]
    CB = 128
    Cpad = ((Cout + CB - 1) // CB) * CB
    pad_c = Cpad - Cout
    Hh, Wh = H // 2, W // 2
    Ho = (H + 4 - K) // 2 + 1
    Wo = (W + 4 - K) // 2 + 1

    # ---- phase-major reorder of the input (the 1x1 conv commutes with it) ----
    x_nhwc = jnp.transpose(x_nchw, (0, 2, 3, 1))                     # [N,H,W,Cin]
    x_ph = x_nhwc.reshape(N, Hh, 2, Wh, 2, Cin)
    x_ph = jnp.transpose(x_ph, (0, 2, 4, 1, 3, 5))                   # [N,2,2,Hh,Wh,Cin]
    x_pm = x_ph.reshape(N * 4 * Hh * Wh, Cin)                        # [P, Cin]

    # ---- lane-pad every channel-indexed tensor 240 -> 256 (zeros are benign) ----
    w1_mat = jnp.pad(w1.reshape(Cout, Cin).T, ((0, 0), (0, pad_c)))      # [Cin, Cpad]
    g2d = jnp.pad(gamma, (0, pad_c)).reshape(1, Cpad)
    b2d = jnp.pad(beta, (0, pad_c)).reshape(1, Cpad)
    w2_mat = jnp.pad(w2.reshape(Cout, K * K).T, ((0, 0), (0, pad_c)))    # [25, Cpad]
    w2_mat = w2_mat.reshape(K * K, 1, 1, Cpad)

    n_blk = Cpad // CB
    kernel = make_fused_kernel(N, H, W, Cin, CB, Ho, Wo)

    out_nhwc = pl.pallas_call(
        kernel,
        out_shape=jax.ShapeDtypeStruct((N, Ho, Wo, Cpad), jnp.float32),
        grid=(n_blk,),
        in_specs=[
            pl.BlockSpec((N * 4 * Hh * Wh, Cin), lambda c: (0, 0)),
            pl.BlockSpec((Cin, CB), lambda c: (0, c)),
            pl.BlockSpec((1, CB), lambda c: (0, c)),
            pl.BlockSpec((1, CB), lambda c: (0, c)),
            pl.BlockSpec((K * K, 1, 1, CB), lambda c: (0, 0, 0, c)),
        ],
        out_specs=pl.BlockSpec((N, Ho, Wo, CB), lambda c: (0, 0, 0, c)),
        scratch_shapes=[
            pltpu.VMEM((N * 4 * Hh * Wh, CB), jnp.float32),          # z (raw 1x1 out)
            pltpu.VMEM((N, 4, Hh + 2, Wh + 2, CB), jnp.float32),     # padded phases
        ],
        compiler_params=pltpu.CompilerParams(dimension_semantics=("parallel",)),
    )(x_pm, w1_mat, g2d, b2d, w2_mat)

    out = out_nhwc[..., :Cout]                                        # drop lane pad
    return jnp.transpose(out, (0, 3, 1, 2))                           # back to NCHW


# ---------------------------- pure-JAX reference -------------------------------
def reference(x, w1, gamma, beta, w2):
    dn = ("NCHW", "OIHW", "NCHW")
    y = lax.conv_general_dilated(x, w1, (1, 1), "VALID", dimension_numbers=dn)
    mean = jnp.mean(y, axis=(0, 2, 3), keepdims=True)
    var = jnp.mean((y - mean) ** 2, axis=(0, 2, 3), keepdims=True)
    y = (y - mean) * lax.rsqrt(var + EPS)
    y = y * gamma[None, :, None, None] + beta[None, :, None, None]
    y = jnp.maximum(y, 0.0)
    out = lax.conv_general_dilated(
        y, w2, (2, 2), ((2, 2), (2, 2)), feature_group_count=w2.shape[0],
        dimension_numbers=dn)
    return out


if __name__ == "__main__":
    key = jax.random.PRNGKey(0)
    k_x, k_w1, k_g, k_b, k_w2 = jax.random.split(key, 5)

    N, Cin, H, W = 1, 40, 28, 28
    Cout = 240

    x60 = jax.random.normal(k_x, (N, Cin, H, W), jnp.float32)
    w1 = jax.random.normal(k_w1, (Cout, Cin, 1, 1), jnp.float32) * 0.1
    gamma = jax.random.normal(k_g, (Cout,), jnp.float32) * 0.1 + 1.0
    beta = jax.random.normal(k_b, (Cout,), jnp.float32) * 0.1
    w2 = jax.random.normal(k_w2, (Cout, 1, K, K), jnp.float32) * 0.1

    fwd = jax.jit(forward)
    out = jax.block_until_ready(fwd(x60, w1, gamma, beta, w2))
    ref = jax.block_until_ready(reference(x60, w1, gamma, beta, w2))

    assert out.shape == (N, Cout, 14, 14), out.shape
    np.testing.assert_allclose(np.asarray(out), np.asarray(ref), rtol=1e-2, atol=1e-2)
    print("KERNEL_OK")
</pallas_src>

<mosaic_0001>
module attributes {stable_mosaic.version = 11 : i64} {
  func.func @kernel(%arg0: i32, %arg1: memref<784x40xf32, #tpu.memory_space<vmem>>, %arg2: memref<40x128xf32, #tpu.memory_space<vmem>>, %arg3: memref<1x128xf32, #tpu.memory_space<vmem>>, %arg4: memref<1x128xf32, #tpu.memory_space<vmem>>, %arg5: memref<25x1x1x128xf32, #tpu.memory_space<vmem>>, %arg6: memref<1x14x14x128xf32, #tpu.memory_space<vmem>>, %arg7: memref<784x128xf32, #tpu.memory_space<vmem>>, %arg8: memref<1x4x16x16x128xf32, #tpu.memory_space<vmem>>) attributes {dimension_semantics = [#tpu.dimension_semantics<parallel>], iteration_bounds = array<i64: 2>, scalar_prefetch = 0 : i64, scratch_operands = 2 : i64, tpu.core_type = #tpu.core_type<tc>, window_params = [{pipeline_mode = #tpu.pipeline_mode<synchronous>, transform_indices = @transform_0, window_bounds = array<i64: 784, 40>}, {transform_indices = @transform_1, window_bounds = array<i64: 40, 128>}, {transform_indices = @transform_2, window_bounds = array<i64: 1, 128>}, {transform_indices = @transform_3, window_bounds = array<i64: 1, 128>}, {transform_indices = @transform_4, window_bounds = array<i64: 25, 1, 1, 128>}, {transform_indices = @transform_5, window_bounds = array<i64: 1, 14, 14, 128>}]} {
    %c0 = arith.constant 0 : index
    %c0_0 = arith.constant 0 : index
    %0 = vector.load %arg1[%c0, %c0_0] : memref<784x40xf32, #tpu.memory_space<vmem>>, vector<784x40xf32>
    %c0_1 = arith.constant 0 : index
    %c0_2 = arith.constant 0 : index
    %1 = vector.load %arg2[%c0_1, %c0_2] : memref<40x128xf32, #tpu.memory_space<vmem>>, vector<40x128xf32>
    %cst = arith.constant dense<0.000000e+00> : vector<784x128xf32>
    %2 = tpu.matmul %0, %1, %cst {dimension_numbers = #tpu.dot_dimension_numbers<[1], [0], [0], [1], [0, 0, 1, 1], [], []>} : vector<784x40xf32>, vector<40x128xf32>, vector<784x128xf32> -> vector<784x128xf32>
    %c0_3 = arith.constant 0 : index
    %c0_4 = arith.constant 0 : index
    %3 = vector.load %arg7[%c0_3, %c0_4] : memref<784x128xf32, #tpu.memory_space<vmem>>, vector<784x128xf32>
    tpu.vector_store %arg7[%c0_3, %c0_4], %2 {strides = array<i32>} : memref<784x128xf32, #tpu.memory_space<vmem>>, vector<784x128xf32>,
    %cst_5 = arith.constant dense<0.000000e+00> : vector<128xf32>
    %4 = vector.multi_reduction <add>, %2, %cst_5 [0] : vector<784x128xf32> to vector<128xf32>
    %5 = vector.shape_cast %4 : vector<128xf32> to vector<1x128xf32>
    %6 = arith.mulf %2, %2 : vector<784x128xf32>
    %cst_6 = arith.constant dense<0.000000e+00> : vector<128xf32>
    %7 = vector.multi_reduction <add>, %6, %cst_6 [0] : vector<784x128xf32> to vector<128xf32>
    %8 = vector.shape_cast %7 : vector<128xf32> to vector<1x128xf32>
    %cst_7 = arith.constant 0.00127551018 : f32
    %9 = vector.broadcast %cst_7 : f32 to vector<1x128xf32>
    %10 = arith.mulf %5, %9 : vector<1x128xf32>
    %cst_8 = arith.constant 0.00127551018 : f32
    %11 = vector.broadcast %cst_8 : f32 to vector<1x128xf32>
    %12 = arith.mulf %8, %11 : vector<1x128xf32>
    %13 = arith.mulf %10, %10 : vector<1x128xf32>
    %14 = arith.subf %12, %13 : vector<1x128xf32>
    %cst_9 = arith.constant 9.99999974E-6 : f32
    %15 = vector.broadcast %cst_9 : f32 to vector<1x128xf32>
    %16 = arith.addf %14, %15 : vector<1x128xf32>
    %17 = math.rsqrt %16 : vector<1x128xf32>
    %c0_10 = arith.constant 0 : index
    %c0_11 = arith.constant 0 : index
    %18 = vector.load %arg3[%c0_10, %c0_11] : memref<1x128xf32, #tpu.memory_space<vmem>>, vector<1x128xf32>
    %19 = arith.mulf %17, %18 : vector<1x128xf32>
    %c0_12 = arith.constant 0 : index
    %c0_13 = arith.constant 0 : index
    %20 = vector.load %arg4[%c0_12, %c0_13] : memref<1x128xf32, #tpu.memory_space<vmem>>, vector<1x128xf32>
    %21 = arith.mulf %10, %19 : vector<1x128xf32>
    %22 = arith.subf %20, %21 : vector<1x128xf32>
    %cst_14 = arith.constant 0.000000e+00 : f32
    %23 = vector.broadcast %cst_14 : f32 to vector<1x4x16x16x128xf32>
    %c0_15 = arith.constant 0 : index
    %c0_16 = arith.constant 0 : index
    %c0_17 = arith.constant 0 : index
    %c0_18 = arith.constant 0 : index
    %c0_19 = arith.constant 0 : index
    %24 = vector.load %arg8[%c0_15, %c0_16, %c0_17, %c0_18, %c0_19] : memref<1x4x16x16x128xf32, #tpu.memory_space<vmem>>, vector<1x4x16x16x128xf32>
    tpu.vector_store %arg8[%c0_15, %c0_16, %c0_17, %c0_18, %c0_19], %23 {strides = array<i32>} : memref<1x4x16x16x128xf32, #tpu.memory_space<vmem>>, vector<1x4x16x16x128xf32>,
    %c0_20 = arith.constant 0 : index
    %c0_21 = arith.constant 0 : index
    %25 = vector.load %arg7[%c0_20, %c0_21] : memref<784x128xf32, #tpu.memory_space<vmem>>, vector<14x128xf32>
    %26 = vector.broadcast %19 : vector<1x128xf32> to vector<14x128xf32>
    %27 = arith.mulf %25, %26 : vector<14x128xf32>
    %28 = vector.broadcast %22 : vector<1x128xf32> to vector<14x128xf32>
    %29 = arith.addf %27, %28 : vector<14x128xf32>
    %cst_22 = arith.constant 0.000000e+00 : f32
    %30 = vector.broadcast %cst_22 : f32 to vector<14x128xf32>
    %31 = arith.maximumf %29, %30 : vector<14x128xf32>
    %c0_23 = arith.constant 0 : index
    %c0_24 = arith.constant 0 : index
    %c1 = arith.constant 1 : index
    %c1_25 = arith.constant 1 : index
    %c0_26 = arith.constant 0 : index
    %32 = vector.load %arg8[%c0_23, %c0_24, %c1, %c1_25, %c0_26] : memref<1x4x16x16x128xf32, #tpu.memory_space<vmem>>, vector<1x1x1x14x128xf32>
    %33 = vector.shape_cast %32 : vector<1x1x1x14x128xf32> to vector<14x128xf32>
    %34 = vector.shape_cast %31 : vector<14x128xf32> to vector<1x1x1x14x128xf32>
    tpu.vector_store %arg8[%c0_23, %c0_24, %c1, %c1_25, %c0_26], %34 {strides = array<i32>} : memref<1x4x16x16x128xf32, #tpu.memory_space<vmem>>, vector<1x1x1x14x128xf32>,
    %c14 = arith.constant 14 : index
    %c0_27 = arith.constant 0 : index
    %35 = vector.load %arg7[%c14, %c0_27] : memref<784x128xf32, #tpu.memory_space<vmem>>, vector<14x128xf32>
    %36 = vector.broadcast %19 : vector<1x128xf32> to vector<14x128xf32>
    %37 = arith.mulf %35, %36 : vector<14x128xf32>
    %38 = vector.broadcast %22 : vector<1x128xf32> to vector<14x128xf32>
    %39 = arith.addf %37, %38 : vector<14x128xf32>
    %cst_28 = arith.constant 0.000000e+00 : f32
    %40 = vector.broadcast %cst_28 : f32 to vector<14x128xf32>
    %41 = arith.maximumf %39, %40 : vector<14x128xf32>
    %c0_29 = arith.constant 0 : index
    %c0_30 = arith.constant 0 : index
    %c2 = arith.constant 2 : index
    %c1_31 = arith.constant 1 : index
    %c0_32 = arith.constant 0 : index
    %42 = vector.load %arg8[%c0_29, %c0_30, %c2, %c1_31, %c0_32] : memref<1x4x16x16x128xf32, #tpu.memory_space<vmem>>, vector<1x1x1x14x128xf32>
    %43 = vector.shape_cast %42 : vector<1x1x1x14x128xf32> to vector<14x128xf32>
    %44 = vector.shape_cast %41 : vector<14x128xf32> to vector<1x1x1x14x128xf32>
    tpu.vector_store %arg8[%c0_29, %c0_30, %c2, %c1_31, %c0_32], %44 {strides = array<i32>} : memref<1x4x16x16x128xf32, #tpu.memory_space<vmem>>, vector<1x1x1x14x128xf32>,
    %c28 = arith.constant 28 : index
    %c0_33 = arith.constant 0 : index
    %45 = vector.load %arg7[%c28, %c0_33] : memref<784x128xf32, #tpu.memory_space<vmem>>, vector<14x128xf32>
    %46 = vector.broadcast %19 : vector<1x128xf32> to vector<14x128xf32>
    %47 = arith.mulf %45, %46 : vector<14x128xf32>
    %48 = vector.broadcast %22 : vector<1x128xf32> to vector<14x128xf32>
    %49 = arith.addf %47, %48 : vector<14x128xf32>
    %cst_34 = arith.constant 0.000000e+00 : f32
    %50 = vector.broadcast %cst_34 : f32 to vector<14x128xf32>
    %51 = arith.maximumf %49, %50 : vector<14x128xf32>
    %c0_35 = arith.constant 0 : index
    %c0_36 = arith.constant 0 : index
    %c3 = arith.constant 3 : index
    %c1_37 = arith.constant 1 : index
    %c0_38 = arith.constant 0 : index
    %52 = vector.load %arg8[%c0_35, %c0_36, %c3, %c1_37, %c0_38] : memref<1x4x16x16x128xf32, #tpu.memory_space<vmem>>, vector<1x1x1x14x128xf32>
    %53 = vector.shape_cast %52 : vector<1x1x1x14x128xf32> to vector<14x128xf32>
    %54 = vector.shape_cast %51 : vector<14x128xf32> to vector<1x1x1x14x128xf32>
    tpu.vector_store %arg8[%c0_35, %c0_36, %c3, %c1_37, %c0_38], %54 {strides = array<i32>} : memref<1x4x16x16x128xf32, #tpu.memory_space<vmem>>, vector<1x1x1x14x128xf32>,
    %c42 = arith.constant 42 : index
    %c0_39 = arith.constant 0 : index
    %55 = vector.load %arg7[%c42, %c0_39] : memref<784x128xf32, #tpu.memory_space<vmem>>, vector<14x128xf32>
    %56 = vector.broadcast %19 : vector<1x128xf32> to vector<14x128xf32>
    %57 = arith.mulf %55, %56 : vector<14x128xf32>
    %58 = vector.broadcast %22 : vector<1x128xf32> to vector<14x128xf32>
    %59 = arith.addf %57, %58 : vector<14x128xf32>
    %cst_40 = arith.constant 0.000000e+00 : f32
    %60 = vector.broadcast %cst_40 : f32 to vector<14x128xf32>
    %61 = arith.maximumf %59, %60 : vector<14x128xf32>
    %c0_41 = arith.constant 0 : index
    %c0_42 = arith.constant 0 : index
    %c4 = arith.constant 4 : index
    %c1_43 = arith.constant 1 : index
    %c0_44 = arith.constant 0 : index
    %62 = vector.load %arg8[%c0_41, %c0_42, %c4, %c1_43, %c0_44] : memref<1x4x16x16x128xf32, #tpu.memory_space<vmem>>, vector<1x1x1x14x128xf32>
    %63 = vector.shape_cast %62 : vector<1x1x1x14x128xf32> to vector<14x128xf32>
    %64 = vector.shape_cast %61 : vector<14x128xf32> to vector<1x1x1x14x128xf32>
    tpu.vector_store %arg8[%c0_41, %c0_42, %c4, %c1_43, %c0_44], %64 {strides = array<i32>} : memref<1x4x16x16x128xf32, #tpu.memory_space<vmem>>, vector<1x1x1x14x128xf32>,
    %c56 = arith.constant 56 : index
    %c0_45 = arith.constant 0 : index
    %65 = vector.load %arg7[%c56, %c0_45] : memref<784x128xf32, #tpu.memory_space<vmem>>, vector<14x128xf32>
    %66 = vector.broadcast %19 : vector<1x128xf32> to vector<14x128xf32>
    %67 = arith.mulf %65, %66 : vector<14x128xf32>
    %68 = vector.broadcast %22 : vector<1x128xf32> to vector<14x128xf32>
    %69 = arith.addf %67, %68 : vector<14x128xf32>
    %cst_46 = arith.constant 0.000000e+00 : f32
    %70 = vector.broadcast %cst_46 : f32 to vector<14x128xf32>
    %71 = arith.maximumf %69, %70 : vector<14x128xf32>
    %c0_47 = arith.constant 0 : index
    %c0_48 = arith.constant 0 : index
    %c5 = arith.constant 5 : index
    %c1_49 = arith.constant 1 : index
    %c0_50 = arith.constant 0 : index
    %72 = vector.load %arg8[%c0_47, %c0_48, %c5, %c1_49, %c0_50] : memref<1x4x16x16x128xf32, #tpu.memory_space<vmem>>, vector<1x1x1x14x128xf32>
    %73 = vector.shape_cast %72 : vector<1x1x1x14x128xf32> to vector<14x128xf32>
    %74 = vector.shape_cast %71 : vector<14x128xf32> to vector<1x1x1x14x128xf32>
    tpu.vector_store %arg8[%c0_47, %c0_48, %c5, %c1_49, %c0_50], %74 {strides = array<i32>} : memref<1x4x16x16x128xf32, #tpu.memory_space<vmem>>, vector<1x1x1x14x128xf32>,
    %c70 = arith.constant 70 : index
    %c0_51 = arith.constant 0 : index
    %75 = vector.load %arg7[%c70, %c0_51] : memref<784x128xf32, #tpu.memory_space<vmem>>, vector<14x128xf32>
    %76 = vector.broadcast %19 : vector<1x128xf32> to vector<14x128xf32>
    %77 = arith.mulf %75, %76 : vector<14x128xf32>
    %78 = vector.broadcast %22 : vector<1x128xf32> to vector<14x128xf32>
    %79 = arith.addf %77, %78 : vector<14x128xf32>
    %cst_52 = arith.constant 0.000000e+00 : f32
    %80 = vector.broadcast %cst_52 : f32 to vector<14x128xf32>
    %81 = arith.maximumf %79, %80 : vector<14x128xf32>
    %c0_53 = arith.constant 0 : index
    %c0_54 = arith.constant 0 : index
    %c6 = arith.constant 6 : index
    %c1_55 = arith.constant 1 : index
    %c0_56 = arith.constant 0 : index
    %82 = vector.load %arg8[%c0_53, %c0_54, %c6, %c1_55, %c0_56] : memref<1x4x16x16x128xf32, #tpu.memory_space<vmem>>, vector<1x1x1x14x128xf32>
    %83 = vector.shape_cast %82 : vector<1x1x1x14x128xf32> to vector<14x128xf32>
    %84 = vector.shape_cast %81 : vector<14x128xf32> to vector<1x1x1x14x128xf32>
    tpu.vector_store %arg8[%c0_53, %c0_54, %c6, %c1_55, %c0_56], %84 {strides = array<i32>} : memref<1x4x16x16x128xf32, #tpu.memory_space<vmem>>, vector<1x1x1x14x128xf32>,
    %c84 = arith.constant 84 : index
    %c0_57 = arith.constant 0 : index
    %85 = vector.load %arg7[%c84, %c0_57] : memref<784x128xf32, #tpu.memory_space<vmem>>, vector<14x128xf32>
    %86 = vector.broadcast %19 : vector<1x128xf32> to vector<14x128xf32>
    %87 = arith.mulf %85, %86 : vector<14x128xf32>
    %88 = vector.broadcast %22 : vector<1x128xf32> to vector<14x128xf32>
    %89 = arith.addf %87, %88 : vector<14x128xf32>
    %cst_58 = arith.constant 0.000000e+00 : f32
    %90 = vector.broadcast %cst_58 : f32 to vector<14x128xf32>
    %91 = arith.maximumf %89, %90 : vector<14x128xf32>
    %c0_59 = arith.constant 0 : index
    %c0_60 = arith.constant 0 : index
    %c7 = arith.constant 7 : index
    %c1_61 = arith.constant 1 : index
    %c0_62 = arith.constant 0 : index
    %92 = vector.load %arg8[%c0_59, %c0_60, %c7, %c1_61, %c0_62] : memref<1x4x16x16x128xf32, #tpu.memory_space<vmem>>, vector<1x1x1x14x128xf32>
    %93 = vector.shape_cast %92 : vector<1x1x1x14x128xf32> to vector<14x128xf32>
    %94 = vector.shape_cast %91 : vector<14x128xf32> to vector<1x1x1x14x128xf32>
    tpu.vector_store %arg8[%c0_59, %c0_60, %c7, %c1_61, %c0_62], %94 {strides = array<i32>} : memref<1x4x16x16x128xf32, #tpu.memory_space<vmem>>, vector<1x1x1x14x128xf32>,
    %c98 = arith.constant 98 : index
    %c0_63 = arith.constant 0 : index
    %95 = vector.load %arg7[%c98, %c0_63] : memref<784x128xf32, #tpu.memory_space<vmem>>, vector<14x128xf32>
    %96 = vector.broadcast %19 : vector<1x128xf32> to vector<14x128xf32>
    %97 = arith.mulf %95, %96 : vector<14x128xf32>
    %98 = vector.broadcast %22 : vector<1x128xf32> to vector<14x128xf32>
    %99 = arith.addf %97, %98 : vector<14x128xf32>
    %cst_64 = arith.constant 0.000000e+00 : f32
    %100 = vector.broadcast %cst_64 : f32 to vector<14x128xf32>
    %101 = arith.maximumf %99, %100 : vector<14x128xf32>
    %c0_65 = arith.constant 0 : index
    %c0_66 = arith.constant 0 : index
    %c8 = arith.constant 8 : index
    %c1_67 = arith.constant 1 : index
    %c0_68 = arith.constant 0 : index
    %102 = vector.load %arg8[%c0_65, %c0_66, %c8, %c1_67, %c0_68] : memref<1x4x16x16x128xf32, #tpu.memory_space<vmem>>, vector<1x1x1x14x128xf32>
    %103 = vector.shape_cast %102 : vector<1x1x1x14x128xf32> to vector<14x128xf32>
    %104 = vector.shape_cast %101 : vector<14x128xf32> to vector<1x1x1x14x128xf32>
    tpu.vector_store %arg8[%c0_65, %c0_66, %c8, %c1_67, %c0_68], %104 {strides = array<i32>} : memref<1x4x16x16x128xf32, #tpu.memory_space<vmem>>, vector<1x1x1x14x128xf32>,
    %c112 = arith.constant 112 : index
    %c0_69 = arith.constant 0 : index
    %105 = vector.load %arg7[%c112, %c0_69] : memref<784x128xf32, #tpu.memory_space<vmem>>, vector<14x128xf32>
    %106 = vector.broadcast %19 : vector<1x128xf32> to vector<14x128xf32>
    %107 = arith.mulf %105, %106 : vector<14x128xf32>
    %108 = vector.broadcast %22 : vector<1x128xf32> to vector<14x128xf32>
    %109 = arith.addf %107, %108 : vector<14x128xf32>
    %cst_70 = arith.constant 0.000000e+00 : f32
    %110 = vector.broadcast %cst_70 : f32 to vector<14x128xf32>
    %111 = arith.maximumf %109, %110 : vector<14x128xf32>
    %c0_71 = arith.constant 0 : index
    %c0_72 = arith.constant 0 : index
    %c9 = arith.constant 9 : index
    %c1_73 = arith.constant 1 : index
    %c0_74 = arith.constant 0 : index
    %112 = vector.load %arg8[%c0_71, %c0_72, %c9, %c1_73, %c0_74] : memref<1x4x16x16x128xf32, #tpu.memory_space<vmem>>, vector<1x1x1x14x128xf32>
    %113 = vector.shape_cast %112 : vector<1x1x1x14x128xf32> to vector<14x128xf32>
    %114 = vector.shape_cast %111 : vector<14x128xf32> to vector<1x1x1x14x128xf32>
    tpu.vector_store %arg8[%c0_71, %c0_72, %c9, %c1_73, %c0_74], %114 {strides = array<i32>} : memref<1x4x16x16x128xf32, #tpu.memory_space<vmem>>, vector<1x1x1x14x128xf32>,
    %c126 = arith.constant 126 : index
    %c0_75 = arith.constant 0 : index
    %115 = vector.load %arg7[%c126, %c0_75] : memref<784x128xf32, #tpu.memory_space<vmem>>, vector<14x128xf32>
    %116 = vector.broadcast %19 : vector<1x128xf32> to vector<14x128xf32>
    %117 = arith.mulf %115, %116 : vector<14x128xf32>
    %118 = vector.broadcast %22 : vector<1x128xf32> to vector<14x128xf32>
    %119 = arith.addf %117, %118 : vector<14x128xf32>
    %cst_76 = arith.constant 0.000000e+00 : f32
    %120 = vector.broadcast %cst_76 : f32 to vector<14x128xf32>
    %121 = arith.maximumf %119, %120 : vector<14x128xf32>
    %c0_77 = arith.constant 0 : index
    %c0_78 = arith.constant 0 : index
    %c10 = arith.constant 10 : index
    %c1_79 = arith.constant 1 : index
    %c0_80 = arith.constant 0 : index
    %122 = vector.load %arg8[%c0_77, %c0_78, %c10, %c1_79, %c0_80] : memref<1x4x16x16x128xf32, #tpu.memory_space<vmem>>, vector<1x1x1x14x128xf32>
    %123 = vector.shape_cast %122 : vector<1x1x1x14x128xf32> to vector<14x128xf32>
    %124 = vector.shape_cast %121 : vector<14x128xf32> to vector<1x1x1x14x128xf32>
    tpu.vector_store %arg8[%c0_77, %c0_78, %c10, %c1_79, %c0_80], %124 {strides = array<i32>} : memref<1x4x16x16x128xf32, #tpu.memory_space<vmem>>, vector<1x1x1x14x128xf32>,
    %c140 = arith.constant 140 : index
    %c0_81 = arith.constant 0 : index
    %125 = vector.load %arg7[%c140, %c0_81] : memref<784x128xf32, #tpu.memory_space<vmem>>, vector<14x128xf32>
    %126 = vector.broadcast %19 : vector<1x128xf32> to vector<14x128xf32>
    %127 = arith.mulf %125, %126 : vector<14x128xf32>
    %128 = vector.broadcast %22 : vector<1x128xf32> to vector<14x128xf32>
    %129 = arith.addf %127, %128 : vector<14x128xf32>
    %cst_82 = arith.constant 0.000000e+00 : f32
    %130 = vector.broadcast %cst_82 : f32 to vector<14x128xf32>
    %131 = arith.maximumf %129, %130 : vector<14x128xf32>
    %c0_83 = arith.constant 0 : index
    %c0_84 = arith.constant 0 : index
    %c11 = arith.constant 11 : index
    %c1_85 = arith.constant 1 : index
    %c0_86 = arith.constant 0 : index
    %132 = vector.load %arg8[%c0_83, %c0_84, %c11, %c1_85, %c0_86] : memref<1x4x16x16x128xf32, #tpu.memory_space<vmem>>, vector<1x1x1x14x128xf32>
    %133 = vector.shape_cast %132 : vector<1x1x1x14x128xf32> to vector<14x128xf32>
    %134 = vector.shape_cast %131 : vector<14x128xf32> to vector<1x1x1x14x128xf32>
    tpu.vector_store %arg8[%c0_83, %c0_84, %c11, %c1_85, %c0_86], %134 {strides = array<i32>} : memref<1x4x16x16x128xf32, #tpu.memory_space<vmem>>, vector<1x1x1x14x128xf32>,
    %c154 = arith.constant 154 : index
    %c0_87 = arith.constant 0 : index
    %135 = vector.load %arg7[%c154, %c0_87] : memref<784x128xf32, #tpu.memory_space<vmem>>, vector<14x128xf32>
    %136 = vector.broadcast %19 : vector<1x128xf32> to vector<14x128xf32>
    %137 = arith.mulf %135, %136 : vector<14x128xf32>
    %138 = vector.broadcast %22 : vector<1x128xf32> to vector<14x128xf32>
    %139 = arith.addf %137, %138 : vector<14x128xf32>
    %cst_88 = arith.constant 0.000000e+00 : f32
    %140 = vector.broadcast %cst_88 : f32 to vector<14x128xf32>
    %141 = arith.maximumf %139, %140 : vector<14x128xf32>
    %c0_89 = arith.constant 0 : index
    %c0_90 = arith.constant 0 : index
    %c12 = arith.constant 12 : index
    %c1_91 = arith.constant 1 : index
    %c0_92 = arith.constant 0 : index
    %142 = vector.load %arg8[%c0_89, %c0_90, %c12, %c1_91, %c0_92] : memref<1x4x16x16x128xf32, #tpu.memory_space<vmem>>, vector<1x1x1x14x128xf32>
    %143 = vector.shape_cast %142 : vector<1x1x1x14x128xf32> to vector<14x128xf32>
    %144 = vector.shape_cast %141 : vector<14x128xf32> to vector<1x1x1x14x128xf32>
    tpu.vector_store %arg8[%c0_89, %c0_90, %c12, %c1_91, %c0_92], %144 {strides = array<i32>} : memref<1x4x16x16x128xf32, #tpu.memory_space<vmem>>, vector<1x1x1x14x128xf32>,
    %c168 = arith.constant 168 : index
    %c0_93 = arith.constant 0 : index
    %145 = vector.load %arg7[%c168, %c0_93] : memref<784x128xf32, #tpu.memory_space<vmem>>, vector<14x128xf32>
    %146 = vector.broadcast %19 : vector<1x128xf32> to vector<14x128xf32>
    %147 = arith.mulf %145, %146 : vector<14x128xf32>
    %148 = vector.broadcast %22 : vector<1x128xf32> to vector<14x128xf32>
    %149 = arith.addf %147, %148 : vector<14x128xf32>
    %cst_94 = arith.constant 0.000000e+00 : f32
    %150 = vector.broadcast %cst_94 : f32 to vector<14x128xf32>
    %151 = arith.maximumf %149, %150 : vector<14x128xf32>
    %c0_95 = arith.constant 0 : index
    %c0_96 = arith.constant 0 : index
    %c13 = arith.constant 13 : index
    %c1_97 = arith.constant 1 : index
    %c0_98 = arith.constant 0 : index
    %152 = vector.load %arg8[%c0_95, %c0_96, %c13, %c1_97, %c0_98] : memref<1x4x16x16x128xf32, #tpu.memory_space<vmem>>, vector<1x1x1x14x128xf32>
    %153 = vector.shape_cast %152 : vector<1x1x1x14x128xf32> to vector<14x128xf32>
    %154 = vector.shape_cast %151 : vector<14x128xf32> to vector<1x1x1x14x128xf32>
    tpu.vector_store %arg8[%c0_95, %c0_96, %c13, %c1_97, %c0_98], %154 {strides = array<i32>} : memref<1x4x16x16x128xf32, #tpu.memory_space<vmem>>, vector<1x1x1x14x128xf32>,
    %c182 = arith.constant 182 : index
    %c0_99 = arith.constant 0 : index
    %155 = vector.load %arg7[%c182, %c0_99] : memref<784x128xf32, #tpu.memory_space<vmem>>, vector<14x128xf32>
    %156 = vector.broadcast %19 : vector<1x128xf32> to vector<14x128xf32>
    %157 = arith.mulf %155, %156 : vector<14x128xf32>
    %158 = vector.broadcast %22 : vector<1x128xf32> to vector<14x128xf32>
    %159 = arith.addf %157, %158 : vector<14x128xf32>
    %cst_100 = arith.constant 0.000000e+00 : f32
    %160 = vector.broadcast %cst_100 : f32 to vector<14x128xf32>
    %161 = arith.maximumf %159, %160 : vector<14x128xf32>
    %c0_101 = arith.constant 0 : index
    %c0_102 = arith.constant 0 : index
    %c14_103 = arith.constant 14 : index
    %c1_104 = arith.constant 1 : index
    %c0_105 = arith.constant 0 : index
    %162 = vector.load %arg8[%c0_101, %c0_102, %c14_103, %c1_104, %c0_105] : memref<1x4x16x16x128xf32, #tpu.memory_space<vmem>>, vector<1x1x1x14x128xf32>
    %163 = vector.shape_cast %162 : vector<1x1x1x14x128xf32> to vector<14x128xf32>
    %164 = vector.shape_cast %161 : vector<14x128xf32> to vector<1x1x1x14x128xf32>
    tpu.vector_store %arg8[%c0_101, %c0_102, %c14_103, %c1_104, %c0_105], %164 {strides = array<i32>} : memref<1x4x16x16x128xf32, #tpu.memory_space<vmem>>, vector<1x1x1x14x128xf32>,
    %c196 = arith.constant 196 : index
    %c0_106 = arith.constant 0 : index
    %165 = vector.load %arg7[%c196, %c0_106] : memref<784x128xf32, #tpu.memory_space<vmem>>, vector<14x128xf32>
    %166 = vector.broadcast %19 : vector<1x128xf32> to vector<14x128xf32>
    %167 = arith.mulf %165, %166 : vector<14x128xf32>
    %168 = vector.broadcast %22 : vector<1x128xf32> to vector<14x128xf32>
    %169 = arith.addf %167, %168 : vector<14x128xf32>
    %cst_107 = arith.constant 0.000000e+00 : f32
    %170 = vector.broadcast %cst_107 : f32 to vector<14x128xf32>
    %171 = arith.maximumf %169, %170 : vector<14x128xf32>
    %c0_108 = arith.constant 0 : index
    %c1_109 = arith.constant 1 : index
    %c1_110 = arith.constant 1 : index
    %c1_111 = arith.constant 1 : index
    %c0_112 = arith.constant 0 : index
    %172 = vector.load %arg8[%c0_108, %c1_109, %c1_110, %c1_111, %c0_112] : memref<1x4x16x16x128xf32, #tpu.memory_space<vmem>>, vector<1x1x1x14x128xf32>
    %173 = vector.shape_cast %172 : vector<1x1x1x14x128xf32> to vector<14x128xf32>
    %174 = vector.shape_cast %171 : vector<14x128xf32> to vector<1x1x1x14x128xf32>
    tpu.vector_store %arg8[%c0_108, %c1_109, %c1_110, %c1_111, %c0_112], %174 {strides = array<i32>} : memref<1x4x16x16x128xf32, #tpu.memory_space<vmem>>, vector<1x1x1x14x128xf32>,
    %c210 = arith.constant 210 : index
    %c0_113 = arith.constant 0 : index
    %175 = vector.load %arg7[%c210, %c0_113] : memref<784x128xf32, #tpu.memory_space<vmem>>, vector<14x128xf32>
    %176 = vector.broadcast %19 : vector<1x128xf32> to vector<14x128xf32>
    %177 = arith.mulf %175, %176 : vector<14x128xf32>
    %178 = vector.broadcast %22 : vector<1x128xf32> to vector<14x128xf32>
    %179 = arith.addf %177, %178 : vector<14x128xf32>
    %cst_114 = arith.constant 0.000000e+00 : f32
    %180 = vector.broadcast %cst_114 : f32 to vector<14x128xf32>
    %181 = arith.maximumf %179, %180 : vector<14x128xf32>
    %c0_115 = arith.constant 0 : index
    %c1_116 = arith.constant 1 : index
    %c2_117 = arith.constant 2 : index
    %c1_118 = arith.constant 1 : index
    %c0_119 = arith.constant 0 : index
    %182 = vector.load %arg8[%c0_115, %c1_116, %c2_117, %c1_118, %c0_119] : memref<1x4x16x16x128xf32, #tpu.memory_space<vmem>>, vector<1x1x1x14x128xf32>
    %183 = vector.shape_cast %182 : vector<1x1x1x14x128xf32> to vector<14x128xf32>
    %184 = vector.shape_cast %181 : vector<14x128xf32> to vector<1x1x1x14x128xf32>
    tpu.vector_store %arg8[%c0_115, %c1_116, %c2_117, %c1_118, %c0_119], %184 {strides = array<i32>} : memref<1x4x16x16x128xf32, #tpu.memory_space<vmem>>, vector<1x1x1x14x128xf32>,
    %c224 = arith.constant 224 : index
    %c0_120 = arith.constant 0 : index
    %185 = vector.load %arg7[%c224, %c0_120] : memref<784x128xf32, #tpu.memory_space<vmem>>, vector<14x128xf32>
    %186 = vector.broadcast %19 : vector<1x128xf32> to vector<14x128xf32>
    %187 = arith.mulf %185, %186 : vector<14x128xf32>
    %188 = vector.broadcast %22 : vector<1x128xf32> to vector<14x128xf32>
    %189 = arith.addf %187, %188 : vector<14x128xf32>
    %cst_121 = arith.constant 0.000000e+00 : f32
    %190 = vector.broadcast %cst_121 : f32 to vector<14x128xf32>
    %191 = arith.maximumf %189, %190 : vector<14x128xf32>
    %c0_122 = arith.constant 0 : index
    %c1_123 = arith.constant 1 : index
    %c3_124 = arith.constant 3 : index
    %c1_125 = arith.constant 1 : index
    %c0_126 = arith.constant 0 : index
    %192 = vector.load %arg8[%c0_122, %c1_123, %c3_124, %c1_125, %c0_126] : memref<1x4x16x16x128xf32, #tpu.memory_space<vmem>>, vector<1x1x1x14x128xf32>
    %193 = vector.shape_cast %192 : vector<1x1x1x14x128xf32> to vector<14x128xf32>
    %194 = vector.shape_cast %191 : vector<14x128xf32> to vector<1x1x1x14x128xf32>
    tpu.vector_store %arg8[%c0_122, %c1_123, %c3_124, %c1_125, %c0_126], %194 {strides = array<i32>} : memref<1x4x16x16x128xf32, #tpu.memory_space<vmem>>, vector<1x1x1x14x128xf32>,
    %c238 = arith.constant 238 : index
    %c0_127 = arith.constant 0 : index
    %195 = vector.load %arg7[%c238, %c0_127] : memref<784x128xf32, #tpu.memory_space<vmem>>, vector<14x128xf32>
    %196 = vector.broadcast %19 : vector<1x128xf32> to vector<14x128xf32>
    %197 = arith.mulf %195, %196 : vector<14x128xf32>
    %198 = vector.broadcast %22 : vector<1x128xf32> to vector<14x128xf32>
    %199 = arith.addf %197, %198 : vector<14x128xf32>
    %cst_128 = arith.constant 0.000000e+00 : f32
    %200 = vector.broadcast %cst_128 : f32 to vector<14x128xf32>
    %201 = arith.maximumf %199, %200 : vector<14x128xf32>
    %c0_129 = arith.constant 0 : index
    %c1_130 = arith.constant 1 : index
    %c4_131 = arith.constant 4 : index
    %c1_132 = arith.constant 1 : index
    %c0_133 = arith.constant 0 : index
    %202 = vector.load %arg8[%c0_129, %c1_130, %c4_131, %c1_132, %c0_133] : memref<1x4x16x16x128xf32, #tpu.memory_space<vmem>>, vector<1x1x1x14x128xf32>
    %203 = vector.shape_cast %202 : vector<1x1x1x14x128xf32> to vector<14x128xf32>
    %204 = vector.shape_cast %201 : vector<14x128xf32> to vector<1x1x1x14x128xf32>
    tpu.vector_store %arg8[%c0_129, %c1_130, %c4_131, %c1_132, %c0_133], %204 {strides = array<i32>} : memref<1x4x16x16x128xf32, #tpu.memory_space<vmem>>, vector<1x1x1x14x128xf32>,
    %c252 = arith.constant 252 : index
    %c0_134 = arith.constant 0 : index
    %205 = vector.load %arg7[%c252, %c0_134] : memref<784x128xf32, #tpu.memory_space<vmem>>, vector<14x128xf32>
    %206 = vector.broadcast %19 : vector<1x128xf32> to vector<14x128xf32>
    %207 = arith.mulf %205, %206 : vector<14x128xf32>
    %208 = vector.broadcast %22 : vector<1x128xf32> to vector<14x128xf32>
    %209 = arith.addf %207, %208 : vector<14x128xf32>
    %cst_135 = arith.constant 0.000000e+00 : f32
    %210 = vector.broadcast %cst_135 : f32 to vector<14x128xf32>
    %211 = arith.maximumf %209, %210 : vector<14x128xf32>
    %c0_136 = arith.constant 0 : index
    %c1_137 = arith.constant 1 : index
    %c5_138 = arith.constant 5 : index
    %c1_139 = arith.constant 1 : index
    %c0_140 = arith.constant 0 : index
    %212 = vector.load %arg8[%c0_136, %c1_137, %c5_138, %c1_139, %c0_140] : memref<1x4x16x16x128xf32, #tpu.memory_space<vmem>>, vector<1x1x1x14x128xf32>
    %213 = vector.shape_cast %212 : vector<1x1x1x14x128xf32> to vector<14x128xf32>
    %214 = vector.shape_cast %211 : vector<14x128xf32> to vector<1x1x1x14x128xf32>
    tpu.vector_store %arg8[%c0_136, %c1_137, %c5_138, %c1_139, %c0_140], %214 {strides = array<i32>} : memref<1x4x16x16x128xf32, #tpu.memory_space<vmem>>, vector<1x1x1x14x128xf32>,
    %c266 = arith.constant 266 : index
    %c0_141 = arith.constant 0 : index
    %215 = vector.load %arg7[%c266, %c0_141] : memref<784x128xf32, #tpu.memory_space<vmem>>, vector<14x128xf32>
    %216 = vector.broadcast %19 : vector<1x128xf32> to vector<14x128xf32>
    %217 = arith.mulf %215, %216 : vector<14x128xf32>
    %218 = vector.broadcast %22 : vector<1x128xf32> to vector<14x128xf32>
    %219 = arith.addf %217, %218 : vector<14x128xf32>
    %cst_142 = arith.constant 0.000000e+00 : f32
    %220 = vector.broadcast %cst_142 : f32 to vector<14x128xf32>
    %221 = arith.maximumf %219, %220 : vector<14x128xf32>
    %c0_143 = arith.constant 0 : index
    %c1_144 = arith.constant 1 : index
    %c6_145 = arith.constant 6 : index
    %c1_146 = arith.constant 1 : index
    %c0_147 = arith.constant 0 : index
    %222 = vector.load %arg8[%c0_143, %c1_144, %c6_145, %c1_146, %c0_147] : memref<1x4x16x16x128xf32, #tpu.memory_space<vmem>>, vector<1x1x1x14x128xf32>
    %223 = vector.shape_cast %222 : vector<1x1x1x14x128xf32> to vector<14x128xf32>
    %224 = vector.shape_cast %221 : vector<14x128xf32> to vector<1x1x1x14x128xf32>
    tpu.vector_store %arg8[%c0_143, %c1_144, %c6_145, %c1_146, %c0_147], %224 {strides = array<i32>} : memref<1x4x16x16x128xf32, #tpu.memory_space<vmem>>, vector<1x1x1x14x128xf32>,
    %c280 = arith.constant 280 : index
    %c0_148 = arith.constant 0 : index
    %225 = vector.load %arg7[%c280, %c0_148] : memref<784x128xf32, #tpu.memory_space<vmem>>, vector<14x128xf32>
    %226 = vector.broadcast %19 : vector<1x128xf32> to vector<14x128xf32>
    %227 = arith.mulf %225, %226 : vector<14x128xf32>
    %228 = vector.broadcast %22 : vector<1x128xf32> to vector<14x128xf32>
    %229 = arith.addf %227, %228 : vector<14x128xf32>
    %cst_149 = arith.constant 0.000000e+00 : f32
    %230 = vector.broadcast %cst_149 : f32 to vector<14x128xf32>
    %231 = arith.maximumf %229, %230 : vector<14x128xf32>
    %c0_150 = arith.constant 0 : index
    %c1_151 = arith.constant 1 : index
    %c7_152 = arith.constant 7 : index
    %c1_153 = arith.constant 1 : index
    %c0_154 = arith.constant 0 : index
    %232 = vector.load %arg8[%c0_150, %c1_151, %c7_152, %c1_153, %c0_154] : memref<1x4x16x16x128xf32, #tpu.memory_space<vmem>>, vector<1x1x1x14x128xf32>
    %233 = vector.shape_cast %232 : vector<1x1x1x14x128xf32> to vector<14x128xf32>
    %234 = vector.shape_cast %231 : vector<14x128xf32> to vector<1x1x1x14x128xf32>
    tpu.vector_store %arg8[%c0_150, %c1_151, %c7_152, %c1_153, %c0_154], %234 {strides = array<i32>} : memref<1x4x16x16x128xf32, #tpu.memory_space<vmem>>, vector<1x1x1x14x128xf32>,
    %c294 = arith.constant 294 : index
    %c0_155 = arith.constant 0 : index
    %235 = vector.load %arg7[%c294, %c0_155] : memref<784x128xf32, #tpu.memory_space<vmem>>, vector<14x128xf32>
    %236 = vector.broadcast %19 : vector<1x128xf32> to vector<14x128xf32>
    %237 = arith.mulf %235, %236 : vector<14x128xf32>
    %238 = vector.broadcast %22 : vector<1x128xf32> to vector<14x128xf32>
    %239 = arith.addf %237, %238 : vector<14x128xf32>
    %cst_156 = arith.constant 0.000000e+00 : f32
    %240 = vector.broadcast %cst_156 : f32 to vector<14x128xf32>
    %241 = arith.maximumf %239, %240 : vector<14x128xf32>
    %c0_157 = arith.constant 0 : index
    %c1_158 = arith.constant 1 : index
    %c8_159 = arith.constant 8 : index
    %c1_160 = arith.constant 1 : index
    %c0_161 = arith.constant 0 : index
    %242 = vector.load %arg8[%c0_157, %c1_158, %c8_159, %c1_160, %c0_161] : memref<1x4x16x16x128xf32, #tpu.memory_space<vmem>>, vector<1x1x1x14x128xf32>
    %243 = vector.shape_cast %242 : vector<1x1x1x14x128xf32> to vector<14x128xf32>
    %244 = vector.shape_cast %241 : vector<14x128xf32> to vector<1x1x1x14x128xf32>
    tpu.vector_store %arg8[%c0_157, %c1_158, %c8_159, %c1_160, %c0_161], %244 {strides = array<i32>} : memref<1x4x16x16x128xf32, #tpu.memory_space<vmem>>, vector<1x1x1x14x128xf32>,
    %c308 = arith.constant 308 : index
    %c0_162 = arith.constant 0 : index
    %245 = vector.load %arg7[%c308, %c0_162] : memref<784x128xf32, #tpu.memory_space<vmem>>, vector<14x128xf32>
    %246 = vector.broadcast %19 : vector<1x128xf32> to vector<14x128xf32>
    %247 = arith.mulf %245, %246 : vector<14x128xf32>
    %248 = vector.broadcast %22 : vector<1x128xf32> to vector<14x128xf32>
    %249 = arith.addf %247, %248 : vector<14x128xf32>
    %cst_163 = arith.constant 0.000000e+00 : f32
    %250 = vector.broadcast %cst_163 : f32 to vector<14x128xf32>
    %251 = arith.maximumf %249, %250 : vector<14x128xf32>
    %c0_164 = arith.constant 0 : index
    %c1_165 = arith.constant 1 : index
    %c9_166 = arith.constant 9 : index
    %c1_167 = arith.constant 1 : index
    %c0_168 = arith.constant 0 : index
    %252 = vector.load %arg8[%c0_164, %c1_165, %c9_166, %c1_167, %c0_168] : memref<1x4x16x16x128xf32, #tpu.memory_space<vmem>>, vector<1x1x1x14x128xf32>
    %253 = vector.shape_cast %252 : vector<1x1x1x14x128xf32> to vector<14x128xf32>
    %254 = vector.shape_cast %251 : vector<14x128xf32> to vector<1x1x1x14x128xf32>
    tpu.vector_store %arg8[%c0_164, %c1_165, %c9_166, %c1_167, %c0_168], %254 {strides = array<i32>} : memref<1x4x16x16x128xf32, #tpu.memory_space<vmem>>, vector<1x1x1x14x128xf32>,
    %c322 = arith.constant 322 : index
    %c0_169 = arith.constant 0 : index
    %255 = vector.load %arg7[%c322, %c0_169] : memref<784x128xf32, #tpu.memory_space<vmem>>, vector<14x128xf32>
    %256 = vector.broadcast %19 : vector<1x128xf32> to vector<14x128xf32>
    %257 = arith.mulf %255, %256 : vector<14x128xf32>
    %258 = vector.broadcast %22 : vector<1x128xf32> to vector<14x128xf32>
    %259 = arith.addf %257, %258 : vector<14x128xf32>
    %cst_170 = arith.constant 0.000000e+00 : f32
    %260 = vector.broadcast %cst_170 : f32 to vector<14x128xf32>
    %261 = arith.maximumf %259, %260 : vector<14x128xf32>
    %c0_171 = arith.constant 0 : index
    %c1_172 = arith.constant 1 : index
    %c10_173 = arith.constant 10 : index
    %c1_174 = arith.constant 1 : index
    %c0_175 = arith.constant 0 : index
    %262 = vector.load %arg8[%c0_171, %c1_172, %c10_173, %c1_174, %c0_175] : memref<1x4x16x16x128xf32, #tpu.memory_space<vmem>>, vector<1x1x1x14x128xf32>
    %263 = vector.shape_cast %262 : vector<1x1x1x14x128xf32> to vector<14x128xf32>
    %264 = vector.shape_cast %261 : vector<14x128xf32> to vector<1x1x1x14x128xf32>
    tpu.vector_store %arg8[%c0_171, %c1_172, %c10_173, %c1_174, %c0_175], %264 {strides = array<i32>} : memref<1x4x16x16x128xf32, #tpu.memory_space<vmem>>, vector<1x1x1x14x128xf32>,
    %c336 = arith.constant 336 : index
    %c0_176 = arith.constant 0 : index
    %265 = vector.load %arg7[%c336, %c0_176] : memref<784x128xf32, #tpu.memory_space<vmem>>, vector<14x128xf32>
    %266 = vector.broadcast %19 : vector<1x128xf32> to vector<14x128xf32>
    %267 = arith.mulf %265, %266 : vector<14x128xf32>
    %268 = vector.broadcast %22 : vector<1x128xf32> to vector<14x128xf32>
    %269 = arith.addf %267, %268 : vector<14x128xf32>
    %cst_177 = arith.constant 0.000000e+00 : f32
    %270 = vector.broadcast %cst_177 : f32 to vector<14x128xf32>
    %271 = arith.maximumf %269, %270 : vector<14x128xf32>
    %c0_178 = arith.constant 0 : index
    %c1_179 = arith.constant 1 : index
    %c11_180 = arith.constant 11 : index
    %c1_181 = arith.constant 1 : index
    %c0_182 = arith.constant 0 : index
    %272 = vector.load %arg8[%c0_178, %c1_179, %c11_180, %c1_181, %c0_182] : memref<1x4x16x16x128xf32, #tpu.memory_space<vmem>>, vector<1x1x1x14x128xf32>
    %273 = vector.shape_cast %272 : vector<1x1x1x14x128xf32> to vector<14x128xf32>
    %274 = vector.shape_cast %271 : vector<14x128xf32> to vector<1x1x1x14x128xf32>
    tpu.vector_store %arg8[%c0_178, %c1_179, %c11_180, %c1_181, %c0_182], %274 {strides = array<i32>} : memref<1x4x16x16x128xf32, #tpu.memory_space<vmem>>, vector<1x1x1x14x128xf32>,
    %c350 = arith.constant 350 : index
    %c0_183 = arith.constant 0 : index
    %275 = vector.load %arg7[%c350, %c0_183] : memref<784x128xf32, #tpu.memory_space<vmem>>, vector<14x128xf32>
    %276 = vector.broadcast %19 : vector<1x128xf32> to vector<14x128xf32>
    %277 = arith.mulf %275, %276 : vector<14x128xf32>
    %278 = vector.broadcast %22 : vector<1x128xf32> to vector<14x128xf32>
    %279 = arith.addf %277, %278 : vector<14x128xf32>
    %cst_184 = arith.constant 0.000000e+00 : f32
    %280 = vector.broadcast %cst_184 : f32 to vector<14x128xf32>
    %281 = arith.maximumf %279, %280 : vector<14x128xf32>
    %c0_185 = arith.constant 0 : index
    %c1_186 = arith.constant 1 : index
    %c12_187 = arith.constant 12 : index
    %c1_188 = arith.constant 1 : index
    %c0_189 = arith.constant 0 : index
    %282 = vector.load %arg8[%c0_185, %c1_186, %c12_187, %c1_188, %c0_189] : memref<1x4x16x16x128xf32, #tpu.memory_space<vmem>>, vector<1x1x1x14x128xf32>
    %283 = vector.shape_cast %282 : vector<1x1x1x14x128xf32> to vector<14x128xf32>
    %284 = vector.shape_cast %281 : vector<14x128xf32> to vector<1x1x1x14x128xf32>
    tpu.vector_store %arg8[%c0_185, %c1_186, %c12_187, %c1_188, %c0_189], %284 {strides = array<i32>} : memref<1x4x16x16x128xf32, #tpu.memory_space<vmem>>, vector<1x1x1x14x128xf32>,
    %c364 = arith.constant 364 : index
    %c0_190 = arith.constant 0 : index
    %285 = vector.load %arg7[%c364, %c0_190] : memref<784x128xf32, #tpu.memory_space<vmem>>, vector<14x128xf32>
    %286 = vector.broadcast %19 : vector<1x128xf32> to vector<14x128xf32>
    %287 = arith.mulf %285, %286 : vector<14x128xf32>
    %288 = vector.broadcast %22 : vector<1x128xf32> to vector<14x128xf32>
    %289 = arith.addf %287, %288 : vector<14x128xf32>
    %cst_191 = arith.constant 0.000000e+00 : f32
    %290 = vector.broadcast %cst_191 : f32 to vector<14x128xf32>
    %291 = arith.maximumf %289, %290 : vector<14x128xf32>
    %c0_192 = arith.constant 0 : index
    %c1_193 = arith.constant 1 : index
    %c13_194 = arith.constant 13 : index
    %c1_195 = arith.constant 1 : index
    %c0_196 = arith.constant 0 : index
    %292 = vector.load %arg8[%c0_192, %c1_193, %c13_194, %c1_195, %c0_196] : memref<1x4x16x16x128xf32, #tpu.memory_space<vmem>>, vector<1x1x1x14x128xf32>
    %293 = vector.shape_cast %292 : vector<1x1x1x14x128xf32> to vector<14x128xf32>
    %294 = vector.shape_cast %291 : vector<14x128xf32> to vector<1x1x1x14x128xf32>
    tpu.vector_store %arg8[%c0_192, %c1_193, %c13_194, %c1_195, %c0_196], %294 {strides = array<i32>} : memref<1x4x16x16x128xf32, #tpu.memory_space<vmem>>, vector<1x1x1x14x128xf32>,
    %c378 = arith.constant 378 : index
    %c0_197 = arith.constant 0 : index
    %295 = vector.load %arg7[%c378, %c0_197] : memref<784x128xf32, #tpu.memory_space<vmem>>, vector<14x128xf32>
    %296 = vector.broadcast %19 : vector<1x128xf32> to vector<14x128xf32>
    %297 = arith.mulf %295, %296 : vector<14x128xf32>
    %298 = vector.broadcast %22 : vector<1x128xf32> to vector<14x128xf32>
    %299 = arith.addf %297, %298 : vector<14x128xf32>
    %cst_198 = arith.constant 0.000000e+00 : f32
    %300 = vector.broadcast %cst_198 : f32 to vector<14x128xf32>
    %301 = arith.maximumf %299, %300 : vector<14x128xf32>
    %c0_199 = arith.constant 0 : index
    %c1_200 = arith.constant 1 : index
    %c14_201 = arith.constant 14 : index
    %c1_202 = arith.constant 1 : index
    %c0_203 = arith.constant 0 : index
    %302 = vector.load %arg8[%c0_199, %c1_200, %c14_201, %c1_202, %c0_203] : memref<1x4x16x16x128xf32, #tpu.memory_space<vmem>>, vector<1x1x1x14x128xf32>
    %303 = vector.shape_cast %302 : vector<1x1x1x14x128xf32> to vector<14x128xf32>
    %304 = vector.shape_cast %301 : vector<14x128xf32> to vector<1x1x1x14x128xf32>
    tpu.vector_store %arg8[%c0_199, %c1_200, %c14_201, %c1_202, %c0_203], %304 {strides = array<i32>} : memref<1x4x16x16x128xf32, #tpu.memory_space<vmem>>, vector<1x1x1x14x128xf32>,
    %c392 = arith.constant 392 : index
    %c0_204 = arith.constant 0 : index
    %305 = vector.load %arg7[%c392, %c0_204] : memref<784x128xf32, #tpu.memory_space<vmem>>, vector<14x128xf32>
    %306 = vector.broadcast %19 : vector<1x128xf32> to vector<14x128xf32>
    %307 = arith.mulf %305, %306 : vector<14x128xf32>
    %308 = vector.broadcast %22 : vector<1x128xf32> to vector<14x128xf32>
    %309 = arith.addf %307, %308 : vector<14x128xf32>
    %cst_205 = arith.constant 0.000000e+00 : f32
    %310 = vector.broadcast %cst_205 : f32 to vector<14x128xf32>
    %311 = arith.maximumf %309, %310 : vector<14x128xf32>
    %c0_206 = arith.constant 0 : index
    %c2_207 = arith.constant 2 : index
    %c1_208 = arith.constant 1 : index
    %c1_209 = arith.constant 1 : index
    %c0_210 = arith.constant 0 : index
    %312 = vector.load %arg8[%c0_206, %c2_207, %c1_208, %c1_209, %c0_210] : memref<1x4x16x16x128xf32, #tpu.memory_space<vmem>>, vector<1x1x1x14x128xf32>
    %313 = vector.shape_cast %312 : vector<1x1x1x14x128xf32> to vector<14x128xf32>
    %314 = vector.shape_cast %311 : vector<14x128xf32> to vector<1x1x1x14x128xf32>
    tpu.vector_store %arg8[%c0_206, %c2_207, %c1_208, %c1_209, %c0_210], %314 {strides = array<i32>} : memref<1x4x16x16x128xf32, #tpu.memory_space<vmem>>, vector<1x1x1x14x128xf32>,
    %c406 = arith.constant 406 : index
    %c0_211 = arith.constant 0 : index
    %315 = vector.load %arg7[%c406, %c0_211] : memref<784x128xf32, #tpu.memory_space<vmem>>, vector<14x128xf32>
    %316 = vector.broadcast %19 : vector<1x128xf32> to vector<14x128xf32>
    %317 = arith.mulf %315, %316 : vector<14x128xf32>
    %318 = vector.broadcast %22 : vector<1x128xf32> to vector<14x128xf32>
    %319 = arith.addf %317, %318 : vector<14x128xf32>
    %cst_212 = arith.constant 0.000000e+00 : f32
    %320 = vector.broadcast %cst_212 : f32 to vector<14x128xf32>
    %321 = arith.maximumf %319, %320 : vector<14x128xf32>
    %c0_213 = arith.constant 0 : index
    %c2_214 = arith.constant 2 : index
    %c2_215 = arith.constant 2 : index
    %c1_216 = arith.constant 1 : index
    %c0_217 = arith.constant 0 : index
    %322 = vector.load %arg8[%c0_213, %c2_214, %c2_215, %c1_216, %c0_217] : memref<1x4x16x16x128xf32, #tpu.memory_space<vmem>>, vector<1x1x1x14x128xf32>
    %323 = vector.shape_cast %322 : vector<1x1x1x14x128xf32> to vector<14x128xf32>
    %324 = vector.shape_cast %321 : vector<14x128xf32> to vector<1x1x1x14x128xf32>
    tpu.vector_store %arg8[%c0_213, %c2_214, %c2_215, %c1_216, %c0_217], %324 {strides = array<i32>} : memref<1x4x16x16x128xf32, #tpu.memory_space<vmem>>, vector<1x1x1x14x128xf32>,
    %c420 = arith.constant 420 : index
    %c0_218 = arith.constant 0 : index
    %325 = vector.load %arg7[%c420, %c0_218] : memref<784x128xf32, #tpu.memory_space<vmem>>, vector<14x128xf32>
    %326 = vector.broadcast %19 : vector<1x128xf32> to vector<14x128xf32>
    %327 = arith.mulf %325, %326 : vector<14x128xf32>
    %328 = vector.broadcast %22 : vector<1x128xf32> to vector<14x128xf32>
    %329 = arith.addf %327, %328 : vector<14x128xf32>
    %cst_219 = arith.constant 0.000000e+00 : f32
    %330 = vector.broadcast %cst_219 : f32 to vector<14x128xf32>
    %331 = arith.maximumf %329, %330 : vector<14x128xf32>
    %c0_220 = arith.constant 0 : index
    %c2_221 = arith.constant 2 : index
    %c3_222 = arith.constant 3 : index
    %c1_223 = arith.constant 1 : index
    %c0_224 = arith.constant 0 : index
    %332 = vector.load %arg8[%c0_220, %c2_221, %c3_222, %c1_223, %c0_224] : memref<1x4x16x16x128xf32, #tpu.memory_space<vmem>>, vector<1x1x1x14x128xf32>
    %333 = vector.shape_cast %332 : vector<1x1x1x14x128xf32> to vector<14x128xf32>
    %334 = vector.shape_cast %331 : vector<14x128xf32> to vector<1x1x1x14x128xf32>
    tpu.vector_store %arg8[%c0_220, %c2_221, %c3_222, %c1_223, %c0_224], %334 {strides = array<i32>} : memref<1x4x16x16x128xf32, #tpu.memory_space<vmem>>, vector<1x1x1x14x128xf32>,
    %c434 = arith.constant 434 : index
    %c0_225 = arith.constant 0 : index
    %335 = vector.load %arg7[%c434, %c0_225] : memref<784x128xf32, #tpu.memory_space<vmem>>, vector<14x128xf32>
    %336 = vector.broadcast %19 : vector<1x128xf32> to vector<14x128xf32>
    %337 = arith.mulf %335, %336 : vector<14x128xf32>
    %338 = vector.broadcast %22 : vector<1x128xf32> to vector<14x128xf32>
    %339 = arith.addf %337, %338 : vector<14x128xf32>
    %cst_226 = arith.constant 0.000000e+00 : f32
    %340 = vector.broadcast %cst_226 : f32 to vector<14x128xf32>
    %341 = arith.maximumf %339, %340 : vector<14x128xf32>
    %c0_227 = arith.constant 0 : index
    %c2_228 = arith.constant 2 : index
    %c4_229 = arith.constant 4 : index
    %c1_230 = arith.constant 1 : index
    %c0_231 = arith.constant 0 : index
    %342 = vector.load %arg8[%c0_227, %c2_228, %c4_229, %c1_230, %c0_231] : memref<1x4x16x16x128xf32, #tpu.memory_space<vmem>>, vector<1x1x1x14x128xf32>
    %343 = vector.shape_cast %342 : vector<1x1x1x14x128xf32> to vector<14x128xf32>
    %344 = vector.shape_cast %341 : vector<14x128xf32> to vector<1x1x1x14x128xf32>
    tpu.vector_store %arg8[%c0_227, %c2_228, %c4_229, %c1_230, %c0_231], %344 {strides = array<i32>} : memref<1x4x16x16x128xf32, #tpu.memory_space<vmem>>, vector<1x1x1x14x128xf32>,
    %c448 = arith.constant 448 : index
    %c0_232 = arith.constant 0 : index
    %345 = vector.load %arg7[%c448, %c0_232] : memref<784x128xf32, #tpu.memory_space<vmem>>, vector<14x128xf32>
    %346 = vector.broadcast %19 : vector<1x128xf32> to vector<14x128xf32>
    %347 = arith.mulf %345, %346 : vector<14x128xf32>
    %348 = vector.broadcast %22 : vector<1x128xf32> to vector<14x128xf32>
    %349 = arith.addf %347, %348 : vector<14x128xf32>
    %cst_233 = arith.constant 0.000000e+00 : f32
    %350 = vector.broadcast %cst_233 : f32 to vector<14x128xf32>
    %351 = arith.maximumf %349, %350 : vector<14x128xf32>
    %c0_234 = arith.constant 0 : index
    %c2_235 = arith.constant 2 : index
    %c5_236 = arith.constant 5 : index
    %c1_237 = arith.constant 1 : index
    %c0_238 = arith.constant 0 : index
    %352 = vector.load %arg8[%c0_234, %c2_235, %c5_236, %c1_237, %c0_238] : memref<1x4x16x16x128xf32, #tpu.memory_space<vmem>>, vector<1x1x1x14x128xf32>
    %353 = vector.shape_cast %352 : vector<1x1x1x14x128xf32> to vector<14x128xf32>
    %354 = vector.shape_cast %351 : vector<14x128xf32> to vector<1x1x1x14x128xf32>
    tpu.vector_store %arg8[%c0_234, %c2_235, %c5_236, %c1_237, %c0_238], %354 {strides = array<i32>} : memref<1x4x16x16x128xf32, #tpu.memory_space<vmem>>, vector<1x1x1x14x128xf32>,
    %c462 = arith.constant 462 : index
    %c0_239 = arith.constant 0 : index
    %355 = vector.load %arg7[%c462, %c0_239] : memref<784x128xf32, #tpu.memory_space<vmem>>, vector<14x128xf32>
    %356 = vector.broadcast %19 : vector<1x128xf32> to vector<14x128xf32>
    %357 = arith.mulf %355, %356 : vector<14x128xf32>
    %358 = vector.broadcast %22 : vector<1x128xf32> to vector<14x128xf32>
    %359 = arith.addf %357, %358 : vector<14x128xf32>
    %cst_240 = arith.constant 0.000000e+00 : f32
    %360 = vector.broadcast %cst_240 : f32 to vector<14x128xf32>
    %361 = arith.maximumf %359, %360 : vector<14x128xf32>
    %c0_241 = arith.constant 0 : index
    %c2_242 = arith.constant 2 : index
    %c6_243 = arith.constant 6 : index
    %c1_244 = arith.constant 1 : index
    %c0_245 = arith.constant 0 : index
    %362 = vector.load %arg8[%c0_241, %c2_242, %c6_243, %c1_244, %c0_245] : memref<1x4x16x16x128xf32, #tpu.memory_space<vmem>>, vector<1x1x1x14x128xf32>
    %363 = vector.shape_cast %362 : vector<1x1x1x14x128xf32> to vector<14x128xf32>
    %364 = vector.shape_cast %361 : vector<14x128xf32> to vector<1x1x1x14x128xf32>
    tpu.vector_store %arg8[%c0_241, %c2_242, %c6_243, %c1_244, %c0_245], %364 {strides = array<i32>} : memref<1x4x16x16x128xf32, #tpu.memory_space<vmem>>, vector<1x1x1x14x128xf32>,
    %c476 = arith.constant 476 : index
    %c0_246 = arith.constant 0 : index
    %365 = vector.load %arg7[%c476, %c0_246] : memref<784x128xf32, #tpu.memory_space<vmem>>, vector<14x128xf32>
    %366 = vector.broadcast %19 : vector<1x128xf32> to vector<14x128xf32>
    %367 = arith.mulf %365, %366 : vector<14x128xf32>
    %368 = vector.broadcast %22 : vector<1x128xf32> to vector<14x128xf32>
    %369 = arith.addf %367, %368 : vector<14x128xf32>
    %cst_247 = arith.constant 0.000000e+00 : f32
    %370 = vector.broadcast %cst_247 : f32 to vector<14x128xf32>
    %371 = arith.maximumf %369, %370 : vector<14x128xf32>
    %c0_248 = arith.constant 0 : index
    %c2_249 = arith.constant 2 : index
    %c7_250 = arith.constant 7 : index
    %c1_251 = arith.constant 1 : index
    %c0_252 = arith.constant 0 : index
    %372 = vector.load %arg8[%c0_248, %c2_249, %c7_250, %c1_251, %c0_252] : memref<1x4x16x16x128xf32, #tpu.memory_space<vmem>>, vector<1x1x1x14x128xf32>
    %373 = vector.shape_cast %372 : vector<1x1x1x14x128xf32> to vector<14x128xf32>
    %374 = vector.shape_cast %371 : vector<14x128xf32> to vector<1x1x1x14x128xf32>
    tpu.vector_store %arg8[%c0_248, %c2_249, %c7_250, %c1_251, %c0_252], %374 {strides = array<i32>} : memref<1x4x16x16x128xf32, #tpu.memory_space<vmem>>, vector<1x1x1x14x128xf32>,
    %c490 = arith.constant 490 : index
    %c0_253 = arith.constant 0 : index
    %375 = vector.load %arg7[%c490, %c0_253] : memref<784x128xf32, #tpu.memory_space<vmem>>, vector<14x128xf32>
    %376 = vector.broadcast %19 : vector<1x128xf32> to vector<14x128xf32>
    %377 = arith.mulf %375, %376 : vector<14x128xf32>
    %378 = vector.broadcast %22 : vector<1x128xf32> to vector<14x128xf32>
    %379 = arith.addf %377, %378 : vector<14x128xf32>
    %cst_254 = arith.constant 0.000000e+00 : f32
    %380 = vector.broadcast %cst_254 : f32 to vector<14x128xf32>
    %381 = arith.maximumf %379, %380 : vector<14x128xf32>
    %c0_255 = arith.constant 0 : index
    %c2_256 = arith.constant 2 : index
    %c8_257 = arith.constant 8 : index
    %c1_258 = arith.constant 1 : index
    %c0_259 = arith.constant 0 : index
    %382 = vector.load %arg8[%c0_255, %c2_256, %c8_257, %c1_258, %c0_259] : memref<1x4x16x16x128xf32, #tpu.memory_space<vmem>>, vector<1x1x1x14x128xf32>
    %383 = vector.shape_cast %382 : vector<1x1x1x14x128xf32> to vector<14x128xf32>
    %384 = vector.shape_cast %381 : vector<14x128xf32> to vector<1x1x1x14x128xf32>
    tpu.vector_store %arg8[%c0_255, %c2_256, %c8_257, %c1_258, %c0_259], %384 {strides = array<i32>} : memref<1x4x16x16x128xf32, #tpu.memory_space<vmem>>, vector<1x1x1x14x128xf32>,
    %c504 = arith.constant 504 : index
    %c0_260 = arith.constant 0 : index
    %385 = vector.load %arg7[%c504, %c0_260] : memref<784x128xf32, #tpu.memory_space<vmem>>, vector<14x128xf32>
    %386 = vector.broadcast %19 : vector<1x128xf32> to vector<14x128xf32>
    %387 = arith.mulf %385, %386 : vector<14x128xf32>
    %388 = vector.broadcast %22 : vector<1x128xf32> to vector<14x128xf32>
    %389 = arith.addf %387, %388 : vector<14x128xf32>
    %cst_261 = arith.constant 0.000000e+00 : f32
    %390 = vector.broadcast %cst_261 : f32 to vector<14x128xf32>
    %391 = arith.maximumf %389, %390 : vector<14x128xf32>
    %c0_262 = arith.constant 0 : index
    %c2_263 = arith.constant 2 : index
    %c9_264 = arith.constant 9 : index
    %c1_265 = arith.constant 1 : index
    %c0_266 = arith.constant 0 : index
    %392 = vector.load %arg8[%c0_262, %c2_263, %c9_264, %c1_265, %c0_266] : memref<1x4x16x16x128xf32, #tpu.memory_space<vmem>>, vector<1x1x1x14x128xf32>
    %393 = vector.shape_cast %392 : vector<1x1x1x14x128xf32> to vector<14x128xf32>
    %394 = vector.shape_cast %391 : vector<14x128xf32> to vector<1x1x1x14x128xf32>
    tpu.vector_store %arg8[%c0_262, %c2_263, %c9_264, %c1_265, %c0_266], %394 {strides = array<i32>} : memref<1x4x16x16x128xf32, #tpu.memory_space<vmem>>, vector<1x1x1x14x128xf32>,
    %c518 = arith.constant 518 : index
    %c0_267 = arith.constant 0 : index
    %395 = vector.load %arg7[%c518, %c0_267] : memref<784x128xf32, #tpu.memory_space<vmem>>, vector<14x128xf32>
    %396 = vector.broadcast %19 : vector<1x128xf32> to vector<14x128xf32>
    %397 = arith.mulf %395, %396 : vector<14x128xf32>
    %398 = vector.broadcast %22 : vector<1x128xf32> to vector<14x128xf32>
    %399 = arith.addf %397, %398 : vector<14x128xf32>
    %cst_268 = arith.constant 0.000000e+00 : f32
    %400 = vector.broadcast %cst_268 : f32 to vector<14x128xf32>
    %401 = arith.maximumf %399, %400 : vector<14x128xf32>
    %c0_269 = arith.constant 0 : index
    %c2_270 = arith.constant 2 : index
    %c10_271 = arith.constant 10 : index
    %c1_272 = arith.constant 1 : index
    %c0_273 = arith.constant 0 : index
    %402 = vector.load %arg8[%c0_269, %c2_270, %c10_271, %c1_272, %c0_273] : memref<1x4x16x16x128xf32, #tpu.memory_space<vmem>>, vector<1x1x1x14x128xf32>
    %403 = vector.shape_cast %402 : vector<1x1x1x14x128xf32> to vector<14x128xf32>
    %404 = vector.shape_cast %401 : vector<14x128xf32> to vector<1x1x1x14x128xf32>
    tpu.vector_store %arg8[%c0_269, %c2_270, %c10_271, %c1_272, %c0_273], %404 {strides = array<i32>} : memref<1x4x16x16x128xf32, #tpu.memory_space<vmem>>, vector<1x1x1x14x128xf32>,
    %c532 = arith.constant 532 : index
    %c0_274 = arith.constant 0 : index
    %405 = vector.load %arg7[%c532, %c0_274] : memref<784x128xf32, #tpu.memory_space<vmem>>, vector<14x128xf32>
    %406 = vector.broadcast %19 : vector<1x128xf32> to vector<14x128xf32>
    %407 = arith.mulf %405, %406 : vector<14x128xf32>
    %408 = vector.broadcast %22 : vector<1x128xf32> to vector<14x128xf32>
    %409 = arith.addf %407, %408 : vector<14x128xf32>
    %cst_275 = arith.constant 0.000000e+00 : f32
    %410 = vector.broadcast %cst_275 : f32 to vector<14x128xf32>
    %411 = arith.maximumf %409, %410 : vector<14x128xf32>
    %c0_276 = arith.constant 0 : index
    %c2_277 = arith.constant 2 : index
    %c11_278 = arith.constant 11 : index
    %c1_279 = arith.constant 1 : index
    %c0_280 = arith.constant 0 : index
    %412 = vector.load %arg8[%c0_276, %c2_277, %c11_278, %c1_279, %c0_280] : memref<1x4x16x16x128xf32, #tpu.memory_space<vmem>>, vector<1x1x1x14x128xf32>
    %413 = vector.shape_cast %412 : vector<1x1x1x14x128xf32> to vector<14x128xf32>
    %414 = vector.shape_cast %411 : vector<14x128xf32> to vector<1x1x1x14x128xf32>
    tpu.vector_store %arg8[%c0_276, %c2_277, %c11_278, %c1_279, %c0_280], %414 {strides = array<i32>} : memref<1x4x16x16x128xf32, #tpu.memory_space<vmem>>, vector<1x1x1x14x128xf32>,
    %c546 = arith.constant 546 : index
    %c0_281 = arith.constant 0 : index
    %415 = vector.load %arg7[%c546, %c0_281] : memref<784x128xf32, #tpu.memory_space<vmem>>, vector<14x128xf32>
    %416 = vector.broadcast %19 : vector<1x128xf32> to vector<14x128xf32>
    %417 = arith.mulf %415, %416 : vector<14x128xf32>
    %418 = vector.broadcast %22 : vector<1x128xf32> to vector<14x128xf32>
    %419 = arith.addf %417, %418 : vector<14x128xf32>
    %cst_282 = arith.constant 0.000000e+00 : f32
    %420 = vector.broadcast %cst_282 : f32 to vector<14x128xf32>
    %421 = arith.maximumf %419, %420 : vector<14x128xf32>
    %c0_283 = arith.constant 0 : index
    %c2_284 = arith.constant 2 : index
    %c12_285 = arith.constant 12 : index
    %c1_286 = arith.constant 1 : index
    %c0_287 = arith.constant 0 : index
    %422 = vector.load %arg8[%c0_283, %c2_284, %c12_285, %c1_286, %c0_287] : memref<1x4x16x16x128xf32, #tpu.memory_space<vmem>>, vector<1x1x1x14x128xf32>
    %423 = vector.shape_cast %422 : vector<1x1x1x14x128xf32> to vector<14x128xf32>
    %424 = vector.shape_cast %421 : vector<14x128xf32> to vector<1x1x1x14x128xf32>
    tpu.vector_store %arg8[%c0_283, %c2_284, %c12_285, %c1_286, %c0_287], %424 {strides = array<i32>} : memref<1x4x16x16x128xf32, #tpu.memory_space<vmem>>, vector<1x1x1x14x128xf32>,
    %c560 = arith.constant 560 : index
    %c0_288 = arith.constant 0 : index
    %425 = vector.load %arg7[%c560, %c0_288] : memref<784x128xf32, #tpu.memory_space<vmem>>, vector<14x128xf32>
    %426 = vector.broadcast %19 : vector<1x128xf32> to vector<14x128xf32>
    %427 = arith.mulf %425, %426 : vector<14x128xf32>
    %428 = vector.broadcast %22 : vector<1x128xf32> to vector<14x128xf32>
    %429 = arith.addf %427, %428 : vector<14x128xf32>
    %cst_289 = arith.constant 0.000000e+00 : f32
    %430 = vector.broadcast %cst_289 : f32 to vector<14x128xf32>
    %431 = arith.maximumf %429, %430 : vector<14x128xf32>
    %c0_290 = arith.constant 0 : index
    %c2_291 = arith.constant 2 : index
    %c13_292 = arith.constant 13 : index
    %c1_293 = arith.constant 1 : index
    %c0_294 = arith.constant 0 : index
    %432 = vector.load %arg8[%c0_290, %c2_291, %c13_292, %c1_293, %c0_294] : memref<1x4x16x16x128xf32, #tpu.memory_space<vmem>>, vector<1x1x1x14x128xf32>
    %433 = vector.shape_cast %432 : vector<1x1x1x14x128xf32> to vector<14x128xf32>
    %434 = vector.shape_cast %431 : vector<14x128xf32> to vector<1x1x1x14x128xf32>
    tpu.vector_store %arg8[%c0_290, %c2_291, %c13_292, %c1_293, %c0_294], %434 {strides = array<i32>} : memref<1x4x16x16x128xf32, #tpu.memory_space<vmem>>, vector<1x1x1x14x128xf32>,
    %c574 = arith.constant 574 : index
    %c0_295 = arith.constant 0 : index
    %435 = vector.load %arg7[%c574, %c0_295] : memref<784x128xf32, #tpu.memory_space<vmem>>, vector<14x128xf32>
    %436 = vector.broadcast %19 : vector<1x128xf32> to vector<14x128xf32>
    %437 = arith.mulf %435, %436 : vector<14x128xf32>
    %438 = vector.broadcast %22 : vector<1x128xf32> to vector<14x128xf32>
    %439 = arith.addf %437, %438 : vector<14x128xf32>
    %cst_296 = arith.constant 0.000000e+00 : f32
    %440 = vector.broadcast %cst_296 : f32 to vector<14x128xf32>
    %441 = arith.maximumf %439, %440 : vector<14x128xf32>
    %c0_297 = arith.constant 0 : index
    %c2_298 = arith.constant 2 : index
    %c14_299 = arith.constant 14 : index
    %c1_300 = arith.constant 1 : index
    %c0_301 = arith.constant 0 : index
    %442 = vector.load %arg8[%c0_297, %c2_298, %c14_299, %c1_300, %c0_301] : memref<1x4x16x16x128xf32, #tpu.memory_space<vmem>>, vector<1x1x1x14x128xf32>
    %443 = vector.shape_cast %442 : vector<1x1x1x14x128xf32> to vector<14x128xf32>
    %444 = vector.shape_cast %441 : vector<14x128xf32> to vector<1x1x1x14x128xf32>
    tpu.vector_store %arg8[%c0_297, %c2_298, %c14_299, %c1_300, %c0_301], %444 {strides = array<i32>} : memref<1x4x16x16x128xf32, #tpu.memory_space<vmem>>, vector<1x1x1x14x128xf32>,
    %c588 = arith.constant 588 : index
    %c0_302 = arith.constant 0 : index
    %445 = vector.load %arg7[%c588, %c0_302] : memref<784x128xf32, #tpu.memory_space<vmem>>, vector<14x128xf32>
    %446 = vector.broadcast %19 : vector<1x128xf32> to vector<14x128xf32>
    %447 = arith.mulf %445, %446 : vector<14x128xf32>
    %448 = vector.broadcast %22 : vector<1x128xf32> to vector<14x128xf32>
    %449 = arith.addf %447, %448 : vector<14x128xf32>
    %cst_303 = arith.constant 0.000000e+00 : f32
    %450 = vector.broadcast %cst_303 : f32 to vector<14x128xf32>
    %451 = arith.maximumf %449, %450 : vector<14x128xf32>
    %c0_304 = arith.constant 0 : index
    %c3_305 = arith.constant 3 : index
    %c1_306 = arith.constant 1 : index
    %c1_307 = arith.constant 1 : index
    %c0_308 = arith.constant 0 : index
    %452 = vector.load %arg8[%c0_304, %c3_305, %c1_306, %c1_307, %c0_308] : memref<1x4x16x16x128xf32, #tpu.memory_space<vmem>>, vector<1x1x1x14x128xf32>
    %453 = vector.shape_cast %452 : vector<1x1x1x14x128xf32> to vector<14x128xf32>
    %454 = vector.shape_cast %451 : vector<14x128xf32> to vector<1x1x1x14x128xf32>
    tpu.vector_store %arg8[%c0_304, %c3_305, %c1_306, %c1_307, %c0_308], %454 {strides = array<i32>} : memref<1x4x16x16x128xf32, #tpu.memory_space<vmem>>, vector<1x1x1x14x128xf32>,
    %c602 = arith.constant 602 : index
    %c0_309 = arith.constant 0 : index
    %455 = vector.load %arg7[%c602, %c0_309] : memref<784x128xf32, #tpu.memory_space<vmem>>, vector<14x128xf32>
    %456 = vector.broadcast %19 : vector<1x128xf32> to vector<14x128xf32>
    %457 = arith.mulf %455, %456 : vector<14x128xf32>
    %458 = vector.broadcast %22 : vector<1x128xf32> to vector<14x128xf32>
    %459 = arith.addf %457, %458 : vector<14x128xf32>
    %cst_310 = arith.constant 0.000000e+00 : f32
    %460 = vector.broadcast %cst_310 : f32 to vector<14x128xf32>
    %461 = arith.maximumf %459, %460 : vector<14x128xf32>
    %c0_311 = arith.constant 0 : index
    %c3_312 = arith.constant 3 : index
    %c2_313 = arith.constant 2 : index
    %c1_314 = arith.constant 1 : index
    %c0_315 = arith.constant 0 : index
    %462 = vector.load %arg8[%c0_311, %c3_312, %c2_313, %c1_314, %c0_315] : memref<1x4x16x16x128xf32, #tpu.memory_space<vmem>>, vector<1x1x1x14x128xf32>
    %463 = vector.shape_cast %462 : vector<1x1x1x14x128xf32> to vector<14x128xf32>
    %464 = vector.shape_cast %461 : vector<14x128xf32> to vector<1x1x1x14x128xf32>
    tpu.vector_store %arg8[%c0_311, %c3_312, %c2_313, %c1_314, %c0_315], %464 {strides = array<i32>} : memref<1x4x16x16x128xf32, #tpu.memory_space<vmem>>, vector<1x1x1x14x128xf32>,
    %c616 = arith.constant 616 : index
    %c0_316 = arith.constant 0 : index
    %465 = vector.load %arg7[%c616, %c0_316] : memref<784x128xf32, #tpu.memory_space<vmem>>, vector<14x128xf32>
    %466 = vector.broadcast %19 : vector<1x128xf32> to vector<14x128xf32>
    %467 = arith.mulf %465, %466 : vector<14x128xf32>
    %468 = vector.broadcast %22 : vector<1x128xf32> to vector<14x128xf32>
    %469 = arith.addf %467, %468 : vector<14x128xf32>
    %cst_317 = arith.constant 0.000000e+00 : f32
    %470 = vector.broadcast %cst_317 : f32 to vector<14x128xf32>
    %471 = arith.maximumf %469, %470 : vector<14x128xf32>
    %c0_318 = arith.constant 0 : index
    %c3_319 = arith.constant 3 : index
    %c3_320 = arith.constant 3 : index
    %c1_321 = arith.constant 1 : index
    %c0_322 = arith.constant 0 : index
    %472 = vector.load %arg8[%c0_318, %c3_319, %c3_320, %c1_321, %c0_322] : memref<1x4x16x16x128xf32, #tpu.memory_space<vmem>>, vector<1x1x1x14x128xf32>
    %473 = vector.shape_cast %472 : vector<1x1x1x14x128xf32> to vector<14x128xf32>
    %474 = vector.shape_cast %471 : vector<14x128xf32> to vector<1x1x1x14x128xf32>
    tpu.vector_store %arg8[%c0_318, %c3_319, %c3_320, %c1_321, %c0_322], %474 {strides = array<i32>} : memref<1x4x16x16x128xf32, #tpu.memory_space<vmem>>, vector<1x1x1x14x128xf32>,
    %c630 = arith.constant 630 : index
    %c0_323 = arith.constant 0 : index
    %475 = vector.load %arg7[%c630, %c0_323] : memref<784x128xf32, #tpu.memory_space<vmem>>, vector<14x128xf32>
    %476 = vector.broadcast %19 : vector<1x128xf32> to vector<14x128xf32>
    %477 = arith.mulf %475, %476 : vector<14x128xf32>
    %478 = vector.broadcast %22 : vector<1x128xf32> to vector<14x128xf32>
    %479 = arith.addf %477, %478 : vector<14x128xf32>
    %cst_324 = arith.constant 0.000000e+00 : f32
    %480 = vector.broadcast %cst_324 : f32 to vector<14x128xf32>
    %481 = arith.maximumf %479, %480 : vector<14x128xf32>
    %c0_325 = arith.constant 0 : index
    %c3_326 = arith.constant 3 : index
    %c4_327 = arith.constant 4 : index
    %c1_328 = arith.constant 1 : index
    %c0_329 = arith.constant 0 : index
    %482 = vector.load %arg8[%c0_325, %c3_326, %c4_327, %c1_328, %c0_329] : memref<1x4x16x16x128xf32, #tpu.memory_space<vmem>>, vector<1x1x1x14x128xf32>
    %483 = vector.shape_cast %482 : vector<1x1x1x14x128xf32> to vector<14x128xf32>
    %484 = vector.shape_cast %481 : vector<14x128xf32> to vector<1x1x1x14x128xf32>
    tpu.vector_store %arg8[%c0_325, %c3_326, %c4_327, %c1_328, %c0_329], %484 {strides = array<i32>} : memref<1x4x16x16x128xf32, #tpu.memory_space<vmem>>, vector<1x1x1x14x128xf32>,
    %c644 = arith.constant 644 : index
    %c0_330 = arith.constant 0 : index
    %485 = vector.load %arg7[%c644, %c0_330] : memref<784x128xf32, #tpu.memory_space<vmem>>, vector<14x128xf32>
    %486 = vector.broadcast %19 : vector<1x128xf32> to vector<14x128xf32>
    %487 = arith.mulf %485, %486 : vector<14x128xf32>
    %488 = vector.broadcast %22 : vector<1x128xf32> to vector<14x128xf32>
    %489 = arith.addf %487, %488 : vector<14x128xf32>
    %cst_331 = arith.constant 0.000000e+00 : f32
    %490 = vector.broadcast %cst_331 : f32 to vector<14x128xf32>
    %491 = arith.maximumf %489, %490 : vector<14x128xf32>
    %c0_332 = arith.constant 0 : index
    %c3_333 = arith.constant 3 : index
    %c5_334 = arith.constant 5 : index
    %c1_335 = arith.constant 1 : index
    %c0_336 = arith.constant 0 : index
    %492 = vector.load %arg8[%c0_332, %c3_333, %c5_334, %c1_335, %c0_336] : memref<1x4x16x16x128xf32, #tpu.memory_space<vmem>>, vector<1x1x1x14x128xf32>
    %493 = vector.shape_cast %492 : vector<1x1x1x14x128xf32> to vector<14x128xf32>
    %494 = vector.shape_cast %491 : vector<14x128xf32> to vector<1x1x1x14x128xf32>
    tpu.vector_store %arg8[%c0_332, %c3_333, %c5_334, %c1_335, %c0_336], %494 {strides = array<i32>} : memref<1x4x16x16x128xf32, #tpu.memory_space<vmem>>, vector<1x1x1x14x128xf32>,
    %c658 = arith.constant 658 : index
    %c0_337 = arith.constant 0 : index
    %495 = vector.load %arg7[%c658, %c0_337] : memref<784x128xf32, #tpu.memory_space<vmem>>, vector<14x128xf32>
    %496 = vector.broadcast %19 : vector<1x128xf32> to vector<14x128xf32>
    %497 = arith.mulf %495, %496 : vector<14x128xf32>
    %498 = vector.broadcast %22 : vector<1x128xf32> to vector<14x128xf32>
    %499 = arith.addf %497, %498 : vector<14x128xf32>
    %cst_338 = arith.constant 0.000000e+00 : f32
    %500 = vector.broadcast %cst_338 : f32 to vector<14x128xf32>
    %501 = arith.maximumf %499, %500 : vector<14x128xf32>
    %c0_339 = arith.constant 0 : index
    %c3_340 = arith.constant 3 : index
    %c6_341 = arith.constant 6 : index
    %c1_342 = arith.constant 1 : index
    %c0_343 = arith.constant 0 : index
    %502 = vector.load %arg8[%c0_339, %c3_340, %c6_341, %c1_342, %c0_343] : memref<1x4x16x16x128xf32, #tpu.memory_space<vmem>>, vector<1x1x1x14x128xf32>
    %503 = vector.shape_cast %502 : vector<1x1x1x14x128xf32> to vector<14x128xf32>
    %504 = vector.shape_cast %501 : vector<14x128xf32> to vector<1x1x1x14x128xf32>
    tpu.vector_store %arg8[%c0_339, %c3_340, %c6_341, %c1_342, %c0_343], %504 {strides = array<i32>} : memref<1x4x16x16x128xf32, #tpu.memory_space<vmem>>, vector<1x1x1x14x128xf32>,
    %c672 = arith.constant 672 : index
    %c0_344 = arith.constant 0 : index
    %505 = vector.load %arg7[%c672, %c0_344] : memref<784x128xf32, #tpu.memory_space<vmem>>, vector<14x128xf32>
    %506 = vector.broadcast %19 : vector<1x128xf32> to vector<14x128xf32>
    %507 = arith.mulf %505, %506 : vector<14x128xf32>
    %508 = vector.broadcast %22 : vector<1x128xf32> to vector<14x128xf32>
    %509 = arith.addf %507, %508 : vector<14x128xf32>
    %cst_345 = arith.constant 0.000000e+00 : f32
    %510 = vector.broadcast %cst_345 : f32 to vector<14x128xf32>
    %511 = arith.maximumf %509, %510 : vector<14x128xf32>
    %c0_346 = arith.constant 0 : index
    %c3_347 = arith.constant 3 : index
    %c7_348 = arith.constant 7 : index
    %c1_349 = arith.constant 1 : index
    %c0_350 = arith.constant 0 : index
    %512 = vector.load %arg8[%c0_346, %c3_347, %c7_348, %c1_349, %c0_350] : memref<1x4x16x16x128xf32, #tpu.memory_space<vmem>>, vector<1x1x1x14x128xf32>
    %513 = vector.shape_cast %512 : vector<1x1x1x14x128xf32> to vector<14x128xf32>
    %514 = vector.shape_cast %511 : vector<14x128xf32> to vector<1x1x1x14x128xf32>
    tpu.vector_store %arg8[%c0_346, %c3_347, %c7_348, %c1_349, %c0_350], %514 {strides = array<i32>} : memref<1x4x16x16x128xf32, #tpu.memory_space<vmem>>, vector<1x1x1x14x128xf32>,
    %c686 = arith.constant 686 : index
    %c0_351 = arith.constant 0 : index
    %515 = vector.load %arg7[%c686, %c0_351] : memref<784x128xf32, #tpu.memory_space<vmem>>, vector<14x128xf32>
    %516 = vector.broadcast %19 : vector<1x128xf32> to vector<14x128xf32>
    %517 = arith.mulf %515, %516 : vector<14x128xf32>
    %518 = vector.broadcast %22 : vector<1x128xf32> to vector<14x128xf32>
    %519 = arith.addf %517, %518 : vector<14x128xf32>
    %cst_352 = arith.constant 0.000000e+00 : f32
    %520 = vector.broadcast %cst_352 : f32 to vector<14x128xf32>
    %521 = arith.maximumf %519, %520 : vector<14x128xf32>
    %c0_353 = arith.constant 0 : index
    %c3_354 = arith.constant 3 : index
    %c8_355 = arith.constant 8 : index
    %c1_356 = arith.constant 1 : index
    %c0_357 = arith.constant 0 : index
    %522 = vector.load %arg8[%c0_353, %c3_354, %c8_355, %c1_356, %c0_357] : memref<1x4x16x16x128xf32, #tpu.memory_space<vmem>>, vector<1x1x1x14x128xf32>
    %523 = vector.shape_cast %522 : vector<1x1x1x14x128xf32> to vector<14x128xf32>
    %524 = vector.shape_cast %521 : vector<14x128xf32> to vector<1x1x1x14x128xf32>
    tpu.vector_store %arg8[%c0_353, %c3_354, %c8_355, %c1_356, %c0_357], %524 {strides = array<i32>} : memref<1x4x16x16x128xf32, #tpu.memory_space<vmem>>, vector<1x1x1x14x128xf32>,
    %c700 = arith.constant 700 : index
    %c0_358 = arith.constant 0 : index
    %525 = vector.load %arg7[%c700, %c0_358] : memref<784x128xf32, #tpu.memory_space<vmem>>, vector<14x128xf32>
    %526 = vector.broadcast %19 : vector<1x128xf32> to vector<14x128xf32>
    %527 = arith.mulf %525, %526 : vector<14x128xf32>
    %528 = vector.broadcast %22 : vector<1x128xf32> to vector<14x128xf32>
    %529 = arith.addf %527, %528 : vector<14x128xf32>
    %cst_359 = arith.constant 0.000000e+00 : f32
    %530 = vector.broadcast %cst_359 : f32 to vector<14x128xf32>
    %531 = arith.maximumf %529, %530 : vector<14x128xf32>
    %c0_360 = arith.constant 0 : index
    %c3_361 = arith.constant 3 : index
    %c9_362 = arith.constant 9 : index
    %c1_363 = arith.constant 1 : index
    %c0_364 = arith.constant 0 : index
    %532 = vector.load %arg8[%c0_360, %c3_361, %c9_362, %c1_363, %c0_364] : memref<1x4x16x16x128xf32, #tpu.memory_space<vmem>>, vector<1x1x1x14x128xf32>
    %533 = vector.shape_cast %532 : vector<1x1x1x14x128xf32> to vector<14x128xf32>
    %534 = vector.shape_cast %531 : vector<14x128xf32> to vector<1x1x1x14x128xf32>
    tpu.vector_store %arg8[%c0_360, %c3_361, %c9_362, %c1_363, %c0_364], %534 {strides = array<i32>} : memref<1x4x16x16x128xf32, #tpu.memory_space<vmem>>, vector<1x1x1x14x128xf32>,
    %c714 = arith.constant 714 : index
    %c0_365 = arith.constant 0 : index
    %535 = vector.load %arg7[%c714, %c0_365] : memref<784x128xf32, #tpu.memory_space<vmem>>, vector<14x128xf32>
    %536 = vector.broadcast %19 : vector<1x128xf32> to vector<14x128xf32>
    %537 = arith.mulf %535, %536 : vector<14x128xf32>
    %538 = vector.broadcast %22 : vector<1x128xf32> to vector<14x128xf32>
    %539 = arith.addf %537, %538 : vector<14x128xf32>
    %cst_366 = arith.constant 0.000000e+00 : f32
    %540 = vector.broadcast %cst_366 : f32 to vector<14x128xf32>
    %541 = arith.maximumf %539, %540 : vector<14x128xf32>
    %c0_367 = arith.constant 0 : index
    %c3_368 = arith.constant 3 : index
    %c10_369 = arith.constant 10 : index
    %c1_370 = arith.constant 1 : index
    %c0_371 = arith.constant 0 : index
    %542 = vector.load %arg8[%c0_367, %c3_368, %c10_369, %c1_370, %c0_371] : memref<1x4x16x16x128xf32, #tpu.memory_space<vmem>>, vector<1x1x1x14x128xf32>
    %543 = vector.shape_cast %542 : vector<1x1x1x14x128xf32> to vector<14x128xf32>
    %544 = vector.shape_cast %541 : vector<14x128xf32> to vector<1x1x1x14x128xf32>
    tpu.vector_store %arg8[%c0_367, %c3_368, %c10_369, %c1_370, %c0_371], %544 {strides = array<i32>} : memref<1x4x16x16x128xf32, #tpu.memory_space<vmem>>, vector<1x1x1x14x128xf32>,
    %c728 = arith.constant 728 : index
    %c0_372 = arith.constant 0 : index
    %545 = vector.load %arg7[%c728, %c0_372] : memref<784x128xf32, #tpu.memory_space<vmem>>, vector<14x128xf32>
    %546 = vector.broadcast %19 : vector<1x128xf32> to vector<14x128xf32>
    %547 = arith.mulf %545, %546 : vector<14x128xf32>
    %548 = vector.broadcast %22 : vector<1x128xf32> to vector<14x128xf32>
    %549 = arith.addf %547, %548 : vector<14x128xf32>
    %cst_373 = arith.constant 0.000000e+00 : f32
    %550 = vector.broadcast %cst_373 : f32 to vector<14x128xf32>
    %551 = arith.maximumf %549, %550 : vector<14x128xf32>
    %c0_374 = arith.constant 0 : index
    %c3_375 = arith.constant 3 : index
    %c11_376 = arith.constant 11 : index
    %c1_377 = arith.constant 1 : index
    %c0_378 = arith.constant 0 : index
    %552 = vector.load %arg8[%c0_374, %c3_375, %c11_376, %c1_377, %c0_378] : memref<1x4x16x16x128xf32, #tpu.memory_space<vmem>>, vector<1x1x1x14x128xf32>
    %553 = vector.shape_cast %552 : vector<1x1x1x14x128xf32> to vector<14x128xf32>
    %554 = vector.shape_cast %551 : vector<14x128xf32> to vector<1x1x1x14x128xf32>
    tpu.vector_store %arg8[%c0_374, %c3_375, %c11_376, %c1_377, %c0_378], %554 {strides = array<i32>} : memref<1x4x16x16x128xf32, #tpu.memory_space<vmem>>, vector<1x1x1x14x128xf32>,
    %c742 = arith.constant 742 : index
    %c0_379 = arith.constant 0 : index
    %555 = vector.load %arg7[%c742, %c0_379] : memref<784x128xf32, #tpu.memory_space<vmem>>, vector<14x128xf32>
    %556 = vector.broadcast %19 : vector<1x128xf32> to vector<14x128xf32>
    %557 = arith.mulf %555, %556 : vector<14x128xf32>
    %558 = vector.broadcast %22 : vector<1x128xf32> to vector<14x128xf32>
    %559 = arith.addf %557, %558 : vector<14x128xf32>
    %cst_380 = arith.constant 0.000000e+00 : f32
    %560 = vector.broadcast %cst_380 : f32 to vector<14x128xf32>
    %561 = arith.maximumf %559, %560 : vector<14x128xf32>
    %c0_381 = arith.constant 0 : index
    %c3_382 = arith.constant 3 : index
    %c12_383 = arith.constant 12 : index
    %c1_384 = arith.constant 1 : index
    %c0_385 = arith.constant 0 : index
    %562 = vector.load %arg8[%c0_381, %c3_382, %c12_383, %c1_384, %c0_385] : memref<1x4x16x16x128xf32, #tpu.memory_space<vmem>>, vector<1x1x1x14x128xf32>
    %563 = vector.shape_cast %562 : vector<1x1x1x14x128xf32> to vector<14x128xf32>
    %564 = vector.shape_cast %561 : vector<14x128xf32> to vector<1x1x1x14x128xf32>
    tpu.vector_store %arg8[%c0_381, %c3_382, %c12_383, %c1_384, %c0_385], %564 {strides = array<i32>} : memref<1x4x16x16x128xf32, #tpu.memory_space<vmem>>, vector<1x1x1x14x128xf32>,
    %c756 = arith.constant 756 : index
    %c0_386 = arith.constant 0 : index
    %565 = vector.load %arg7[%c756, %c0_386] : memref<784x128xf32, #tpu.memory_space<vmem>>, vector<14x128xf32>
    %566 = vector.broadcast %19 : vector<1x128xf32> to vector<14x128xf32>
    %567 = arith.mulf %565, %566 : vector<14x128xf32>
    %568 = vector.broadcast %22 : vector<1x128xf32> to vector<14x128xf32>
    %569 = arith.addf %567, %568 : vector<14x128xf32>
    %cst_387 = arith.constant 0.000000e+00 : f32
    %570 = vector.broadcast %cst_387 : f32 to vector<14x128xf32>
    %571 = arith.maximumf %569, %570 : vector<14x128xf32>
    %c0_388 = arith.constant 0 : index
    %c3_389 = arith.constant 3 : index
    %c13_390 = arith.constant 13 : index
    %c1_391 = arith.constant 1 : index
    %c0_392 = arith.constant 0 : index
    %572 = vector.load %arg8[%c0_388, %c3_389, %c13_390, %c1_391, %c0_392] : memref<1x4x16x16x128xf32, #tpu.memory_space<vmem>>, vector<1x1x1x14x128xf32>
    %573 = vector.shape_cast %572 : vector<1x1x1x14x128xf32> to vector<14x128xf32>
    %574 = vector.shape_cast %571 : vector<14x128xf32> to vector<1x1x1x14x128xf32>
    tpu.vector_store %arg8[%c0_388, %c3_389, %c13_390, %c1_391, %c0_392], %574 {strides = array<i32>} : memref<1x4x16x16x128xf32, #tpu.memory_space<vmem>>, vector<1x1x1x14x128xf32>,
    %c770 = arith.constant 770 : index
    %c0_393 = arith.constant 0 : index
    %575 = vector.load %arg7[%c770, %c0_393] : memref<784x128xf32, #tpu.memory_space<vmem>>, vector<14x128xf32>
    %576 = vector.broadcast %19 : vector<1x128xf32> to vector<14x128xf32>
    %577 = arith.mulf %575, %576 : vector<14x128xf32>
    %578 = vector.broadcast %22 : vector<1x128xf32> to vector<14x128xf32>
    %579 = arith.addf %577, %578 : vector<14x128xf32>
    %cst_394 = arith.constant 0.000000e+00 : f32
    %580 = vector.broadcast %cst_394 : f32 to vector<14x128xf32>
    %581 = arith.maximumf %579, %580 : vector<14x128xf32>
    %c0_395 = arith.constant 0 : index
    %c3_396 = arith.constant 3 : index
    %c14_397 = arith.constant 14 : index
    %c1_398 = arith.constant 1 : index
    %c0_399 = arith.constant 0 : index
    %582 = vector.load %arg8[%c0_395, %c3_396, %c14_397, %c1_398, %c0_399] : memref<1x4x16x16x128xf32, #tpu.memory_space<vmem>>, vector<1x1x1x14x128xf32>
    %583 = vector.shape_cast %582 : vector<1x1x1x14x128xf32> to vector<14x128xf32>
    %584 = vector.shape_cast %581 : vector<14x128xf32> to vector<1x1x1x14x128xf32>
    tpu.vector_store %arg8[%c0_395, %c3_396, %c14_397, %c1_398, %c0_399], %584 {strides = array<i32>} : memref<1x4x16x16x128xf32, #tpu.memory_space<vmem>>, vector<1x1x1x14x128xf32>,
    %cst_400 = arith.constant 0.000000e+00 : f32
    %585 = vector.broadcast %cst_400 : f32 to vector<14x14x128xf32>
    %c0_401 = arith.constant 0 : index
    %c0_402 = arith.constant 0 : index
    %c0_403 = arith.constant 0 : index
    %c0_404 = arith.constant 0 : index
    %c0_405 = arith.constant 0 : index
    %586 = vector.load %arg8[%c0_401, %c0_402, %c0_403, %c0_404, %c0_405] : memref<1x4x16x16x128xf32, #tpu.memory_space<vmem>>, vector<1x1x16x14x128xf32>
    %587 = vector.shape_cast %586 : vector<1x1x16x14x128xf32> to vector<16x14x128xf32>
    %c0_406 = arith.constant 0 : index
    %c0_407 = arith.constant 0 : index
    %c0_408 = arith.constant 0 : index
    %c0_409 = arith.constant 0 : index
    %588 = vector.load %arg5[%c0_406, %c0_407, %c0_408, %c0_409] : memref<25x1x1x128xf32, #tpu.memory_space<vmem>>, vector<1x1x1x128xf32>
    %589 = vector.shape_cast %588 : vector<1x1x1x128xf32> to vector<1x1x128xf32>
    %590 = vector.extract_strided_slice %587 {offsets = [0, 0, 0], sizes = [14, 14, 128], strides = [1, 1, 1]} : vector<16x14x128xf32> to vector<14x14x128xf32>
    %591 = vector.broadcast %589 : vector<1x1x128xf32> to vector<14x14x128xf32>
    %592 = arith.mulf %590, %591 : vector<14x14x128xf32>
    %593 = arith.addf %585, %592 : vector<14x14x128xf32>
    %c10_410 = arith.constant 10 : index
    %c0_411 = arith.constant 0 : index
    %c0_412 = arith.constant 0 : index
    %c0_413 = arith.constant 0 : index
    %594 = vector.load %arg5[%c10_410, %c0_411, %c0_412, %c0_413] : memref<25x1x1x128xf32, #tpu.memory_space<vmem>>, vector<1x1x1x128xf32>
    %595 = vector.shape_cast %594 : vector<1x1x1x128xf32> to vector<1x1x128xf32>
    %596 = vector.extract_strided_slice %587 {offsets = [1, 0, 0], sizes = [14, 14, 128], strides = [1, 1, 1]} : vector<16x14x128xf32> to vector<14x14x128xf32>
    %597 = vector.broadcast %595 : vector<1x1x128xf32> to vector<14x14x128xf32>
    %598 = arith.mulf %596, %597 : vector<14x14x128xf32>
    %599 = arith.addf %593, %598 : vector<14x14x128xf32>
    %c20 = arith.constant 20 : index
    %c0_414 = arith.constant 0 : index
    %c0_415 = arith.constant 0 : index
    %c0_416 = arith.constant 0 : index
    %600 = vector.load %arg5[%c20, %c0_414, %c0_415, %c0_416] : memref<25x1x1x128xf32, #tpu.memory_space<vmem>>, vector<1x1x1x128xf32>
    %601 = vector.shape_cast %600 : vector<1x1x1x128xf32> to vector<1x1x128xf32>
    %602 = vector.extract_strided_slice %587 {offsets = [2, 0, 0], sizes = [14, 14, 128], strides = [1, 1, 1]} : vector<16x14x128xf32> to vector<14x14x128xf32>
    %603 = vector.broadcast %601 : vector<1x1x128xf32> to vector<14x14x128xf32>
    %604 = arith.mulf %602, %603 : vector<14x14x128xf32>
    %605 = arith.addf %599, %604 : vector<14x14x128xf32>
    %c0_417 = arith.constant 0 : index
    %c0_418 = arith.constant 0 : index
    %c0_419 = arith.constant 0 : index
    %c1_420 = arith.constant 1 : index
    %c0_421 = arith.constant 0 : index
    %606 = vector.load %arg8[%c0_417, %c0_418, %c0_419, %c1_420, %c0_421] : memref<1x4x16x16x128xf32, #tpu.memory_space<vmem>>, vector<1x1x16x14x128xf32>
    %607 = vector.shape_cast %606 : vector<1x1x16x14x128xf32> to vector<16x14x128xf32>
    %c2_422 = arith.constant 2 : index
    %c0_423 = arith.constant 0 : index
    %c0_424 = arith.constant 0 : index
    %c0_425 = arith.constant 0 : index
    %608 = vector.load %arg5[%c2_422, %c0_423, %c0_424, %c0_425] : memref<25x1x1x128xf32, #tpu.memory_space<vmem>>, vector<1x1x1x128xf32>
    %609 = vector.shape_cast %608 : vector<1x1x1x128xf32> to vector<1x1x128xf32>
    %610 = vector.extract_strided_slice %607 {offsets = [0, 0, 0], sizes = [14, 14, 128], strides = [1, 1, 1]} : vector<16x14x128xf32> to vector<14x14x128xf32>
    %611 = vector.broadcast %609 : vector<1x1x128xf32> to vector<14x14x128xf32>
    %612 = arith.mulf %610, %611 : vector<14x14x128xf32>
    %613 = arith.addf %605, %612 : vector<14x14x128xf32>
    %c12_426 = arith.constant 12 : index
    %c0_427 = arith.constant 0 : index
    %c0_428 = arith.constant 0 : index
    %c0_429 = arith.constant 0 : index
    %614 = vector.load %arg5[%c12_426, %c0_427, %c0_428, %c0_429] : memref<25x1x1x128xf32, #tpu.memory_space<vmem>>, vector<1x1x1x128xf32>
    %615 = vector.shape_cast %614 : vector<1x1x1x128xf32> to vector<1x1x128xf32>
    %616 = vector.extract_strided_slice %607 {offsets = [1, 0, 0], sizes = [14, 14, 128], strides = [1, 1, 1]} : vector<16x14x128xf32> to vector<14x14x128xf32>
    %617 = vector.broadcast %615 : vector<1x1x128xf32> to vector<14x14x128xf32>
    %618 = arith.mulf %616, %617 : vector<14x14x128xf32>
    %619 = arith.addf %613, %618 : vector<14x14x128xf32>
    %c22 = arith.constant 22 : index
    %c0_430 = arith.constant 0 : index
    %c0_431 = arith.constant 0 : index
    %c0_432 = arith.constant 0 : index
    %620 = vector.load %arg5[%c22, %c0_430, %c0_431, %c0_432] : memref<25x1x1x128xf32, #tpu.memory_space<vmem>>, vector<1x1x1x128xf32>
    %621 = vector.shape_cast %620 : vector<1x1x1x128xf32> to vector<1x1x128xf32>
    %622 = vector.extract_strided_slice %607 {offsets = [2, 0, 0], sizes = [14, 14, 128], strides = [1, 1, 1]} : vector<16x14x128xf32> to vector<14x14x128xf32>
    %623 = vector.broadcast %621 : vector<1x1x128xf32> to vector<14x14x128xf32>
    %624 = arith.mulf %622, %623 : vector<14x14x128xf32>
    %625 = arith.addf %619, %624 : vector<14x14x128xf32>
    %c0_433 = arith.constant 0 : index
    %c0_434 = arith.constant 0 : index
    %c0_435 = arith.constant 0 : index
    %c2_436 = arith.constant 2 : index
    %c0_437 = arith.constant 0 : index
    %626 = vector.load %arg8[%c0_433, %c0_434, %c0_435, %c2_436, %c0_437] : memref<1x4x16x16x128xf32, #tpu.memory_space<vmem>>, vector<1x1x16x14x128xf32>
    %627 = vector.shape_cast %626 : vector<1x1x16x14x128xf32> to vector<16x14x128xf32>
    %c4_438 = arith.constant 4 : index
    %c0_439 = arith.constant 0 : index
    %c0_440 = arith.constant 0 : index
    %c0_441 = arith.constant 0 : index
    %628 = vector.load %arg5[%c4_438, %c0_439, %c0_440, %c0_441] : memref<25x1x1x128xf32, #tpu.memory_space<vmem>>, vector<1x1x1x128xf32>
    %629 = vector.shape_cast %628 : vector<1x1x1x128xf32> to vector<1x1x128xf32>
    %630 = vector.extract_strided_slice %627 {offsets = [0, 0, 0], sizes = [14, 14, 128], strides = [1, 1, 1]} : vector<16x14x128xf32> to vector<14x14x128xf32>
    %631 = vector.broadcast %629 : vector<1x1x128xf32> to vector<14x14x128xf32>
    %632 = arith.mulf %630, %631 : vector<14x14x128xf32>
    %633 = arith.addf %625, %632 : vector<14x14x128xf32>
    %c14_442 = arith.constant 14 : index
    %c0_443 = arith.constant 0 : index
    %c0_444 = arith.constant 0 : index
    %c0_445 = arith.constant 0 : index
    %634 = vector.load %arg5[%c14_442, %c0_443, %c0_444, %c0_445] : memref<25x1x1x128xf32, #tpu.memory_space<vmem>>, vector<1x1x1x128xf32>
    %635 = vector.shape_cast %634 : vector<1x1x1x128xf32> to vector<1x1x128xf32>
    %636 = vector.extract_strided_slice %627 {offsets = [1, 0, 0], sizes = [14, 14, 128], strides = [1, 1, 1]} : vector<16x14x128xf32> to vector<14x14x128xf32>
    %637 = vector.broadcast %635 : vector<1x1x128xf32> to vector<14x14x128xf32>
    %638 = arith.mulf %636, %637 : vector<14x14x128xf32>
    %639 = arith.addf %633, %638 : vector<14x14x128xf32>
    %c24 = arith.constant 24 : index
    %c0_446 = arith.constant 0 : index
    %c0_447 = arith.constant 0 : index
    %c0_448 = arith.constant 0 : index
    %640 = vector.load %arg5[%c24, %c0_446, %c0_447, %c0_448] : memref<25x1x1x128xf32, #tpu.memory_space<vmem>>, vector<1x1x1x128xf32>
    %641 = vector.shape_cast %640 : vector<1x1x1x128xf32> to vector<1x1x128xf32>
    %642 = vector.extract_strided_slice %627 {offsets = [2, 0, 0], sizes = [14, 14, 128], strides = [1, 1, 1]} : vector<16x14x128xf32> to vector<14x14x128xf32>
    %643 = vector.broadcast %641 : vector<1x1x128xf32> to vector<14x14x128xf32>
    %644 = arith.mulf %642, %643 : vector<14x14x128xf32>
    %645 = arith.addf %639, %644 : vector<14x14x128xf32>
    %c0_449 = arith.constant 0 : index
    %c1_450 = arith.constant 1 : index
    %c0_451 = arith.constant 0 : index
    %c0_452 = arith.constant 0 : index
    %c0_453 = arith.constant 0 : index
    %646 = vector.load %arg8[%c0_449, %c1_450, %c0_451, %c0_452, %c0_453] : memref<1x4x16x16x128xf32, #tpu.memory_space<vmem>>, vector<1x1x16x14x128xf32>
    %647 = vector.shape_cast %646 : vector<1x1x16x14x128xf32> to vector<16x14x128xf32>
    %c1_454 = arith.constant 1 : index
    %c0_455 = arith.constant 0 : index
    %c0_456 = arith.constant 0 : index
    %c0_457 = arith.constant 0 : index
    %648 = vector.load %arg5[%c1_454, %c0_455, %c0_456, %c0_457] : memref<25x1x1x128xf32, #tpu.memory_space<vmem>>, vector<1x1x1x128xf32>
    %649 = vector.shape_cast %648 : vector<1x1x1x128xf32> to vector<1x1x128xf32>
    %650 = vector.extract_strided_slice %647 {offsets = [0, 0, 0], sizes = [14, 14, 128], strides = [1, 1, 1]} : vector<16x14x128xf32> to vector<14x14x128xf32>
    %651 = vector.broadcast %649 : vector<1x1x128xf32> to vector<14x14x128xf32>
    %652 = arith.mulf %650, %651 : vector<14x14x128xf32>
    %653 = arith.addf %645, %652 : vector<14x14x128xf32>
    %c11_458 = arith.constant 11 : index
    %c0_459 = arith.constant 0 : index
    %c0_460 = arith.constant 0 : index
    %c0_461 = arith.constant 0 : index
    %654 = vector.load %arg5[%c11_458, %c0_459, %c0_460, %c0_461] : memref<25x1x1x128xf32, #tpu.memory_space<vmem>>, vector<1x1x1x128xf32>
    %655 = vector.shape_cast %654 : vector<1x1x1x128xf32> to vector<1x1x128xf32>
    %656 = vector.extract_strided_slice %647 {offsets = [1, 0, 0], sizes = [14, 14, 128], strides = [1, 1, 1]} : vector<16x14x128xf32> to vector<14x14x128xf32>
    %657 = vector.broadcast %655 : vector<1x1x128xf32> to vector<14x14x128xf32>
    %658 = arith.mulf %656, %657 : vector<14x14x128xf32>
    %659 = arith.addf %653, %658 : vector<14x14x128xf32>
    %c21 = arith.constant 21 : index
    %c0_462 = arith.constant 0 : index
    %c0_463 = arith.constant 0 : index
    %c0_464 = arith.constant 0 : index
    %660 = vector.load %arg5[%c21, %c0_462, %c0_463, %c0_464] : memref<25x1x1x128xf32, #tpu.memory_space<vmem>>, vector<1x1x1x128xf32>
    %661 = vector.shape_cast %660 : vector<1x1x1x128xf32> to vector<1x1x128xf32>
    %662 = vector.extract_strided_slice %647 {offsets = [2, 0, 0], sizes = [14, 14, 128], strides = [1, 1, 1]} : vector<16x14x128xf32> to vector<14x14x128xf32>
    %663 = vector.broadcast %661 : vector<1x1x128xf32> to vector<14x14x128xf32>
    %664 = arith.mulf %662, %663 : vector<14x14x128xf32>
    %665 = arith.addf %659, %664 : vector<14x14x128xf32>
    %c0_465 = arith.constant 0 : index
    %c1_466 = arith.constant 1 : index
    %c0_467 = arith.constant 0 : index
    %c1_468 = arith.constant 1 : index
    %c0_469 = arith.constant 0 : index
    %666 = vector.load %arg8[%c0_465, %c1_466, %c0_467, %c1_468, %c0_469] : memref<1x4x16x16x128xf32, #tpu.memory_space<vmem>>, vector<1x1x16x14x128xf32>
    %667 = vector.shape_cast %666 : vector<1x1x16x14x128xf32> to vector<16x14x128xf32>
    %c3_470 = arith.constant 3 : index
    %c0_471 = arith.constant 0 : index
    %c0_472 = arith.constant 0 : index
    %c0_473 = arith.constant 0 : index
    %668 = vector.load %arg5[%c3_470, %c0_471, %c0_472, %c0_473] : memref<25x1x1x128xf32, #tpu.memory_space<vmem>>, vector<1x1x1x128xf32>
    %669 = vector.shape_cast %668 : vector<1x1x1x128xf32> to vector<1x1x128xf32>
    %670 = vector.extract_strided_slice %667 {offsets = [0, 0, 0], sizes = [14, 14, 128], strides = [1, 1, 1]} : vector<16x14x128xf32> to vector<14x14x128xf32>
    %671 = vector.broadcast %669 : vector<1x1x128xf32> to vector<14x14x128xf32>
    %672 = arith.mulf %670, %671 : vector<14x14x128xf32>
    %673 = arith.addf %665, %672 : vector<14x14x128xf32>
    %c13_474 = arith.constant 13 : index
    %c0_475 = arith.constant 0 : index
    %c0_476 = arith.constant 0 : index
    %c0_477 = arith.constant 0 : index
    %674 = vector.load %arg5[%c13_474, %c0_475, %c0_476, %c0_477] : memref<25x1x1x128xf32, #tpu.memory_space<vmem>>, vector<1x1x1x128xf32>
    %675 = vector.shape_cast %674 : vector<1x1x1x128xf32> to vector<1x1x128xf32>
    %676 = vector.extract_strided_slice %667 {offsets = [1, 0, 0], sizes = [14, 14, 128], strides = [1, 1, 1]} : vector<16x14x128xf32> to vector<14x14x128xf32>
    %677 = vector.broadcast %675 : vector<1x1x128xf32> to vector<14x14x128xf32>
    %678 = arith.mulf %676, %677 : vector<14x14x128xf32>
    %679 = arith.addf %673, %678 : vector<14x14x128xf32>
    %c23 = arith.constant 23 : index
    %c0_478 = arith.constant 0 : index
    %c0_479 = arith.constant 0 : index
    %c0_480 = arith.constant 0 : index
    %680 = vector.load %arg5[%c23, %c0_478, %c0_479, %c0_480] : memref<25x1x1x128xf32, #tpu.memory_space<vmem>>, vector<1x1x1x128xf32>
    %681 = vector.shape_cast %680 : vector<1x1x1x128xf32> to vector<1x1x128xf32>
    %682 = vector.extract_strided_slice %667 {offsets = [2, 0, 0], sizes = [14, 14, 128], strides = [1, 1, 1]} : vector<16x14x128xf32> to vector<14x14x128xf32>
    %683 = vector.broadcast %681 : vector<1x1x128xf32> to vector<14x14x128xf32>
    %684 = arith.mulf %682, %683 : vector<14x14x128xf32>
    %685 = arith.addf %679, %684 : vector<14x14x128xf32>
    %c0_481 = arith.constant 0 : index
    %c2_482 = arith.constant 2 : index
    %c0_483 = arith.constant 0 : index
    %c0_484 = arith.constant 0 : index
    %c0_485 = arith.constant 0 : index
    %686 = vector.load %arg8[%c0_481, %c2_482, %c0_483, %c0_484, %c0_485] : memref<1x4x16x16x128xf32, #tpu.memory_space<vmem>>, vector<1x1x16x14x128xf32>
    %687 = vector.shape_cast %686 : vector<1x1x16x14x128xf32> to vector<16x14x128xf32>
    %c5_486 = arith.constant 5 : index
    %c0_487 = arith.constant 0 : index
    %c0_488 = arith.constant 0 : index
    %c0_489 = arith.constant 0 : index
    %688 = vector.load %arg5[%c5_486, %c0_487, %c0_488, %c0_489] : memref<25x1x1x128xf32, #tpu.memory_space<vmem>>, vector<1x1x1x128xf32>
    %689 = vector.shape_cast %688 : vector<1x1x1x128xf32> to vector<1x1x128xf32>
    %690 = vector.extract_strided_slice %687 {offsets = [0, 0, 0], sizes = [14, 14, 128], strides = [1, 1, 1]} : vector<16x14x128xf32> to vector<14x14x128xf32>
    %691 = vector.broadcast %689 : vector<1x1x128xf32> to vector<14x14x128xf32>
    %692 = arith.mulf %690, %691 : vector<14x14x128xf32>
    %693 = arith.addf %685, %692 : vector<14x14x128xf32>
    %c15 = arith.constant 15 : index
    %c0_490 = arith.constant 0 : index
    %c0_491 = arith.constant 0 : index
    %c0_492 = arith.constant 0 : index
    %694 = vector.load %arg5[%c15, %c0_490, %c0_491, %c0_492] : memref<25x1x1x128xf32, #tpu.memory_space<vmem>>, vector<1x1x1x128xf32>
    %695 = vector.shape_cast %694 : vector<1x1x1x128xf32> to vector<1x1x128xf32>
    %696 = vector.extract_strided_slice %687 {offsets = [1, 0, 0], sizes = [14, 14, 128], strides = [1, 1, 1]} : vector<16x14x128xf32> to vector<14x14x128xf32>
    %697 = vector.broadcast %695 : vector<1x1x128xf32> to vector<14x14x128xf32>
    %698 = arith.mulf %696, %697 : vector<14x14x128xf32>
    %699 = arith.addf %693, %698 : vector<14x14x128xf32>
    %c0_493 = arith.constant 0 : index
    %c2_494 = arith.constant 2 : index
    %c0_495 = arith.constant 0 : index
    %c1_496 = arith.constant 1 : index
    %c0_497 = arith.constant 0 : index
    %700 = vector.load %arg8[%c0_493, %c2_494, %c0_495, %c1_496, %c0_497] : memref<1x4x16x16x128xf32, #tpu.memory_space<vmem>>, vector<1x1x16x14x128xf32>
    %701 = vector.shape_cast %700 : vector<1x1x16x14x128xf32> to vector<16x14x128xf32>
    %c7_498 = arith.constant 7 : index
    %c0_499 = arith.constant 0 : index
    %c0_500 = arith.constant 0 : index
    %c0_501 = arith.constant 0 : index
    %702 = vector.load %arg5[%c7_498, %c0_499, %c0_500, %c0_501] : memref<25x1x1x128xf32, #tpu.memory_space<vmem>>, vector<1x1x1x128xf32>
    %703 = vector.shape_cast %702 : vector<1x1x1x128xf32> to vector<1x1x128xf32>
    %704 = vector.extract_strided_slice %701 {offsets = [0, 0, 0], sizes = [14, 14, 128], strides = [1, 1, 1]} : vector<16x14x128xf32> to vector<14x14x128xf32>
    %705 = vector.broadcast %703 : vector<1x1x128xf32> to vector<14x14x128xf32>
    %706 = arith.mulf %704, %705 : vector<14x14x128xf32>
    %707 = arith.addf %699, %706 : vector<14x14x128xf32>
    %c17 = arith.constant 17 : index
    %c0_502 = arith.constant 0 : index
    %c0_503 = arith.constant 0 : index
    %c0_504 = arith.constant 0 : index
    %708 = vector.load %arg5[%c17, %c0_502, %c0_503, %c0_504] : memref<25x1x1x128xf32, #tpu.memory_space<vmem>>, vector<1x1x1x128xf32>
    %709 = vector.shape_cast %708 : vector<1x1x1x128xf32> to vector<1x1x128xf32>
    %710 = vector.extract_strided_slice %701 {offsets = [1, 0, 0], sizes = [14, 14, 128], strides = [1, 1, 1]} : vector<16x14x128xf32> to vector<14x14x128xf32>
    %711 = vector.broadcast %709 : vector<1x1x128xf32> to vector<14x14x128xf32>
    %712 = arith.mulf %710, %711 : vector<14x14x128xf32>
    %713 = arith.addf %707, %712 : vector<14x14x128xf32>
    %c0_505 = arith.constant 0 : index
    %c2_506 = arith.constant 2 : index
    %c0_507 = arith.constant 0 : index
    %c2_508 = arith.constant 2 : index
    %c0_509 = arith.constant 0 : index
    %714 = vector.load %arg8[%c0_505, %c2_506, %c0_507, %c2_508, %c0_509] : memref<1x4x16x16x128xf32, #tpu.memory_space<vmem>>, vector<1x1x16x14x128xf32>
    %715 = vector.shape_cast %714 : vector<1x1x16x14x128xf32> to vector<16x14x128xf32>
    %c9_510 = arith.constant 9 : index
    %c0_511 = arith.constant 0 : index
    %c0_512 = arith.constant 0 : index
    %c0_513 = arith.constant 0 : index
    %716 = vector.load %arg5[%c9_510, %c0_511, %c0_512, %c0_513] : memref<25x1x1x128xf32, #tpu.memory_space<vmem>>, vector<1x1x1x128xf32>
    %717 = vector.shape_cast %716 : vector<1x1x1x128xf32> to vector<1x1x128xf32>
    %718 = vector.extract_strided_slice %715 {offsets = [0, 0, 0], sizes = [14, 14, 128], strides = [1, 1, 1]} : vector<16x14x128xf32> to vector<14x14x128xf32>
    %719 = vector.broadcast %717 : vector<1x1x128xf32> to vector<14x14x128xf32>
    %720 = arith.mulf %718, %719 : vector<14x14x128xf32>
    %721 = arith.addf %713, %720 : vector<14x14x128xf32>
    %c19 = arith.constant 19 : index
    %c0_514 = arith.constant 0 : index
    %c0_515 = arith.constant 0 : index
    %c0_516 = arith.constant 0 : index
    %722 = vector.load %arg5[%c19, %c0_514, %c0_515, %c0_516] : memref<25x1x1x128xf32, #tpu.memory_space<vmem>>, vector<1x1x1x128xf32>
    %723 = vector.shape_cast %722 : vector<1x1x1x128xf32> to vector<1x1x128xf32>
    %724 = vector.extract_strided_slice %715 {offsets = [1, 0, 0], sizes = [14, 14, 128], strides = [1, 1, 1]} : vector<16x14x128xf32> to vector<14x14x128xf32>
    %725 = vector.broadcast %723 : vector<1x1x128xf32> to vector<14x14x128xf32>
    %726 = arith.mulf %724, %725 : vector<14x14x128xf32>
    %727 = arith.addf %721, %726 : vector<14x14x128xf32>
    %c0_517 = arith.constant 0 : index
    %c3_518 = arith.constant 3 : index
    %c0_519 = arith.constant 0 : index
    %c0_520 = arith.constant 0 : index
    %c0_521 = arith.constant 0 : index
    %728 = vector.load %arg8[%c0_517, %c3_518, %c0_519, %c0_520, %c0_521] : memref<1x4x16x16x128xf32, #tpu.memory_space<vmem>>, vector<1x1x16x14x128xf32>
    %729 = vector.shape_cast %728 : vector<1x1x16x14x128xf32> to vector<16x14x128xf32>
    %c6_522 = arith.constant 6 : index
    %c0_523 = arith.constant 0 : index
    %c0_524 = arith.constant 0 : index
    %c0_525 = arith.constant 0 : index
    %730 = vector.load %arg5[%c6_522, %c0_523, %c0_524, %c0_525] : memref<25x1x1x128xf32, #tpu.memory_space<vmem>>, vector<1x1x1x128xf32>
    %731 = vector.shape_cast %730 : vector<1x1x1x128xf32> to vector<1x1x128xf32>
    %732 = vector.extract_strided_slice %729 {offsets = [0, 0, 0], sizes = [14, 14, 128], strides = [1, 1, 1]} : vector<16x14x128xf32> to vector<14x14x128xf32>
    %733 = vector.broadcast %731 : vector<1x1x128xf32> to vector<14x14x128xf32>
    %734 = arith.mulf %732, %733 : vector<14x14x128xf32>
    %735 = arith.addf %727, %734 : vector<14x14x128xf32>
    %c16 = arith.constant 16 : index
    %c0_526 = arith.constant 0 : index
    %c0_527 = arith.constant 0 : index
    %c0_528 = arith.constant 0 : index
    %736 = vector.load %arg5[%c16, %c0_526, %c0_527, %c0_528] : memref<25x1x1x128xf32, #tpu.memory_space<vmem>>, vector<1x1x1x128xf32>
    %737 = vector.shape_cast %736 : vector<1x1x1x128xf32> to vector<1x1x128xf32>
    %738 = vector.extract_strided_slice %729 {offsets = [1, 0, 0], sizes = [14, 14, 128], strides = [1, 1, 1]} : vector<16x14x128xf32> to vector<14x14x128xf32>
    %739 = vector.broadcast %737 : vector<1x1x128xf32> to vector<14x14x128xf32>
    %740 = arith.mulf %738, %739 : vector<14x14x128xf32>
    %741 = arith.addf %735, %740 : vector<14x14x128xf32>
    %c0_529 = arith.constant 0 : index
    %c3_530 = arith.constant 3 : index
    %c0_531 = arith.constant 0 : index
    %c1_532 = arith.constant 1 : index
    %c0_533 = arith.constant 0 : index
    %742 = vector.load %arg8[%c0_529, %c3_530, %c0_531, %c1_532, %c0_533] : memref<1x4x16x16x128xf32, #tpu.memory_space<vmem>>, vector<1x1x16x14x128xf32>
    %743 = vector.shape_cast %742 : vector<1x1x16x14x128xf32> to vector<16x14x128xf32>
    %c8_534 = arith.constant 8 : index
    %c0_535 = arith.constant 0 : index
    %c0_536 = arith.constant 0 : index
    %c0_537 = arith.constant 0 : index
    %744 = vector.load %arg5[%c8_534, %c0_535, %c0_536, %c0_537] : memref<25x1x1x128xf32, #tpu.memory_space<vmem>>, vector<1x1x1x128xf32>
    %745 = vector.shape_cast %744 : vector<1x1x1x128xf32> to vector<1x1x128xf32>
    %746 = vector.extract_strided_slice %743 {offsets = [0, 0, 0], sizes = [14, 14, 128], strides = [1, 1, 1]} : vector<16x14x128xf32> to vector<14x14x128xf32>
    %747 = vector.broadcast %745 : vector<1x1x128xf32> to vector<14x14x128xf32>
    %748 = arith.mulf %746, %747 : vector<14x14x128xf32>
    %749 = arith.addf %741, %748 : vector<14x14x128xf32>
    %c18 = arith.constant 18 : index
    %c0_538 = arith.constant 0 : index
    %c0_539 = arith.constant 0 : index
    %c0_540 = arith.constant 0 : index
    %750 = vector.load %arg5[%c18, %c0_538, %c0_539, %c0_540] : memref<25x1x1x128xf32, #tpu.memory_space<vmem>>, vector<1x1x1x128xf32>
    %751 = vector.shape_cast %750 : vector<1x1x1x128xf32> to vector<1x1x128xf32>
    %752 = vector.extract_strided_slice %743 {offsets = [1, 0, 0], sizes = [14, 14, 128], strides = [1, 1, 1]} : vector<16x14x128xf32> to vector<14x14x128xf32>
    %753 = vector.broadcast %751 : vector<1x1x128xf32> to vector<14x14x128xf32>
    %754 = arith.mulf %752, %753 : vector<14x14x128xf32>
    %755 = arith.addf %749, %754 : vector<14x14x128xf32>
    %c0_541 = arith.constant 0 : index
    %c0_542 = arith.constant 0 : index
    %c0_543 = arith.constant 0 : index
    %c0_544 = arith.constant 0 : index
    %756 = vector.load %arg6[%c0_541, %c0_542, %c0_543, %c0_544] : memref<1x14x14x128xf32, #tpu.memory_space<vmem>>, vector<1x14x14x128xf32>
    %757 = vector.shape_cast %756 : vector<1x14x14x128xf32> to vector<14x14x128xf32>
    %758 = vector.shape_cast %755 : vector<14x14x128xf32> to vector<1x14x14x128xf32>
    tpu.vector_store %arg6[%c0_541, %c0_542, %c0_543, %c0_544], %758 {strides = array<i32>} : memref<1x14x14x128xf32, #tpu.memory_space<vmem>>, vector<1x14x14x128xf32>,
    return
  }
  func.func @transform_0(%arg0: i32) -> (i32, i32) {
    %c0_i32 = arith.constant 0 : i32
    %c0_i32_0 = arith.constant 0 : i32
    %c0_i32_1 = arith.constant 0 : i32
    return %c0_i32, %c0_i32_0 : i32, i32
  }
  func.func @transform_1(%arg0: i32) -> (i32, i32) {
    %c0_i32 = arith.constant 0 : i32
    %c0_i32_0 = arith.constant 0 : i32
    return %c0_i32, %arg0 : i32, i32
  }
  func.func @transform_2(%arg0: i32) -> (i32, i32) {
    %c0_i32 = arith.constant 0 : i32
    %c0_i32_0 = arith.constant 0 : i32
    return %c0_i32, %arg0 : i32, i32
  }
  func.func @transform_3(%arg0: i32) -> (i32, i32) {
    %c0_i32 = arith.constant 0 : i32
    %c0_i32_0 = arith.constant 0 : i32
    return %c0_i32, %arg0 : i32, i32
  }
  func.func @transform_4(%arg0: i32) -> (i32, i32, i32, i32) {
    %c0_i32 = arith.constant 0 : i32
    %c0_i32_0 = arith.constant 0 : i32
    %c0_i32_1 = arith.constant 0 : i32
    %c0_i32_2 = arith.constant 0 : i32
    return %c0_i32, %c0_i32_0, %c0_i32_1, %arg0 : i32, i32, i32, i32
  }
  func.func @transform_5(%arg0: i32) -> (i32, i32, i32, i32) {
    %c0_i32 = arith.constant 0 : i32
    %c0_i32_0 = arith.constant 0 : i32
    %c0_i32_1 = arith.constant 0 : i32
    %c0_i32_2 = arith.constant 0 : i32
    return %c0_i32, %c0_i32_0, %c0_i32_1, %arg0 : i32, i32, i32, i32
  }
}

</mosaic_0001>

<bundles_post_ra>
// kernel: forward.1
= control target key start
LH: loop header
LB: loop body
LE: loop exit
PB: predicated region body
PF: predicated region fallthrough
CT: control target
= control target key end

     0   :  { %s4716_s18 = smov 0   ;;  %s4718_s19 = smov 0   ;;  %s8953_s0 = inlined_call_operand.vmem [shape: f32[784,40], index: 0, kind: input, shape index: {}]   ;;  %s8954_s1 = inlined_call_operand.vmem [shape: f32[40,256], index: 1, kind: input, shape index: {}]   ;;  %s8955_s2 = inlined_call_operand.vmem [shape: f32[1,256], index: 2, kind: input, shape index: {}]   ;;  %s8956_s3 = inlined_call_operand.vmem [shape: f32[1,256], index: 3, kind: input, shape index: {}]   ;;  %s8957_s4 = inlined_call_operand.vmem [shape: f32[25,1,1,256], index: 4, kind: input, shape index: {}]   ;;  %s8958_s5 = inlined_call_operand.vmem [shape: f32[1,14,14,256], index: 5, kind: output, shape index: {}]  }
   0x1   :  { %s4720_s20 = smov 0  }
   0x2 LB: > { %s4732_s21 = sadd.s32 4294967295, %s4683_s20   ;;  %s4735_s22 = sadd.s32 1, %s4683_s20   ;;  %s4683_s20 = sphi %s4720_s20, %s10066_s20   ;;  %s4679_s19 = sphi %s4718_s19, %s10065_s19   ;;  %s4675_s18 = sphi %s4716_s18, %s10064_s18  }
   0x3   : > { %s40_s23 = ssub.s32 %s4683_s20, %s4735_s22  ;;  %s43_s24 = sadd.s32 1, %s4679_s19 }
   0x4   : > { %p41_p0 = scmp.eq.s32.totalorder %s40_s23, 0  ;;  %p50_p1 = scmp.ne.s32.totalorder %s4679_s19, %s4675_s18 }
   0x5   : > { %p51_p2 = scmp.eq.s32.totalorder %s4683_s20, 0  ;;  %p158_p3 = scmp.eq.s32.totalorder %s4732_s21, 1 }
   0x6   : > { %s4745_s25 = scalar_select %p41_p0, %s4679_s19, %s43_s24  }
   0x7   : > { %p4747_p4 = por %p51_p2, %p50_p1  ;;  %p4751_p5 = por %p158_p3, %p50_p1 }
   0x8   : > { %p4444_p6 = scmp.ge.s32.totalorder %s4683_s20, 2 }
   0xa   : > { %183 = sbr.rel (%p4444_p6) target bundleno = 53 (0x35), region = 20 }
   0xf   : > { %186 = sbr.rel (!%p4747_p4) target bundleno = 24 (0x18), region = 24  ;;  %s188_s28 = sand.u32 (%p4747_p4), 1, %s4679_s19  }
  0x10   : > { %s4445_s29 = sshll.u32 (%p4747_p4), %s4683_s20, 3  ;;  %s4587_s30 = smul.u32 (%p4747_p4), 40, %s188_s28 }
  0x11   : > { %s192_s8 = scalar_lea.vmem (%p4747_p4), %s8954_s1, %s4445_s29 }
  0x12   : > { %v229_v0 = vld [vmem:[%s192_s8] sm:$0xff] (%p4747_p4)  ;;  %v231_v1 = vld [vmem:[%s192_s8 + $0x10] sm:$0xff] (%p4747_p4)  ;;  %s190_s9 = scalar_lea.vmem (%p4747_p4), [#allocation4], %s4587_s30 }
  0x13   : > { %v233_v2 = vld [vmem:[%s192_s8 + $0x20] sm:$0xff] (%p4747_p4)  ;;  %230 = vst [vmem:[%s190_s9] sm:$0xff] (%p4747_p4), %v229_v0  ;;  %v235_v3 = vld [vmem:[%s192_s8 + $0x30] sm:$0xff] (%p4747_p4) }
  0x14   : > { %232 = vst [vmem:[%s190_s9 + $0x8] sm:$0xff] %v231_v1  ;;  %v237_v4 = vld [vmem:[%s192_s8 + $0x40] sm:$0xff] }
  0x15   : > { %234 = vst [vmem:[%s190_s9 + $0x10] sm:$0xff] %v233_v2 }
  0x16   : > { %236 = vst [vmem:[%s190_s9 + $0x18] sm:$0xff] %v235_v3 }
  0x17   : > { %238 = vst [vmem:[%s190_s9 + $0x20] sm:$0xff] %v237_v4 }
  0x18 PF: > { %256 = sbr.rel (!%p4747_p4) target bundleno = 53 (0x35), region = 70  ;;  %s258_s10 = sand.u32 (%p4747_p4), 1, %s4679_s19  }
  0x19   : > { %s4770_s13 = scalar_lea.vmem (%p4747_p4), %s8957_s4, %s4683_s20  ;;  %s4588_s14 = smul.u32 (%p4747_p4), 25, %s258_s10 }
  0x1a   : > { %v278_v5 = vld [vmem:[%s4770_s13] sm:$0x1] (%p4747_p4)  ;;  %v280_v6 = vld [vmem:[%s4770_s13 + $0x2] sm:$0x1] (%p4747_p4)  ;;  %v282_v7 = vld [vmem:[%s4770_s13 + $0x4] sm:$0x1] (%p4747_p4) }
  0x1b   : > { %s4775_s15 = scalar_lea.vmem (%p4747_p4), [#allocation5], %s4588_s14  ;;  %v284_v8 = vld [vmem:[%s4770_s13 + $0x6] sm:$0x1] (%p4747_p4)  ;;  %v286_v9 = vld [vmem:[%s4770_s13 + $0x8] sm:$0x1] (%p4747_p4) }
  0x1c   : > { %279 = vst [vmem:[%s4775_s15] sm:$0x1] (%p4747_p4), %v278_v5  ;;  %v288_v10 = vld [vmem:[%s4770_s13 + $0xa] sm:$0x1] (%p4747_p4)  ;;  %v290_v11 = vld [vmem:[%s4770_s13 + $0xc] sm:$0x1] (%p4747_p4) }
  0x1d   : > { %281 = vst [vmem:[%s4775_s15 + $0x1] sm:$0x1] %v280_v6  ;;  %v292_v12 = vld [vmem:[%s4770_s13 + $0xe] sm:$0x1]  ;;  %v294_v13 = vld [vmem:[%s4770_s13 + $0x10] sm:$0x1] }
  0x1e   : > { %283 = vst [vmem:[%s4775_s15 + $0x2] sm:$0x1] %v282_v7  ;;  %v296_v14 = vld [vmem:[%s4770_s13 + $0x12] sm:$0x1]  ;;  %v298_v15 = vld [vmem:[%s4770_s13 + $0x14] sm:$0x1] }
  0x1f   : > { %285 = vst [vmem:[%s4775_s15 + $0x3] sm:$0x1] %v284_v8  ;;  %v300_v16 = vld [vmem:[%s4770_s13 + $0x16] sm:$0x1]  ;;  %v302_v17 = vld [vmem:[%s4770_s13 + $0x18] sm:$0x1] }
  0x20   : > { %287 = vst [vmem:[%s4775_s15 + $0x4] sm:$0x1] %v286_v9  ;;  %v304_v18 = vld [vmem:[%s4770_s13 + $0x1a] sm:$0x1]  ;;  %v306_v19 = vld [vmem:[%s4770_s13 + $0x1c] sm:$0x1] }
  0x21   : > { %289 = vst [vmem:[%s4775_s15 + $0x5] sm:$0x1] %v288_v10  ;;  %v308_v20 = vld [vmem:[%s4770_s13 + $0x1e] sm:$0x1]  ;;  %v310_v21 = vld [vmem:[%s4770_s13 + $0x20] sm:$0x1] }
  0x22   : > { %291 = vst [vmem:[%s4775_s15 + $0x6] sm:$0x1] %v290_v11  ;;  %v312_v22 = vld [vmem:[%s4770_s13 + $0x22] sm:$0x1]  ;;  %v314_v23 = vld [vmem:[%s4770_s13 + $0x24] sm:$0x1] }
  0x23   : > { %293 = vst [vmem:[%s4775_s15 + $0x7] sm:$0x1] %v292_v12  ;;  %v316_v24 = vld [vmem:[%s4770_s13 + $0x26] sm:$0x1]  ;;  %v318_v25 = vld [vmem:[%s4770_s13 + $0x28] sm:$0x1] }
  0x24   : > { %295 = vst [vmem:[%s4775_s15 + $0x8] sm:$0x1] %v294_v13  ;;  %v320_v26 = vld [vmem:[%s4770_s13 + $0x2a] sm:$0x1]  ;;  %v322_v27 = vld [vmem:[%s4770_s13 + $0x2c] sm:$0x1] }
  0x25   : > { %297 = vst [vmem:[%s4775_s15 + $0x9] sm:$0x1] %v296_v14  ;;  %v324_v28 = vld [vmem:[%s4770_s13 + $0x2e] sm:$0x1]  ;;  %v326_v29 = vld [vmem:[%s4770_s13 + $0x30] sm:$0x1] }
  0x26   : > { %299 = vst [vmem:[%s4775_s15 + $0xa] sm:$0x1] %v298_v15 }
  0x27   : > { %301 = vst [vmem:[%s4775_s15 + $0xb] sm:$0x1] %v300_v16 }
  0x28   : > { %303 = vst [vmem:[%s4775_s15 + $0xc] sm:$0x1] %v302_v17 }
  0x29   : > { %305 = vst [vmem:[%s4775_s15 + $0xd] sm:$0x1] %v304_v18 }
  0x2a   : > { %307 = vst [vmem:[%s4775_s15 + $0xe] sm:$0x1] %v306_v19 }
  0x2b   : > { %309 = vst [vmem:[%s4775_s15 + $0xf] sm:$0x1] %v308_v20 }
  0x2c   : > { %311 = vst [vmem:[%s4775_s15 + $0x10] sm:$0x1] %v310_v21 }
  0x2d   : > { %313 = vst [vmem:[%s4775_s15 + $0x11] sm:$0x1] %v312_v22 }
  0x2e   : > { %315 = vst [vmem:[%s4775_s15 + $0x12] sm:$0x1] %v314_v23 }
  0x2f   : > { %317 = vst [vmem:[%s4775_s15 + $0x13] sm:$0x1] %v316_v24 }
  0x30   : > { %319 = vst [vmem:[%s4775_s15 + $0x14] sm:$0x1] %v318_v25 }
  0x31   : > { %321 = vst [vmem:[%s4775_s15 + $0x15] sm:$0x1] %v320_v26 }
  0x32   : > { %323 = vst [vmem:[%s4775_s15 + $0x16] sm:$0x1] %v322_v27 }
  0x33   : > { %325 = vst [vmem:[%s4775_s15 + $0x17] sm:$0x1] %v324_v28 }
  0x34   : > { %327 = vst [vmem:[%s4775_s15 + $0x18] sm:$0x1] %v326_v29 }
  0x35 PF: > { %p4446_p7 = scmp.ge.s32.totalorder %s4683_s20, 1  ;;  %p400_p8 = scmp.lt.s32.totalorder %s4683_s20, 3 }
  0x37   : > { %p401_p9 = pnand %p4446_p7, %p400_p8 }
  0x39   : > { %404 = sbr.rel (%p401_p9) target bundleno = 1179 (0x49b), region = 111 }
  0x3e   : > { %s4827_s16 = sand.u32 1, %s4675_s18   ;;  %v456_v34 = vld [vmem:[%s8953_s0] sm:$0xff]  ;;  %vm559_vm0 = vcmask 326656   ;;  %v505_v35 = vld [vmem:[%s8953_s0 + $0x188] sm:$0xff]  ;;  %v506_v39 = vld [vmem:[%s8953_s0 + $0x190] sm:$0xff]  ;;  %p450_p10 = scmp.lt.s32.totalorder %s4732_s21, 1 }
  0x3f   : > { %s4589_s17 = smul.u32 40, %s4827_s16  ;;  %v480_v37 = vld [vmem:[%s8953_s0 + $0xc0] sm:$0xff]  ;;  %v457_v38 = vld [vmem:[%s8953_s0 + $0x8] sm:$0xff]  ;;  %v458_v41 = vld [vmem:[%s8953_s0 + $0x10] sm:$0xff] }
  0x40   : > { %s4590_s23 = smul.u32 25, %s4827_s16  ;;  %v481_v40 = vld [vmem:[%s8953_s0 + $0xc8] sm:$0xff]  ;;  %v507_v42 = vld [vmem:[%s8953_s0 + $0x198] sm:$0xff]  ;;  %v482_v43 = vld [vmem:[%s8953_s0 + $0xd0] sm:$0xff] }
  0x41   : > { %s409_s24 = scalar_lea.vmem [#allocation4], %s4589_s17  ;;  %v459_v44 = vld [vmem:[%s8953_s0 + $0x18] sm:$0xff]  ;;  %v508_v45 = vld [vmem:[%s8953_s0 + $0x1a0] sm:$0xff]  ;;  %v509_v48 = vld [vmem:[%s8953_s0 + $0x1a8] sm:$0xff]  ;;  %s4591_s6 = smul.u32 224, %s4827_s16 }
  0x42   : > { %v558_v30 = vld [vmem:[%s409_s24 + $0x20] sm:$0xff]  ;;  %v557_v31 = vld [vmem:[%s409_s24 + $0x18] sm:$0xff]  ;;  %s4831_s26 = scalar_lea.vmem [#allocation5], %s4590_s23  ;;  %v556_v32 = vld [vmem:[%s409_s24 + $0x10] sm:$0xff]  ;;  %s4569_s16 = sshll.u32 (%p4751_p5), %s4732_s21, 3 }
  0x43   : > { %865 = vmatpush.msra.mxu0 %v558_v30  ;;  %4573 = vmatpush.msra.mxu2 %v558_v30  ;;  %v555_v33 = vld [vmem:[%s409_s24 + $0x8] sm:$0xff]  ;;  %v554_v36 = vld [vmem:[%s409_s24] sm:$0xff]  ;;  %v461_v50 = vld [vmem:[%s8953_s0 + $0x28] sm:$0xff]  ;;  %s5688_s23 = scalar_select %p450_p10, %s4732_s21, 1 }
  0x44   : > { %4572 = vmatpush.msra.mxu1 %v558_v30  ;;  %4574 = vmatpush.msra.mxu3 %v558_v30  ;;  %v483_v46 = vld [vmem:[%s8953_s0 + $0xd8] sm:$0xff]  ;;  %v460_v47 = vld [vmem:[%s8953_s0 + $0x20] sm:$0xff]  ;;  %v510_v51 = vld [vmem:[%s8953_s0 + $0x1b0] sm:$0xff]  ;;  %s8887_s9 = scalar_lea.vmem (%p4751_p5), %s8958_s5, %s4569_s16 }
  0x45   : > { %866 = vmatpush.msra.mxu0 %v557_v31  ;;  %4576 = vmatpush.msra.mxu2 %v557_v31  ;;  %v484_v49 = vld [vmem:[%s8953_s0 + $0xe0] sm:$0xff]  ;;  %v485_v52 = vld [vmem:[%s8953_s0 + $0xe8] sm:$0xff]  ;;  %v462_v53 = vld [vmem:[%s8953_s0 + $0x30] sm:$0xff]  ;;  %s452_s20 = scalar_lea.vmem %s8955_s2, %s5688_s23  ;;  %s455_s30 = scalar_lea.vmem %s8956_s3, %s5688_s23 }
  0x46   : > { %4575 = vmatpush.msra.mxu1 %v557_v31  ;;  %4577 = vmatpush.msra.mxu3 %v557_v31  ;;  %v511_v54 = vld [vmem:[%s8953_s0 + $0x1b8] sm:$0xff]  ;;  %v486_v55 = vld [vmem:[%s8953_s0 + $0xf0] sm:$0xff]  ;;  %v512_v57 = vld [vmem:[%s8953_s0 + $0x1c0] sm:$0xff] }
  0x47   : > { %867 = vmatpush.msra.mxu0 %v556_v32  ;;  %4579 = vmatpush.msra.mxu2 %v556_v32  ;;  %v463_v56 = vld [vmem:[%s8953_s0 + $0x38] sm:$0xff]  ;;  %v464_v59 = vld [vmem:[%s8953_s0 + $0x40] sm:$0xff]  ;;  %v513_v60 = vld [vmem:[%s8953_s0 + $0x1c8] sm:$0xff] }
  0x48   : > { %4578 = vmatpush.msra.mxu1 %v556_v32  ;;  %4580 = vmatpush.msra.mxu3 %v556_v32  ;;  %v487_v58 = vld [vmem:[%s8953_s0 + $0xf8] sm:$0xff]  ;;  %v488_v61 = vld [vmem:[%s8953_s0 + $0x100] sm:$0xff]  ;;  %v465_v62 = vld [vmem:[%s8953_s0 + $0x48] sm:$0xff] }
  0x49   : > { %868 = vmatpush.msra.mxu0 %v555_v33  ;;  %4582 = vmatpush.msra.mxu2 %v555_v33  ;;  %v514_v63 = vld [vmem:[%s8953_s0 + $0x1d0] sm:$0xff]  ;;  %v489_v0 = vld [vmem:[%s8953_s0 + $0x108] sm:$0xff]  ;;  %v515_v2 = vld [vmem:[%s8953_s0 + $0x1d8] sm:$0xff] }
  0x4a   : > { %4581 = vmatpush.msra.mxu1 %v555_v33  ;;  %4583 = vmatpush.msra.mxu3 %v555_v33  ;;  %v466_v1 = vld [vmem:[%s8953_s0 + $0x50] sm:$0xff]  ;;  %v467_v4 = vld [vmem:[%s8953_s0 + $0x58] sm:$0xff]  ;;  %v516_v5 = vld [vmem:[%s8953_s0 + $0x1e0] sm:$0xff] }
  0x4b   : > { %869 = vmatpush.msra.mxu0 %v554_v36  ;;  %4585 = vmatpush.msra.mxu2 %v554_v36  ;;  %v490_v3 = vld [vmem:[%s8953_s0 + $0x110] sm:$0xff]  ;;  %v491_v6 = vld [vmem:[%s8953_s0 + $0x118] sm:$0xff]  ;;  %v468_v7 = vld [vmem:[%s8953_s0 + $0x60] sm:$0xff] }
  0x4c   : > { %4447 = vmatmul.msk.f32.vlgmr.msra.gmra.mxu0 %vm559_vm0, %v456_v34  ;;  %4496 = vmatmul.msk.f32.vlgmr.msra.gmra.mxu2 %vm559_vm0, %v505_v35  ;;  %v517_v8 = vld [vmem:[%s8953_s0 + $0x1e8] sm:$0xff]  ;;  %v492_v9 = vld [vmem:[%s8953_s0 + $0x120] sm:$0xff]  ;;  %v518_v11 = vld [vmem:[%s8953_s0 + $0x1f0] sm:$0xff] }
  0x4d   : > { %4584 = vmatpush.msra.mxu1 %v554_v36  ;;  %4586 = vmatpush.msra.mxu3 %v554_v36  ;;  %v469_v10 = vld [vmem:[%s8953_s0 + $0x68] sm:$0xff]  ;;  %v530_v12 = vld [vmem:[%s8953_s0 + $0x250] sm:$0xff]  ;;  %v519_v15 = vld [vmem:[%s8953_s0 + $0x1f8] sm:$0xff] }
  0x4e   : > { %4471 = vmatmul.msk.f32.vlgmr.msra.gmra.mxu1 %vm559_vm0, %v480_v37  ;;  %4521 = vmatmul.msk.f32.vlgmr.msra.gmra.mxu3 %vm559_vm0, %v530_v12  ;;  %v493_v13 = vld [vmem:[%s8953_s0 + $0x128] sm:$0xff]  ;;  %v470_v14 = vld [vmem:[%s8953_s0 + $0x70] sm:$0xff]  ;;  %v531_v16 = vld [vmem:[%s8953_s0 + $0x258] sm:$0xff] }
  0x4f   : > { %v494_v17 = vld [vmem:[%s8953_s0 + $0x130] sm:$0xff]  ;;  %v471_v18 = vld [vmem:[%s8953_s0 + $0x78] sm:$0xff]  ;;  %v520_v19 = vld [vmem:[%s8953_s0 + $0x200] sm:$0xff] }
  0x50   : > { %v532_v20 = vld [vmem:[%s8953_s0 + $0x260] sm:$0xff]  ;;  %v495_v21 = vld [vmem:[%s8953_s0 + $0x138] sm:$0xff]  ;;  %v521_v24 = vld [vmem:[%s8953_s0 + $0x208] sm:$0xff] }
  0x51   : > { %v472_v23 = vld [vmem:[%s8953_s0 + $0x80] sm:$0xff]  ;;  %v533_v25 = vld [vmem:[%s8953_s0 + $0x268] sm:$0xff]  ;;  %v522_v31 = vld [vmem:[%s8953_s0 + $0x210] sm:$0xff] }
  0x52   : > { %v496_v27 = vld [vmem:[%s8953_s0 + $0x140] sm:$0xff]  ;;  %v473_v30 = vld [vmem:[%s8953_s0 + $0x88] sm:$0xff]  ;;  %v534_v32 = vld [vmem:[%s8953_s0 + $0x270] sm:$0xff] }
  0x53   : > { %v497_v34 = vld [vmem:[%s8953_s0 + $0x148] sm:$0xff] }
  0x54   : > { %4448 = vmatmul.msk.f32.gmra.mxu0 %vm559_vm0, %v457_v38  ;;  %4497 = vmatmul.msk.f32.gmra.mxu2 %vm559_vm0, %v506_v39 }
  0x56   : > { %4472 = vmatmul.msk.f32.gmra.mxu1 %vm559_vm0, %v481_v40  ;;  %4522 = vmatmul.msk.f32.gmra.mxu3 %vm559_vm0, %v531_v16  ;;  %v474_v40 = vld [vmem:[%s8953_s0 + $0x90] sm:$0xff] }
  0x5c   : > { %4449 = vmatmul.msk.f32.gmra.mxu0 %vm559_vm0, %v458_v41  ;;  %4498 = vmatmul.msk.f32.gmra.mxu2 %vm559_vm0, %v507_v42  ;;  %v523_v41 = vld [vmem:[%s8953_s0 + $0x218] sm:$0xff] }
  0x5d   : > { %v535_v42 = vld [vmem:[%s8953_s0 + $0x278] sm:$0xff] }
  0x5e   : > { %4473 = vmatmul.msk.f32.gmra.mxu1 %vm559_vm0, %v482_v43  ;;  %4523 = vmatmul.msk.f32.gmra.mxu3 %vm559_vm0, %v532_v20 }
  0x64   : > { %4450 = vmatmul.msk.f32.gmra.mxu0 %vm559_vm0, %v459_v44  ;;  %4499 = vmatmul.msk.f32.gmra.mxu2 %vm559_vm0, %v508_v45 }
  0x66   : > { %4474 = vmatmul.msk.f32.gmra.mxu1 %vm559_vm0, %v483_v46  ;;  %4524 = vmatmul.msk.f32.gmra.mxu3 %vm559_vm0, %v533_v25 }
  0x6c   : > { %4451 = vmatmul.msk.f32.gmra.mxu0 %vm559_vm0, %v460_v47  ;;  %4500 = vmatmul.msk.f32.gmra.mxu2 %vm559_vm0, %v509_v48  ;;  %v498_v48 = vld [vmem:[%s8953_s0 + $0x150] sm:$0xff] }
  0x6e   : > { %4475 = vmatmul.msk.f32.gmra.mxu1 %vm559_vm0, %v484_v49  ;;  %4525 = vmatmul.msk.f32.gmra.mxu3 %vm559_vm0, %v534_v32 }
  0x74   : > { %4452 = vmatmul.msk.f32.gmra.mxu0 %vm559_vm0, %v461_v50  ;;  %4501 = vmatmul.msk.f32.gmra.mxu2 %vm559_vm0, %v510_v51  ;;  %v475_v51 = vld [vmem:[%s8953_s0 + $0x98] sm:$0xff] }
  0x76   : > { %4476 = vmatmul.msk.f32.gmra.mxu1 %vm559_vm0, %v485_v52  ;;  %4526 = vmatmul.msk.f32.gmra.mxu3 %vm559_vm0, %v535_v42  ;;  %v524_v52 = vld [vmem:[%s8953_s0 + $0x220] sm:$0xff] }
  0x7c   : > { %4453 = vmatmul.msk.f32.gmra.mxu0 %vm559_vm0, %v462_v53  ;;  %4502 = vmatmul.msk.f32.gmra.mxu2 %vm559_vm0, %v511_v54  ;;  %v536_v53 = vld [vmem:[%s8953_s0 + $0x280] sm:$0xff] }
  0x7e   : > { %4477 = vmatmul.msk.f32.gmra.mxu1 %vm559_vm0, %v486_v55  ;;  %4527 = vmatmul.msk.f32.gmra.mxu3 %vm559_vm0, %v536_v53 }
  0x84   : > { %4454 = vmatmul.msk.f32.gmra.mxu0 %vm559_vm0, %v463_v56  ;;  %4503 = vmatmul.msk.f32.gmra.mxu2 %vm559_vm0, %v512_v57 }
  0x86   : > { %4478 = vmatmul.msk.f32.gmra.mxu1 %vm559_vm0, %v487_v58  ;;  %v499_v58 = vld [vmem:[%s8953_s0 + $0x158] sm:$0xff] }
  0x8c   : > { %4455 = vmatmul.msk.f32.gmra.mxu0 %vm559_vm0, %v464_v59  ;;  %4504 = vmatmul.msk.f32.gmra.mxu2 %vm559_vm0, %v513_v60 }
  0x8e   : > { %4479 = vmatmul.msk.f32.gmra.mxu1 %vm559_vm0, %v488_v61  ;;  %v476_v61 = vld [vmem:[%s8953_s0 + $0xa0] sm:$0xff] }
  0x94   : > { %4456 = vmatmul.msk.f32.gmra.mxu0 %vm559_vm0, %v465_v62  ;;  %4505 = vmatmul.msk.f32.gmra.mxu2 %vm559_vm0, %v514_v63  ;;  %v525_v62 = vld [vmem:[%s8953_s0 + $0x228] sm:$0xff] }
  0x95   : > { %v537_v63 = vld [vmem:[%s8953_s0 + $0x288] sm:$0xff] }
  0x96   : > { %4480 = vmatmul.msk.f32.gmra.mxu1 %vm559_vm0, %v489_v0  ;;  %4528 = vmatmul.msk.f32.gmra.mxu3 %vm559_vm0, %v537_v63 }
  0x9c   : > { %4457 = vmatmul.msk.f32.gmra.mxu0 %vm559_vm0, %v466_v1  ;;  %4506 = vmatmul.msk.f32.gmra.mxu2 %vm559_vm0, %v515_v2 }
  0x9e   : > { %4481 = vmatmul.msk.f32.gmra.mxu1 %vm559_vm0, %v490_v3 }
  0xa4   : > { %4458 = vmatmul.msk.f32.gmra.mxu0 %vm559_vm0, %v467_v4  ;;  %4507 = vmatmul.msk.f32.gmra.mxu2 %vm559_vm0, %v516_v5  ;;  %v500_v4 = vld [vmem:[%s8953_s0 + $0x160] sm:$0xff] }
  0xa6   : > { %4482 = vmatmul.msk.f32.gmra.mxu1 %vm559_vm0, %v491_v6 }
  0xac   : > { %4459 = vmatmul.msk.f32.gmra.mxu0 %vm559_vm0, %v468_v7  ;;  %4508 = vmatmul.msk.f32.gmra.mxu2 %vm559_vm0, %v517_v8  ;;  %v477_v7 = vld [vmem:[%s8953_s0 + $0xa8] sm:$0xff]  ;;  %v526_v8 = vld [vmem:[%s8953_s0 + $0x230] sm:$0xff] }
  0xae   : > { %4483 = vmatmul.msk.f32.gmra.mxu1 %vm559_vm0, %v492_v9  ;;  %v538_v9 = vld [vmem:[%s8953_s0 + $0x290] sm:$0xff] }
  0xaf   : > { %4529 = vmatmul.msk.f32.gmra.mxu3 %vm559_vm0, %v538_v9 }
  0xb4   : > { %4460 = vmatmul.msk.f32.gmra.mxu0 %vm559_vm0, %v469_v10  ;;  %4509 = vmatmul.msk.f32.gmra.mxu2 %vm559_vm0, %v518_v11 }
  0xb6   : > { %4484 = vmatmul.msk.f32.gmra.mxu1 %vm559_vm0, %v493_v13 }
  0xbc   : > { %4461 = vmatmul.msk.f32.gmra.mxu0 %vm559_vm0, %v470_v14  ;;  %4510 = vmatmul.msk.f32.gmra.mxu2 %vm559_vm0, %v519_v15  ;;  %v501_v14 = vld [vmem:[%s8953_s0 + $0x168] sm:$0xff] }
  0xbe   : > { %4485 = vmatmul.msk.f32.gmra.mxu1 %vm559_vm0, %v494_v17  ;;  %v478_v17 = vld [vmem:[%s8953_s0 + $0xb0] sm:$0xff] }
  0xc4   : > { %4462 = vmatmul.msk.f32.gmra.mxu0 %vm559_vm0, %v471_v18  ;;  %4511 = vmatmul.msk.f32.gmra.mxu2 %vm559_vm0, %v520_v19  ;;  %v527_v18 = vld [vmem:[%s8953_s0 + $0x238] sm:$0xff] }
  0xc5   : > { %v539_v19 = vld [vmem:[%s8953_s0 + $0x298] sm:$0xff] }
  0xc6   : > { %4486 = vmatmul.msk.f32.gmra.mxu1 %vm559_vm0, %v495_v21  ;;  %4530 = vmatmul.msk.f32.gmra.mxu3 %vm559_vm0, %v539_v19 }
  0xc9   : > { %v871_v22 = vpop.f32.mrf.mxu0 }
  0xca   : > { %1165 = vst [vmem:[#allocation2] sm:$0xff] %v871_v22  ;;  %v1366_v37 = vmul.f32 %v871_v22, %v871_v22 }
  0xcb   : > { %v5047_v26 = vpop.f32.mrf.mxu1 }
  0xcc   : > { %4463 = vmatmul.msk.f32.gmra.mxu0 %vm559_vm0, %v472_v23  ;;  %4512 = vmatmul.msk.f32.gmra.mxu2 %vm559_vm0, %v521_v24  ;;  %1189 = vst [vmem:[#allocation2 + $0xc0] sm:$0xff] %v5047_v26  ;;  %v502_v24 = vld [vmem:[%s8953_s0 + $0x170] sm:$0xff] }
  0xce   : > { %4487 = vmatmul.msk.f32.gmra.mxu1 %vm559_vm0, %v496_v27 }
  0xcf   : > { %v5056_v28 = vpop.f32.mrf.mxu2 }
  0xd0   : > { %1214 = vst [vmem:[#allocation2 + $0x188] sm:$0xff] %v5056_v28 }
  0xd1   : > { %v874_v29 = vpop.f32.mrf.mxu0 }
  0xd2   : > { %1166 = vst [vmem:[#allocation2 + $0x8] sm:$0xff] %v874_v29  ;;  %v1367_v35 = vmul.f32 %v874_v29, %v874_v29  ;;  %v1263_v38 = vadd.f32 %v874_v29, %v871_v22  ;;  %v479_v29 = vld [vmem:[%s8953_s0 + $0xb8] sm:$0xff] }
  0xd3   : > { %v5069_v33 = vpop.f32.mrf.mxu1 }
  0xd4   : > { %4464 = vmatmul.msk.f32.gmra.mxu0 %vm559_vm0, %v473_v30  ;;  %4513 = vmatmul.msk.f32.gmra.mxu2 %vm559_vm0, %v522_v31  ;;  %1190 = vst [vmem:[#allocation2 + $0xc8] sm:$0xff] %v5069_v33  ;;  %v1464_v43 = vadd.f32 %v1367_v35, %v1366_v37  ;;  %v528_v30 = vld [vmem:[%s8953_s0 + $0x240] sm:$0xff] }
  0xd5   : > { %v540_v31 = vld [vmem:[%s8953_s0 + $0x2a0] sm:$0xff] }
  0xd6   : > { %4488 = vmatmul.msk.f32.gmra.mxu1 %vm559_vm0, %v497_v34  ;;  %4531 = vmatmul.msk.f32.gmra.mxu3 %vm559_vm0, %v540_v31  ;;  %v503_v34 = vld [vmem:[%s8953_s0 + $0x178] sm:$0xff]  ;;  %v5278_v31 = vpop.f32.mrf.mxu3 }
  0xd7   : > { %v5078_v36 = vpop.f32.mrf.mxu2  ;;  %1239 = vst [vmem:[#allocation2 + $0x250] sm:$0xff] %v5278_v31 }
  0xd8   : > { %1215 = vst [vmem:[#allocation2 + $0x190] sm:$0xff] %v5078_v36 }
  0xd9   : > { %v877_v39 = vpop.f32.mrf.mxu0 }
  0xda   : > { %1167 = vst [vmem:[#allocation2 + $0x10] sm:$0xff] %v877_v39  ;;  %v1264_v44 = vadd.f32 %v1263_v38, %v877_v39  ;;  %v1368_v45 = vmul.f32 %v877_v39, %v877_v39 }
  0xdb   : > { %v5091_v46 = vpop.f32.mrf.mxu1 }
  0xdc   : > { %v1465_v47 = vadd.f32 %v1464_v43, %v1368_v45  ;;  %4465 = vmatmul.msk.f32.gmra.mxu0 %vm559_vm0, %v474_v40  ;;  %4514 = vmatmul.msk.f32.gmra.mxu2 %vm559_vm0, %v523_v41  ;;  %1191 = vst [vmem:[#allocation2 + $0xd0] sm:$0xff] %v5091_v46  ;;  %v529_v40 = vld [vmem:[%s8953_s0 + $0x248] sm:$0xff] }
  0xdd   : > { %v541_v41 = vld [vmem:[%s8953_s0 + $0x2a8] sm:$0xff] }
  0xde   : > { %4489 = vmatmul.msk.f32.gmra.mxu1 %vm559_vm0, %v498_v48  ;;  %4532 = vmatmul.msk.f32.gmra.mxu3 %vm559_vm0, %v541_v41  ;;  %v504_v48 = vld [vmem:[%s8953_s0 + $0x180] sm:$0xff] }
  0xdf   : > { %v5100_v49 = vpop.f32.mrf.mxu2 }
  0xe0   : > { %1216 = vst [vmem:[#allocation2 + $0x198] sm:$0xff] %v5100_v49 }
  0xe1   : > { %v880_v50 = vpop.f32.mrf.mxu0 }
  0xe2   : > { %1168 = vst [vmem:[#allocation2 + $0x18] sm:$0xff] %v880_v50  ;;  %v1265_v54 = vadd.f32 %v1264_v44, %v880_v50  ;;  %v1369_v55 = vmul.f32 %v880_v50, %v880_v50 }
  0xe3   : > { %v5113_v56 = vpop.f32.mrf.mxu1 }
  0xe4   : > { %v1466_v57 = vadd.f32 %v1465_v47, %v1369_v55  ;;  %4466 = vmatmul.msk.f32.gmra.mxu0 %vm559_vm0, %v475_v51  ;;  %4515 = vmatmul.msk.f32.gmra.mxu2 %vm559_vm0, %v524_v52  ;;  %1192 = vst [vmem:[#allocation2 + $0xd8] sm:$0xff] %v5113_v56  ;;  %v542_v52 = vld [vmem:[%s8953_s0 + $0x2b0] sm:$0xff] }
  0xe6   : > { %4490 = vmatmul.msk.f32.gmra.mxu1 %vm559_vm0, %v499_v58  ;;  %4533 = vmatmul.msk.f32.gmra.mxu3 %vm559_vm0, %v542_v52 }
  0xe7   : > { %v5122_v59 = vpop.f32.mrf.mxu2 }
  0xe8   : > { %1217 = vst [vmem:[#allocation2 + $0x1a0] sm:$0xff] %v5122_v59 }
  0xe9   : > { %v883_v60 = vpop.f32.mrf.mxu0 }
  0xea   : > { %1169 = vst [vmem:[#allocation2 + $0x20] sm:$0xff] %v883_v60  ;;  %v1266_v0 = vadd.f32 %v1265_v54, %v883_v60  ;;  %v1370_v1 = vmul.f32 %v883_v60, %v883_v60 }
  0xeb   : > { %v5135_v2 = vpop.f32.mrf.mxu1 }
  0xec   : > { %v1467_v3 = vadd.f32 %v1466_v57, %v1370_v1  ;;  %4467 = vmatmul.msk.f32.gmra.mxu0 %vm559_vm0, %v476_v61  ;;  %4516 = vmatmul.msk.f32.gmra.mxu2 %vm559_vm0, %v525_v62  ;;  %1193 = vst [vmem:[#allocation2 + $0xe0] sm:$0xff] %v5135_v2  ;;  %v543_v61 = vld [vmem:[%s8953_s0 + $0x2b8] sm:$0xff] }
  0xee   : > { %4491 = vmatmul.msk.f32.gmra.mxu1 %vm559_vm0, %v500_v4  ;;  %4534 = vmatmul.msk.f32.gmra.mxu3 %vm559_vm0, %v543_v61 }
  0xef   : > { %v5144_v5 = vpop.f32.mrf.mxu2 }
  0xf0   : > { %1218 = vst [vmem:[#allocation2 + $0x1a8] sm:$0xff] %v5144_v5 }
  0xf1   : > { %v886_v6 = vpop.f32.mrf.mxu0 }
  0xf2   : > { %1170 = vst [vmem:[#allocation2 + $0x28] sm:$0xff] %v886_v6  ;;  %v1267_v10 = vadd.f32 %v1266_v0, %v886_v6  ;;  %v1371_v11 = vmul.f32 %v886_v6, %v886_v6  ;;  %v544_v6 = vld [vmem:[%s8953_s0 + $0x2c0] sm:$0xff] }
  0xf3   : > { %v5157_v12 = vpop.f32.mrf.mxu1 }
  0xf4   : > { %v1468_v13 = vadd.f32 %v1467_v3, %v1371_v11  ;;  %4468 = vmatmul.msk.f32.gmra.mxu0 %vm559_vm0, %v477_v7  ;;  %4517 = vmatmul.msk.f32.gmra.mxu2 %vm559_vm0, %v526_v8  ;;  %1194 = vst [vmem:[#allocation2 + $0xe8] sm:$0xff] %v5157_v12 }
  0xf6   : > { %4492 = vmatmul.msk.f32.gmra.mxu1 %vm559_vm0, %v501_v14  ;;  %4535 = vmatmul.msk.f32.gmra.mxu3 %vm559_vm0, %v544_v6  ;;  %v545_v14 = vld [vmem:[%s8953_s0 + $0x2c8] sm:$0xff] }
  0xf7   : > { %v5166_v15 = vpop.f32.mrf.mxu2 }
  0xf8   : > { %1219 = vst [vmem:[#allocation2 + $0x1b0] sm:$0xff] %v5166_v15 }
  0xf9   : > { %v889_v16 = vpop.f32.mrf.mxu0 }
  0xfa   : > { %1171 = vst [vmem:[#allocation2 + $0x30] sm:$0xff] %v889_v16  ;;  %v1268_v20 = vadd.f32 %v1267_v10, %v889_v16  ;;  %v1372_v21 = vmul.f32 %v889_v16, %v889_v16 }
  0xfb   : > { %v5179_v22 = vpop.f32.mrf.mxu1 }
  0xfc   : > { %v1469_v23 = vadd.f32 %v1468_v13, %v1372_v21  ;;  %4469 = vmatmul.msk.f32.gmra.mxu0 %vm559_vm0, %v478_v17  ;;  %4518 = vmatmul.msk.f32.gmra.mxu2 %vm559_vm0, %v527_v18  ;;  %1195 = vst [vmem:[#allocation2 + $0xf0] sm:$0xff] %v5179_v22 }
  0xfe   : > { %4493 = vmatmul.msk.f32.gmra.mxu1 %vm559_vm0, %v502_v24  ;;  %4536 = vmatmul.msk.f32.gmra.mxu3 %vm559_vm0, %v545_v14 }
  0xff   : > { %v5188_v25 = vpop.f32.mrf.mxu2 }
 0x100   : > { %1220 = vst [vmem:[#allocation2 + $0x1b8] sm:$0xff] %v5188_v25 }
 0x101   : > { %v892_v27 = vpop.f32.mrf.mxu0 }
 0x102   : > { %1172 = vst [vmem:[#allocation2 + $0x38] sm:$0xff] %v892_v27  ;;  %v1373_v35 = vmul.f32 %v892_v27, %v892_v27  ;;  %v1269_v38 = vadd.f32 %v1268_v20, %v892_v27 }
 0x103   : > { %v5201_v32 = vpop.f32.mrf.mxu1 }
 0x104   : > { %4470 = vmatmul.msk.f32.gmra.mxu0 %vm559_vm0, %v479_v29  ;;  %4519 = vmatmul.msk.f32.gmra.mxu2 %vm559_vm0, %v528_v30  ;;  %1196 = vst [vmem:[#allocation2 + $0xf8] sm:$0xff] %v5201_v32  ;;  %v1470_v42 = vadd.f32 %v1469_v23, %v1373_v35  ;;  %v546_v23 = vld [vmem:[%s8953_s0 + $0x2d0] sm:$0xff] }
 0x106   : > { %4494 = vmatmul.msk.f32.gmra.mxu1 %vm559_vm0, %v503_v34  ;;  %4537 = vmatmul.msk.f32.gmra.mxu3 %vm559_vm0, %v546_v23 }
 0x107   : > { %v5210_v37 = vpop.f32.mrf.mxu2 }
 0x108   : > { %1221 = vst [vmem:[#allocation2 + $0x1c0] sm:$0xff] %v5210_v37 }
 0x109   : > { %v895_v39 = vpop.f32.mrf.mxu0 }
 0x10a   : > { %1173 = vst [vmem:[#allocation2 + $0x40] sm:$0xff] %v895_v39  ;;  %v1270_v43 = vadd.f32 %v1269_v38, %v895_v39  ;;  %v1374_v44 = vmul.f32 %v895_v39, %v895_v39  ;;  %v547_v38 = vld [vmem:[%s8953_s0 + $0x2d8] sm:$0xff] }
 0x10b   : > { %v5220_v45 = vpop.f32.mrf.mxu1 }
 0x10c   : > { %v1471_v47 = vadd.f32 %v1470_v42, %v1374_v44  ;;  %4520 = vmatmul.msk.f32.gmra.mxu2 %vm559_vm0, %v529_v40  ;;  %1197 = vst [vmem:[#allocation2 + $0x100] sm:$0xff] %v5220_v45  ;;  %v5291_v40 = vpop.f32.mrf.mxu3 }
 0x10d   : > { %1240 = vst [vmem:[#allocation2 + $0x258] sm:$0xff] %v5291_v40 }
 0x10e   : > { %4495 = vmatmul.msk.f32.gmra.mxu1 %vm559_vm0, %v504_v48  ;;  %4538 = vmatmul.msk.f32.gmra.mxu3 %vm559_vm0, %v547_v38 }
 0x10f   : > { %v5228_v50 = vpop.f32.mrf.mxu2 }
 0x110   : > { %1222 = vst [vmem:[#allocation2 + $0x1c8] sm:$0xff] %v5228_v50 }
 0x111   : > { %v898_v51 = vpop.f32.mrf.mxu0 }
 0x112   : > { %1174 = vst [vmem:[#allocation2 + $0x48] sm:$0xff] %v898_v51  ;;  %v1271_v53 = vadd.f32 %v1270_v43, %v898_v51  ;;  %v1375_v54 = vmul.f32 %v898_v51, %v898_v51 }
 0x113   : > { %v5235_v55 = vpop.f32.mrf.mxu1 }
 0x114   : > { %v1472_v57 = vadd.f32 %v1471_v47, %v1375_v54  ;;  %1198 = vst [vmem:[#allocation2 + $0x108] sm:$0xff] %v5235_v55  ;;  %v548_v47 = vld [vmem:[%s8953_s0 + $0x2e0] sm:$0xff] }
 0x116   : > { %4539 = vmatmul.msk.f32.gmra.mxu3 %vm559_vm0, %v548_v47 }
 0x117   : > { %v5238_v58 = vpop.f32.mrf.mxu2 }
 0x118   : > { %1223 = vst [vmem:[#allocation2 + $0x1d0] sm:$0xff] %v5238_v58 }
 0x119   : > { %v901_v60 = vpop.f32.mrf.mxu0 }
 0x11a   : > { %1175 = vst [vmem:[#allocation2 + $0x50] sm:$0xff] %v901_v60  ;;  %v1272_v62 = vadd.f32 %v1271_v53, %v901_v60  ;;  %v1376_v63 = vmul.f32 %v901_v60, %v901_v60 }
 0x11b   : > { %v5245_v0 = vpop.f32.mrf.mxu1 }
 0x11c   : > { %v1473_v1 = vadd.f32 %v1472_v57, %v1376_v63  ;;  %1199 = vst [vmem:[#allocation2 + $0x110] sm:$0xff] %v5245_v0  ;;  %v5304_v57 = vpop.f32.mrf.mxu3 }
 0x11d   : > { %1241 = vst [vmem:[#allocation2 + $0x260] sm:$0xff] %v5304_v57 }
 0x11f   : > { %v5248_v3 = vpop.f32.mrf.mxu2 }
 0x120   : > { %1224 = vst [vmem:[#allocation2 + $0x1d8] sm:$0xff] %v5248_v3 }
 0x121   : > { %v904_v4 = vpop.f32.mrf.mxu0 }
 0x122   : > { %1176 = vst [vmem:[#allocation2 + $0x58] sm:$0xff] %v904_v4  ;;  %v1273_v7 = vadd.f32 %v1272_v62, %v904_v4  ;;  %v1377_v8 = vmul.f32 %v904_v4, %v904_v4  ;;  %v549_v62 = vld [vmem:[%s8953_s0 + $0x2e8] sm:$0xff] }
 0x123   : > { %v5255_v9 = vpop.f32.mrf.mxu1  ;;  %4540 = vmatmul.msk.f32.gmra.mxu3 %vm559_vm0, %v549_v62 }
 0x124   : > { %v1474_v10 = vadd.f32 %v1473_v1, %v1377_v8  ;;  %1200 = vst [vmem:[#allocation2 + $0x118] sm:$0xff] %v5255_v9 }
 0x127   : > { %v5258_v11 = vpop.f32.mrf.mxu2 }
 0x128   : > { %1225 = vst [vmem:[#allocation2 + $0x1e0] sm:$0xff] %v5258_v11 }
 0x129   : > { %v907_v13 = vpop.f32.mrf.mxu0 }
 0x12a   : > { %1177 = vst [vmem:[#allocation2 + $0x60] sm:$0xff] %v907_v13  ;;  %v1274_v16 = vadd.f32 %v1273_v7, %v907_v13  ;;  %v1378_v17 = vmul.f32 %v907_v13, %v907_v13  ;;  %v5317_v7 = vpop.f32.mrf.mxu3  ;;  %v550_v13 = vld [vmem:[%s8953_s0 + $0x2f0] sm:$0xff] }
 0x12b   : > { %v5265_v18 = vpop.f32.mrf.mxu1  ;;  %1242 = vst [vmem:[#allocation2 + $0x268] sm:$0xff] %v5317_v7  ;;  %4541 = vmatmul.msk.f32.gmra.mxu3 %vm559_vm0, %v550_v13 }
 0x12c   : > { %v1475_v19 = vadd.f32 %v1474_v10, %v1378_v17  ;;  %1201 = vst [vmem:[#allocation2 + $0x120] sm:$0xff] %v5265_v18 }
 0x12f   : > { %v5268_v20 = vpop.f32.mrf.mxu2 }
 0x130   : > { %1226 = vst [vmem:[#allocation2 + $0x1e8] sm:$0xff] %v5268_v20 }
 0x131   : > { %v910_v21 = vpop.f32.mrf.mxu0 }
 0x132   : > { %1178 = vst [vmem:[#allocation2 + $0x68] sm:$0xff] %v910_v21  ;;  %v1275_v24 = vadd.f32 %v1274_v16, %v910_v21  ;;  %v1379_v27 = vmul.f32 %v910_v21, %v910_v21  ;;  %v5330_v21 = vpop.f32.mrf.mxu3 }
 0x133   : > { %v5275_v29 = vpop.f32.mrf.mxu1  ;;  %9307 = vst [vmem:[#allocation7_spill] sm:$0xff] %v5330_v21 }
 0x134   : > { %v1476_v30 = vadd.f32 %v1475_v19, %v1379_v27  ;;  %1202 = vst [vmem:[#allocation2 + $0x128] sm:$0xff] %v5275_v29  ;;  %v551_v27 = vld [vmem:[%s8953_s0 + $0x2f8] sm:$0xff] }
 0x135   : > { %1243 = vst [vmem:[#allocation2 + $0x270] sm:$0xff] %v5330_v21  ;;  %4542 = vmatmul.msk.f32.gmra.mxu3 %vm559_vm0, %v551_v27 }
 0x137   : > { %v5281_v34 = vpop.f32.mrf.mxu2 }
 0x138   : > { %1227 = vst [vmem:[#allocation2 + $0x1f0] sm:$0xff] %v5281_v34 }
 0x139   : > { %v913_v35 = vpop.f32.mrf.mxu0 }
 0x13a   : > { %1179 = vst [vmem:[#allocation2 + $0x70] sm:$0xff] %v913_v35  ;;  %v1380_v41 = vmul.f32 %v913_v35, %v913_v35  ;;  %v1276_v43 = vadd.f32 %v1275_v24, %v913_v35 }
 0x13b   : > { %v5288_v39 = vpop.f32.mrf.mxu1 }
 0x13c   : > { %1203 = vst [vmem:[#allocation2 + $0x130] sm:$0xff] %v5288_v39  ;;  %v1477_v48 = vadd.f32 %v1476_v30, %v1380_v41 }
 0x13f   : > { %v5294_v42 = vpop.f32.mrf.mxu2 }
 0x140   : > { %1228 = vst [vmem:[#allocation2 + $0x1f8] sm:$0xff] %v5294_v42 }
 0x141   : > { %v916_v44 = vpop.f32.mrf.mxu0 }
 0x142   : > { %1180 = vst [vmem:[#allocation2 + $0x78] sm:$0xff] %v916_v44  ;;  %v1277_v51 = vadd.f32 %v1276_v43, %v916_v44  ;;  %v1381_v52 = vmul.f32 %v916_v44, %v916_v44  ;;  %v5343_v43 = vpop.f32.mrf.mxu3 }
 0x143   : > { %v5301_v53 = vpop.f32.mrf.mxu1  ;;  %9308 = vst [vmem:[#allocation8_spill] sm:$0xff] %v5343_v43 }
 0x144   : > { %v1478_v54 = vadd.f32 %v1477_v48, %v1381_v52  ;;  %1204 = vst [vmem:[#allocation2 + $0x138] sm:$0xff] %v5301_v53  ;;  %v552_v48 = vld [vmem:[%s8953_s0 + $0x300] sm:$0xff] }
 0x145   : > { %1244 = vst [vmem:[#allocation2 + $0x278] sm:$0xff] %v5343_v43  ;;  %4543 = vmatmul.msk.f32.gmra.mxu3 %vm559_vm0, %v552_v48 }
 0x147   : > { %v5307_v60 = vpop.f32.mrf.mxu2 }
 0x148   : > { %1229 = vst [vmem:[#allocation2 + $0x200] sm:$0xff] %v5307_v60 }
 0x149   : > { %v919_v61 = vpop.f32.mrf.mxu0 }
 0x14a   : > { %1181 = vst [vmem:[#allocation2 + $0x80] sm:$0xff] %v919_v61  ;;  %v1278_v63 = vadd.f32 %v1277_v51, %v919_v61  ;;  %v1382_v1 = vmul.f32 %v919_v61, %v919_v61  ;;  %v5356_v62 = vpop.f32.mrf.mxu3 }
 0x14b   : > { %v5314_v4 = vpop.f32.mrf.mxu1  ;;  %9309 = vst [vmem:[#allocation9_spill] sm:$0xff] %v5356_v62 }
 0x14c   : > { %v1479_v6 = vadd.f32 %v1478_v54, %v1382_v1  ;;  %1205 = vst [vmem:[#allocation2 + $0x140] sm:$0xff] %v5314_v4 }
 0x14d   : > { %1245 = vst [vmem:[#allocation2 + $0x280] sm:$0xff] %v5356_v62 }
 0x14f   : > { %v5320_v8 = vpop.f32.mrf.mxu2 }
 0x150   : > { %1230 = vst [vmem:[#allocation2 + $0x208] sm:$0xff] %v5320_v8 }
 0x151   : > { %v922_v10 = vpop.f32.mrf.mxu0 }
 0x152   : > { %1182 = vst [vmem:[#allocation2 + $0x88] sm:$0xff] %v922_v10  ;;  %v1279_v14 = vadd.f32 %v1278_v63, %v922_v10  ;;  %v1383_v16 = vmul.f32 %v922_v10, %v922_v10 }
 0x153   : > { %v5327_v17 = vpop.f32.mrf.mxu1 }
 0x154   : > { %v1480_v19 = vadd.f32 %v1479_v6, %v1383_v16  ;;  %1206 = vst [vmem:[#allocation2 + $0x148] sm:$0xff] %v5327_v17  ;;  %v553_v6 = vld [vmem:[%s8953_s0 + $0x308] sm:$0xff] }
 0x155   : > { %4544 = vmatmul.msk.f32.gmra.mxu3 %vm559_vm0, %v553_v6 }
 0x157   : > { %v5333_v23 = vpop.f32.mrf.mxu2 }
 0x158   : > { %1231 = vst [vmem:[#allocation2 + $0x210] sm:$0xff] %v5333_v23 }
 0x159   : > { %v925_v24 = vpop.f32.mrf.mxu0 }
 0x15a   : > { %1183 = vst [vmem:[#allocation2 + $0x90] sm:$0xff] %v925_v24  ;;  %v1280_v30 = vadd.f32 %v1279_v14, %v925_v24  ;;  %v1384_v35 = vmul.f32 %v925_v24, %v925_v24 }
 0x15b   : > { %v5340_v38 = vpop.f32.mrf.mxu1 }
 0x15c   : > { %v1481_v41 = vadd.f32 %v1480_v19, %v1384_v35  ;;  %1207 = vst [vmem:[#allocation2 + $0x150] sm:$0xff] %v5340_v38  ;;  %v5369_v19 = vpop.f32.mrf.mxu3 }
 0x15d   : > { %9310 = vst [vmem:[#allocation10_spill] sm:$0xff] %v5369_v19 }
 0x15e   : > { %1246 = vst [vmem:[#allocation2 + $0x288] sm:$0xff] %v5369_v19 }
 0x15f   : > { %v5346_v44 = vpop.f32.mrf.mxu2 }
 0x160   : > { %1232 = vst [vmem:[#allocation2 + $0x218] sm:$0xff] %v5346_v44 }
 0x161   : > { %v928_v47 = vpop.f32.mrf.mxu0 }
 0x162   : > { %1184 = vst [vmem:[#allocation2 + $0x98] sm:$0xff] %v928_v47  ;;  %v1281_v51 = vadd.f32 %v1280_v30, %v928_v47  ;;  %v1385_v52 = vmul.f32 %v928_v47, %v928_v47 }
 0x163   : > { %v5353_v54 = vpop.f32.mrf.mxu1 }
 0x164   : > { %v1482_v61 = vadd.f32 %v1481_v41, %v1385_v52  ;;  %1208 = vst [vmem:[#allocation2 + $0x158] sm:$0xff] %v5353_v54  ;;  %v5378_v35 = vpop.f32.mrf.mxu3 }
 0x165   : > { %9311 = vst [vmem:[#allocation11_spill] sm:$0xff] %v5378_v35 }
 0x166   : > { %1247 = vst [vmem:[#allocation2 + $0x290] sm:$0xff] %v5378_v35 }
 0x167   : > { %v5359_v63 = vpop.f32.mrf.mxu2 }
 0x168   : > { %1233 = vst [vmem:[#allocation2 + $0x220] sm:$0xff] %v5359_v63 }
 0x169   : > { %v931_v1 = vpop.f32.mrf.mxu0 }
 0x16a   : > { %1185 = vst [vmem:[#allocation2 + $0xa0] sm:$0xff] %v931_v1  ;;  %v1282_v10 = vadd.f32 %v1281_v51, %v931_v1  ;;  %v1386_v13 = vmul.f32 %v931_v1, %v931_v1 }
 0x16b   : > { %v5366_v14 = vpop.f32.mrf.mxu1 }
 0x16c   : > { %v1483_v16 = vadd.f32 %v1482_v61, %v1386_v13  ;;  %1209 = vst [vmem:[#allocation2 + $0x160] sm:$0xff] %v5366_v14  ;;  %v5387_v19 = vpop.f32.mrf.mxu3 }
 0x16d   : > { %9312 = vst [vmem:[#allocation12_spill] sm:$0xff] %v5387_v19 }
 0x16e   : > { %1248 = vst [vmem:[#allocation2 + $0x298] sm:$0xff] %v5387_v19  ;;  %v1391_v19 = vmul.f32 %v5069_v33, %v5069_v33 }
 0x16f   : > { %v5372_v24 = vpop.f32.mrf.mxu2 }
 0x170   : > { %1234 = vst [vmem:[#allocation2 + $0x228] sm:$0xff] %v5372_v24 }
 0x171   : > { %v934_v27 = vpop.f32.mrf.mxu0 }
 0x172   : > { %1186 = vst [vmem:[#allocation2 + $0xa8] sm:$0xff] %v934_v27  ;;  %v1387_v41 = vmul.f32 %v934_v27, %v934_v27  ;;  %v1283_v48 = vadd.f32 %v1282_v10, %v934_v27 }
 0x173   : > { %v5375_v30 = vpop.f32.mrf.mxu1 }
 0x174   : > { %1210 = vst [vmem:[#allocation2 + $0x168] sm:$0xff] %v5375_v30  ;;  %v1484_v52 = vadd.f32 %v1483_v16, %v1387_v41 }
 0x177   : > { %v5381_v47 = vpop.f32.mrf.mxu2 }
 0x178   : > { %1235 = vst [vmem:[#allocation2 + $0x230] sm:$0xff] %v5381_v47 }
 0x179   : > { %v937_v51 = vpop.f32.mrf.mxu0 }
 0x17a   : > { %1187 = vst [vmem:[#allocation2 + $0xb0] sm:$0xff] %v937_v51  ;;  %v1284_v61 = vadd.f32 %v1283_v48, %v937_v51  ;;  %v1388_v1 = vmul.f32 %v937_v51, %v937_v51  ;;  %v1390_v48 = vmul.f32 %v5047_v26, %v5047_v26 }
 0x17b   : > { %v5384_v6 = vpop.f32.mrf.mxu1 }
 0x17c   : > { %v1485_v13 = vadd.f32 %v1484_v52, %v1388_v1  ;;  %1211 = vst [vmem:[#allocation2 + $0x170] sm:$0xff] %v5384_v6  ;;  %v5399_v1 = vpop.f32.mrf.mxu3 }
 0x17d   : > { %1249 = vst [vmem:[#allocation2 + $0x2a0] sm:$0xff] %v5399_v1 }
 0x17f   : > { %v5390_v35 = vpop.f32.mrf.mxu2 }
 0x180   : > { %1236 = vst [vmem:[#allocation2 + $0x238] sm:$0xff] %v5390_v35 }
 0x181   : > { %v940_v10 = vpop.f32.mrf.mxu0 }
 0x182   : > { %1188 = vst [vmem:[#allocation2 + $0xb8] sm:$0xff] %v940_v10  ;;  %v1285_v27 = vadd.f32 %v1284_v61, %v940_v10  ;;  %v1389_v16 = vmul.f32 %v940_v10, %v940_v10  ;;  %v1392_v10 = vmul.f32 %v5091_v46, %v5091_v46 }
 0x183   : > { %v5393_v41 = vpop.f32.mrf.mxu1 }
 0x184   : > { %v1286_v51 = vadd.f32 %v1285_v27, %v5047_v26  ;;  %v1486_v52 = vadd.f32 %v1485_v13, %v1389_v16  ;;  %1212 = vst [vmem:[#allocation2 + $0x178] sm:$0xff] %v5393_v41  ;;  %v1393_v27 = vmul.f32 %v5113_v56, %v5113_v56 }
 0x186   : > { %v1287_v62 = vadd.f32 %v1286_v51, %v5069_v33  ;;  %v1487_v43 = vadd.f32 %v1486_v52, %v1390_v48  ;;  %v1394_v48 = vmul.f32 %v5135_v2, %v5135_v2 }
 0x187   : > { %v5405_v61 = vpop.f32.mrf.mxu2 }
 0x188   : > { %v1288_v26 = vadd.f32 %v1287_v62, %v5091_v46  ;;  %v1488_v13 = vadd.f32 %v1487_v43, %v1391_v19  ;;  %1237 = vst [vmem:[#allocation2 + $0x240] sm:$0xff] %v5405_v61  ;;  %v5420_v46 = vpop.f32.mrf.mxu3  ;;  %v1395_v43 = vmul.f32 %v5157_v12, %v5157_v12 }
 0x189   : > { %1250 = vst [vmem:[#allocation2 + $0x2a8] sm:$0xff] %v5420_v46 }
 0x18a   : > { %v1289_v16 = vadd.f32 %v1288_v26, %v5113_v56  ;;  %v1489_v21 = vadd.f32 %v1488_v13, %v1392_v10  ;;  %v1396_v10 = vmul.f32 %v5179_v22, %v5179_v22  ;;  %v1397_v26 = vmul.f32 %v5201_v32, %v5201_v32 }
 0x18b   : > { %v5414_v33 = vpop.f32.mrf.mxu1 }
 0x18c   : > { %v1290_v51 = vadd.f32 %v1289_v16, %v5135_v2  ;;  %v1490_v52 = vadd.f32 %v1489_v21, %v1393_v27  ;;  %1213 = vst [vmem:[#allocation2 + $0x180] sm:$0xff] %v5414_v33 }
 0x18e   : > { %v1291_v62 = vadd.f32 %v1290_v51, %v5157_v12  ;;  %v1491_v19 = vadd.f32 %v1490_v52, %v1394_v48  ;;  %v1398_v12 = vmul.f32 %v5220_v45, %v5220_v45 }
 0x18f   : > { %v5426_v56 = vpop.f32.mrf.mxu2 }
 0x190   : > { %v1292_v2 = vadd.f32 %v1291_v62, %v5179_v22  ;;  %v1492_v21 = vadd.f32 %v1491_v19, %v1395_v43  ;;  %1238 = vst [vmem:[#allocation2 + $0x248] sm:$0xff] %v5426_v56  ;;  %v5438_v51 = vpop.f32.mrf.mxu3  ;;  %v1399_v22 = vmul.f32 %v5235_v55, %v5235_v55 }
 0x191   : > { %1251 = vst [vmem:[#allocation2 + $0x2b0] sm:$0xff] %v5438_v51 }
 0x192   : > { %v1293_v13 = vadd.f32 %v1292_v2, %v5201_v32  ;;  %v1493_v27 = vadd.f32 %v1492_v21, %v1396_v10  ;;  %v1400_v32 = vmul.f32 %v5245_v0, %v5245_v0  ;;  %v1402_v21 = vmul.f32 %v5265_v18, %v5265_v18 }
 0x194   : > { %v1294_v16 = vadd.f32 %v1293_v13, %v5220_v45  ;;  %v1494_v48 = vadd.f32 %v1493_v27, %v1397_v26  ;;  %v1401_v45 = vmul.f32 %v5255_v9, %v5255_v9  ;;  %v1403_v27 = vmul.f32 %v5275_v29, %v5275_v29 }
 0x196   : > { %v1295_v52 = vadd.f32 %v1294_v16, %v5235_v55  ;;  %v1495_v43 = vadd.f32 %v1494_v48, %v1398_v12 }
 0x198   : > { %v1496_v62 = vadd.f32 %v1495_v43, %v1399_v22  ;;  %v1296_v19 = vadd.f32 %v1295_v52, %v5245_v0  ;;  %v5453_v13 = vpop.f32.mrf.mxu3  ;;  %v1406_v43 = vmul.f32 %v5314_v4, %v5314_v4 }
 0x199   : > { %1252 = vst [vmem:[#allocation2 + $0x2b8] sm:$0xff] %v5453_v13 }
 0x19a   : > { %v1297_v10 = vadd.f32 %v1296_v19, %v5255_v9  ;;  %v1497_v2 = vadd.f32 %v1496_v62, %v1400_v32  ;;  %v1404_v9 = vmul.f32 %v5288_v39, %v5288_v39  ;;  %v1407_v19 = vmul.f32 %v5327_v17, %v5327_v17 }
 0x19c   : > { %v1298_v55 = vadd.f32 %v1297_v10, %v5265_v18  ;;  %v1498_v26 = vadd.f32 %v1497_v2, %v1401_v45  ;;  %v1405_v18 = vmul.f32 %v5301_v53, %v5301_v53 }
 0x19e   : > { %v1299_v12 = vadd.f32 %v1298_v55, %v5275_v29  ;;  %v1499_v0 = vadd.f32 %v1498_v26, %v1402_v21 }
 0x1a0   : > { %v1300_v16 = vadd.f32 %v1299_v12, %v5288_v39  ;;  %v1500_v48 = vadd.f32 %v1499_v0, %v1403_v27  ;;  %v5468_v62 = vpop.f32.mrf.mxu3 }
 0x1a1   : > { %1253 = vst [vmem:[#allocation2 + $0x2c0] sm:$0xff] %v5468_v62 }
 0x1a2   : > { %v1301_v22 = vadd.f32 %v1300_v16, %v5301_v53  ;;  %v1501_v52 = vadd.f32 %v1500_v48, %v1404_v9  ;;  %v1408_v53 = vmul.f32 %v5340_v38, %v5340_v38  ;;  %v1412_v48 = vmul.f32 %v5384_v6, %v5384_v6 }
 0x1a4   : > { %v1302_v29 = vadd.f32 %v1301_v22, %v5314_v4  ;;  %v1502_v32 = vadd.f32 %v1501_v52, %v1405_v18  ;;  %v1409_v4 = vmul.f32 %v5353_v54, %v5353_v54  ;;  %v1414_v52 = vmul.f32 %v5414_v33, %v5414_v33 }
 0x1a6   : > { %v1303_v39 = vadd.f32 %v1302_v29, %v5327_v17  ;;  %v1503_v45 = vadd.f32 %v1502_v32, %v1406_v43  ;;  %v1410_v17 = vmul.f32 %v5366_v14, %v5366_v14  ;;  %v1415_v32 = vmul.f32 %v5056_v28, %v5056_v28 }
 0x1a8   : > { %v1304_v10 = vadd.f32 %v1303_v39, %v5340_v38  ;;  %v1504_v2 = vadd.f32 %v1503_v45, %v1407_v19  ;;  %v5483_v12 = vpop.f32.mrf.mxu3  ;;  %v1411_v38 = vmul.f32 %v5375_v30, %v5375_v30  ;;  %v1416_v39 = vmul.f32 %v5078_v36, %v5078_v36 }
 0x1a9   : > { %1254 = vst [vmem:[#allocation2 + $0x2c8] sm:$0xff] %v5483_v12 }
 0x1aa   : > { %v1305_v21 = vadd.f32 %v1304_v10, %v5353_v54  ;;  %v1505_v55 = vadd.f32 %v1504_v2, %v1408_v53  ;;  %v1417_v53 = vmul.f32 %v5100_v49, %v5100_v49  ;;  %v1418_v2 = vmul.f32 %v5122_v59, %v5122_v59 }
 0x1ac   : > { %v1506_v26 = vadd.f32 %v1505_v55, %v1409_v4  ;;  %v1306_v27 = vadd.f32 %v1305_v21, %v5366_v14  ;;  %v1413_v14 = vmul.f32 %v5393_v41, %v5393_v41  ;;  %v1419_v55 = vmul.f32 %v5144_v5, %v5144_v5 }
 0x1ae   : > { %v1507_v0 = vadd.f32 %v1506_v26, %v1410_v17  ;;  %v1307_v9 = vadd.f32 %v1306_v27, %v5375_v30 }
 0x1b0   : > { %v1508_v16 = vadd.f32 %v1507_v0, %v1411_v38  ;;  %v1308_v54 = vadd.f32 %v1307_v9, %v5384_v6  ;;  %v5498_v29 = vpop.f32.mrf.mxu3  ;;  %v1422_v38 = vmul.f32 %v5210_v37, %v5210_v37 }
 0x1b1   : > { %1255 = vst [vmem:[#allocation2 + $0x2d0] sm:$0xff] %v5498_v29 }
 0x1b2   : > { %v1509_v18 = vadd.f32 %v1508_v16, %v1412_v48  ;;  %v1309_v22 = vadd.f32 %v1308_v54, %v5393_v41  ;;  %v1423_v48 = vmul.f32 %v5228_v50, %v5228_v50 }
 0x1b4   : > { %v1510_v43 = vadd.f32 %v1509_v18, %v1413_v14  ;;  %v1310_v30 = vadd.f32 %v1309_v22, %v5414_v33 }
 0x1b6   : > { %v1311_v19 = vadd.f32 %v1310_v30, %v5056_v28  ;;  %v1511_v6 = vadd.f32 %v1510_v43, %v1414_v52  ;;  %v1426_v30 = vmul.f32 %v5258_v11, %v5258_v11 }
 0x1b8   : > { %v1312_v41 = vadd.f32 %v1311_v19, %v5078_v36  ;;  %v1512_v45 = vadd.f32 %v1511_v6, %v1415_v32  ;;  %v5513_v4 = vpop.f32.mrf.mxu3  ;;  %v1427_v6 = vmul.f32 %v5268_v20, %v5268_v20 }
 0x1b9   : > { %1256 = vst [vmem:[#allocation2 + $0x2d8] sm:$0xff] %v5513_v4 }
 0x1ba   : > { %v1313_v33 = vadd.f32 %v1312_v41, %v5100_v49  ;;  %v1513_v10 = vadd.f32 %v1512_v45, %v1416_v39  ;;  %v1420_v49 = vmul.f32 %v5166_v15, %v5166_v15 }
 0x1bc   : > { %v1314_v28 = vadd.f32 %v1313_v33, %v5122_v59  ;;  %v1514_v21 = vadd.f32 %v1513_v10, %v1417_v53  ;;  %v1421_v59 = vmul.f32 %v5188_v25, %v5188_v25  ;;  %v1430_v10 = vmul.f32 %v5307_v60, %v5307_v60 }
 0x1be   : > { %v1315_v36 = vadd.f32 %v1314_v28, %v5144_v5  ;;  %v1515_v26 = vadd.f32 %v1514_v21, %v1418_v2  ;;  %v1431_v21 = vmul.f32 %v5320_v8, %v5320_v8 }
 0x1c0   : > { %v1316_v27 = vadd.f32 %v1315_v36, %v5166_v15  ;;  %v1516_v17 = vadd.f32 %v1515_v26, %v1419_v55  ;;  %v5528_v54 = vpop.f32.mrf.mxu3 }
 0x1c1   : > { %1257 = vst [vmem:[#allocation2 + $0x2e0] sm:$0xff] %v5528_v54 }
 0x1c2   : > { %v1317_v0 = vadd.f32 %v1316_v27, %v5188_v25  ;;  %v1517_v9 = vadd.f32 %v1516_v17, %v1420_v49  ;;  %v1424_v25 = vmul.f32 %v5238_v58, %v5238_v58  ;;  %v1434_v17 = vmul.f32 %v5359_v63, %v5359_v63 }
 0x1c4   : > { %v1318_v5 = vadd.f32 %v1317_v0, %v5210_v37  ;;  %v1518_v16 = vadd.f32 %v1517_v9, %v1421_v59  ;;  %v1425_v37 = vmul.f32 %v5248_v3, %v5248_v3  ;;  %v1435_v9 = vmul.f32 %v5372_v24, %v5372_v24 }
 0x1c6   : > { %v1319_v15 = vadd.f32 %v1318_v5, %v5228_v50  ;;  %v1519_v18 = vadd.f32 %v1518_v16, %v1422_v38  ;;  %v1436_v5 = vmul.f32 %v5381_v47, %v5381_v47 }
 0x1c8   : > { %v1320_v22 = vadd.f32 %v1319_v15, %v5238_v58  ;;  %v1520_v14 = vadd.f32 %v1519_v18, %v1423_v48  ;;  %v5543_v19 = vpop.f32.mrf.mxu3  ;;  %v1438_v18 = vmul.f32 %v5405_v61, %v5405_v61 }
 0x1c9   : > { %1258 = vst [vmem:[#allocation2 + $0x2e8] sm:$0xff] %v5543_v19 }
 0x1ca   : > { %v1321_v52 = vadd.f32 %v1320_v22, %v5248_v3  ;;  %v1521_v43 = vadd.f32 %v1520_v14, %v1424_v25  ;;  %v1428_v3 = vmul.f32 %v5281_v34, %v5281_v34 }
 0x1cc   : > { %v1322_v50 = vadd.f32 %v1321_v52, %v5258_v11  ;;  %v1522_v32 = vadd.f32 %v1521_v43, %v1425_v37  ;;  %v1429_v11 = vmul.f32 %v5294_v42, %v5294_v42 }
 0x1ce   : > { %v1323_v58 = vadd.f32 %v1322_v50, %v5268_v20  ;;  %v1523_v39 = vadd.f32 %v1522_v32, %v1426_v30  ;;  %v1441_v30 = vmul.f32 %v5291_v40, %v5291_v40  ;;  %v1442_v32 = vmul.f32 %v5304_v57, %v5304_v57 }
 0x1d0   : > { %v1324_v41 = vadd.f32 %v1323_v58, %v5281_v34  ;;  %v1524_v45 = vadd.f32 %v1523_v39, %v1427_v6  ;;  %v5558_v28 = vpop.f32.mrf.mxu3  ;;  %v1443_v39 = vmul.f32 %v5317_v7, %v5317_v7 }
 0x1d1   : > { %1259 = vst [vmem:[#allocation2 + $0x2f0] sm:$0xff] %v5558_v28 }
 0x1d2   : > { %v1325_v53 = vadd.f32 %v1324_v41, %v5294_v42  ;;  %v1525_v33 = vadd.f32 %v1524_v45, %v1428_v3  ;;  %v1432_v42 = vmul.f32 %v5333_v23, %v5333_v23  ;;  %v9313_v41 = vld [vmem:[#allocation7_spill] sm:$0xff] }
 0x1d4   : > { %v1326_v20 = vadd.f32 %v1325_v53, %v5307_v60  ;;  %v1526_v2 = vadd.f32 %v1525_v33, %v1429_v11  ;;  %v1433_v60 = vmul.f32 %v5346_v44, %v5346_v44  ;;  %v9314_v53 = vld [vmem:[#allocation8_spill] sm:$0xff] }
 0x1d6   : > { %v1327_v34 = vadd.f32 %v1326_v20, %v5320_v8  ;;  %v1527_v55 = vadd.f32 %v1526_v2, %v1430_v10  ;;  %v9315_v20 = vld [vmem:[#allocation9_spill] sm:$0xff] }
 0x1d7   : > { %v1446_v2 = vmul.f32 %v9315_v20, %v9315_v20 }
 0x1d8   : > { %v1328_v36 = vadd.f32 %v1327_v34, %v5333_v23  ;;  %v1528_v26 = vadd.f32 %v1527_v55, %v1431_v21  ;;  %v5573_v0 = vpop.f32.mrf.mxu3  ;;  %v9316_v34 = vld [vmem:[#allocation10_spill] sm:$0xff] }
 0x1d9   : > { %1260 = vst [vmem:[#allocation2 + $0x2f8] sm:$0xff] %v5573_v0  ;;  %v1447_v55 = vmul.f32 %v9316_v34, %v9316_v34 }
 0x1da   : > { %v1529_v49 = vadd.f32 %v1528_v26, %v1432_v42  ;;  %v1329_v27 = vadd.f32 %v1328_v36, %v5346_v44  ;;  %v9317_v26 = vld [vmem:[#allocation11_spill] sm:$0xff] }
 0x1dc   : > { %v1330_v8 = vadd.f32 %v1329_v27, %v5359_v63  ;;  %v1530_v59 = vadd.f32 %v1529_v49, %v1433_v60  ;;  %v1437_v63 = vmul.f32 %v5390_v35, %v5390_v35  ;;  %v1448_v60 = vmul.f32 %v9317_v26, %v9317_v26 }
 0x1de   : > { %v1331_v23 = vadd.f32 %v1330_v8, %v5372_v24  ;;  %v1531_v38 = vadd.f32 %v1530_v59, %v1434_v17  ;;  %v1439_v24 = vmul.f32 %v5426_v56, %v5426_v56  ;;  %v9318_v17 = vld [vmem:[#allocation12_spill] sm:$0xff] }
 0x1df   : > { %v1449_v8 = vmul.f32 %v9318_v17, %v9318_v17 }
 0x1e0   : > { %v1332_v44 = vadd.f32 %v1331_v23, %v5381_v47  ;;  %v1532_v16 = vadd.f32 %v1531_v38, %v1435_v9  ;;  %v5590_v14 = vpop.f32.mrf.mxu3  ;;  %v1450_v23 = vmul.f32 %v5399_v1, %v5399_v1 }
 0x1e1   : > { %1261 = vst [vmem:[#allocation2 + $0x300] sm:$0xff] %v5590_v14 }
 0x1e2   : > { %v1333_v48 = vadd.f32 %v1332_v44, %v5390_v35  ;;  %v1533_v15 = vadd.f32 %v1532_v16, %v1436_v5  ;;  %v1440_v35 = vmul.f32 %v5278_v31, %v5278_v31  ;;  %v1451_v16 = vmul.f32 %v5420_v46, %v5420_v46 }
 0x1e4   : > { %v1334_v25 = vadd.f32 %v1333_v48, %v5405_v61  ;;  %v1534_v22 = vadd.f32 %v1533_v15, %v1437_v63 }
 0x1e6   : > { %v1335_v47 = vadd.f32 %v1334_v25, %v5426_v56  ;;  %v1535_v37 = vadd.f32 %v1534_v22, %v1438_v18  ;;  %v1452_v18 = vmul.f32 %v5438_v51, %v5438_v51  ;;  %v1453_v22 = vmul.f32 %v5453_v13, %v5453_v13 }
 0x1e8   : > { %v1336_v52 = vadd.f32 %v1335_v47, %v5278_v31  ;;  %v1536_v43 = vadd.f32 %v1535_v37, %v1439_v24  ;;  %v5603_v58 = vpop.f32.mrf.mxu3  ;;  %v1454_v37 = vmul.f32 %v5468_v62, %v5468_v62 }
 0x1e9   : > { %1262 = vst [vmem:[#allocation2 + $0x308] sm:$0xff] %v5603_v58 }
 0x1ea   : > { %v1337_v50 = vadd.f32 %v1336_v52, %v5291_v40  ;;  %v1537_v61 = vadd.f32 %v1536_v43, %v1440_v35  ;;  %v1444_v40 = vmul.f32 %v9313_v41, %v9313_v41  ;;  %v1455_v52 = vmul.f32 %v5483_v12, %v5483_v12 }
 0x1ec   : > { %v1338_v56 = vadd.f32 %v1337_v50, %v5304_v57  ;;  %v1538_v6 = vadd.f32 %v1537_v61, %v1441_v30  ;;  %v1445_v57 = vmul.f32 %v9314_v53, %v9314_v53  ;;  %v1456_v30 = vmul.f32 %v5498_v29, %v5498_v29 }
 0x1ed   : > { %v1457_v61 = vmul.f32 %v5513_v4, %v5513_v4 }
 0x1ee   : > { %v1339_v31 = vadd.f32 %v1338_v56, %v5317_v7  ;;  %v1539_v3 = vadd.f32 %v1538_v6, %v1442_v32  ;;  %v1458_v56 = vmul.f32 %v5528_v54, %v5528_v54 }
 0x1f0   : > { %v1340_v45 = vadd.f32 %v1339_v31, %v9313_v41  ;;  %v1540_v11 = vadd.f32 %v1539_v3, %v1443_v39  ;;  %v1459_v39 = vmul.f32 %v5543_v19, %v5543_v19  ;;  %v1460_v3 = vmul.f32 %v5558_v28, %v5558_v28 }
 0x1f2   : > { %v1341_v33 = vadd.f32 %v1340_v45, %v9314_v53  ;;  %v1541_v10 = vadd.f32 %v1540_v11, %v1444_v40  ;;  %v1461_v40 = vmul.f32 %v5573_v0, %v5573_v0  ;;  %v1462_v11 = vmul.f32 %v5590_v14, %v5590_v14 }
 0x1f4   : > { %v1342_v7 = vadd.f32 %v1341_v33, %v9315_v20  ;;  %v1542_v21 = vadd.f32 %v1541_v10, %v1445_v57 }
 0x1f6   : > { %v1343_v42 = vadd.f32 %v1342_v7, %v9316_v34  ;;  %v1543_v36 = vadd.f32 %v1542_v21, %v1446_v2 }
 0x1f8   : > { %v1344_v49 = vadd.f32 %v1343_v42, %v9317_v26  ;;  %v1544_v27 = vadd.f32 %v1543_v36, %v1447_v55  ;;  %v4685_v26 = vmov 0.0  }
 0x1f9   : > { %1587 = vst [vmem:[#allocation3] sm:$0xff] %v4685_v26 }
 0x1fa   : > { %v1345_v59 = vadd.f32 %v1344_v49, %v9318_v17  ;;  %v1545_v9 = vadd.f32 %v1544_v27, %v1448_v60  ;;  %1588 = vst [vmem:[#allocation3 + $0x8] sm:$0xff] %v4685_v26 }
 0x1fb   : > { %1589 = vst [vmem:[#allocation3 + $0x10] sm:$0xff] %v4685_v26 }
 0x1fc   : > { %v1346_v38 = vadd.f32 %v1345_v59, %v5399_v1  ;;  %v1546_v5 = vadd.f32 %v1545_v9, %v1449_v8  ;;  %1590 = vst [vmem:[#allocation3 + $0x18] sm:$0xff] %v4685_v26 }
 0x1fd   : > { %1591 = vst [vmem:[#allocation3 + $0x20] sm:$0xff] %v4685_v26 }
 0x1fe   : > { %v1347_v44 = vadd.f32 %v1346_v38, %v5420_v46  ;;  %v1547_v63 = vadd.f32 %v1546_v5, %v1450_v23  ;;  %1592 = vst [vmem:[#allocation3 + $0x28] sm:$0xff] %v4685_v26 }
 0x1ff   : > { %1593 = vst [vmem:[#allocation3 + $0x30] sm:$0xff] %v4685_v26 }
 0x200   : > { %v1548_v48 = vadd.f32 %v1547_v63, %v1451_v16  ;;  %v1348_v15 = vadd.f32 %v1347_v44, %v5438_v51  ;;  %1594 = vst [vmem:[#allocation3 + $0x38] sm:$0xff] %v4685_v26  ;;  %v1582_v44 = vld [vmem:[%s452_s20] sm:$0x1] }
 0x201   : > { %1595 = vst [vmem:[#allocation3 + $0x40] sm:$0xff] %v4685_v26 }
 0x202   : > { %v1549_v24 = vadd.f32 %v1548_v48, %v1452_v18  ;;  %v1349_v25 = vadd.f32 %v1348_v15, %v5453_v13  ;;  %1596 = vst [vmem:[#allocation3 + $0x48] sm:$0xff] %v4685_v26  ;;  %v1584_v15 = vld [vmem:[%s455_s30] sm:$0x1] }
 0x203   : > { %1597 = vst [vmem:[#allocation3 + $0x50] sm:$0xff] %v4685_v26 }
 0x204   : > { %v1550_v1 = vadd.f32 %v1549_v24, %v1453_v22  ;;  %v1350_v47 = vadd.f32 %v1349_v25, %v5468_v62  ;;  %1598 = vst [vmem:[#allocation3 + $0x58] sm:$0xff] %v4685_v26  ;;  %v1716_v22 = vld [vmem:[#allocation2 + $0x8] sm:$0x3f] }
 0x205   : > { %1599 = vst [vmem:[#allocation3 + $0x60] sm:$0xff] %v4685_v26 }
 0x206   : > { %v1551_v46 = vadd.f32 %v1550_v1, %v1454_v37  ;;  %v1351_v35 = vadd.f32 %v1350_v47, %v5483_v12  ;;  %1600 = vst [vmem:[#allocation3 + $0x68] sm:$0xff] %v4685_v26  ;;  %v4644_v1 = vld [vmem:[#allocation2] sm:$0xff]  ;;  %v1730_v37 = vld [vmem:[#allocation2 + $0xe] sm:$0xff] }
 0x207   : > { %1601 = vst [vmem:[#allocation3 + $0x70] sm:$0xff] %v4685_v26 }
 0x208   : > { %v1552_v43 = vadd.f32 %v1551_v46, %v1455_v52  ;;  %v1352_v51 = vadd.f32 %v1351_v35, %v5498_v29  ;;  %1602 = vst [vmem:[#allocation3 + $0x78] sm:$0xff] %v4685_v26  ;;  %v1731_v35 = vld [vmem:[#allocation2 + $0x16] sm:$0x3f] }
 0x209   : > { %1603 = vst [vmem:[#allocation3 + $0x80] sm:$0xff] %v4685_v26 }
 0x20a   : > { %v1553_v50 = vadd.f32 %v1552_v43, %v1456_v30  ;;  %v1353_v13 = vadd.f32 %v1352_v51, %v5513_v4  ;;  %1604 = vst [vmem:[#allocation3 + $0x88] sm:$0xff] %v4685_v26  ;;  %v1741_v51 = vld [vmem:[#allocation2 + $0x1c] sm:$0xff] }
 0x20b   : > { %1605 = vst [vmem:[#allocation3 + $0x90] sm:$0xff] %v4685_v26 }
 0x20c   : > { %v1554_v32 = vadd.f32 %v1553_v50, %v1457_v61  ;;  %v1354_v62 = vadd.f32 %v1353_v13, %v5528_v54  ;;  %1606 = vst [vmem:[#allocation3 + $0x98] sm:$0xff] %v4685_v26  ;;  %v1742_v13 = vld [vmem:[#allocation2 + $0x24] sm:$0x3f] }
 0x20d   : > { %1607 = vst [vmem:[#allocation3 + $0xa0] sm:$0xff] %v4685_v26 }
 0x20e   : > { %v1555_v6 = vadd.f32 %v1554_v32, %v1458_v56  ;;  %v1355_v12 = vadd.f32 %v1354_v62, %v5543_v19  ;;  %v1463_v19 = vmul.f32 %v5603_v58, %v5603_v58  ;;  %1608 = vst [vmem:[#allocation3 + $0xa8] sm:$0xff] %v4685_v26  ;;  %v1752_v62 = vld [vmem:[#allocation2 + $0x2a] sm:$0xff] }
 0x20f   : > { %1609 = vst [vmem:[#allocation3 + $0xb0] sm:$0xff] %v4685_v26 }
 0x210   : > { %v1556_v31 = vadd.f32 %v1555_v6, %v1459_v39  ;;  %v1356_v29 = vadd.f32 %v1355_v12, %v5558_v28  ;;  %1610 = vst [vmem:[#allocation3 + $0xb8] sm:$0xff] %v4685_v26  ;;  %v1753_v12 = vld [vmem:[#allocation2 + $0x32] sm:$0x3f] }
 0x211   : > { %1611 = vst [vmem:[#allocation3 + $0xc0] sm:$0xff] %v4685_v26 }
 0x212   : > { %v1557_v41 = vadd.f32 %v1556_v31, %v1460_v3  ;;  %v1357_v4 = vadd.f32 %v1356_v29, %v5573_v0  ;;  %1612 = vst [vmem:[#allocation3 + $0xc8] sm:$0xff] %v4685_v26 }
 0x213   : > { %1613 = vst [vmem:[#allocation3 + $0xd0] sm:$0xff] %v4685_v26 }
 0x214   : > { %v1558_v45 = vadd.f32 %v1557_v41, %v1461_v40  ;;  %v1358_v54 = vadd.f32 %v1357_v4, %v5590_v14  ;;  %1614 = vst [vmem:[#allocation3 + $0xd8] sm:$0xff] %v4685_v26  ;;  %v1764_v40 = vld [vmem:[#allocation2 + $0x40] sm:$0x3f] }
 0x215   : > { %1615 = vst [vmem:[#allocation3 + $0xe0] sm:$0xff] %v4685_v26 }
 0x216   : > { %v1559_v53 = vadd.f32 %v1558_v45, %v1462_v11  ;;  %v1359_v57 = vadd.f32 %v1358_v54, %v5603_v58  ;;  %1616 = vst [vmem:[#allocation3 + $0xe8] sm:$0xff] %v4685_v26  ;;  %v4645_v11 = vld [vmem:[#allocation2 + $0x38] sm:$0xff] }
 0x217   : > { %1617 = vst [vmem:[#allocation3 + $0xf0] sm:$0xff] %v4685_v26 }
 0x218   : > { %v1360_v33 = vrot.slane %v1359_v57, 4  ;;  %v1560_v28 = vadd.f32 %v1559_v53, %v1463_v19  ;;  %1618 = vst [vmem:[#allocation3 + $0xf8] sm:$0xff] %v4685_v26  ;;  %v1774_v53 = vld [vmem:[#allocation2 + $0x46] sm:$0xff] }
 0x219   : > { %1619 = vst [vmem:[#allocation3 + $0x100] sm:$0xff] %v4685_v26 }
 0x21a   : > { %v1361_v10 = vadd.f32 %v1360_v33, %v1359_v57  ;;  %v1561_v20 = vrot.slane %v1560_v28, 4  ;;  %1620 = vst [vmem:[#allocation3 + $0x108] sm:$0xff] %v4685_v26 }
 0x21b   : > { %1621 = vst [vmem:[#allocation3 + $0x110] sm:$0xff] %v4685_v26 }
 0x21c   : > { %v1362_v2 = vrot.slane %v1361_v10, 2  ;;  %v1562_v7 = vadd.f32 %v1561_v20, %v1560_v28  ;;  %1622 = vst [vmem:[#allocation3 + $0x118] sm:$0xff] %v4685_v26 }
 0x21d   : > { %1623 = vst [vmem:[#allocation3 + $0x120] sm:$0xff] %v4685_v26 }
 0x21e   : > { %v1363_v21 = vadd.f32 %v1362_v2, %v1361_v10  ;;  %v1563_v0 = vrot.slane %v1562_v7, 2  ;;  %1624 = vst [vmem:[#allocation3 + $0x128] sm:$0xff] %v4685_v26  ;;  %v1775_v10 = vld [vmem:[#allocation2 + $0x4e] sm:$0x3f] }
 0x21f   : > { %1625 = vst [vmem:[#allocation3 + $0x130] sm:$0xff] %v4685_v26 }
 0x220   : > { %v1364_v34 = vrot.slane %v1363_v21, 1  ;;  %v1564_v55 = vadd.f32 %v1563_v0, %v1562_v7  ;;  %1626 = vst [vmem:[#allocation3 + $0x138] sm:$0xff] %v4685_v26 }
 0x221   : > { %1627 = vst [vmem:[#allocation3 + $0x140] sm:$0xff] %v4685_v26 }
 0x222   : > { %v1365_v42 = vadd.f32 %v1364_v34, %v1363_v21  ;;  %v1565_v36 = vrot.slane %v1564_v55, 1  ;;  %1628 = vst [vmem:[#allocation3 + $0x148] sm:$0xff] %v4685_v26  ;;  %v1785_v21 = vld [vmem:[#allocation2 + $0x54] sm:$0xff] }
 0x223   : > { %1629 = vst [vmem:[#allocation3 + $0x150] sm:$0xff] %v4685_v26 }
 0x224   : > { %v1566_v14 = vadd.f32 %v1565_v36, %v1564_v55  ;;  %v1567_v60 = vmul.f32 0.0012755102, %v1365_v42  ;;  %1630 = vst [vmem:[#allocation3 + $0x158] sm:$0xff] %v4685_v26  ;;  %v1786_v42 = vld [vmem:[#allocation2 + $0x5c] sm:$0x3f] }
 0x225   : > { %1631 = vst [vmem:[#allocation3 + $0x160] sm:$0xff] %v4685_v26 }
 0x226   : > { %v1568_v58 = vmul.f32 0.0012755102, %v1566_v14  ;;  %v1569_v49 = vmul.f32 %v1567_v60, %v1567_v60  ;;  %1632 = vst [vmem:[#allocation3 + $0x168] sm:$0xff] %v4685_v26 }
 0x227   : > { %1633 = vst [vmem:[#allocation3 + $0x170] sm:$0xff] %v4685_v26 }
 0x228   : > { %v1570_v27 = vsub.f32 %v1568_v58, %v1569_v49  ;;  %1634 = vst [vmem:[#allocation3 + $0x178] sm:$0xff] %v4685_v26 }
 0x229   : > { %1635 = vst [vmem:[#allocation3 + $0x180] sm:$0xff] %v4685_v26 }
 0x22a   : > { %v1571_v17 = vadd.f32 1e-05, %v1570_v27  ;;  %1636 = vst [vmem:[#allocation3 + $0x188] sm:$0xff] %v4685_v26 }
 0x22b   : > { %1637 = vst [vmem:[#allocation3 + $0x190] sm:$0xff] %v4685_v26 }
 0x22c   : > { %4642 = vrsqrt.f32 %v1571_v17  ;;  %vm1578_vm2 = vweird.f32 %v1571_v17  ;;  %1638 = vst [vmem:[#allocation3 + $0x198] sm:$0xff] %v4685_v26 }
 0x22d   : > { %1639 = vst [vmem:[#allocation3 + $0x1a0] sm:$0xff] %v4685_v26 }
 0x22e   : > { %1640 = vst [vmem:[#allocation3 + $0x1a8] sm:$0xff] %v4685_v26 }
 0x22f   : > { %1641 = vst [vmem:[#allocation3 + $0x1b0] sm:$0xff] %v4685_v26 }
 0x230   : > { %1642 = vst [vmem:[#allocation3 + $0x1b8] sm:$0xff] %v4685_v26 }
 0x231   : > { %1643 = vst [vmem:[#allocation3 + $0x1c0] sm:$0xff] %v4685_v26 }
 0x232   : > { %v4643_v8 = vpop.eup %4642  ;;  %1644 = vst [vmem:[#allocation3 + $0x1c8] sm:$0xff] %v4685_v26 }
 0x233   : > { %v1573_v59 = vmul.f32 %v4643_v8, %v1571_v17  ;;  %vm1579_vm1 = vweird.f32 %v4643_v8  ;;  %1645 = vst [vmem:[#allocation3 + $0x1d0] sm:$0xff] %v4685_v26  ;;  %v1797_v17 = vld [vmem:[#allocation2 + $0x6a] sm:$0x3f] }
 0x234   : > { %vm1580_vm3 = vmor %vm1578_vm2, %vm1579_vm1  ;;  %1646 = vst [vmem:[#allocation3 + $0x1d8] sm:$0xff] %v4685_v26 }
 0x235   : > { %v1574_v9 = vmul.f32 %v4643_v8, %v1573_v59  ;;  %1647 = vst [vmem:[#allocation3 + $0x1e0] sm:$0xff] %v4685_v26 }
 0x236   : > { %1648 = vst [vmem:[#allocation3 + $0x1e8] sm:$0xff] %v4685_v26 }
 0x237   : > { %v1575_v23 = vmul.f32 0.5, %v1574_v9  ;;  %1649 = vst [vmem:[#allocation3 + $0x1f0] sm:$0xff] %v4685_v26 }
 0x238   : > { %1650 = vst [vmem:[#allocation3 + $0x1f8] sm:$0xff] %v4685_v26 }
 0x239   : > { %v1576_v38 = vsub.f32 1.5, %v1575_v23  ;;  %1651 = vst [vmem:[#allocation3 + $0x200] sm:$0xff] %v4685_v26 }
 0x23a   : > { %1652 = vst [vmem:[#allocation3 + $0x208] sm:$0xff] %v4685_v26 }
 0x23b   : > { %v1577_v5 = vmul.f32 %v4643_v8, %v1576_v38  ;;  %1653 = vst [vmem:[#allocation3 + $0x210] sm:$0xff] %v4685_v26 }
 0x23c   : > { %1654 = vst [vmem:[#allocation3 + $0x218] sm:$0xff] %v4685_v26 }
 0x23d   : > { %v1581_v16 = vsel %vm1580_vm3, %v4643_v8, %v1577_v5  ;;  %1655 = vst [vmem:[#allocation3 + $0x220] sm:$0xff] %v4685_v26 }
 0x23e   : > { %v5704_v63 = vmul.f32 %v1582_v44, %v1581_v16  ;;  %1656 = vst [vmem:[#allocation3 + $0x228] sm:$0xff] %v4685_v26  ;;  %v1808_v44 = vld [vmem:[#allocation2 + $0x78] sm:$0x3f] }
 0x23f   : > { %1657 = vst [vmem:[#allocation3 + $0x230] sm:$0xff] %v4685_v26 }
 0x240   : > { %v5709_v48 = vmul.f32 %v5704_v63, %v1567_v60  ;;  %1658 = vst [vmem:[#allocation3 + $0x238] sm:$0xff] %v4685_v26  ;;  %v5799_v24 = vperm.slane %v5704_v63, 0  ;;  %v1796_v60 = vld [vmem:[#allocation2 + $0x62] sm:$0xff] }
 0x241   : > { %1659 = vst [vmem:[#allocation3 + $0x240] sm:$0xff] %v4685_v26 }
 0x242   : > { %1660 = vst [vmem:[#allocation3 + $0x248] sm:$0xff] %v4685_v26  ;;  %v1586_v18 = vsub.f32 %v1584_v15, %v5709_v48  ;;  %v1718_v47 = vmul.f32 %v4644_v1, %v5799_v24  ;;  %v1719_v46 = vmul.f32 %v5799_v24, %v1716_v22  ;;  %v1732_v43 = vmul.f32 %v1730_v37, %v5799_v24  ;;  %v4646_v48 = vld [vmem:[#allocation2 + $0x70] sm:$0xff]  ;;  %v1819_v37 = vld [vmem:[#allocation2 + $0x86] sm:$0x3f] }
 0x243   : > { %1661 = vst [vmem:[#allocation3 + $0x250] sm:$0xff] %v4685_v26  ;;  %v1733_v50 = vmul.f32 %v1731_v35, %v5799_v24  ;;  %v1743_v32 = vmul.f32 %v1741_v51, %v5799_v24  ;;  %v1744_v6 = vmul.f32 %v1742_v13, %v5799_v24  ;;  %v1754_v29 = vmul.f32 %v1752_v62, %v5799_v24  ;;  %v1830_v13 = vld [vmem:[#allocation2 + $0x94] sm:$0x3f] }
 0x244   : > { %1662 = vst [vmem:[#allocation3 + $0x258] sm:$0xff] %v4685_v26  ;;  %v5803_v25 = vperm.slane %v1586_v18, 0  ;;  %v1755_v4 = vmul.f32 %v1753_v12, %v5799_v24  ;;  %v1765_v19 = vmul.f32 %v4645_v11, %v5799_v24  ;;  %v1766_v28 = vmul.f32 %v1764_v40, %v5799_v24  ;;  %v1818_v18 = vld [vmem:[#allocation2 + $0x7e] sm:$0xff] }
 0x245   : > { %1663 = vst [vmem:[#allocation3 + $0x260] sm:$0xff] %v4685_v26  ;;  %v1776_v7 = vmul.f32 %v1774_v53, %v5799_v24  ;;  %v1777_v55 = vmul.f32 %v1775_v10, %v5799_v24  ;;  %v1787_v14 = vmul.f32 %v1785_v21, %v5799_v24  ;;  %v1788_v27 = vmul.f32 %v1786_v42, %v5799_v24  ;;  %v4647_v53 = vld [vmem:[#allocation2 + $0xa8] sm:$0xff] }
 0x246   : > { %1664 = vst [vmem:[#allocation3 + $0x268] sm:$0xff] %v4685_v26  ;;  %v1723_v52 = vadd.f32 %v5803_v25, %v1718_v47  ;;  %v1724_v30 = vadd.f32 %v5803_v25, %v1719_v46  ;;  %v1734_v61 = vadd.f32 %v1732_v43, %v5803_v25  ;;  %v1735_v56 = vadd.f32 %v1733_v50, %v5803_v25  ;;  %v1829_v43 = vld [vmem:[#allocation2 + $0x8c] sm:$0xff] }
 0x247   : > { %1665 = vst [vmem:[#allocation3 + $0x270] sm:$0xff] %v4685_v26  ;;  %v1745_v31 = vadd.f32 %v1743_v32, %v5803_v25  ;;  %v1746_v41 = vadd.f32 %v1744_v6, %v5803_v25  ;;  %v1756_v54 = vadd.f32 %v1754_v29, %v5803_v25  ;;  %v1757_v33 = vadd.f32 %v1755_v4, %v5803_v25 }
 0x248   : > { %1666 = vst [vmem:[#allocation3 + $0x278] sm:$0xff] %v4685_v26  ;;  %v1725_v39 = vmax.f32 %v1723_v52, 0.0  ;;  %v1726_v3 = vmax.f32 %v1724_v30, 0.0  ;;  %v1736_v45 = vmax.f32 %v1734_v61, 0.0  ;;  %v1737_v57 = vmax.f32 %v1735_v56, 0.0  ;;  %v1840_v56 = vld [vmem:[#allocation2 + $0x9a] sm:$0xff] }
 0x249   : > { %1667 = vst [vmem:[#allocation3 + $0x280] sm:$0xff] %v4685_v26  ;;  %v1747_v20 = vmax.f32 %v1745_v31, 0.0  ;;  %v1767_v2 = vadd.f32 %v1765_v19, %v5803_v25  ;;  %v1748_v0 = vmax.f32 %v1746_v41, 0.0  ;;  %v1768_v34 = vadd.f32 %v1766_v28, %v5803_v25  ;;  %v1841_v31 = vld [vmem:[#allocation2 + $0xa2] sm:$0x3f] }
 0x24a   : > { %1668 = vst [vmem:[#allocation3 + $0x288] sm:$0xff] %v4685_v26  ;;  %v1758_v36 = vmax.f32 %v1756_v54, 0.0  ;;  %v1759_v58 = vmax.f32 %v1757_v33, 0.0  ;;  %v1779_v49 = vadd.f32 %v1777_v55, %v5803_v25  ;;  %v1789_v59 = vadd.f32 %v1787_v14, %v5803_v25  ;;  %v1852_v54 = vld [vmem:[#allocation2 + $0xb0] sm:$0x3f]  ;;  %v1862_v33 = vld [vmem:[#allocation2 + $0xb6] sm:$0xff] }
 0x24b   : > { %1669 = vst [vmem:[#allocation3 + $0x290] sm:$0xff] %v4685_v26  ;;  %v1769_v8 = vmax.f32 %v1767_v2, 0.0  ;;  %v1798_v9 = vmul.f32 %v1796_v60, %v5799_v24  ;;  %v1770_v23 = vmax.f32 %v1768_v34, 0.0  ;;  %v1790_v38 = vadd.f32 %v1788_v27, %v5803_v25  ;;  %v1863_v2 = vld [vmem:[#allocation2 + $0xbe] sm:$0x3f]  ;;  %v1873_v34 = vld [vmem:[#allocation2 + $0xc4] sm:$0xff] }
 0x24c   : > { %1670 = vst [vmem:[#allocation3 + $0x298] sm:$0xff] %v4685_v26  ;;  %v1799_v5 = vmul.f32 %v1797_v17, %v5799_v24  ;;  %v1809_v15 = vmul.f32 %v4646_v48, %v5799_v24  ;;  %v1781_v22 = vmax.f32 %v1779_v49, 0.0  ;;  %v1810_v47 = vmul.f32 %v1808_v44, %v5799_v24  ;;  %v1884_v49 = vld [vmem:[#allocation2 + $0xd2] sm:$0xff] }
 0x24d   : > { %1671 = vst [vmem:[#allocation3 + $0x2a0] sm:$0xff] %v4685_v26  ;;  %v1800_v63 = vadd.f32 %v1798_v9, %v5803_v25  ;;  %v1791_v46 = vmax.f32 %v1789_v59, 0.0  ;;  %v1820_v52 = vmul.f32 %v1818_v18, %v5799_v24  ;;  %v1792_v51 = vmax.f32 %v1790_v38, 0.0  ;;  %v1885_v59 = vld [vmem:[#allocation2 + $0xda] sm:$0x3f]  ;;  %v4648_v18 = vld [vmem:[#allocation2 + $0xe0] sm:$0xff] }
 0x24e   : > { %1672 = vst [vmem:[#allocation3 + $0x2a8] sm:$0xff] %v4685_v26  ;;  %v1801_v1 = vadd.f32 %v1799_v5, %v5803_v25  ;;  %v1811_v35 = vadd.f32 %v1809_v15, %v5803_v25  ;;  %v1812_v30 = vadd.f32 %v1810_v47, %v5803_v25  ;;  %v1821_v50 = vmul.f32 %v1819_v37, %v5799_v24 }
 0x24f   : > { %1673 = vst [vmem:[#allocation3 + $0x2b0] sm:$0xff] %v4685_v26  ;;  %v1802_v61 = vmax.f32 %v1800_v63, 0.0  ;;  %v1822_v32 = vadd.f32 %v1820_v52, %v5803_v25  ;;  %v1831_v62 = vmul.f32 %v1829_v43, %v5799_v24  ;;  %v1842_v41 = vmul.f32 %v1840_v56, %v5799_v24  ;;  %v1896_v63 = vld [vmem:[#allocation2 + $0xe8] sm:$0x3f] }
 0x250   : > { %1674 = vst [vmem:[#allocation3 + $0x2b8] sm:$0xff] %v4685_v26  ;;  %v1803_v6 = vmax.f32 %v1801_v1, 0.0  ;;  %v1823_v12 = vadd.f32 %v1821_v50, %v5803_v25  ;;  %v1813_v29 = vmax.f32 %v1811_v35, 0.0  ;;  %v1814_v4 = vmax.f32 %v1812_v30, 0.0  ;;  %v1906_v1 = vld [vmem:[#allocation2 + $0xee] sm:$0xff]  ;;  %v1917_v30 = vld [vmem:[#allocation2 + $0xfc] sm:$0xff] }
 0x251   : > { %1675 = vst [vmem:[#allocation3 + $0x2c0] sm:$0xff] %v4685_v26  ;;  %v1824_v11 = vmax.f32 %v1822_v32, 0.0  ;;  %v1844_v19 = vadd.f32 %v1842_v41, %v5803_v25  ;;  %v1886_v38 = vmul.f32 %v1884_v49, %v5799_v24  ;;  %v1907_v35 = vld [vmem:[#allocation2 + $0xf6] sm:$0x3f]  ;;  %v1918_v32 = vld [vmem:[#allocation2 + $0x104] sm:$0x3f] }
 0x252   : > { %1676 = vst [vmem:[#allocation3 + $0x2c8] sm:$0xff] %v4685_v26  ;;  %v1825_v28 = vmax.f32 %v1823_v12, 0.0  ;;  %v1928_v12 = vld [vmem:[#allocation2 + $0x10a] sm:$0xff] }
 0x253   : > { %1677 = vst [vmem:[#allocation3 + $0x2d0] sm:$0xff] %v4685_v26  ;;  %v1846_v14 = vmax.f32 %v1844_v19, 0.0  ;;  %v1888_v15 = vadd.f32 %v1886_v38, %v5803_v25  ;;  %v1940_v19 = vld [vmem:[#allocation2 + $0x120] sm:$0x3f] }
 0x254   : > { %1678 = vst [vmem:[#allocation3 + $0x2d8] sm:$0xff] %v4685_v26 }
 0x255   : > { %1679 = vst [vmem:[#allocation3 + $0x2e0] sm:$0xff] %v4685_v26 }
 0x256   : > { %1680 = vst [vmem:[#allocation3 + $0x2e8] sm:$0xff] %v4685_v26 }
 0x257   : > { %1683 = vst [vmem:[#allocation3 + $0x300] sm:$0xff] %v4685_v26 }
 0x258   : > { %1684 = vst [vmem:[#allocation3 + $0x308] sm:$0xff] %v4685_v26 }
 0x259   : > { %1685 = vst [vmem:[#allocation3 + $0x310] sm:$0xff] %v4685_v26 }
 0x25a   : > { %1686 = vst [vmem:[#allocation3 + $0x318] sm:$0xff] %v4685_v26 }
 0x25b   : > { %1687 = vst [vmem:[#allocation3 + $0x320] sm:$0xff] %v4685_v26 }
 0x25c   : > { %1688 = vst [vmem:[#allocation3 + $0x328] sm:$0xff] %v4685_v26 }
 0x25d   : > { %1689 = vst [vmem:[#allocation3 + $0x330] sm:$0xff] %v4685_v26 }
 0x25e   : > { %1690 = vst [vmem:[#allocation3 + $0x338] sm:$0xff] %v4685_v26 }
 0x25f   : > { %1691 = vst [vmem:[#allocation3 + $0x340] sm:$0xff] %v4685_v26 }
 0x260   : > { %1692 = vst [vmem:[#allocation3 + $0x348] sm:$0xff] %v4685_v26 }
 0x261   : > { %1693 = vst [vmem:[#allocation3 + $0x350] sm:$0xff] %v4685_v26 }
 0x262   : > { %1694 = vst [vmem:[#allocation3 + $0x358] sm:$0xff] %v4685_v26 }
 0x263   : > { %1695 = vst [vmem:[#allocation3 + $0x360] sm:$0xff] %v4685_v26 }
 0x264   : > { %1696 = vst [vmem:[#allocation3 + $0x368] sm:$0xff] %v4685_v26 }
 0x265   : > { %1697 = vst [vmem:[#allocation3 + $0x370] sm:$0xff] %v4685_v26 }
 0x266   : > { %1698 = vst [vmem:[#allocation3 + $0x378] sm:$0xff] %v4685_v26 }
 0x267   : > { %1699 = vst [vmem:[#allocation3 + $0x380] sm:$0xff] %v4685_v26 }
 0x268   : > { %1700 = vst [vmem:[#allocation3 + $0x388] sm:$0xff] %v4685_v26 }
 0x269   : > { %1701 = vst [vmem:[#allocation3 + $0x390] sm:$0xff] %v4685_v26 }
 0x26a   : > { %1702 = vst [vmem:[#allocation3 + $0x398] sm:$0xff] %v4685_v26 }
 0x26b   : > { %1703 = vst [vmem:[#allocation3 + $0x3a0] sm:$0xff] %v4685_v26 }
 0x26c   : > { %1704 = vst [vmem:[#allocation3 + $0x3a8] sm:$0xff] %v4685_v26 }
 0x26d   : > { %1705 = vst [vmem:[#allocation3 + $0x3b0] sm:$0xff] %v4685_v26 }
 0x26e   : > { %1706 = vst [vmem:[#allocation3 + $0x3b8] sm:$0xff] %v4685_v26 }
 0x26f   : > { %1707 = vst [vmem:[#allocation3 + $0x3c0] sm:$0xff] %v4685_v26 }
 0x270   : > { %1708 = vst [vmem:[#allocation3 + $0x3c8] sm:$0xff] %v4685_v26 }
 0x271   : > { %1709 = vst [vmem:[#allocation3 + $0x3d0] sm:$0xff] %v4685_v26 }
 0x272   : > { %1710 = vst [vmem:[#allocation3 + $0x3d8] sm:$0xff] %v4685_v26 }
 0x273   : > { %1711 = vst [vmem:[#allocation3 + $0x3e0] sm:$0xff] %v4685_v26 }
 0x274   : > { %1712 = vst [vmem:[#allocation3 + $0x3e8] sm:$0xff] %v4685_v26  ;;  %v1778_v26 = vadd.f32 %v1776_v7, %v5803_v25 }
 0x275   : > { %1728 = vst [vmem:[#allocation3 + $0x11] sm:$0xff] %v1725_v39  ;;  %v1832_v39 = vmul.f32 %v1830_v13, %v5799_v24 }
 0x276   : > { %1729 = vst [vmem:[#allocation3 + $0x19] sm:$0x3f] %v1726_v3  ;;  %v1780_v16 = vmax.f32 %v1778_v26, 0.0  ;;  %v1833_v3 = vadd.f32 %v1831_v62, %v5803_v25  ;;  %v1874_v26 = vld [vmem:[#allocation2 + $0xcc] sm:$0x3f]  ;;  %v1890_v62 = vmax.f32 %v1888_v15, 0.0 }
 0x277   : > { %1739 = vst [vmem:[#allocation3 + $0x21] sm:$0xff] %v1736_v45  ;;  %v1834_v40 = vadd.f32 %v1832_v39, %v5803_v25  ;;  %v1843_v45 = vmul.f32 %v1841_v31, %v5799_v24  ;;  %v1984_v15 = vld [vmem:[#allocation2 + $0x158] sm:$0x3f] }
 0x278   : > { %1740 = vst [vmem:[#allocation3 + $0x29] sm:$0x3f] %v1737_v57  ;;  %v1853_v57 = vmul.f32 %v4647_v53, %v5799_v24  ;;  %v1835_v7 = vmax.f32 %v1833_v3, 0.0  ;;  %v1929_v3 = vld [vmem:[#allocation2 + $0x112] sm:$0x3f] }
 0x279   : > { %1750 = vst [vmem:[#allocation3 + $0x31] sm:$0xff] %v1747_v20  ;;  %v1845_v10 = vadd.f32 %v1843_v45, %v5803_v25  ;;  %v1854_v20 = vmul.f32 %v1852_v54, %v5799_v24  ;;  %v1836_v55 = vmax.f32 %v1834_v40, 0.0  ;;  %v1930_v40 = vmul.f32 %v1928_v12, %v5799_v24 }
 0x27a   : > { %1751 = vst [vmem:[#allocation3 + $0x39] sm:$0x3f] %v1748_v0  ;;  %v1855_v21 = vadd.f32 %v1853_v57, %v5803_v25  ;;  %v1864_v0 = vmul.f32 %v1862_v33, %v5799_v24  ;;  %v4649_v33 = vld [vmem:[#allocation2 + $0x118] sm:$0xff] }
 0x27b   : > { %1761 = vst [vmem:[#allocation3 + $0x41] sm:$0xff] %v1758_v36  ;;  %v1856_v42 = vadd.f32 %v1854_v20, %v5803_v25  ;;  %v1865_v36 = vmul.f32 %v1863_v2, %v5799_v24  ;;  %v1847_v27 = vmax.f32 %v1845_v10, 0.0  ;;  %v1932_v57 = vadd.f32 %v1930_v40, %v5803_v25  ;;  %v1950_v10 = vld [vmem:[#allocation2 + $0x126] sm:$0xff] }
 0x27c   : > { %1762 = vst [vmem:[#allocation3 + $0x49] sm:$0x3f] %v1759_v58  ;;  %v1866_v60 = vadd.f32 %v1864_v0, %v5803_v25  ;;  %v1875_v58 = vmul.f32 %v1873_v34, %v5799_v24  ;;  %v1857_v9 = vmax.f32 %v1855_v21, 0.0  ;;  %v1951_v21 = vld [vmem:[#allocation2 + $0x12e] sm:$0x3f] }
 0x27d   : > { %1772 = vst [vmem:[#allocation3 + $0x51] sm:$0xff] %v1769_v8  ;;  %v1867_v17 = vadd.f32 %v1865_v36, %v5803_v25  ;;  %v1876_v8 = vmul.f32 %v1874_v26, %v5799_v24  ;;  %v1858_v5 = vmax.f32 %v1856_v42, 0.0  ;;  %v1961_v42 = vld [vmem:[#allocation2 + $0x134] sm:$0xff] }
 0x27e   : > { %1773 = vst [vmem:[#allocation3 + $0x59] sm:$0x3f] %v1770_v23  ;;  %v1877_v23 = vadd.f32 %v1875_v58, %v5803_v25  ;;  %v1868_v48 = vmax.f32 %v1866_v60, 0.0  ;;  %v1962_v60 = vld [vmem:[#allocation2 + $0x13c] sm:$0x3f]  ;;  %v1934_v58 = vmax.f32 %v1932_v57, 0.0 }
 0x27f   : > { %1783 = vst [vmem:[#allocation3 + $0x61] sm:$0xff] %v1780_v16  ;;  %v1878_v44 = vadd.f32 %v1876_v8, %v5803_v25  ;;  %v1887_v16 = vmul.f32 %v1885_v59, %v5799_v24  ;;  %v1869_v47 = vmax.f32 %v1867_v17, 0.0  ;;  %v1972_v17 = vld [vmem:[#allocation2 + $0x142] sm:$0xff] }
 0x280   : > { %1784 = vst [vmem:[#allocation3 + $0x69] sm:$0x3f] %v1781_v22  ;;  %v1897_v22 = vmul.f32 %v4648_v18, %v5799_v24  ;;  %v1879_v52 = vmax.f32 %v1877_v23, 0.0  ;;  %v1973_v23 = vld [vmem:[#allocation2 + $0x14a] sm:$0x3f] }
 0x281   : > { %1794 = vst [vmem:[#allocation3 + $0x71] sm:$0xff] %v1791_v46  ;;  %v1889_v37 = vadd.f32 %v1887_v16, %v5803_v25  ;;  %v1898_v46 = vmul.f32 %v1896_v63, %v5799_v24  ;;  %v1880_v50 = vmax.f32 %v1878_v44, 0.0  ;;  %v1974_v44 = vmul.f32 %v1972_v17, %v5799_v24  ;;  %v4651_v57 = vld [vmem:[#allocation2 + $0x188] sm:$0xff]  ;;  %v2061_v17 = vld [vmem:[#allocation2 + $0x1ba] sm:$0x3f] }
 0x282   : > { %1795 = vst [vmem:[#allocation3 + $0x79] sm:$0x3f] %v1792_v51  ;;  %v1899_v43 = vadd.f32 %v1897_v22, %v5803_v25  ;;  %v1908_v51 = vmul.f32 %v1906_v1, %v5799_v24  ;;  %v4650_v1 = vld [vmem:[#allocation2 + $0x150] sm:$0xff] }
 0x283   : > { %1805 = vst [vmem:[#allocation3 + $0x81] sm:$0xff] %v1802_v61  ;;  %v1900_v13 = vadd.f32 %v1898_v46, %v5803_v25  ;;  %v1909_v61 = vmul.f32 %v1907_v35, %v5799_v24  ;;  %v1891_v39 = vmax.f32 %v1889_v37, 0.0  ;;  %v1976_v22 = vadd.f32 %v1974_v44, %v5803_v25  ;;  %v1994_v37 = vld [vmem:[#allocation2 + $0x15e] sm:$0xff] }
 0x284   : > { %1806 = vst [vmem:[#allocation3 + $0x89] sm:$0x3f] %v1803_v6  ;;  %v1910_v56 = vadd.f32 %v1908_v51, %v5803_v25  ;;  %v1919_v6 = vmul.f32 %v1917_v30, %v5799_v24  ;;  %v1901_v41 = vmax.f32 %v1899_v43, 0.0  ;;  %v1995_v43 = vld [vmem:[#allocation2 + $0x166] sm:$0x3f]  ;;  %v2005_v51 = vld [vmem:[#allocation2 + $0x16c] sm:$0xff] }
 0x285   : > { %1816 = vst [vmem:[#allocation3 + $0x91] sm:$0xff] %v1813_v29  ;;  %v1911_v31 = vadd.f32 %v1909_v61, %v5803_v25  ;;  %v1920_v29 = vmul.f32 %v1918_v32, %v5799_v24  ;;  %v1902_v45 = vmax.f32 %v1900_v13, 0.0  ;;  %v1996_v13 = vmul.f32 %v1994_v37, %v5799_v24  ;;  %v2006_v61 = vld [vmem:[#allocation2 + $0x174] sm:$0x3f]  ;;  %v2016_v32 = vld [vmem:[#allocation2 + $0x17a] sm:$0xff] }
 0x286   : > { %1817 = vst [vmem:[#allocation3 + $0x99] sm:$0x3f] %v1814_v4  ;;  %v1921_v4 = vadd.f32 %v1919_v6, %v5803_v25  ;;  %v1912_v53 = vmax.f32 %v1910_v56, 0.0  ;;  %v1997_v6 = vmul.f32 %v1995_v43, %v5799_v24  ;;  %v2007_v12 = vmul.f32 %v2005_v51, %v5799_v24 }
 0x287   : > { %1827 = vst [vmem:[#allocation3 + $0xa1] sm:$0xff] %v1824_v11  ;;  %v1922_v54 = vadd.f32 %v1920_v29, %v5803_v25  ;;  %v1931_v11 = vmul.f32 %v1929_v3, %v5799_v24  ;;  %v1913_v20 = vmax.f32 %v1911_v31, 0.0  ;;  %v1978_v31 = vmax.f32 %v1976_v22, 0.0  ;;  %v4652_v22 = vld [vmem:[#allocation2 + $0x1c0] sm:$0xff] }
 0x288   : > { %1828 = vst [vmem:[#allocation3 + $0xa9] sm:$0x3f] %v1825_v28  ;;  %v1941_v28 = vmul.f32 %v4649_v33, %v5799_v24  ;;  %v1923_v0 = vmax.f32 %v1921_v4, 0.0  ;;  %v1998_v29 = vadd.f32 %v1996_v13, %v5803_v25  ;;  %v2008_v3 = vmul.f32 %v2006_v61, %v5799_v24 }
 0x289   : > { %1838 = vst [vmem:[#allocation3 + $0xb1] sm:$0xff] %v1835_v7  ;;  %v1933_v2 = vadd.f32 %v1931_v11, %v5803_v25  ;;  %v1942_v7 = vmul.f32 %v1940_v19, %v5799_v24  ;;  %v1924_v36 = vmax.f32 %v1922_v54, 0.0  ;;  %v1999_v40 = vadd.f32 %v1997_v6, %v5803_v25  ;;  %v2093_v6 = vld [vmem:[#allocation2 + $0x1dc] sm:$0xff] }
 0x28a   : > { %1839 = vst [vmem:[#allocation3 + $0xb9] sm:$0x3f] %v1836_v55  ;;  %v1943_v34 = vadd.f32 %v1941_v28, %v5803_v25  ;;  %v1952_v55 = vmul.f32 %v1950_v10, %v5799_v24  ;;  %v2010_v19 = vadd.f32 %v2008_v3, %v5803_v25  ;;  %v2029_v33 = vmul.f32 %v4651_v57, %v5799_v24 }
 0x28b   : > { %1849 = vst [vmem:[#allocation3 + $0xc1] sm:$0xff] %v1846_v14  ;;  %v1944_v26 = vadd.f32 %v1942_v7, %v5803_v25  ;;  %v1953_v14 = vmul.f32 %v1951_v21, %v5799_v24  ;;  %v1935_v8 = vmax.f32 %v1933_v2, 0.0  ;;  %v2038_v2 = vld [vmem:[#allocation2 + $0x196] sm:$0xff]  ;;  %v2000_v7 = vmax.f32 %v1998_v29, 0.0 }
 0x28c   : > { %1850 = vst [vmem:[#allocation3 + $0xc9] sm:$0x3f] %v1847_v27  ;;  %v1954_v49 = vadd.f32 %v1952_v55, %v5803_v25  ;;  %v1963_v27 = vmul.f32 %v1961_v42, %v5799_v24  ;;  %v1945_v38 = vmax.f32 %v1943_v34, 0.0  ;;  %v2031_v21 = vadd.f32 %v2029_v33, %v5803_v25 }
 0x28d   : > { %1860 = vst [vmem:[#allocation3 + $0xd1] sm:$0xff] %v1857_v9  ;;  %v1955_v59 = vadd.f32 %v1953_v14, %v5803_v25  ;;  %v1964_v9 = vmul.f32 %v1962_v60, %v5799_v24  ;;  %v1946_v16 = vmax.f32 %v1944_v26, 0.0  ;;  %v2001_v34 = vmax.f32 %v1999_v40, 0.0  ;;  %v2050_v26 = vld [vmem:[#allocation2 + $0x1ac] sm:$0x3f] }
 0x28e   : > { %1861 = vst [vmem:[#allocation3 + $0xd9] sm:$0x3f] %v1858_v5  ;;  %v1965_v5 = vadd.f32 %v1963_v27, %v5803_v25  ;;  %v1956_v18 = vmax.f32 %v1954_v49, 0.0  ;;  %v2012_v14 = vmax.f32 %v2010_v19, 0.0  ;;  %v2060_v27 = vld [vmem:[#allocation2 + $0x1b2] sm:$0xff] }
 0x28f   : > { %1871 = vst [vmem:[#allocation3 + $0xe1] sm:$0xff] %v1868_v48  ;;  %v1966_v63 = vadd.f32 %v1964_v9, %v5803_v25  ;;  %v1975_v48 = vmul.f32 %v1973_v23, %v5799_v24  ;;  %v1957_v46 = vmax.f32 %v1955_v59, 0.0  ;;  %v2052_v23 = vmul.f32 %v2050_v26, %v5799_v24 }
 0x290   : > { %1872 = vst [vmem:[#allocation3 + $0xe9] sm:$0x3f] %v1869_v47  ;;  %v1985_v47 = vmul.f32 %v4650_v1, %v5799_v24  ;;  %v1967_v30 = vmax.f32 %v1965_v5, 0.0  ;;  %v2033_v5 = vmax.f32 %v2031_v21, 0.0  ;;  %v2073_v1 = vmul.f32 %v4652_v22, %v5799_v24 }
 0x291   : > { %1882 = vst [vmem:[#allocation3 + $0x111] sm:$0xff] %v1879_v52  ;;  %v1977_v35 = vadd.f32 %v1975_v48, %v5803_v25  ;;  %v1986_v52 = vmul.f32 %v1984_v15, %v5799_v24  ;;  %v2082_v48 = vld [vmem:[#allocation2 + $0x1ce] sm:$0xff]  ;;  %v2054_v37 = vadd.f32 %v2052_v23, %v5803_v25 }
 0x292   : > { %1883 = vst [vmem:[#allocation3 + $0x119] sm:$0x3f] %v1880_v50  ;;  %v1987_v50 = vadd.f32 %v1985_v47, %v5803_v25  ;;  %v2075_v51 = vadd.f32 %v2073_v1, %v5803_v25 }
 0x293   : > { %1893 = vst [vmem:[#allocation3 + $0x121] sm:$0xff] %v1890_v62  ;;  %v1968_v62 = vmax.f32 %v1966_v63, 0.0  ;;  %v1988_v56 = vadd.f32 %v1986_v52, %v5803_v25  ;;  %v1979_v4 = vmax.f32 %v1977_v35, 0.0  ;;  %v2063_v63 = vmul.f32 %v2061_v17, %v5799_v24 }
 0x294   : > { %1894 = vst [vmem:[#allocation3 + $0x129] sm:$0x3f] %v1891_v39  ;;  %v2017_v39 = vld [vmem:[#allocation2 + $0x182] sm:$0x3f]  ;;  %v1989_v11 = vmax.f32 %v1987_v50, 0.0  ;;  %v2084_v52 = vmul.f32 %v2082_v48, %v5799_v24 }
 0x295   : > { %1904 = vst [vmem:[#allocation3 + $0x131] sm:$0xff] %v1901_v41  ;;  %v2018_v41 = vmul.f32 %v2016_v32, %v5799_v24  ;;  %v2019_v54 = vmul.f32 %v2017_v39, %v5799_v24  ;;  %v1990_v28 = vmax.f32 %v1988_v56, 0.0  ;;  %v2065_v35 = vadd.f32 %v2063_v63, %v5803_v25  ;;  %v2083_v50 = vld [vmem:[#allocation2 + $0x1d6] sm:$0x3f]  ;;  %v2094_v32 = vld [vmem:[#allocation2 + $0x1e4] sm:$0x3f] }
 0x296   : > { %1905 = vst [vmem:[#allocation3 + $0x139] sm:$0x3f] %v1902_v45  ;;  %v2009_v45 = vadd.f32 %v2007_v12, %v5803_v25  ;;  %v5952_v61 = vadd.f32 %v2084_v52, %v5803_v25  ;;  %v2104_v12 = vld [vmem:[#allocation2 + $0x1ea] sm:$0xff]  ;;  %v2056_v39 = vmax.f32 %v2054_v37, 0.0  ;;  %v2085_v3 = vmul.f32 %v2083_v50, %v5799_v24  ;;  %v2160_v63 = vld [vmem:[#allocation2 + $0x238] sm:$0x3f] }
 0x297   : > { %1915 = vst [vmem:[#allocation3 + $0x141] sm:$0xff] %v1912_v53  ;;  %v2020_v53 = vadd.f32 %v2018_v41, %v5803_v25  ;;  %v2021_v10 = vadd.f32 %v2019_v54, %v5803_v25  ;;  %v2067_v29 = vmax.f32 %v2065_v35, 0.0  ;;  %v2105_v41 = vld [vmem:[#allocation2 + $0x1f2] sm:$0x3f]  ;;  %v2096_v54 = vmul.f32 %v2094_v32, %v5799_v24  ;;  %v2170_v37 = vld [vmem:[#allocation2 + $0x23e] sm:$0xff] }
 0x298   : > { %1916 = vst [vmem:[#allocation3 + $0x149] sm:$0x3f] %v1913_v20  ;;  %v2028_v20 = vld [vmem:[#allocation2 + $0x190] sm:$0x3f]  ;;  %v2011_v55 = vmax.f32 %v2009_v45, 0.0  ;;  %v2095_v45 = vmul.f32 %v2093_v6, %v5799_v24  ;;  %v2087_v19 = vadd.f32 %v2085_v3, %v5803_v25  ;;  %v2106_v57 = vmul.f32 %v2104_v12, %v5799_v24 }
 0x299   : > { %1926 = vst [vmem:[#allocation3 + $0x151] sm:$0xff] %v1923_v0  ;;  %v2039_v0 = vld [vmem:[#allocation2 + $0x19e] sm:$0x3f]  ;;  %v2030_v42 = vmul.f32 %v2028_v20, %v5799_v24  ;;  %v2022_v60 = vmax.f32 %v2020_v53, 0.0  ;;  %v2088_v53 = vmax.f32 %v5952_v61, 0.0  ;;  %v2107_v33 = vmul.f32 %v2105_v41, %v5799_v24 }
 0x29a   : > { %1927 = vst [vmem:[#allocation3 + $0x159] sm:$0x3f] %v1924_v36  ;;  %v2049_v36 = vld [vmem:[#allocation2 + $0x1a4] sm:$0xff]  ;;  %v2041_v49 = vmul.f32 %v2039_v0, %v5799_v24  ;;  %v2097_v20 = vadd.f32 %v2095_v45, %v5803_v25  ;;  %v2162_v32 = vmul.f32 %v2160_v63, %v5799_v24 }
 0x29b   : > { %1937 = vst [vmem:[#allocation3 + $0x161] sm:$0xff] %v1934_v58  ;;  %v2040_v58 = vmul.f32 %v2038_v2, %v5799_v24  ;;  %v2032_v59 = vadd.f32 %v2030_v42, %v5803_v25  ;;  %v2051_v9 = vmul.f32 %v2049_v36, %v5799_v24  ;;  %v2098_v2 = vadd.f32 %v2096_v54, %v5803_v25  ;;  %v2193_v3 = vld [vmem:[#allocation2 + $0x262] sm:$0x3f]  ;;  %v2204_v54 = vld [vmem:[#allocation2 + $0x270] sm:$0x3f] }
 0x29c   : > { %1938 = vst [vmem:[#allocation3 + $0x169] sm:$0x3f] %v1935_v8  ;;  %v2023_v8 = vmax.f32 %v2021_v10, 0.0  ;;  %v2043_v15 = vadd.f32 %v2041_v49, %v5803_v25  ;;  %v2127_v10 = vld [vmem:[#allocation2 + $0x20e] sm:$0x3f]  ;;  %v2108_v42 = vadd.f32 %v2106_v57, %v5803_v25  ;;  %v5968_v36 = vadd.f32 %v2107_v33, %v5803_v25  ;;  %v2214_v33 = vld [vmem:[#allocation2 + $0x276] sm:$0xff] }
 0x29d   : > { %1948 = vst [vmem:[#allocation3 + $0x171] sm:$0xff] %v1945_v38  ;;  %v2072_v38 = vld [vmem:[#allocation2 + $0x1c8] sm:$0x3f]  ;;  %v2042_v44 = vadd.f32 %v2040_v58, %v5803_v25  ;;  %v2034_v43 = vmax.f32 %v2032_v59, 0.0  ;;  %v2099_v48 = vmax.f32 %v2097_v20, 0.0  ;;  %v2100_v22 = vmax.f32 %v2098_v2, 0.0 }
 0x29e   : > { %1949 = vst [vmem:[#allocation3 + $0x179] sm:$0x3f] %v1946_v16  ;;  %v2062_v16 = vmul.f32 %v2060_v27, %v5799_v24  ;;  %v2074_v47 = vmul.f32 %v2072_v38, %v5799_v24  ;;  %v2149_v58 = vld [vmem:[#allocation2 + $0x22a] sm:$0x3f]  ;;  %v2110_v1 = vmax.f32 %v2108_v42, 0.0  ;;  %v2195_v57 = vmul.f32 %v2193_v3, %v5799_v24 }
 0x29f   : > { %1959 = vst [vmem:[#allocation3 + $0x181] sm:$0xff] %v1956_v18  ;;  %v2053_v18 = vadd.f32 %v2051_v9, %v5803_v25  ;;  %v2044_v13 = vmax.f32 %v2042_v44, 0.0  ;;  %v2151_v38 = vmul.f32 %v2149_v58, %v5799_v24  ;;  %v4655_v2 = vld [vmem:[#allocation2 + $0x268] sm:$0xff] }
 0x2a0   : > { %1960 = vst [vmem:[#allocation3 + $0x189] sm:$0x3f] %v1957_v46  ;;  %v2064_v46 = vadd.f32 %v2062_v16, %v5803_v25  ;;  %v6041_v42 = vadd.f32 %v2195_v57, %v5803_v25  ;;  %v2248_v63 = vld [vmem:[#allocation2 + $0x2a8] sm:$0x3f] }
 0x2a1   : > { %1970 = vst [vmem:[#allocation3 + $0x191] sm:$0xff] %v1967_v30  ;;  %v5949_v30 = vadd.f32 %v2074_v47, %v5803_v25  ;;  %v2055_v56 = vmax.f32 %v2053_v18, 0.0  ;;  %v5998_v18 = vadd.f32 %v2151_v38, %v5803_v25  ;;  %v2111_v47 = vmax.f32 %v5968_v36, 0.0 }
 0x2a2   : > { %1971 = vst [vmem:[#allocation3 + $0x199] sm:$0x3f] %v1968_v62  ;;  %v2045_v62 = vmax.f32 %v2043_v15, 0.0  ;;  %v2216_v36 = vmul.f32 %v2214_v33, %v5799_v24 }
 0x2a3   : > { %1981 = vst [vmem:[#allocation3 + $0x1a1] sm:$0xff] %v1978_v31  ;;  %v2066_v31 = vmax.f32 %v2064_v46, 0.0  ;;  %v2078_v40 = vmax.f32 %v5949_v30, 0.0  ;;  %v2155_v12 = vmax.f32 %v5998_v18, 0.0 }
 0x2a4   : > { %1982 = vst [vmem:[#allocation3 + $0x1a9] sm:$0x3f] %v1979_v4  ;;  %v2077_v4 = vmax.f32 %v2075_v51, 0.0  ;;  %v2171_v51 = vld [vmem:[#allocation2 + $0x246] sm:$0x3f] }
 0x2a5   : > { %1992 = vst [vmem:[#allocation3 + $0x1b1] sm:$0xff] %v1989_v11  ;;  %v2116_v11 = vld [vmem:[#allocation2 + $0x200] sm:$0x3f] }
 0x2a6   : > { %1993 = vst [vmem:[#allocation3 + $0x1b9] sm:$0x3f] %v1990_v28  ;;  %v2126_v28 = vld [vmem:[#allocation2 + $0x206] sm:$0xff]  ;;  %v2118_v0 = vmul.f32 %v2116_v11, %v5799_v24 }
 0x2a7   : > { %2003 = vst [vmem:[#allocation3 + $0x1c1] sm:$0xff] %v2000_v7  ;;  %v4653_v7 = vld [vmem:[#allocation2 + $0x1f8] sm:$0xff]  ;;  %v2128_v26 = vmul.f32 %v2126_v28, %v5799_v24 }
 0x2a8   : > { %2004 = vst [vmem:[#allocation3 + $0x1c9] sm:$0x3f] %v2001_v34  ;;  %v2117_v21 = vmul.f32 %v4653_v7, %v5799_v24  ;;  %v2137_v34 = vld [vmem:[#allocation2 + $0x214] sm:$0xff]  ;;  %v5976_v27 = vadd.f32 %v2118_v0, %v5803_v25  ;;  %v2215_v28 = vld [vmem:[#allocation2 + $0x27e] sm:$0x3f]  ;;  %v2205_v7 = vmul.f32 %v4655_v2, %v5799_v24  ;;  %v2225_v0 = vld [vmem:[#allocation2 + $0x284] sm:$0xff] }
 0x2a9   : > { %2014 = vst [vmem:[#allocation3 + $0x1d1] sm:$0xff] %v2011_v55  ;;  %v2138_v55 = vld [vmem:[#allocation2 + $0x21c] sm:$0x3f]  ;;  %v2139_v17 = vmul.f32 %v2137_v34, %v5799_v24  ;;  %v5981_v59 = vadd.f32 %v2128_v26, %v5803_v25  ;;  %v2226_v34 = vld [vmem:[#allocation2 + $0x28c] sm:$0x3f]  ;;  %v2217_v26 = vmul.f32 %v2215_v28, %v5799_v24  ;;  %v2313_v2 = vld [vmem:[#allocation2 + $0x2f4] sm:$0xff] }
 0x2aa   : > { %2015 = vst [vmem:[#allocation3 + $0x1d9] sm:$0x3f] %v2012_v14  ;;  %v2129_v14 = vmul.f32 %v2127_v10, %v5799_v24  ;;  %v5973_v49 = vadd.f32 %v2117_v21, %v5803_v25  ;;  %v2122_v35 = vmax.f32 %v5976_v27, 0.0  ;;  %v2206_v21 = vmul.f32 %v2204_v54, %v5799_v24 }
 0x2ab   : > { %2025 = vst [vmem:[#allocation3 + $0x1e1] sm:$0xff] %v2022_v60  ;;  %v2148_v60 = vld [vmem:[#allocation2 + $0x222] sm:$0xff]  ;;  %v5989_v44 = vadd.f32 %v2139_v17, %v5803_v25  ;;  %v2132_v52 = vmax.f32 %v5981_v59, 0.0  ;;  %v6046_v58 = vadd.f32 %v2205_v7, %v5803_v25  ;;  %v2227_v27 = vmul.f32 %v2225_v0, %v5799_v24  ;;  %v4657_v0 = vld [vmem:[#allocation2 + $0x2d8] sm:$0xff] }
 0x2ac   : > { %2026 = vst [vmem:[#allocation3 + $0x1e9] sm:$0x3f] %v2023_v8  ;;  %v2140_v8 = vmul.f32 %v2138_v55, %v5799_v24  ;;  %v5984_v9 = vadd.f32 %v2129_v14, %v5803_v25  ;;  %v2150_v23 = vmul.f32 %v2148_v60, %v5799_v24  ;;  %v2121_v46 = vmax.f32 %v5973_v49, 0.0  ;;  %v2236_v14 = vld [vmem:[#allocation2 + $0x292] sm:$0xff]  ;;  %v2237_v60 = vld [vmem:[#allocation2 + $0x29a] sm:$0x3f] }
 0x2ad   : > { %2036 = vst [vmem:[#allocation3 + $0x211] sm:$0xff] %v2033_v5  ;;  %v2089_v5 = vmax.f32 %v2087_v19, 0.0  ;;  %v2143_v30 = vmax.f32 %v5989_v44, 0.0  ;;  %v6049_v49 = vadd.f32 %v2206_v21, %v5803_v25  ;;  %v2228_v17 = vmul.f32 %v2226_v34, %v5799_v24 }
 0x2ae   : > { %2037 = vst [vmem:[#allocation3 + $0x219] sm:$0x3f] %v2034_v43  ;;  %v5992_v16 = vadd.f32 %v2140_v8, %v5803_v25  ;;  %v5995_v15 = vadd.f32 %v2150_v23, %v5803_v25  ;;  %v2133_v43 = vmax.f32 %v5984_v9, 0.0  ;;  %v6054_v8 = vadd.f32 %v2216_v36, %v5803_v25 }
 0x2af   : > { %2047 = vst [vmem:[#allocation3 + $0x221] sm:$0xff] %v2044_v13  ;;  %v4654_v13 = vld [vmem:[#allocation2 + $0x230] sm:$0xff]  ;;  %v6057_v59 = vadd.f32 %v2217_v26, %v5803_v25  ;;  %v2238_v9 = vmul.f32 %v2236_v14, %v5799_v24  ;;  %v2239_v23 = vmul.f32 %v2237_v60, %v5799_v24  ;;  %v6064_v44 = vadd.f32 %v2227_v27, %v5803_v25  ;;  %v2324_v27 = vld [vmem:[#allocation2 + $0x302] sm:$0xff] }
 0x2b0   : > { %2048 = vst [vmem:[#allocation3 + $0x229] sm:$0x3f] %v2045_v62  ;;  %v2144_v50 = vmax.f32 %v5992_v16, 0.0  ;;  %v2161_v61 = vmul.f32 %v4654_v13, %v5799_v24  ;;  %v2182_v62 = vld [vmem:[#allocation2 + $0x254] sm:$0x3f]  ;;  %v2154_v6 = vmax.f32 %v5995_v15, 0.0  ;;  %v6067_v16 = vadd.f32 %v2228_v17, %v5803_v25 }
 0x2b1   : > { %2058 = vst [vmem:[#allocation3 + $0x231] sm:$0xff] %v2055_v56  ;;  %v2181_v56 = vld [vmem:[#allocation2 + $0x24c] sm:$0xff]  ;;  %v2184_v45 = vmul.f32 %v2182_v62, %v5799_v24  ;;  %v2221_v13 = vmax.f32 %v6057_v59, 0.0  ;;  %v4656_v62 = vld [vmem:[#allocation2 + $0x2a0] sm:$0xff]  ;;  %v2293_v34 = vmul.f32 %v4657_v0, %v5799_v24  ;;  %v6194_v59 = vld [vmem:[#allocation3 + $0x28] sm:$0x3f] }
 0x2b2   : > { %2059 = vst [vmem:[#allocation3 + $0x239] sm:$0x3f] %v2056_v39  ;;  %v2172_v39 = vmul.f32 %v2170_v37, %v5799_v24  ;;  %v6014_v41 = vadd.f32 %v2161_v61, %v5803_v25  ;;  %v2259_v61 = vld [vmem:[#allocation2 + $0x2b6] sm:$0x3f]  ;;  %v2325_v17 = vld [vmem:[#allocation2 + $0x30a] sm:$0x3f] }
 0x2b3   : > { %2069 = vst [vmem:[#allocation3 + $0x241] sm:$0xff] %v2066_v31  ;;  %v2173_v31 = vmul.f32 %v2171_v51, %v5799_v24  ;;  %v6033_v20 = vadd.f32 %v2184_v45, %v5803_v25  ;;  %v2210_v51 = vmax.f32 %v6049_v49, 0.0  ;;  %v2261_v18 = vmul.f32 %v2259_v61, %v5799_v24  ;;  %v6315_v49 = vld [vmem:[#allocation3 + $0xd0] sm:$0xff] }
 0x2b4   : > { %2070 = vst [vmem:[#allocation3 + $0x249] sm:$0x3f] %v2067_v29  ;;  %v2192_v29 = vld [vmem:[#allocation2 + $0x25a] sm:$0xff]  ;;  %v6022_v11 = vadd.f32 %v2172_v39, %v5803_v25  ;;  %v2165_v38 = vmax.f32 %v6014_v41, 0.0 }
 0x2b5   : > { %2080 = vst [vmem:[#allocation3 + $0x251] sm:$0xff] %v2077_v4  ;;  %v6017_v4 = vadd.f32 %v2162_v32, %v5803_v25  ;;  %v6025_v19 = vadd.f32 %v2173_v31, %v5803_v25  ;;  %v2188_v37 = vmax.f32 %v6033_v20, 0.0  ;;  %v2232_v32 = vmax.f32 %v6067_v16, 0.0  ;;  %v2269_v39 = vld [vmem:[#allocation2 + $0x2bc] sm:$0xff]  ;;  %v2270_v31 = vld [vmem:[#allocation2 + $0x2c4] sm:$0x3f] }
 0x2b6   : > { %2081 = vst [vmem:[#allocation3 + $0x259] sm:$0x3f] %v2078_v40  ;;  %v2183_v40 = vmul.f32 %v2181_v56, %v5799_v24  ;;  %v2249_v56 = vmul.f32 %v4656_v62, %v5799_v24  ;;  %v2271_v54 = vmul.f32 %v2269_v39, %v5799_v24  ;;  %v6107_v57 = vadd.f32 %v2261_v18, %v5803_v25  ;;  %v2303_v20 = vld [vmem:[#allocation2 + $0x2ee] sm:$0x3f]  ;;  %v6208_v16 = vld [vmem:[#allocation3 + $0x50] sm:$0xff] }
 0x2b7   : > { %2091 = vst [vmem:[#allocation3 + $0x261] sm:$0xff] %v2088_v53  ;;  %v2194_v53 = vmul.f32 %v2192_v29, %v5799_v24  ;;  %v2177_v15 = vmax.f32 %v6025_v19, 0.0  ;;  %v2292_v19 = vld [vmem:[#allocation2 + $0x2e0] sm:$0x3f]  ;;  %v2305_v60 = vmul.f32 %v2303_v20, %v5799_v24 }
 0x2b8   : > { %2092 = vst [vmem:[#allocation3 + $0x269] sm:$0x3f] %v2089_v5  ;;  %v6030_v10 = vadd.f32 %v2183_v40, %v5803_v25  ;;  %v2166_v5 = vmax.f32 %v6017_v4, 0.0  ;;  %v2281_v4 = vld [vmem:[#allocation2 + $0x2d2] sm:$0x3f]  ;;  %v6096_v40 = vadd.f32 %v2249_v56, %v5803_v25  ;;  %v6112_v7 = vadd.f32 %v2271_v54, %v5803_v25  ;;  %v2337_v54 = vld [vmem:[#allocation3 + $0x10] sm:$0xff] }
 0x2b9   : > { %2102 = vst [vmem:[#allocation3 + $0x271] sm:$0xff] %v2099_v48  ;;  %v6038_v55 = vadd.f32 %v2194_v53, %v5803_v25  ;;  %v2176_v48 = vmax.f32 %v6022_v11, 0.0  ;;  %v2272_v11 = vmul.f32 %v2270_v31, %v5799_v24  ;;  %v2283_v28 = vmul.f32 %v2281_v4, %v5799_v24  ;;  %v6171_v31 = vld [vmem:[%s4831_s26 + $0xa] ss:$0 sm:$0xff] }
 0x2ba   : > { %2103 = vst [vmem:[#allocation3 + $0x279] sm:$0x3f] %v2100_v22  ;;  %v6072_v22 = vadd.f32 %v2238_v9, %v5803_v25  ;;  %v2315_v9 = vmul.f32 %v2313_v2, %v5799_v24  ;;  %v2253_v61 = vmax.f32 %v6096_v40, 0.0  ;;  %v2265_v56 = vmax.f32 %v6107_v57, 0.0  ;;  %v6230_v2 = vld [vmem:[#allocation3 + $0x78] sm:$0x3f] }
 0x2bb   : > { %2113 = vst [vmem:[#allocation3 + $0x281] sm:$0xff] %v2110_v1  ;;  %v6075_v1 = vadd.f32 %v2239_v23, %v5803_v25  ;;  %v6115_v21 = vadd.f32 %v2272_v11, %v5803_v25  ;;  %v6123_v26 = vadd.f32 %v2283_v28, %v5803_v25  ;;  %v2338_v11 = vld [vmem:[#allocation3 + $0x18] sm:$0x3f]  ;;  %v4658_v28 = vld [vmem:[#allocation3] sm:$0xff]  ;;  %v2435_v57 = vmul.f32 %v6171_v31, %v6194_v59 }
 0x2bc   : > { %2114 = vst [vmem:[#allocation3 + $0x289] sm:$0x3f] %v2111_v47  ;;  %v2187_v47 = vmax.f32 %v6030_v10, 0.0  ;;  %v2242_v29 = vmax.f32 %v6072_v22, 0.0  ;;  %v2302_v10 = vld [vmem:[#allocation2 + $0x2e6] sm:$0xff] }
 0x2bd   : > { %2124 = vst [vmem:[#allocation3 + $0x291] sm:$0xff] %v2121_v46  ;;  %v2198_v46 = vmax.f32 %v6038_v55, 0.0  ;;  %v2243_v3 = vmax.f32 %v6075_v1, 0.0  ;;  %v2294_v55 = vmul.f32 %v2292_v19, %v5799_v24  ;;  %v2304_v14 = vmul.f32 %v2302_v10, %v5799_v24  ;;  %v6192_v19 = vld [vmem:[#allocation3 + $0x20] sm:$0xff]  ;;  %v6226_v1 = vld [vmem:[#allocation3 + $0x68] sm:$0x3f] }
 0x2be   : > { %2125 = vst [vmem:[#allocation3 + $0x299] sm:$0x3f] %v2122_v35  ;;  %v2199_v35 = vmax.f32 %v6041_v42, 0.0  ;;  %v2314_v42 = vld [vmem:[#allocation2 + $0x2fc] sm:$0x3f]  ;;  %v2276_v39 = vmax.f32 %v6115_v21, 0.0 }
 0x2bf   : > { %2135 = vst [vmem:[#allocation3 + $0x2a1] sm:$0xff] %v2132_v52  ;;  %v2258_v52 = vld [vmem:[#allocation2 + $0x2ae] sm:$0xff]  ;;  %v2316_v23 = vmul.f32 %v2314_v42, %v5799_v24  ;;  %v6244_v42 = vmul.f32 %v6171_v31, %v2337_v54 }
 0x2c0   : > { %2136 = vst [vmem:[#allocation3 + $0x2a9] sm:$0x3f] %v2133_v43  ;;  %v2209_v43 = vmax.f32 %v6046_v58, 0.0  ;;  %v2260_v41 = vmul.f32 %v2258_v52, %v5799_v24 }
 0x2c1   : > { %2146 = vst [vmem:[#allocation3 + $0x2b1] sm:$0xff] %v2143_v30  ;;  %v2220_v30 = vmax.f32 %v6054_v8, 0.0 }
 0x2c2   : > { %2147 = vst [vmem:[#allocation3 + $0x2b9] sm:$0x3f] %v2144_v50  ;;  %v2231_v50 = vmax.f32 %v6064_v44, 0.0  ;;  %v6104_v53 = vadd.f32 %v2260_v41, %v5803_v25  ;;  %v6204_v44 = vld [vmem:[#allocation3 + $0x48] sm:$0x3f] }
 0x2c3   : > { %2157 = vst [vmem:[#allocation3 + $0x2c1] sm:$0xff] %v2154_v6  ;;  %v2250_v6 = vmul.f32 %v2248_v63, %v5799_v24  ;;  %v6132_v63 = vadd.f32 %v2293_v34, %v5803_v25 }
 0x2c4   : > { %2158 = vst [vmem:[#allocation3 + $0x2c9] sm:$0x3f] %v2155_v12  ;;  %v2280_v12 = vld [vmem:[#allocation2 + $0x2ca] sm:$0xff]  ;;  %v2264_v62 = vmax.f32 %v6104_v53, 0.0 }
 0x2c5   : > { %2168 = vst [vmem:[#allocation3 + $0x2d1] sm:$0xff] %v2165_v38  ;;  %v6099_v45 = vadd.f32 %v2250_v6, %v5803_v25  ;;  %v2282_v33 = vmul.f32 %v2280_v12, %v5799_v24  ;;  %v2326_v38 = vmul.f32 %v2324_v27, %v5799_v24  ;;  %v6162_v6 = vld [vmem:[%s4831_s26] ss:$0 sm:$0xff]  ;;  %v6180_v12 = vld [vmem:[%s4831_s26 + $0x14] ss:$0 sm:$0xff] }
 0x2c6   : > { %2169 = vst [vmem:[#allocation3 + $0x2d9] sm:$0x3f] %v2166_v5  ;;  %v2327_v5 = vmul.f32 %v2325_v17, %v5799_v24  ;;  %v6147_v24 = vadd.f32 %v2316_v23, %v5803_v25  ;;  %v6200_v53 = vld [vmem:[#allocation3 + $0x38] sm:$0x3f]  ;;  %v6215_v10 = vmul.f32 %v4658_v28, %v6162_v6  ;;  %v6224_v20 = vmul.f32 %v4658_v28, %v6180_v12  ;;  %v6250_v27 = vld [vmem:[#allocation3 + $0x90] sm:$0xff] }
 0x2c7   : > { %2179 = vst [vmem:[#allocation3 + $0x2e1] sm:$0xff] %v2176_v48  ;;  %v6120_v36 = vadd.f32 %v2282_v33, %v5803_v25  ;;  %v6135_v48 = vadd.f32 %v2294_v55, %v5803_v25  ;;  %v6202_v33 = vld [vmem:[#allocation3 + $0x40] sm:$0xff]  ;;  %v6233_v0 = vmul.f32 %v6162_v6, %v2338_v11  ;;  %v6237_v34 = vmul.f32 %v6162_v6, %v6192_v19 }
 0x2c8   : > { %2180 = vst [vmem:[#allocation3 + $0x2e9] sm:$0x3f] %v2177_v15  ;;  %v6138_v15 = vadd.f32 %v2304_v14, %v5803_v25  ;;  %v6153_v52 = vadd.f32 %v2327_v5, %v5803_v25  ;;  %v6241_v55 = vmul.f32 %v6162_v6, %v6194_v59  ;;  %v6246_v14 = vld [vmem:[#allocation3 + $0x80] sm:$0xff]  ;;  %v6262_v23 = vmul.f32 %v6162_v6, %v6202_v33  ;;  %v6267_v5 = vld [vmem:[#allocation3 + $0x98] sm:$0x3f] }
 0x2c9   : > { %2190 = vst [vmem:[#allocation3 + $0x311] sm:$0xff] %v2187_v47  ;;  %v6141_v47 = vadd.f32 %v2305_v60, %v5803_v25  ;;  %v6248_v60 = vld [vmem:[#allocation3 + $0x88] sm:$0x3f]  ;;  %v6301_v40 = vmul.f32 %v6162_v6, %v6226_v1  ;;  %v6319_v18 = vmul.f32 %v6162_v6, %v6230_v2  ;;  %v6323_v41 = vmul.f32 %v6162_v6, %v6246_v14 }
 0x2ca   : > { %2191 = vst [vmem:[#allocation3 + $0x319] sm:$0x3f] %v2188_v37  ;;  %v6144_v37 = vadd.f32 %v2315_v9, %v5803_v25  ;;  %v6258_v9 = vmul.f32 %v6162_v6, %v6200_v53  ;;  %v6337_v58 = vmul.f32 %v6162_v6, %v6250_v27  ;;  %v9348_v21 = vmax.f32 %v6120_v36, 0.0 }
 0x2cb   : > { %2201 = vst [vmem:[#allocation3 + $0x321] sm:$0xff] %v2198_v46  ;;  %v6150_v46 = vadd.f32 %v2326_v38, %v5803_v25  ;;  %v2275_v25 = vmax.f32 %v6112_v7, 0.0  ;;  %v6265_v38 = vmul.f32 %v6171_v31, %v2338_v11  ;;  %v6291_v11 = vld [vmem:[#allocation3 + $0xa8] sm:$0x3f] }
 0x2cc   : > { %2202 = vst [vmem:[#allocation3 + $0x329] sm:$0x3f] %v2199_v35  ;;  %v2254_v35 = vmax.f32 %v6099_v45, 0.0  ;;  %v2336_v45 = vld [vmem:[#allocation3 + $0x8] sm:$0x3f] }
 0x2cd   : > { %2212 = vst [vmem:[#allocation3 + $0x331] sm:$0xff] %v2209_v43  ;;  %v6218_v22 = vmul.f32 %v6162_v6, %v2336_v45  ;;  %v6275_v45 = vmul.f32 %v6162_v6, %v6204_v44  ;;  %v6327_v43 = vmul.f32 %v6162_v6, %v6248_v60 }
 0x2ce   : > { %2213 = vst [vmem:[#allocation3 + $0x339] sm:$0x3f] %v2210_v51  ;;  %v6313_v51 = vld [vmem:[#allocation3 + $0xc8] sm:$0x3f] }
 0x2cf   : > { %2223 = vst [vmem:[#allocation3 + $0x341] sm:$0xff] %v2220_v30  ;;  %v6293_v30 = vld [vmem:[#allocation3 + $0xb8] sm:$0x3f]  ;;  %v2396_v36 = vmul.f32 %v6162_v6, %v6313_v51 }
 0x2d0   : > { %9319 = vst [vmem:[#allocation7_spill] sm:$0xff] %v6180_v12 }
 0x2d1   : > { %2224 = vst [vmem:[#allocation3 + $0x349] sm:$0x3f] %v2221_v13  ;;  %v6196_v13 = vld [vmem:[#allocation3 + $0x30] sm:$0xff] }
 0x2d2   : > { %2234 = vst [vmem:[#allocation3 + $0x351] sm:$0xff] %v2231_v50  ;;  %v6210_v50 = vld [vmem:[#allocation3 + $0x58] sm:$0x3f]  ;;  %v6254_v17 = vmul.f32 %v6162_v6, %v6196_v13  ;;  %v2436_v7 = vmul.f32 %v6171_v31, %v6196_v13 }
 0x2d3   : > { %2235 = vst [vmem:[#allocation3 + $0x359] sm:$0x3f] %v2232_v32  ;;  %v6212_v32 = vld [vmem:[#allocation3 + $0x60] sm:$0xff]  ;;  %v6283_v28 = vmul.f32 %v6162_v6, %v6210_v50 }
 0x2d4   : > { %9320 = vst [vmem:[#allocation8_spill] sm:$0xff] %v6192_v19  ;;  %v6297_v8 = vmul.f32 %v6162_v6, %v6212_v32 }
 0x2d5   : > { %9321 = vst [vmem:[#allocation9_spill] sm:$0xff] %v6194_v59 }
 0x2d6   : > { %9322 = vst [vmem:[#allocation10_spill] sm:$0xff] %v6196_v13  ;;  %v2437_v13 = vmul.f32 %v6171_v31, %v6200_v53 }
 0x2d7   : > { %2245 = vst [vmem:[#allocation3 + $0x361] sm:$0xff] %v2242_v29  ;;  %v6221_v29 = vmul.f32 %v6162_v6, %v2337_v54  ;;  %v6279_v54 = vmul.f32 %v6162_v6, %v6208_v16 }
 0x2d8   : > { %9323 = vst [vmem:[#allocation11_spill] sm:$0xff] %v6200_v53 }
 0x2d9   : > { %9324 = vst [vmem:[#allocation12_spill] sm:$0xff] %v6202_v33 }
 0x2da   : > { %2246 = vst [vmem:[#allocation3 + $0x369] sm:$0x3f] %v2243_v3  ;;  %v6228_v3 = vld [vmem:[#allocation3 + $0x70] sm:$0xff] }
 0x2db   : > { %9325 = vst [vmem:[#allocation13_spill] sm:$0xff] %v6208_v16  ;;  %v6305_v4 = vmul.f32 %v6162_v6, %v6228_v3 }
 0x2dc   : > { %9326 = vst [vmem:[#allocation14_spill] sm:$0xff] %v6210_v50 }
 0x2dd   : > { %9327 = vst [vmem:[#allocation15_spill] sm:$0xff] %v6212_v32 }
 0x2de   : > { %9328 = vst [vmem:[#allocation16_spill] sm:$0xff] %v6224_v20  ;;  %v6341_v20 = vmul.f32 %v6162_v6, %v6267_v5 }
 0x2df   : > { %2256 = vst [vmem:[#allocation3 + $0x371] sm:$0xff] %v2253_v61  ;;  %v6269_v61 = vld [vmem:[#allocation3 + $0xa0] sm:$0xff] }
 0x2e0   : > { %9329 = vst [vmem:[#allocation17_spill] sm:$0xff] %v6226_v1  ;;  %v6345_v59 = vmul.f32 %v6162_v6, %v6269_v61 }
 0x2e1   : > { %9330 = vst [vmem:[#allocation18_spill] sm:$0xff] %v6228_v3 }
 0x2e2   : > { %9331 = vst [vmem:[#allocation19_spill] sm:$0xff] %v6230_v2 }
 0x2e3   : > { %2257 = vst [vmem:[#allocation3 + $0x379] sm:$0x3f] %v2254_v35  ;;  %v6271_v35 = vld [vmem:[#allocation3 + $0xb0] sm:$0xff] }
 0x2e4   : > { %9332 = vst [vmem:[#allocation20_spill] sm:$0xff] %v6248_v60  ;;  %v2393_v12 = vmul.f32 %v6162_v6, %v6271_v35 }
 0x2e5   : > { %9333 = vst [vmem:[#allocation21_spill] sm:$0xff] %v6250_v27 }
 0x2e6   : > { %2267 = vst [vmem:[#allocation3 + $0x381] sm:$0xff] %v2264_v62  ;;  %v6287_v62 = vmul.f32 %v6171_v31, %v6192_v19  ;;  %v2394_v19 = vmul.f32 %v6162_v6, %v6293_v30 }
 0x2e7   : > { %9334 = vst [vmem:[#allocation22_spill] sm:$0xff] %v6267_v5 }
 0x2e8   : > { %9335 = vst [vmem:[#allocation23_spill] sm:$0xff] %v6269_v61 }
 0x2e9   : > { %9336 = vst [vmem:[#allocation24_spill] sm:$0xff] %v6271_v35 }
 0x2ea   : > { %2268 = vst [vmem:[#allocation3 + $0x389] sm:$0x3f] %v2265_v56  ;;  %v6311_v56 = vld [vmem:[#allocation3 + $0xc0] sm:$0xff] }
 0x2eb   : > { %9337 = vst [vmem:[#allocation25_spill] sm:$0xff] %v6293_v30  ;;  %v2395_v53 = vmul.f32 %v6162_v6, %v6311_v56 }
 0x2ec   : > { %9338 = vst [vmem:[#allocation26_spill] sm:$0xff] %v6305_v4  ;;  %v6381_v4 = vld [vmem:[#allocation3 + $0xe0] sm:$0xff] }
 0x2ed   : > { %2278 = vst [vmem:[#allocation3 + $0x391] sm:$0xff] %v2275_v25  ;;  %v6333_v25 = vld [vmem:[#allocation3 + $0xd8] sm:$0x3f] }
 0x2ee   : > { %9339 = vst [vmem:[#allocation27_spill] sm:$0xff] %v6311_v56 }
 0x2ef   : > { %9340 = vst [vmem:[#allocation28_spill] sm:$0xff] %v6315_v49 }
 0x2f0   : > { %9341 = vst [vmem:[#allocation29_spill] sm:$0xff] %v6319_v18  ;;  %v9351_v18 = vmax.f32 %v6135_v48, 0.0  ;;  %v2447_v48 = vmul.f32 %v6171_v31, %v6248_v60  ;;  %v2453_v60 = vmul.f32 %v6171_v31, %v6293_v30  ;;  %v9357_v30 = vmax.f32 %v6147_v24, 0.0 }
 0x2f1   : > { %9342 = vst [vmem:[#allocation30_spill] sm:$0xff] %v6323_v41  ;;  %v2442_v41 = vmul.f32 %v6171_v31, %v6212_v32  ;;  %v6393_v32 = vld [vmem:[#allocation3 + $0xe8] sm:$0x3f]  ;;  %v2464_v24 = vadd.f32 %v2436_v7, %v6237_v34 }
 0x2f2   : > { %9343 = vst [vmem:[#allocation31_spill] sm:$0xff] %v6327_v43  ;;  %v9350_v43 = vmax.f32 %v6132_v63, 0.0  ;;  %v2443_v63 = vmul.f32 %v6171_v31, %v6226_v1  ;;  %v9355_v1 = vmax.f32 %v6141_v47, 0.0  ;;  %v2456_v47 = vmul.f32 %v6171_v31, %v6315_v49  ;;  %v9370_v7 = vld [vmem:[#allocation8_spill] sm:$0xff] }
 0x2f3   : > { %2279 = vst [vmem:[#allocation3 + $0x399] sm:$0x3f] %v2276_v39  ;;  %v2392_v39 = vmul.f32 %v6162_v6, %v6291_v11 }
 0x2f4   : > { %9344 = vst [vmem:[#allocation32_spill] sm:$0xff] %v6333_v25 }
 0x2f5   : > { %9345 = vst [vmem:[#allocation33_spill] sm:$0xff] %v6337_v58  ;;  %v2439_v58 = vmul.f32 %v6171_v31, %v6204_v44 }
 0x2f6   : > { %9346 = vst [vmem:[#allocation34_spill] sm:$0xff] %v6341_v20  ;;  %v2438_v20 = vmul.f32 %v6171_v31, %v6202_v33  ;;  %v2398_v33 = vmul.f32 %v6162_v6, %v6333_v25 }
 0x2f7   : > { %9347 = vst [vmem:[#allocation35_spill] sm:$0xff] %v6345_v59  ;;  %v9349_v59 = vmax.f32 %v6123_v26, 0.0  ;;  %v2440_v26 = vmul.f32 %v6171_v31, %v6208_v16  ;;  %v9353_v16 = vmax.f32 %v6138_v15, 0.0  ;;  %v2451_v15 = vmul.f32 %v6171_v31, %v6291_v11 }
 0x2f8   : > { %2289 = vst [vmem:[#allocation3 + $0x3a1] sm:$0xff] %v9348_v21  ;;  %v2397_v21 = vmul.f32 %v6162_v6, %v6315_v49  ;;  %v2444_v6 = vmul.f32 %v6171_v31, %v6228_v3  ;;  %v2449_v3 = vmul.f32 %v6171_v31, %v6267_v5  ;;  %v9356_v5 = vmax.f32 %v6144_v37, 0.0 }
 0x2f9   : > { %2290 = vst [vmem:[#allocation3 + $0x3a9] sm:$0x3f] %v9349_v59  ;;  %v2441_v59 = vmul.f32 %v6171_v31, %v6210_v50  ;;  %v2446_v50 = vmul.f32 %v6171_v31, %v6246_v14  ;;  %v2460_v37 = vadd.f32 %v6244_v42, %v6215_v10  ;;  %v2462_v49 = vadd.f32 %v6287_v62, %v6221_v29 }
 0x2fa   : > { %2300 = vst [vmem:[#allocation3 + $0x3b1] sm:$0xff] %v9350_v43  ;;  %v2445_v43 = vmul.f32 %v6171_v31, %v6230_v2  ;;  %v2450_v2 = vmul.f32 %v6171_v31, %v6269_v61  ;;  %v2455_v61 = vmul.f32 %v6171_v31, %v6313_v51  ;;  %v2467_v10 = vadd.f32 %v2439_v58, %v6258_v9  ;;  %v9363_v58 = vld [vmem:[#allocation31_spill] sm:$0xff] }
 0x2fb   : > { %2301 = vst [vmem:[#allocation3 + $0x3b9] sm:$0x3f] %v9351_v18  ;;  %v2448_v18 = vmul.f32 %v6171_v31, %v6250_v27  ;;  %v2454_v27 = vmul.f32 %v6171_v31, %v6311_v56  ;;  %v2459_v56 = vmul.f32 %v6171_v31, %v6393_v32  ;;  %v2469_v29 = vadd.f32 %v2441_v59, %v6275_v45  ;;  %v9372_v59 = vld [vmem:[#allocation9_spill] sm:$0xff] }
 0x2fc   : > { %9352 = vst [vmem:[#allocation36_spill] sm:$0xff] %v6381_v4  ;;  %v2471_v42 = vadd.f32 %v2443_v63, %v6283_v28  ;;  %v2473_v34 = vadd.f32 %v2445_v43, %v6301_v40  ;;  %v6454_v9 = vadd.f32 %v2449_v3, %v9363_v58  ;;  %v6465_v40 = vadd.f32 %v2453_v60, %v2392_v39  ;;  %v9373_v60 = vld [vmem:[#allocation10_spill] sm:$0xff]  ;;  %v9379_v43 = vld [vmem:[#allocation17_spill] sm:$0xff] }
 0x2fd   : > { %2311 = vst [vmem:[#allocation3 + $0x3c1] sm:$0xff] %v9353_v16  ;;  %v2452_v16 = vmul.f32 %v6171_v31, %v6271_v35  ;;  %v2458_v35 = vmul.f32 %v6171_v31, %v6381_v4  ;;  %v2463_v4 = vadd.f32 %v2435_v57, %v6233_v0  ;;  %v2472_v0 = vadd.f32 %v2444_v6, %v6297_v8  ;;  %v9377_v39 = vld [vmem:[#allocation14_spill] sm:$0xff] }
 0x2fe   : > { %9354 = vst [vmem:[#allocation37_spill] sm:$0xff] %v6393_v32  ;;  %v9359_v32 = vmax.f32 %v6153_v52, 0.0  ;;  %v9362_v52 = vld [vmem:[#allocation30_spill] sm:$0xff]  ;;  %v6469_v28 = vadd.f32 %v2455_v61, %v2394_v19  ;;  %v6471_v62 = vadd.f32 %v2456_v47, %v2395_v53  ;;  %v9375_v53 = vld [vmem:[#allocation12_spill] sm:$0xff]  ;;  %v9381_v47 = vld [vmem:[#allocation19_spill] sm:$0xff] }
 0x2ff   : > { %2312 = vst [vmem:[#allocation3 + $0x3c9] sm:$0x3f] %v9355_v1  ;;  %v2457_v1 = vmul.f32 %v6171_v31, %v6333_v25  ;;  %v9358_v25 = vmax.f32 %v6150_v46, 0.0  ;;  %v2466_v31 = vadd.f32 %v2438_v20, %v6254_v17  ;;  %v2470_v46 = vadd.f32 %v2442_v41, %v6279_v54  ;;  %v9361_v20 = vld [vmem:[#allocation29_spill] sm:$0xff]  ;;  %v9365_v41 = vld [vmem:[#allocation34_spill] sm:$0xff]  ;;  %v9366_v54 = vld [vmem:[#allocation35_spill] sm:$0xff] }
 0x300   : > { %2322 = vst [vmem:[#allocation3 + $0x3d1] sm:$0xff] %v9356_v5  ;;  %v2461_v5 = vadd.f32 %v6265_v38, %v6218_v22  ;;  %v2468_v22 = vadd.f32 %v2440_v26, %v6262_v23  ;;  %v2475_v17 = vadd.f32 %v2447_v48, %v9361_v20  ;;  %v9364_v23 = vld [vmem:[#allocation33_spill] sm:$0xff]  ;;  %v6460_v45 = vadd.f32 %v2451_v15, %v9365_v41 }
 0x301   : > { %2323 = vst [vmem:[#allocation3 + $0x3d9] sm:$0x3f] %v9357_v30  ;;  %v2465_v30 = vadd.f32 %v2437_v13, %v6241_v55  ;;  %v9360_v13 = vld [vmem:[#allocation26_spill] sm:$0xff]  ;;  %v6457_v38 = vadd.f32 %v2450_v2, %v9364_v23  ;;  %v6463_v8 = vadd.f32 %v2452_v16, %v9366_v54  ;;  %v6473_v57 = vadd.f32 %v2457_v1, %v2396_v36  ;;  %v9385_v54 = vld [vmem:[#allocation23_spill] sm:$0xff] }
 0x302   : > { %2333 = vst [vmem:[#allocation3 + $0x3e1] sm:$0xff] %v9358_v25  ;;  %v2474_v55 = vadd.f32 %v2446_v50, %v9360_v13  ;;  %v6467_v50 = vadd.f32 %v2454_v27, %v2393_v12  ;;  %v6475_v3 = vadd.f32 %v2458_v35, %v2397_v21  ;;  %v6477_v2 = vadd.f32 %v2459_v56, %v2398_v33  ;;  %v9371_v25 = vld [vmem:[#allocation7_spill] sm:$0xff]  ;;  %v9376_v33 = vld [vmem:[#allocation13_spill] sm:$0xff]  ;;  %v9382_v13 = vld [vmem:[#allocation20_spill] sm:$0xff] }
 0x303   : > { %2334 = vst [vmem:[#allocation3 + $0x3e9] sm:$0x3f] %v9359_v32  ;;  %v6451_v32 = vadd.f32 %v2448_v18, %v9362_v52  ;;  %v2493_v26 = vmul.f32 %v9371_v25, %v9370_v7  ;;  %v2494_v63 = vmul.f32 %v9371_v25, %v9372_v59  ;;  %v2495_v12 = vmul.f32 %v9371_v25, %v9373_v60  ;;  %v9374_v27 = vld [vmem:[#allocation11_spill] sm:$0xff]  ;;  %v9380_v18 = vld [vmem:[#allocation18_spill] sm:$0xff]  ;;  %v9383_v52 = vld [vmem:[#allocation21_spill] sm:$0xff] }
 0x304   : > { %9367 = vst [vmem:[#allocation26_spill] sm:$0xff] %v6473_v57  ;;  %v2496_v19 = vmul.f32 %v9371_v25, %v9374_v27  ;;  %v2497_v61 = vmul.f32 %v9371_v25, %v9375_v53  ;;  %v2498_v35 = vmul.f32 %v9371_v25, %v6204_v44  ;;  %v2499_v56 = vmul.f32 %v9371_v25, %v9376_v33  ;;  %v9378_v21 = vld [vmem:[#allocation15_spill] sm:$0xff]  ;;  %v2366_v16 = vld [vmem:[#allocation3 + $0xf8] sm:$0x3f]  ;;  %v9386_v60 = vld [vmem:[#allocation24_spill] sm:$0xff] }
 0x305   : > { %9368 = vst [vmem:[#allocation29_spill] sm:$0xff] %v6475_v3  ;;  %v2500_v36 = vmul.f32 %v9371_v25, %v9377_v39  ;;  %v2501_v6 = vmul.f32 %v9371_v25, %v9378_v21  ;;  %v2502_v48 = vmul.f32 %v9371_v25, %v9379_v43  ;;  %v2503_v15 = vmul.f32 %v9371_v25, %v9380_v18  ;;  %v9384_v23 = vld [vmem:[#allocation22_spill] sm:$0xff]  ;;  %v9388_v33 = vld [vmem:[#allocation27_spill] sm:$0xff]  ;;  %v9389_v43 = vld [vmem:[#allocation28_spill] sm:$0xff] }
 0x306   : > { %9369 = vst [vmem:[#allocation30_spill] sm:$0xff] %v6477_v2  ;;  %v2504_v1 = vmul.f32 %v9371_v25, %v9381_v47  ;;  %v2505_v44 = vmul.f32 %v9371_v25, %v6246_v14  ;;  %v2506_v20 = vmul.f32 %v9371_v25, %v9382_v13  ;;  %v2507_v58 = vmul.f32 %v9371_v25, %v9383_v52  ;;  %v9387_v14 = vld [vmem:[#allocation25_spill] sm:$0xff]  ;;  %v9390_v47 = vld [vmem:[#allocation32_spill] sm:$0xff] }
 0x307   : > { %v2508_v41 = vmul.f32 %v9371_v25, %v9384_v23  ;;  %v2509_v7 = vmul.f32 %v9371_v25, %v9385_v54  ;;  %v2510_v59 = vmul.f32 %v9371_v25, %v6291_v11  ;;  %v2511_v27 = vmul.f32 %v9371_v25, %v9386_v60  ;;  %v9391_v52 = vld [vmem:[#allocation36_spill] sm:$0xff]  ;;  %v9392_v23 = vld [vmem:[#allocation37_spill] sm:$0xff] }
 0x308   : > { %v2512_v53 = vmul.f32 %v9371_v25, %v9387_v14  ;;  %v2513_v39 = vmul.f32 %v9371_v25, %v9388_v33  ;;  %v2514_v21 = vmul.f32 %v9371_v25, %v6313_v51  ;;  %v2515_v18 = vmul.f32 %v9371_v25, %v9389_v43  ;;  %v6541_v43 = vld [vmem:[%s4831_s26 + $0x2] ss:$0 sm:$0xff] }
 0x309   : > { %v2516_v13 = vmul.f32 %v9371_v25, %v9390_v47  ;;  %v2517_v11 = vmul.f32 %v9371_v25, %v9391_v52  ;;  %v2518_v54 = vmul.f32 %v9371_v25, %v9392_v23  ;;  %v2520_v60 = vmul.f32 %v9371_v25, %v2366_v16  ;;  %v2550_v25 = vld [vmem:[#allocation3 + $0x9] sm:$0x3f] }
 0x30a   : > { %v6532_v14 = vadd.f32 %v2493_v26, %v2460_v37  ;;  %v6534_v33 = vadd.f32 %v2494_v63, %v2461_v5  ;;  %v6536_v2 = vadd.f32 %v2495_v12, %v2462_v49  ;;  %v6538_v51 = vadd.f32 %v2496_v19, %v2463_v4  ;;  %v2549_v4 = vld [vmem:[#allocation3 + $0x1] sm:$0xff]  ;;  %v6559_v26 = vld [vmem:[#allocation3 + $0x11] sm:$0xff]  ;;  %v6593_v19 = vld [vmem:[#allocation3 + $0x49] sm:$0x3f] }
 0x30b   : > { %v6543_v3 = vadd.f32 %v2497_v61, %v2464_v24  ;;  %v6545_v47 = vadd.f32 %v2498_v35, %v2465_v30  ;;  %v6547_v52 = vadd.f32 %v2499_v56, %v2466_v31  ;;  %v6549_v57 = vadd.f32 %v2500_v36, %v2467_v10  ;;  %9393 = vst [vmem:[#allocation31_spill] sm:$0xff] %v6559_v26  ;;  %v6561_v24 = vld [vmem:[#allocation3 + $0x19] sm:$0x3f]  ;;  %v6611_v56 = vld [vmem:[#allocation3 + $0x61] sm:$0xff] }
 0x30c   : > { %v6551_v23 = vadd.f32 %v2501_v6, %v2468_v22  ;;  %v6553_v37 = vadd.f32 %v2502_v48, %v2469_v29  ;;  %v6555_v5 = vadd.f32 %v2503_v15, %v2470_v46  ;;  %v6557_v49 = vadd.f32 %v2504_v1, %v2471_v42  ;;  %9394 = vst [vmem:[#allocation33_spill] sm:$0xff] %v6561_v24  ;;  %v6571_v29 = vld [vmem:[#allocation3 + $0x21] sm:$0xff]  ;;  %v6573_v46 = vld [vmem:[#allocation3 + $0x29] sm:$0x3f]  ;;  %v6575_v42 = vld [vmem:[#allocation3 + $0x31] sm:$0xff] }
 0x30d   : > { %v6563_v30 = vadd.f32 %v2505_v44, %v2472_v0  ;;  %v6565_v31 = vadd.f32 %v2506_v20, %v2473_v34  ;;  %v6567_v10 = vadd.f32 %v2507_v58, %v2474_v55  ;;  %v6569_v22 = vadd.f32 %v2508_v41, %v2475_v17  ;;  %9395 = vst [vmem:[#allocation34_spill] sm:$0xff] %v6571_v29  ;;  %v6589_v55 = vld [vmem:[#allocation3 + $0x39] sm:$0x3f]  ;;  %v6591_v17 = vld [vmem:[#allocation3 + $0x41] sm:$0xff]  ;;  %v9407_v48 = vld [vmem:[#allocation16_spill] sm:$0xff] }
 0x30e   : > { %9396 = vst [vmem:[#allocation35_spill] sm:$0xff] %v6573_v46  ;;  %v6578_v63 = vadd.f32 %v2509_v7, %v6451_v32  ;;  %v6581_v12 = vadd.f32 %v2510_v59, %v6454_v9  ;;  %v6584_v0 = vadd.f32 %v2511_v27, %v6457_v38  ;;  %v6587_v34 = vadd.f32 %v2512_v53, %v6460_v45  ;;  %v6607_v45 = vld [vmem:[#allocation3 + $0x51] sm:$0xff]  ;;  %v6609_v35 = vld [vmem:[#allocation3 + $0x59] sm:$0x3f]  ;;  %v6632_v20 = vld [vmem:[#allocation3 + $0x81] sm:$0xff] }
 0x30f   : > { %9397 = vst [vmem:[#allocation8_spill] sm:$0xff] %v6575_v42  ;;  %v6596_v61 = vadd.f32 %v2513_v39, %v6463_v8  ;;  %v6599_v32 = vadd.f32 %v2514_v21, %v6465_v40  ;;  %v6602_v9 = vadd.f32 %v2515_v18, %v6467_v50  ;;  %v6605_v38 = vadd.f32 %v2516_v13, %v6469_v28  ;;  %v9404_v8 = vld [vmem:[#allocation26_spill] sm:$0xff]  ;;  %v9406_v40 = vld [vmem:[#allocation29_spill] sm:$0xff]  ;;  %v6626_v28 = vld [vmem:[#allocation3 + $0x69] sm:$0x3f] }
 0x310   : > { %9398 = vst [vmem:[#allocation7_spill] sm:$0xff] %v6589_v55  ;;  %v6614_v36 = vadd.f32 %v2517_v11, %v6471_v62  ;;  %v6617_v6 = vadd.f32 %v2518_v54, %v9404_v8  ;;  %v6621_v15 = vadd.f32 %v9407_v48, %v9406_v40  ;;  %v9409_v50 = vld [vmem:[#allocation30_spill] sm:$0xff]  ;;  %v6628_v1 = vld [vmem:[#allocation3 + $0x71] sm:$0xff]  ;;  %v6634_v62 = vld [vmem:[#allocation3 + $0x89] sm:$0x3f]  ;;  %v2586_v41 = vmul.f32 %v6541_v43, %v2549_v4 }
 0x311   : > { %9399 = vst [vmem:[#allocation9_spill] sm:$0xff] %v6591_v17  ;;  %v6624_v16 = vadd.f32 %v2520_v60, %v9409_v50  ;;  %v6630_v44 = vld [vmem:[#allocation3 + $0x79] sm:$0x3f]  ;;  %v6636_v58 = vld [vmem:[#allocation3 + $0x91] sm:$0xff]  ;;  %v2587_v7 = vmul.f32 %v6541_v43, %v2550_v25  ;;  %v2588_v59 = vmul.f32 %v6541_v43, %v6559_v26  ;;  %v2589_v27 = vmul.f32 %v6541_v43, %v6561_v24  ;;  %v6646_v39 = vld [vmem:[#allocation3 + $0xa1] sm:$0xff] }
 0x312   : > { %9400 = vst [vmem:[#allocation10_spill] sm:$0xff] %v6593_v19  ;;  %v6644_v53 = vld [vmem:[#allocation3 + $0x99] sm:$0x3f]  ;;  %v6648_v21 = vld [vmem:[#allocation3 + $0xa9] sm:$0x3f]  ;;  %v2590_v18 = vmul.f32 %v6541_v43, %v6571_v29  ;;  %v2591_v13 = vmul.f32 %v6541_v43, %v6573_v46  ;;  %v2592_v11 = vmul.f32 %v6541_v43, %v6575_v42  ;;  %v2593_v54 = vmul.f32 %v6541_v43, %v6589_v55  ;;  %v6658_v60 = vld [vmem:[#allocation3 + $0xb1] sm:$0xff] }
 0x313   : > { %9401 = vst [vmem:[#allocation11_spill] sm:$0xff] %v6607_v45  ;;  %v6660_v4 = vld [vmem:[#allocation3 + $0xb9] sm:$0x3f]  ;;  %v6662_v25 = vld [vmem:[#allocation3 + $0xc1] sm:$0xff]  ;;  %v2594_v8 = vmul.f32 %v6541_v43, %v6591_v17  ;;  %v2595_v40 = vmul.f32 %v6541_v43, %v6593_v19  ;;  %v2596_v48 = vmul.f32 %v6541_v43, %v6607_v45  ;;  %v2597_v50 = vmul.f32 %v6541_v43, %v6609_v35  ;;  %v6672_v42 = vld [vmem:[#allocation3 + $0xc9] sm:$0x3f] }
 0x314   : > { %9402 = vst [vmem:[#allocation12_spill] sm:$0xff] %v6609_v35  ;;  %v6674_v55 = vld [vmem:[#allocation3 + $0xd1] sm:$0xff]  ;;  %v6676_v46 = vld [vmem:[#allocation3 + $0xd9] sm:$0x3f]  ;;  %v2598_v29 = vmul.f32 %v6541_v43, %v6611_v56  ;;  %v2599_v17 = vmul.f32 %v6541_v43, %v6626_v28  ;;  %v2600_v19 = vmul.f32 %v6541_v43, %v6628_v1  ;;  %v2601_v45 = vmul.f32 %v6541_v43, %v6630_v44 }
 0x315   : > { %9403 = vst [vmem:[#allocation13_spill] sm:$0xff] %v6611_v56  ;;  %v2602_v35 = vmul.f32 %v6541_v43, %v6632_v20  ;;  %v2603_v24 = vmul.f32 %v6541_v43, %v6634_v62  ;;  %v2604_v26 = vmul.f32 %v6541_v43, %v6636_v58  ;;  %v2605_v56 = vmul.f32 %v6541_v43, %v6644_v53 }
 0x316   : > { %9405 = vst [vmem:[#allocation14_spill] sm:$0xff] %v6617_v6  ;;  %v2621_v6 = vadd.f32 %v2593_v54, %v6549_v57 }
 0x317   : > { %9408 = vst [vmem:[#allocation15_spill] sm:$0xff] %v6621_v15  ;;  %v2619_v15 = vadd.f32 %v2591_v13, %v6545_v47  ;;  %v2629_v47 = vadd.f32 %v2601_v45, %v6569_v22  ;;  %v2631_v57 = vadd.f32 %v2603_v24, %v6581_v12  ;;  %v9429_v12 = vld [vmem:[#allocation31_spill] sm:$0xff]  ;;  %v9431_v45 = vld [vmem:[#allocation34_spill] sm:$0xff] }
 0x318   : > { %9410 = vst [vmem:[#allocation17_spill] sm:$0xff] %v6624_v16  ;;  %v2616_v16 = vadd.f32 %v2588_v59, %v6536_v2  ;;  %v2626_v2 = vadd.f32 %v2598_v29, %v6563_v30  ;;  %v6751_v13 = vld [vmem:[#allocation3 + $0xe1] sm:$0xff] }
 0x319   : > { %9411 = vst [vmem:[#allocation18_spill] sm:$0xff] %v6626_v28  ;;  %v2606_v28 = vmul.f32 %v6541_v43, %v6646_v39 }
 0x31a   : > { %9412 = vst [vmem:[#allocation19_spill] sm:$0xff] %v6628_v1  ;;  %v2607_v1 = vmul.f32 %v6541_v43, %v6648_v21 }
 0x31b   : > { %9413 = vst [vmem:[#allocation20_spill] sm:$0xff] %v6630_v44  ;;  %v2608_v44 = vmul.f32 %v6541_v43, %v6658_v60 }
 0x31c   : > { %9414 = vst [vmem:[#allocation21_spill] sm:$0xff] %v6632_v20  ;;  %v2609_v20 = vmul.f32 %v6541_v43, %v6660_v4 }
 0x31d   : > { %9415 = vst [vmem:[#allocation22_spill] sm:$0xff] %v6634_v62  ;;  %v2610_v62 = vmul.f32 %v6541_v43, %v6662_v25  ;;  %v2636_v30 = vadd.f32 %v2608_v44, %v6602_v9  ;;  %v9426_v29 = vld [vmem:[#allocation14_spill] sm:$0xff] }
 0x31e   : > { %9416 = vst [vmem:[#allocation23_spill] sm:$0xff] %v6636_v58  ;;  %v2611_v58 = vmul.f32 %v6541_v43, %v6672_v42  ;;  %v9436_v44 = vld [vmem:[#allocation10_spill] sm:$0xff] }
 0x31f   : > { %9417 = vst [vmem:[#allocation24_spill] sm:$0xff] %v6644_v53  ;;  %v2612_v53 = vmul.f32 %v6541_v43, %v6674_v55 }
 0x320   : > { %9418 = vst [vmem:[#allocation25_spill] sm:$0xff] %v6646_v39  ;;  %v2613_v39 = vmul.f32 %v6541_v43, %v6676_v46  ;;  %v2623_v43 = vadd.f32 %v2595_v40, %v6553_v37  ;;  %v2633_v37 = vadd.f32 %v2605_v56, %v6587_v34  ;;  %v2639_v22 = vadd.f32 %v2611_v58, %v9426_v29  ;;  %v9433_v56 = vld [vmem:[#allocation8_spill] sm:$0xff] }
 0x321   : > { %9419 = vst [vmem:[#allocation27_spill] sm:$0xff] %v6648_v21  ;;  %v2614_v21 = vadd.f32 %v2586_v41, %v6532_v14  ;;  %v2624_v14 = vadd.f32 %v2596_v48, %v6555_v5  ;;  %v4621_v41 = vld [vmem:[%s4831_s26 + $0xc] ss:$0 sm:$0xff]  ;;  %v2634_v5 = vadd.f32 %v2606_v28, %v6596_v61  ;;  %v9434_v28 = vld [vmem:[#allocation7_spill] sm:$0xff] }
 0x322   : > { %9420 = vst [vmem:[#allocation28_spill] sm:$0xff] %v6658_v60  ;;  %v2615_v60 = vadd.f32 %v2587_v7, %v6534_v33  ;;  %v2625_v33 = vadd.f32 %v2597_v50, %v6557_v49  ;;  %v2635_v49 = vadd.f32 %v2607_v1, %v6599_v32  ;;  %v2649_v61 = vmul.f32 %v4621_v41, %v9431_v45  ;;  %v9435_v1 = vld [vmem:[#allocation9_spill] sm:$0xff]  ;;  %v9438_v7 = vld [vmem:[#allocation12_spill] sm:$0xff]  ;;  %v9443_v54 = vld [vmem:[#allocation19_spill] sm:$0xff] }
 0x323   : > { %9421 = vst [vmem:[#allocation32_spill] sm:$0xff] %v6660_v4  ;;  %v2617_v4 = vadd.f32 %v2589_v27, %v6538_v51  ;;  %v2627_v51 = vadd.f32 %v2599_v17, %v6565_v31  ;;  %v2637_v31 = vadd.f32 %v2609_v20, %v6605_v38  ;;  %v9427_v17 = vld [vmem:[#allocation15_spill] sm:$0xff]  ;;  %v2651_v9 = vmul.f32 %v4621_v41, %v9433_v56  ;;  %v9439_v27 = vld [vmem:[#allocation13_spill] sm:$0xff]  ;;  %v9444_v40 = vld [vmem:[#allocation20_spill] sm:$0xff] }
 0x324   : > { %9422 = vst [vmem:[#allocation36_spill] sm:$0xff] %v6662_v25  ;;  %v2618_v25 = vadd.f32 %v2590_v18, %v6543_v3  ;;  %v2628_v3 = vadd.f32 %v2600_v19, %v6567_v10  ;;  %v2638_v10 = vadd.f32 %v2610_v62, %v6614_v36  ;;  %v9428_v19 = vld [vmem:[#allocation17_spill] sm:$0xff]  ;;  %v2652_v38 = vmul.f32 %v4621_v41, %v9434_v28  ;;  %v9437_v62 = vld [vmem:[#allocation11_spill] sm:$0xff] }
 0x325   : > { %9423 = vst [vmem:[#allocation37_spill] sm:$0xff] %v6672_v42  ;;  %v2620_v42 = vadd.f32 %v2592_v11, %v6547_v52  ;;  %v2630_v52 = vadd.f32 %v2602_v35, %v6578_v63  ;;  %v2640_v63 = vadd.f32 %v2612_v53, %v9427_v17  ;;  %v2641_v24 = vadd.f32 %v2613_v39, %v9428_v19  ;;  %v9432_v35 = vld [vmem:[#allocation35_spill] sm:$0xff]  ;;  %v9440_v39 = vld [vmem:[#allocation18_spill] sm:$0xff]  ;;  %v9445_v50 = vld [vmem:[#allocation21_spill] sm:$0xff] }
 0x326   : > { %9424 = vst [vmem:[#allocation26_spill] sm:$0xff] %v6674_v55  ;;  %v2622_v55 = vadd.f32 %v2594_v8, %v6551_v23  ;;  %v2632_v23 = vadd.f32 %v2604_v26, %v6584_v0  ;;  %v2647_v26 = vmul.f32 %v4621_v41, %v9429_v12  ;;  %v9430_v0 = vld [vmem:[#allocation33_spill] sm:$0xff]  ;;  %v2650_v32 = vmul.f32 %v4621_v41, %v9432_v35  ;;  %v6753_v11 = vld [vmem:[#allocation3 + $0xe9] sm:$0x3f]  ;;  %v9446_v17 = vld [vmem:[#allocation22_spill] sm:$0xff] }
 0x327   : > { %9425 = vst [vmem:[#allocation29_spill] sm:$0xff] %v6676_v46  ;;  %v2648_v34 = vmul.f32 %v4621_v41, %v9430_v0  ;;  %v2653_v36 = vmul.f32 %v4621_v41, %v9435_v1  ;;  %v2654_v20 = vmul.f32 %v4621_v41, %v9436_v44  ;;  %v2655_v58 = vmul.f32 %v4621_v41, %v9437_v62  ;;  %v9447_v12 = vld [vmem:[#allocation23_spill] sm:$0xff]  ;;  %v9448_v62 = vld [vmem:[#allocation24_spill] sm:$0xff]  ;;  %v9449_v44 = vld [vmem:[#allocation25_spill] sm:$0xff] }
 0x328   : > { %v2656_v59 = vmul.f32 %v4621_v41, %v9438_v7  ;;  %v2657_v53 = vmul.f32 %v4621_v41, %v9439_v27  ;;  %v2658_v18 = vmul.f32 %v4621_v41, %v9440_v39  ;;  %9441 = vst [vmem:[#allocation16_spill] sm:$0xff] %v6751_v13  ;;  %v2659_v8 = vmul.f32 %v4621_v41, %v9443_v54  ;;  %v9450_v1 = vld [vmem:[#allocation27_spill] sm:$0xff] }
 0x329   : > { %9442 = vst [vmem:[#allocation30_spill] sm:$0xff] %v6753_v11  ;;  %v2660_v48 = vmul.f32 %v4621_v41, %v9444_v40  ;;  %v2661_v29 = vmul.f32 %v4621_v41, %v9445_v50  ;;  %v2662_v19 = vmul.f32 %v4621_v41, %v9446_v17  ;;  %v2663_v0 = vmul.f32 %v4621_v41, %v9447_v12  ;;  %v9451_v28 = vld [vmem:[#allocation28_spill] sm:$0xff] }
 0x32a   : > { %v2664_v7 = vmul.f32 %v4621_v41, %v9448_v62  ;;  %v2665_v27 = vmul.f32 %v4621_v41, %v9449_v44  ;;  %v2666_v39 = vmul.f32 %v4621_v41, %v9450_v1  ;;  %v2667_v56 = vmul.f32 %v4621_v41, %v9451_v28  ;;  %v9452_v35 = vld [vmem:[#allocation32_spill] sm:$0xff] }
 0x32b   : > { %v2668_v45 = vmul.f32 %v4621_v41, %v9452_v35  ;;  %v9453_v11 = vld [vmem:[#allocation36_spill] sm:$0xff]  ;;  %v2675_v35 = vadd.f32 %v2647_v26, %v2614_v21  ;;  %v2683_v21 = vadd.f32 %v2655_v58, %v2622_v55  ;;  %v2684_v26 = vadd.f32 %v2656_v59, %v2623_v43 }
 0x32c   : > { %v2669_v54 = vmul.f32 %v4621_v41, %v9453_v11  ;;  %v9454_v13 = vld [vmem:[#allocation37_spill] sm:$0xff]  ;;  %v2676_v11 = vadd.f32 %v2648_v34, %v2615_v60  ;;  %v2685_v34 = vadd.f32 %v2657_v53, %v2624_v14  ;;  %v2686_v60 = vadd.f32 %v2658_v18, %v2625_v33 }
 0x32d   : > { %v2670_v40 = vmul.f32 %v4621_v41, %v9454_v13  ;;  %v9455_v46 = vld [vmem:[#allocation26_spill] sm:$0xff]  ;;  %v2677_v13 = vadd.f32 %v2649_v61, %v2616_v16  ;;  %v2687_v61 = vadd.f32 %v2659_v8, %v2626_v2 }
 0x32e   : > { %v2671_v50 = vmul.f32 %v4621_v41, %v9455_v46  ;;  %v9456_v17 = vld [vmem:[#allocation29_spill] sm:$0xff]  ;;  %v2678_v46 = vadd.f32 %v2650_v32, %v2617_v4  ;;  %v4622_v16 = vld [vmem:[%s4831_s26 + $0x16] ss:$0 sm:$0xff]  ;;  %v2688_v4 = vadd.f32 %v2660_v48, %v2627_v51  ;;  %v2689_v32 = vadd.f32 %v2661_v29, %v2628_v3 }
 0x32f   : > { %v2672_v12 = vmul.f32 %v4621_v41, %v9456_v17  ;;  %v9457_v62 = vld [vmem:[#allocation16_spill] sm:$0xff]  ;;  %v2679_v17 = vadd.f32 %v2651_v9, %v2618_v25  ;;  %v2690_v9 = vadd.f32 %v2662_v19, %v2629_v47  ;;  %v6772_v25 = vadd.f32 %v2663_v0, %v2630_v52  ;;  %v9464_v3 = vld [vmem:[#allocation34_spill] sm:$0xff]  ;;  %v9465_v52 = vld [vmem:[#allocation35_spill] sm:$0xff] }
 0x330   : > { %v2673_v44 = vmul.f32 %v4621_v41, %v9457_v62  ;;  %v9458_v1 = vld [vmem:[#allocation30_spill] sm:$0xff]  ;;  %v2680_v62 = vadd.f32 %v2652_v38, %v2619_v15  ;;  %v6774_v15 = vadd.f32 %v2664_v7, %v2631_v57  ;;  %v6776_v38 = vadd.f32 %v2665_v27, %v2632_v23  ;;  %v9466_v23 = vld [vmem:[#allocation8_spill] sm:$0xff]  ;;  %v9474_v7 = vld [vmem:[#allocation19_spill] sm:$0xff] }
 0x331   : > { %v2674_v28 = vmul.f32 %v4621_v41, %v9458_v1  ;;  %v2681_v1 = vadd.f32 %v2653_v36, %v2620_v42  ;;  %v2682_v41 = vadd.f32 %v2654_v20, %v2621_v6  ;;  %v6778_v36 = vadd.f32 %v2666_v39, %v2633_v37  ;;  %v9475_v27 = vld [vmem:[#allocation20_spill] sm:$0xff]  ;;  %v2580_v18 = vld [vmem:[#allocation3 + $0xf9] sm:$0x3f] }
 0x332   : > { %v6780_v42 = vadd.f32 %v2667_v56, %v2634_v5  ;;  %v6782_v6 = vadd.f32 %v2668_v45, %v2635_v49  ;;  %v6784_v55 = vadd.f32 %v2669_v54, %v2636_v30  ;;  %v6786_v43 = vadd.f32 %v2670_v40, %v2637_v31  ;;  %v9467_v5 = vld [vmem:[#allocation7_spill] sm:$0xff]  ;;  %v9468_v30 = vld [vmem:[#allocation9_spill] sm:$0xff]  ;;  %v9469_v31 = vld [vmem:[#allocation10_spill] sm:$0xff] }
 0x333   : > { %v6788_v14 = vadd.f32 %v2671_v50, %v2638_v10  ;;  %v6790_v33 = vadd.f32 %v2672_v12, %v2639_v22  ;;  %v6792_v2 = vadd.f32 %v2673_v44, %v2640_v63  ;;  %v6794_v51 = vadd.f32 %v2674_v28, %v2641_v24  ;;  %v9470_v10 = vld [vmem:[#allocation11_spill] sm:$0xff]  ;;  %v9471_v22 = vld [vmem:[#allocation12_spill] sm:$0xff]  ;;  %v9472_v63 = vld [vmem:[#allocation13_spill] sm:$0xff] }
 0x334   : > { %9459 = vst [vmem:[#allocation14_spill] sm:$0xff] %v6786_v43  ;;  %v2708_v47 = vmul.f32 %v4622_v16, %v9464_v3  ;;  %v2709_v57 = vmul.f32 %v4622_v16, %v9465_v52  ;;  %v2710_v37 = vmul.f32 %v4622_v16, %v9466_v23  ;;  %v2711_v49 = vmul.f32 %v4622_v16, %v9467_v5  ;;  %v9473_v24 = vld [vmem:[#allocation18_spill] sm:$0xff]  ;;  %v2579_v39 = vld [vmem:[#allocation3 + $0xf1] sm:$0xff]  ;;  %v9478_v50 = vld [vmem:[#allocation23_spill] sm:$0xff] }
 0x335   : > { %9460 = vst [vmem:[#allocation15_spill] sm:$0xff] %v6788_v14  ;;  %v2712_v45 = vmul.f32 %v4622_v16, %v9468_v30  ;;  %v2713_v56 = vmul.f32 %v4622_v16, %v9469_v31  ;;  %v2714_v20 = vmul.f32 %v4622_v16, %v9470_v10  ;;  %v2715_v58 = vmul.f32 %v4622_v16, %v9471_v22  ;;  %v9476_v54 = vld [vmem:[#allocation21_spill] sm:$0xff]  ;;  %v9477_v40 = vld [vmem:[#allocation22_spill] sm:$0xff]  ;;  %v9479_v19 = vld [vmem:[#allocation24_spill] sm:$0xff] }
 0x336   : > { %9461 = vst [vmem:[#allocation17_spill] sm:$0xff] %v6790_v33  ;;  %v2716_v44 = vmul.f32 %v4622_v16, %v9472_v63  ;;  %v2717_v28 = vmul.f32 %v4622_v16, %v9473_v24  ;;  %v2718_v59 = vmul.f32 %v4622_v16, %v9474_v7  ;;  %v2719_v53 = vmul.f32 %v4622_v16, %v9475_v27  ;;  %v9480_v0 = vld [vmem:[#allocation25_spill] sm:$0xff]  ;;  %v9481_v52 = vld [vmem:[#allocation27_spill] sm:$0xff]  ;;  %v9482_v5 = vld [vmem:[#allocation28_spill] sm:$0xff] }
 0x337   : > { %9462 = vst [vmem:[#allocation31_spill] sm:$0xff] %v6792_v2  ;;  %v2720_v8 = vmul.f32 %v4622_v16, %v9476_v54  ;;  %v2721_v48 = vmul.f32 %v4622_v16, %v9477_v40  ;;  %v2722_v29 = vmul.f32 %v4622_v16, %v9478_v50  ;;  %v2723_v12 = vmul.f32 %v4622_v16, %v9479_v19  ;;  %v9483_v31 = vld [vmem:[#allocation32_spill] sm:$0xff]  ;;  %v9485_v24 = vld [vmem:[#allocation37_spill] sm:$0xff]  ;;  %v9486_v27 = vld [vmem:[#allocation26_spill] sm:$0xff] }
 0x338   : > { %9463 = vst [vmem:[#allocation33_spill] sm:$0xff] %v6794_v51  ;;  %v2724_v3 = vmul.f32 %v4622_v16, %v9480_v0  ;;  %v2725_v23 = vmul.f32 %v4622_v16, %v9481_v52  ;;  %v2726_v30 = vmul.f32 %v4622_v16, %v9482_v5  ;;  %v2727_v10 = vmul.f32 %v4622_v16, %v9483_v31  ;;  %v9484_v22 = vld [vmem:[#allocation36_spill] sm:$0xff]  ;;  %v9487_v40 = vld [vmem:[#allocation29_spill] sm:$0xff]  ;;  %v9489_v19 = vld [vmem:[#allocation30_spill] sm:$0xff] }
 0x339   : > { %v2728_v63 = vmul.f32 %v4622_v16, %v9484_v22  ;;  %v2729_v7 = vmul.f32 %v4622_v16, %v9485_v24  ;;  %v2730_v54 = vmul.f32 %v4622_v16, %v9486_v27  ;;  %v2731_v51 = vmul.f32 %v4622_v16, %v9487_v40  ;;  %v9488_v50 = vld [vmem:[#allocation16_spill] sm:$0xff] }
 0x33a   : > { %v2732_v2 = vmul.f32 %v4622_v16, %v9488_v50  ;;  %v2733_v33 = vmul.f32 %v4622_v16, %v9489_v19  ;;  %v2734_v0 = vmul.f32 %v4622_v16, %v2579_v39  ;;  %v2735_v14 = vmul.f32 %v4622_v16, %v2580_v18  ;;  %v6839_v50 = vld [vmem:[%s4831_s26 + $0x4] ss:$0 sm:$0xff] }
 0x33b   : > { %v6822_v52 = vadd.f32 %v2708_v47, %v2675_v35  ;;  %v6824_v5 = vadd.f32 %v2709_v57, %v2676_v11  ;;  %v6826_v31 = vadd.f32 %v2710_v37, %v2677_v13  ;;  %v6828_v22 = vadd.f32 %v2711_v49, %v2678_v46  ;;  %v6849_v46 = vld [vmem:[#allocation3 + $0x12] sm:$0xff]  ;;  %v2765_v57 = vld [vmem:[#allocation3 + $0xa] sm:$0x3f]  ;;  %v6881_v37 = vld [vmem:[#allocation3 + $0x42] sm:$0xff] }
 0x33c   : > { %v6830_v43 = vadd.f32 %v2712_v45, %v2679_v17  ;;  %v6832_v24 = vadd.f32 %v2713_v56, %v2680_v62  ;;  %v6834_v27 = vadd.f32 %v2714_v20, %v2681_v1  ;;  %v6836_v40 = vadd.f32 %v2715_v58, %v2682_v41  ;;  %9490 = vst [vmem:[#allocation34_spill] sm:$0xff] %v6849_v46  ;;  %v6851_v17 = vld [vmem:[#allocation3 + $0x1a] sm:$0x3f]  ;;  %v6883_v49 = vld [vmem:[#allocation3 + $0x4a] sm:$0x3f]  ;;  %v6901_v58 = vld [vmem:[#allocation3 + $0x62] sm:$0xff] }
 0x33d   : > { %v6841_v39 = vadd.f32 %v2716_v44, %v2683_v21  ;;  %v6843_v35 = vadd.f32 %v2717_v28, %v2684_v26  ;;  %v6845_v11 = vadd.f32 %v2718_v59, %v2685_v34  ;;  %v6847_v13 = vadd.f32 %v2719_v53, %v2686_v60  ;;  %9491 = vst [vmem:[#allocation35_spill] sm:$0xff] %v6851_v17  ;;  %v6861_v21 = vld [vmem:[#allocation3 + $0x22] sm:$0xff]  ;;  %v6863_v26 = vld [vmem:[#allocation3 + $0x2a] sm:$0x3f]  ;;  %v6865_v34 = vld [vmem:[#allocation3 + $0x32] sm:$0xff] }
 0x33e   : > { %v6853_v62 = vadd.f32 %v2720_v8, %v2687_v61  ;;  %v6855_v1 = vadd.f32 %v2721_v48, %v2688_v4  ;;  %v6857_v41 = vadd.f32 %v2722_v29, %v2689_v32  ;;  %v6859_v16 = vadd.f32 %v2723_v12, %v2690_v9  ;;  %9492 = vst [vmem:[#allocation8_spill] sm:$0xff] %v6861_v21  ;;  %v6867_v60 = vld [vmem:[#allocation3 + $0x3a] sm:$0x3f]  ;;  %v2764_v9 = vld [vmem:[#allocation3 + $0x2] sm:$0xff]  ;;  %v6917_v8 = vld [vmem:[#allocation3 + $0x72] sm:$0xff] }
 0x33f   : > { %9493 = vst [vmem:[#allocation7_spill] sm:$0xff] %v6863_v26  ;;  %v6870_v47 = vadd.f32 %v2724_v3, %v6772_v25  ;;  %v6873_v61 = vadd.f32 %v2725_v23, %v6774_v15  ;;  %v6876_v4 = vadd.f32 %v2726_v30, %v6776_v38  ;;  %v6879_v32 = vadd.f32 %v2727_v10, %v6778_v36  ;;  %v9498_v38 = vld [vmem:[#allocation14_spill] sm:$0xff]  ;;  %v6897_v36 = vld [vmem:[#allocation3 + $0x52] sm:$0xff]  ;;  %v9502_v44 = vld [vmem:[#allocation15_spill] sm:$0xff] }
 0x340   : > { %9494 = vst [vmem:[#allocation9_spill] sm:$0xff] %v6865_v34  ;;  %v6886_v45 = vadd.f32 %v2728_v63, %v6780_v42  ;;  %v6889_v25 = vadd.f32 %v2729_v7, %v6782_v6  ;;  %v6892_v15 = vadd.f32 %v2730_v54, %v6784_v55  ;;  %v6895_v56 = vadd.f32 %v2731_v51, %v9498_v38  ;;  %v6899_v20 = vld [vmem:[#allocation3 + $0x5a] sm:$0x3f]  ;;  %v9503_v42 = vld [vmem:[#allocation17_spill] sm:$0xff]  ;;  %v9505_v6 = vld [vmem:[#allocation31_spill] sm:$0xff] }
 0x341   : > { %9495 = vst [vmem:[#allocation10_spill] sm:$0xff] %v6867_v60  ;;  %v6904_v28 = vadd.f32 %v2732_v2, %v9502_v44  ;;  %v6907_v59 = vadd.f32 %v2733_v33, %v9503_v42  ;;  %v6910_v53 = vadd.f32 %v2734_v0, %v9505_v6  ;;  %v9507_v55 = vld [vmem:[#allocation33_spill] sm:$0xff]  ;;  %v6915_v51 = vld [vmem:[#allocation3 + $0x6a] sm:$0x3f]  ;;  %v6919_v48 = vld [vmem:[#allocation3 + $0x7a] sm:$0x3f]  ;;  %v2801_v33 = vmul.f32 %v6839_v50, %v2764_v9 }
 0x342   : > { %9496 = vst [vmem:[#allocation11_spill] sm:$0xff] %v6881_v37  ;;  %v6913_v18 = vadd.f32 %v2735_v14, %v9507_v55  ;;  %v6921_v29 = vld [vmem:[#allocation3 + $0x82] sm:$0xff]  ;;  %v6923_v12 = vld [vmem:[#allocation3 + $0x8a] sm:$0x3f]  ;;  %v6925_v2 = vld [vmem:[#allocation3 + $0x92] sm:$0xff]  ;;  %v2802_v3 = vmul.f32 %v6839_v50, %v2765_v57  ;;  %v2803_v14 = vmul.f32 %v6839_v50, %v6849_v46  ;;  %v2804_v23 = vmul.f32 %v6839_v50, %v6851_v17 }
 0x343   : > { %9497 = vst [vmem:[#allocation12_spill] sm:$0xff] %v6883_v49  ;;  %v6933_v30 = vld [vmem:[#allocation3 + $0x9a] sm:$0x3f]  ;;  %v6935_v10 = vld [vmem:[#allocation3 + $0xa2] sm:$0xff]  ;;  %v6937_v63 = vld [vmem:[#allocation3 + $0xaa] sm:$0x3f]  ;;  %v2805_v7 = vmul.f32 %v6839_v50, %v6861_v21  ;;  %v2806_v54 = vmul.f32 %v6839_v50, %v6863_v26  ;;  %v2807_v19 = vmul.f32 %v6839_v50, %v6865_v34  ;;  %v2808_v0 = vmul.f32 %v6839_v50, %v6867_v60 }
 0x344   : > { %9499 = vst [vmem:[#allocation13_spill] sm:$0xff] %v6897_v36  ;;  %v6947_v9 = vld [vmem:[#allocation3 + $0xb2] sm:$0xff]  ;;  %v6949_v57 = vld [vmem:[#allocation3 + $0xba] sm:$0x3f]  ;;  %v6951_v38 = vld [vmem:[#allocation3 + $0xc2] sm:$0xff]  ;;  %v2809_v44 = vmul.f32 %v6839_v50, %v6881_v37  ;;  %v2810_v42 = vmul.f32 %v6839_v50, %v6883_v49  ;;  %v2811_v6 = vmul.f32 %v6839_v50, %v6897_v36  ;;  %v2812_v55 = vmul.f32 %v6839_v50, %v6899_v20 }
 0x345   : > { %9500 = vst [vmem:[#allocation18_spill] sm:$0xff] %v6899_v20  ;;  %v6961_v34 = vld [vmem:[#allocation3 + $0xca] sm:$0x3f]  ;;  %v6963_v60 = vld [vmem:[#allocation3 + $0xd2] sm:$0xff]  ;;  %v6965_v26 = vld [vmem:[#allocation3 + $0xda] sm:$0x3f]  ;;  %v2813_v21 = vmul.f32 %v6839_v50, %v6901_v58  ;;  %v2814_v37 = vmul.f32 %v6839_v50, %v6915_v51  ;;  %v2815_v49 = vmul.f32 %v6839_v50, %v6917_v8  ;;  %v2816_v36 = vmul.f32 %v6839_v50, %v6919_v48 }
 0x346   : > { %9501 = vst [vmem:[#allocation19_spill] sm:$0xff] %v6901_v58  ;;  %v2817_v20 = vmul.f32 %v6839_v50, %v6921_v29  ;;  %v2818_v17 = vmul.f32 %v6839_v50, %v6923_v12  ;;  %v2819_v46 = vmul.f32 %v6839_v50, %v6925_v2  ;;  %v2820_v58 = vmul.f32 %v6839_v50, %v6933_v30 }
 0x347   : > { %9504 = vst [vmem:[#allocation20_spill] sm:$0xff] %v6907_v59  ;;  %v2836_v59 = vadd.f32 %v2808_v0, %v6836_v40 }
 0x348   : > { %9506 = vst [vmem:[#allocation21_spill] sm:$0xff] %v6910_v53  ;;  %v2834_v53 = vadd.f32 %v2806_v54, %v6832_v24  ;;  %v2844_v24 = vadd.f32 %v2816_v36, %v6859_v16  ;;  %v2846_v40 = vadd.f32 %v2818_v17, %v6873_v61  ;;  %v9527_v61 = vld [vmem:[#allocation34_spill] sm:$0xff]  ;;  %v9529_v36 = vld [vmem:[#allocation8_spill] sm:$0xff]  ;;  %v7040_v54 = vld [vmem:[#allocation3 + $0xe2] sm:$0xff] }
 0x349   : > { %9508 = vst [vmem:[#allocation22_spill] sm:$0xff] %v6913_v18  ;;  %v2831_v18 = vadd.f32 %v2803_v14, %v6826_v31  ;;  %v2841_v31 = vadd.f32 %v2813_v21, %v6853_v62 }
 0x34a   : > { %9509 = vst [vmem:[#allocation23_spill] sm:$0xff] %v6915_v51  ;;  %v2821_v51 = vmul.f32 %v6839_v50, %v6935_v10 }
 0x34b   : > { %9510 = vst [vmem:[#allocation24_spill] sm:$0xff] %v6917_v8  ;;  %v2822_v8 = vmul.f32 %v6839_v50, %v6937_v63 }
 0x34c   : > { %9511 = vst [vmem:[#allocation25_spill] sm:$0xff] %v6919_v48  ;;  %v2823_v48 = vmul.f32 %v6839_v50, %v6947_v9 }
 0x34d   : > { %9512 = vst [vmem:[#allocation27_spill] sm:$0xff] %v6921_v29  ;;  %v2824_v29 = vmul.f32 %v6839_v50, %v6949_v57 }
 0x34e   : > { %9513 = vst [vmem:[#allocation28_spill] sm:$0xff] %v6923_v12  ;;  %v2825_v12 = vmul.f32 %v6839_v50, %v6951_v38  ;;  %v2851_v62 = vadd.f32 %v2823_v48, %v6892_v15  ;;  %v9524_v21 = vld [vmem:[#allocation20_spill] sm:$0xff] }
 0x34f   : > { %9514 = vst [vmem:[#allocation32_spill] sm:$0xff] %v6925_v2  ;;  %v2826_v2 = vmul.f32 %v6839_v50, %v6961_v34  ;;  %v9534_v48 = vld [vmem:[#allocation12_spill] sm:$0xff] }
 0x350   : > { %9515 = vst [vmem:[#allocation36_spill] sm:$0xff] %v6933_v30  ;;  %v2827_v30 = vmul.f32 %v6839_v50, %v6963_v60 }
 0x351   : > { %9516 = vst [vmem:[#allocation37_spill] sm:$0xff] %v6935_v10  ;;  %v2828_v10 = vmul.f32 %v6839_v50, %v6965_v26  ;;  %v2838_v50 = vadd.f32 %v2810_v42, %v6843_v35  ;;  %v2848_v35 = vadd.f32 %v2820_v58, %v6879_v32  ;;  %v2854_v16 = vadd.f32 %v2826_v2, %v9524_v21  ;;  %v9531_v58 = vld [vmem:[#allocation9_spill] sm:$0xff] }
 0x352   : > { %9517 = vst [vmem:[#allocation26_spill] sm:$0xff] %v6937_v63  ;;  %v2829_v63 = vadd.f32 %v2801_v33, %v6822_v52  ;;  %v2839_v52 = vadd.f32 %v2811_v6, %v6845_v11  ;;  %v4624_v33 = vld [vmem:[%s4831_s26 + $0xe] ss:$0 sm:$0xff]  ;;  %v2849_v11 = vadd.f32 %v2821_v51, %v6886_v45  ;;  %v9541_v0 = vld [vmem:[#allocation24_spill] sm:$0xff] }
 0x353   : > { %9518 = vst [vmem:[#allocation29_spill] sm:$0xff] %v6947_v9  ;;  %v2830_v9 = vadd.f32 %v2802_v3, %v6824_v5  ;;  %v2840_v5 = vadd.f32 %v2812_v55, %v6847_v13  ;;  %v2850_v13 = vadd.f32 %v2822_v8, %v6889_v25  ;;  %v2864_v45 = vmul.f32 %v4624_v33, %v9529_v36  ;;  %v9532_v51 = vld [vmem:[#allocation10_spill] sm:$0xff]  ;;  %v9533_v8 = vld [vmem:[#allocation11_spill] sm:$0xff]  ;;  %v9542_v42 = vld [vmem:[#allocation25_spill] sm:$0xff] }
 0x354   : > { %9519 = vst [vmem:[#allocation16_spill] sm:$0xff] %v6949_v57  ;;  %v2832_v57 = vadd.f32 %v2804_v23, %v6828_v22  ;;  %v2842_v22 = vadd.f32 %v2814_v37, %v6855_v1  ;;  %v2852_v1 = vadd.f32 %v2824_v29, %v6895_v56  ;;  %v9525_v37 = vld [vmem:[#allocation21_spill] sm:$0xff]  ;;  %v2866_v15 = vmul.f32 %v4624_v33, %v9531_v58  ;;  %v9536_v3 = vld [vmem:[#allocation18_spill] sm:$0xff]  ;;  %v9537_v23 = vld [vmem:[#allocation19_spill] sm:$0xff] }
 0x355   : > { %9520 = vst [vmem:[#allocation30_spill] sm:$0xff] %v6951_v38  ;;  %v2833_v38 = vadd.f32 %v2805_v7, %v6830_v43  ;;  %v2843_v43 = vadd.f32 %v2815_v49, %v6857_v41  ;;  %v2853_v41 = vadd.f32 %v2825_v12, %v6904_v28  ;;  %v9526_v49 = vld [vmem:[#allocation22_spill] sm:$0xff]  ;;  %v2867_v56 = vmul.f32 %v4624_v33, %v9532_v51  ;;  %v9535_v12 = vld [vmem:[#allocation13_spill] sm:$0xff]  ;;  %v9543_v55 = vld [vmem:[#allocation27_spill] sm:$0xff] }
 0x356   : > { %9521 = vst [vmem:[#allocation14_spill] sm:$0xff] %v6961_v34  ;;  %v2835_v34 = vadd.f32 %v2807_v19, %v6834_v27  ;;  %v2845_v27 = vadd.f32 %v2817_v20, %v6870_v47  ;;  %v2855_v47 = vadd.f32 %v2827_v30, %v9525_v37  ;;  %v2856_v17 = vadd.f32 %v2828_v10, %v9526_v49  ;;  %v9530_v20 = vld [vmem:[#allocation7_spill] sm:$0xff]  ;;  %v7042_v19 = vld [vmem:[#allocation3 + $0xea] sm:$0x3f] }
 0x357   : > { %9522 = vst [vmem:[#allocation15_spill] sm:$0xff] %v6963_v60  ;;  %v2837_v60 = vadd.f32 %v2809_v44, %v6841_v39  ;;  %v2847_v39 = vadd.f32 %v2819_v46, %v6876_v4  ;;  %v2862_v46 = vmul.f32 %v4624_v33, %v9527_v61  ;;  %v9528_v4 = vld [vmem:[#allocation35_spill] sm:$0xff]  ;;  %v2865_v25 = vmul.f32 %v4624_v33, %v9530_v20  ;;  %v9544_v37 = vld [vmem:[#allocation28_spill] sm:$0xff] }
 0x358   : > { %9523 = vst [vmem:[#allocation17_spill] sm:$0xff] %v6965_v26  ;;  %v2863_v32 = vmul.f32 %v4624_v33, %v9528_v4  ;;  %v2868_v28 = vmul.f32 %v4624_v33, %v9533_v8  ;;  %v2869_v29 = vmul.f32 %v4624_v33, %v9534_v48  ;;  %v2870_v2 = vmul.f32 %v4624_v33, %v9535_v12  ;;  %v9538_v10 = vld [vmem:[#allocation23_spill] sm:$0xff]  ;;  %v9545_v61 = vld [vmem:[#allocation32_spill] sm:$0xff]  ;;  %v9547_v48 = vld [vmem:[#allocation37_spill] sm:$0xff] }
 0x359   : > { %v2871_v14 = vmul.f32 %v4624_v33, %v9536_v3  ;;  %v2872_v30 = vmul.f32 %v4624_v33, %v9537_v23  ;;  %v2873_v7 = vmul.f32 %v4624_v33, %v9538_v10  ;;  %9539 = vst [vmem:[#allocation31_spill] sm:$0xff] %v7040_v54  ;;  %v2874_v44 = vmul.f32 %v4624_v33, %v9541_v0  ;;  %v9546_v12 = vld [vmem:[#allocation36_spill] sm:$0xff]  ;;  %v9548_v8 = vld [vmem:[#allocation26_spill] sm:$0xff] }
 0x35a   : > { %9540 = vst [vmem:[#allocation33_spill] sm:$0xff] %v7042_v19  ;;  %v2875_v6 = vmul.f32 %v4624_v33, %v9542_v42  ;;  %v2876_v21 = vmul.f32 %v4624_v33, %v9543_v55  ;;  %v2877_v49 = vmul.f32 %v4624_v33, %v9544_v37  ;;  %v2878_v4 = vmul.f32 %v4624_v33, %v9545_v61  ;;  %v9549_v51 = vld [vmem:[#allocation29_spill] sm:$0xff] }
 0x35b   : > { %v2879_v3 = vmul.f32 %v4624_v33, %v9546_v12  ;;  %v2880_v23 = vmul.f32 %v4624_v33, %v9547_v48  ;;  %v2881_v10 = vmul.f32 %v4624_v33, %v9548_v8  ;;  %v2882_v58 = vmul.f32 %v4624_v33, %v9549_v51  ;;  %v9550_v20 = vld [vmem:[#allocation16_spill] sm:$0xff] }
 0x35c   : > { %v2883_v36 = vmul.f32 %v4624_v33, %v9550_v20  ;;  %v9551_v19 = vld [vmem:[#allocation30_spill] sm:$0xff]  ;;  %v2890_v20 = vadd.f32 %v2862_v46, %v2829_v63  ;;  %v2898_v46 = vadd.f32 %v2870_v2, %v2837_v60  ;;  %v2899_v63 = vadd.f32 %v2871_v14, %v2838_v50 }
 0x35d   : > { %v2884_v0 = vmul.f32 %v4624_v33, %v9551_v19  ;;  %v9552_v54 = vld [vmem:[#allocation14_spill] sm:$0xff]  ;;  %v2891_v19 = vadd.f32 %v2863_v32, %v2830_v9  ;;  %v2900_v9 = vadd.f32 %v2872_v30, %v2839_v52  ;;  %v2901_v32 = vadd.f32 %v2873_v7, %v2840_v5 }
 0x35e   : > { %v2885_v42 = vmul.f32 %v4624_v33, %v9552_v54  ;;  %v9553_v26 = vld [vmem:[#allocation15_spill] sm:$0xff]  ;;  %v2892_v54 = vadd.f32 %v2864_v45, %v2831_v18  ;;  %v2902_v45 = vadd.f32 %v2874_v44, %v2841_v31  ;;  %v2795_v7 = vld [vmem:[#allocation3 + $0xfa] sm:$0x3f] }
 0x35f   : > { %v2886_v55 = vmul.f32 %v4624_v33, %v9553_v26  ;;  %v9554_v37 = vld [vmem:[#allocation17_spill] sm:$0xff]  ;;  %v2893_v26 = vadd.f32 %v2865_v25, %v2832_v57  ;;  %v4625_v18 = vld [vmem:[%s4831_s26 + $0x18] ss:$0 sm:$0xff]  ;;  %v2903_v25 = vadd.f32 %v2875_v6, %v2842_v22  ;;  %v2904_v57 = vadd.f32 %v2876_v21, %v2843_v43  ;;  %v9562_v43 = vld [vmem:[#allocation8_spill] sm:$0xff] }
 0x360   : > { %v2887_v61 = vmul.f32 %v4624_v33, %v9554_v37  ;;  %v9555_v12 = vld [vmem:[#allocation31_spill] sm:$0xff]  ;;  %v2894_v37 = vadd.f32 %v2866_v15, %v2833_v38  ;;  %v2905_v15 = vadd.f32 %v2877_v49, %v2844_v24  ;;  %v7061_v38 = vadd.f32 %v2878_v4, %v2845_v27  ;;  %v9577_v49 = vld [vmem:[#allocation36_spill] sm:$0xff]  ;;  %v9578_v4 = vld [vmem:[#allocation37_spill] sm:$0xff] }
 0x361   : > { %v2888_v48 = vmul.f32 %v4624_v33, %v9555_v12  ;;  %v9556_v8 = vld [vmem:[#allocation33_spill] sm:$0xff]  ;;  %v2895_v12 = vadd.f32 %v2867_v56, %v2834_v53  ;;  %v7063_v53 = vadd.f32 %v2879_v3, %v2846_v40  ;;  %v7065_v56 = vadd.f32 %v2880_v23, %v2847_v39  ;;  %v9563_v27 = vld [vmem:[#allocation7_spill] sm:$0xff]  ;;  %v9572_v3 = vld [vmem:[#allocation24_spill] sm:$0xff] }
 0x362   : > { %v2889_v51 = vmul.f32 %v4624_v33, %v9556_v8  ;;  %v2896_v8 = vadd.f32 %v2868_v28, %v2835_v34  ;;  %v2897_v33 = vadd.f32 %v2869_v29, %v2836_v59  ;;  %v7067_v28 = vadd.f32 %v2881_v10, %v2848_v35  ;;  %v9564_v39 = vld [vmem:[#allocation9_spill] sm:$0xff] }
 0x363   : > { %v7069_v34 = vadd.f32 %v2882_v58, %v2849_v11  ;;  %v7071_v59 = vadd.f32 %v2883_v36, %v2850_v13  ;;  %v7073_v60 = vadd.f32 %v2884_v0, %v2851_v62  ;;  %v7075_v50 = vadd.f32 %v2885_v42, %v2852_v1  ;;  %v9565_v11 = vld [vmem:[#allocation10_spill] sm:$0xff]  ;;  %v9566_v62 = vld [vmem:[#allocation11_spill] sm:$0xff]  ;;  %v9567_v1 = vld [vmem:[#allocation12_spill] sm:$0xff] }
 0x364   : > { %v7077_v52 = vadd.f32 %v2886_v55, %v2853_v41  ;;  %v7079_v5 = vadd.f32 %v2887_v61, %v2854_v16  ;;  %v7081_v31 = vadd.f32 %v2888_v48, %v2855_v47  ;;  %v7083_v22 = vadd.f32 %v2889_v51, %v2856_v17  ;;  %v9568_v41 = vld [vmem:[#allocation13_spill] sm:$0xff]  ;;  %v9569_v16 = vld [vmem:[#allocation18_spill] sm:$0xff]  ;;  %v9570_v47 = vld [vmem:[#allocation19_spill] sm:$0xff] }
 0x365   : > { %9557 = vst [vmem:[#allocation20_spill] sm:$0xff] %v7075_v50  ;;  %v2923_v24 = vmul.f32 %v4625_v18, %v9562_v43  ;;  %v2924_v40 = vmul.f32 %v4625_v18, %v9563_v27  ;;  %v2925_v35 = vmul.f32 %v4625_v18, %v9564_v39  ;;  %v2926_v13 = vmul.f32 %v4625_v18, %v9565_v11  ;;  %v9571_v17 = vld [vmem:[#allocation23_spill] sm:$0xff]  ;;  %v9573_v23 = vld [vmem:[#allocation25_spill] sm:$0xff]  ;;  %v9575_v42 = vld [vmem:[#allocation28_spill] sm:$0xff] }
 0x366   : > { %9558 = vst [vmem:[#allocation21_spill] sm:$0xff] %v7077_v52  ;;  %v2927_v36 = vmul.f32 %v4625_v18, %v9566_v62  ;;  %v2928_v58 = vmul.f32 %v4625_v18, %v9567_v1  ;;  %v2929_v29 = vmul.f32 %v4625_v18, %v9568_v41  ;;  %v2930_v2 = vmul.f32 %v4625_v18, %v9569_v16  ;;  %v2794_v10 = vld [vmem:[#allocation3 + $0xf2] sm:$0xff]  ;;  %v9574_v0 = vld [vmem:[#allocation27_spill] sm:$0xff]  ;;  %v9576_v55 = vld [vmem:[#allocation32_spill] sm:$0xff] }
 0x367   : > { %9559 = vst [vmem:[#allocation22_spill] sm:$0xff] %v7079_v5  ;;  %v2931_v48 = vmul.f32 %v4625_v18, %v9570_v47  ;;  %v2932_v51 = vmul.f32 %v4625_v18, %v9571_v17  ;;  %v2933_v14 = vmul.f32 %v4625_v18, %v9572_v3  ;;  %v2934_v30 = vmul.f32 %v4625_v18, %v9573_v23  ;;  %v9579_v27 = vld [vmem:[#allocation26_spill] sm:$0xff]  ;;  %v9580_v11 = vld [vmem:[#allocation29_spill] sm:$0xff]  ;;  %v9581_v1 = vld [vmem:[#allocation16_spill] sm:$0xff] }
 0x368   : > { %9560 = vst [vmem:[#allocation34_spill] sm:$0xff] %v7081_v31  ;;  %v2935_v44 = vmul.f32 %v4625_v18, %v9574_v0  ;;  %v2936_v6 = vmul.f32 %v4625_v18, %v9575_v42  ;;  %v2937_v21 = vmul.f32 %v4625_v18, %v9576_v55  ;;  %v2938_v61 = vmul.f32 %v4625_v18, %v9577_v49  ;;  %v9582_v16 = vld [vmem:[#allocation30_spill] sm:$0xff]  ;;  %v9584_v23 = vld [vmem:[#allocation15_spill] sm:$0xff]  ;;  %v9585_v42 = vld [vmem:[#allocation17_spill] sm:$0xff] }
 0x369   : > { %9561 = vst [vmem:[#allocation35_spill] sm:$0xff] %v7083_v22  ;;  %v2939_v43 = vmul.f32 %v4625_v18, %v9578_v4  ;;  %v2940_v39 = vmul.f32 %v4625_v18, %v9579_v27  ;;  %v2941_v62 = vmul.f32 %v4625_v18, %v9580_v11  ;;  %v2942_v41 = vmul.f32 %v4625_v18, %v9581_v1  ;;  %v9583_v17 = vld [vmem:[#allocation14_spill] sm:$0xff]  ;;  %v9586_v55 = vld [vmem:[#allocation31_spill] sm:$0xff]  ;;  %v9587_v49 = vld [vmem:[#allocation33_spill] sm:$0xff] }
 0x36a   : > { %v2943_v47 = vmul.f32 %v4625_v18, %v9582_v16  ;;  %v2944_v3 = vmul.f32 %v4625_v18, %v9583_v17  ;;  %v2945_v0 = vmul.f32 %v4625_v18, %v9584_v23  ;;  %v2946_v22 = vmul.f32 %v4625_v18, %v9585_v42 }
 0x36b   : > { %v2947_v31 = vmul.f32 %v4625_v18, %v9586_v55  ;;  %v2948_v5 = vmul.f32 %v4625_v18, %v9587_v49  ;;  %v2949_v4 = vmul.f32 %v4625_v18, %v2794_v10  ;;  %v2950_v52 = vmul.f32 %v4625_v18, %v2795_v7  ;;  %v7128_v55 = vld [vmem:[%s4831_s26 + $0x1] ss:$0 sm:$0xff] }
 0x36c   : > { %v7111_v27 = vadd.f32 %v2923_v24, %v2890_v20  ;;  %v7113_v11 = vadd.f32 %v2924_v40, %v2891_v19  ;;  %v7115_v1 = vadd.f32 %v2925_v35, %v2892_v54  ;;  %v7117_v16 = vadd.f32 %v2926_v13, %v2893_v26  ;;  %v7138_v26 = vld [vmem:[#allocation3 + $0x110] sm:$0xff]  ;;  %v7170_v40 = vld [vmem:[#allocation3 + $0x140] sm:$0xff]  ;;  %v7172_v35 = vld [vmem:[#allocation3 + $0x148] sm:$0x3f] }
 0x36d   : > { %v7119_v50 = vadd.f32 %v2927_v36, %v2894_v37  ;;  %v7121_v17 = vadd.f32 %v2928_v58, %v2895_v12  ;;  %v7123_v23 = vadd.f32 %v2929_v29, %v2896_v8  ;;  %v7125_v42 = vadd.f32 %v2930_v2, %v2897_v33  ;;  %9588 = vst [vmem:[#allocation8_spill] sm:$0xff] %v7138_v26  ;;  %v7140_v37 = vld [vmem:[#allocation3 + $0x118] sm:$0x3f]  ;;  %v9596_v36 = vld [vmem:[#allocation20_spill] sm:$0xff]  ;;  %v7190_v29 = vld [vmem:[#allocation3 + $0x160] sm:$0xff] }
 0x36e   : > { %v7130_v10 = vadd.f32 %v2931_v48, %v2898_v46  ;;  %v7132_v20 = vadd.f32 %v2932_v51, %v2899_v63  ;;  %v7134_v19 = vadd.f32 %v2933_v14, %v2900_v9  ;;  %v7136_v54 = vadd.f32 %v2934_v30, %v2901_v32  ;;  %9589 = vst [vmem:[#allocation7_spill] sm:$0xff] %v7140_v37  ;;  %v7150_v46 = vld [vmem:[#allocation3 + $0x120] sm:$0xff]  ;;  %v7152_v63 = vld [vmem:[#allocation3 + $0x128] sm:$0x3f]  ;;  %v7154_v9 = vld [vmem:[#allocation3 + $0x130] sm:$0xff] }
 0x36f   : > { %v7142_v12 = vadd.f32 %v2935_v44, %v2902_v45  ;;  %v7144_v8 = vadd.f32 %v2936_v6, %v2903_v25  ;;  %v7146_v33 = vadd.f32 %v2937_v21, %v2904_v57  ;;  %v7148_v18 = vadd.f32 %v2938_v61, %v2905_v15  ;;  %9590 = vst [vmem:[#allocation9_spill] sm:$0xff] %v7150_v46  ;;  %v7156_v32 = vld [vmem:[#allocation3 + $0x138] sm:$0x3f]  ;;  %v2981_v15 = vld [vmem:[#allocation3 + $0x108] sm:$0x3f]  ;;  %v7186_v58 = vld [vmem:[#allocation3 + $0x150] sm:$0xff] }
 0x370   : > { %9591 = vst [vmem:[#allocation10_spill] sm:$0xff] %v7152_v63  ;;  %v7159_v24 = vadd.f32 %v2939_v43, %v7061_v38  ;;  %v7162_v45 = vadd.f32 %v2940_v39, %v7063_v53  ;;  %v7165_v25 = vadd.f32 %v2941_v62, %v7065_v56  ;;  %v7168_v57 = vadd.f32 %v2942_v41, %v7067_v28  ;;  %v7188_v28 = vld [vmem:[#allocation3 + $0x158] sm:$0x3f]  ;;  %v7206_v7 = vld [vmem:[#allocation3 + $0x170] sm:$0xff]  ;;  %v7210_v6 = vld [vmem:[#allocation3 + $0x180] sm:$0xff] }
 0x371   : > { %9592 = vst [vmem:[#allocation11_spill] sm:$0xff] %v7154_v9  ;;  %v7175_v13 = vadd.f32 %v2943_v47, %v7069_v34  ;;  %v7178_v38 = vadd.f32 %v2944_v3, %v7071_v59  ;;  %v7181_v53 = vadd.f32 %v2945_v0, %v7073_v60  ;;  %v7184_v56 = vadd.f32 %v2946_v22, %v9596_v36  ;;  %v9600_v2 = vld [vmem:[#allocation21_spill] sm:$0xff]  ;;  %v9601_v34 = vld [vmem:[#allocation22_spill] sm:$0xff]  ;;  %v9605_v60 = vld [vmem:[#allocation35_spill] sm:$0xff] }
 0x372   : > { %9593 = vst [vmem:[#allocation12_spill] sm:$0xff] %v7156_v32  ;;  %v7193_v48 = vadd.f32 %v2947_v31, %v9600_v2  ;;  %v7196_v51 = vadd.f32 %v2948_v5, %v9601_v34  ;;  %v9603_v59 = vld [vmem:[#allocation34_spill] sm:$0xff]  ;;  %v7202_v30 = vadd.f32 %v2950_v52, %v9605_v60  ;;  %v7204_v22 = vld [vmem:[#allocation3 + $0x168] sm:$0x3f]  ;;  %v7214_v31 = vld [vmem:[#allocation3 + $0x190] sm:$0xff]  ;;  %v3018_v52 = vmul.f32 %v7128_v55, %v2981_v15 }
 0x373   : > { %9594 = vst [vmem:[#allocation13_spill] sm:$0xff] %v7170_v40  ;;  %v7199_v14 = vadd.f32 %v2949_v4, %v9603_v59  ;;  %v7208_v44 = vld [vmem:[#allocation3 + $0x178] sm:$0x3f]  ;;  %v7212_v21 = vld [vmem:[#allocation3 + $0x188] sm:$0x3f]  ;;  %v7216_v5 = vld [vmem:[#allocation3] sm:$0xff]  ;;  %v3019_v43 = vmul.f32 %v7128_v55, %v7138_v26  ;;  %v3020_v39 = vmul.f32 %v7128_v55, %v7140_v37  ;;  %v3021_v3 = vmul.f32 %v7128_v55, %v7150_v46 }
 0x374   : > { %9595 = vst [vmem:[#allocation18_spill] sm:$0xff] %v7172_v35  ;;  %v3017_v61 = vmul.f32 %v7216_v5, %v7128_v55  ;;  %v7225_v62 = vld [vmem:[#allocation3 + $0x198] sm:$0x3f]  ;;  %v7227_v41 = vld [vmem:[#allocation3 + $0x1a0] sm:$0xff]  ;;  %v7229_v47 = vld [vmem:[#allocation3 + $0x1a8] sm:$0x3f]  ;;  %v3022_v0 = vmul.f32 %v7128_v55, %v7152_v63  ;;  %v3023_v49 = vmul.f32 %v7128_v55, %v7154_v9  ;;  %v3024_v4 = vmul.f32 %v7128_v55, %v7156_v32 }
 0x375   : > { %9597 = vst [vmem:[#allocation19_spill] sm:$0xff] %v7186_v58  ;;  %v7239_v15 = vld [vmem:[#allocation3 + $0x1b0] sm:$0xff]  ;;  %v7241_v36 = vld [vmem:[#allocation3 + $0x1b8] sm:$0x3f]  ;;  %v7243_v2 = vld [vmem:[#allocation3 + $0x1c0] sm:$0xff]  ;;  %v3025_v34 = vmul.f32 %v7128_v55, %v7170_v40  ;;  %v3026_v59 = vmul.f32 %v7128_v55, %v7172_v35  ;;  %v3027_v60 = vmul.f32 %v7128_v55, %v7186_v58  ;;  %v3029_v46 = vmul.f32 %v7128_v55, %v7190_v29 }
 0x376   : > { %9598 = vst [vmem:[#allocation23_spill] sm:$0xff] %v7188_v28  ;;  %v7253_v9 = vld [vmem:[#allocation3 + $0x1c8] sm:$0x3f]  ;;  %v7255_v32 = vld [vmem:[#allocation3 + $0x1d0] sm:$0xff]  ;;  %v7257_v63 = vld [vmem:[#allocation3 + $0x1d8] sm:$0x3f]  ;;  %v3030_v40 = vmul.f32 %v7128_v55, %v7204_v22  ;;  %v3031_v35 = vmul.f32 %v7128_v55, %v7206_v7  ;;  %v3032_v58 = vmul.f32 %v7128_v55, %v7208_v44  ;;  %v3034_v37 = vmul.f32 %v7128_v55, %v7212_v21 }
 0x377   : > { %9599 = vst [vmem:[#allocation24_spill] sm:$0xff] %v7190_v29  ;;  %v3035_v26 = vmul.f32 %v7128_v55, %v7214_v31  ;;  %v3036_v29 = vmul.f32 %v7128_v55, %v7225_v62 }
 0x378   : > { %9602 = vst [vmem:[#allocation25_spill] sm:$0xff] %v7196_v51  ;;  %v3052_v51 = vadd.f32 %v3024_v4, %v7125_v42  ;;  %v3062_v42 = vadd.f32 %v3034_v37, %v7162_v45  ;;  %v9626_v45 = vld [vmem:[#allocation8_spill] sm:$0xff] }
 0x379   : > { %9604 = vst [vmem:[#allocation27_spill] sm:$0xff] %v7199_v14  ;;  %v3050_v14 = vadd.f32 %v3022_v0, %v7121_v17  ;;  %v3060_v17 = vadd.f32 %v3032_v58, %v7148_v18  ;;  %v9628_v58 = vld [vmem:[#allocation9_spill] sm:$0xff]  ;;  %v7334_v0 = vld [vmem:[#allocation3 + $0x1e8] sm:$0x3f] }
 0x37a   : > { %9606 = vst [vmem:[#allocation28_spill] sm:$0xff] %v7202_v30  ;;  %v3047_v30 = vadd.f32 %v3019_v43, %v7115_v1  ;;  %v3057_v1 = vadd.f32 %v3029_v46, %v7142_v12 }
 0x37b   : > { %9607 = vst [vmem:[#allocation32_spill] sm:$0xff] %v7204_v22  ;;  %v3037_v22 = vmul.f32 %v7128_v55, %v7227_v41 }
 0x37c   : > { %9608 = vst [vmem:[#allocation36_spill] sm:$0xff] %v7206_v7  ;;  %v3038_v7 = vmul.f32 %v7128_v55, %v7229_v47 }
 0x37d   : > { %9609 = vst [vmem:[#allocation37_spill] sm:$0xff] %v7208_v44  ;;  %v3039_v44 = vmul.f32 %v7128_v55, %v7239_v15 }
 0x37e   : > { %9610 = vst [vmem:[#allocation26_spill] sm:$0xff] %v7210_v6  ;;  %v9636_v43 = vld [vmem:[#allocation24_spill] sm:$0xff] }
 0x37f   : > { %9611 = vst [vmem:[#allocation29_spill] sm:$0xff] %v7212_v21  ;;  %v3041_v21 = vmul.f32 %v7128_v55, %v7243_v2  ;;  %v3067_v12 = vadd.f32 %v3039_v44, %v7181_v53  ;;  %v9623_v46 = vld [vmem:[#allocation25_spill] sm:$0xff]  ;;  %v9633_v44 = vld [vmem:[#allocation18_spill] sm:$0xff] }
 0x380   : > { %9612 = vst [vmem:[#allocation16_spill] sm:$0xff] %v7214_v31  ;;  %v3042_v31 = vmul.f32 %v7128_v55, %v7253_v9 }
 0x381   : > { %9613 = vst [vmem:[#allocation30_spill] sm:$0xff] %v7216_v5  ;;  %v3028_v5 = vmul.f32 %v7128_v55, %v7188_v28  ;;  %v3033_v28 = vmul.f32 %v7128_v55, %v7210_v6  ;;  %v3040_v6 = vmul.f32 %v7128_v55, %v7241_v36 }
 0x382   : > { %9614 = vst [vmem:[#allocation14_spill] sm:$0xff] %v7225_v62  ;;  %v3043_v62 = vmul.f32 %v7128_v55, %v7255_v32  ;;  %v3070_v18 = vadd.f32 %v3042_v31, %v9623_v46 }
 0x383   : > { %9615 = vst [vmem:[#allocation15_spill] sm:$0xff] %v7227_v41  ;;  %v3044_v41 = vmul.f32 %v7128_v55, %v7257_v63  ;;  %v3054_v55 = vadd.f32 %v3026_v59, %v7132_v20  ;;  %v3064_v20 = vadd.f32 %v3036_v29, %v7168_v57  ;;  %v9630_v29 = vld [vmem:[#allocation11_spill] sm:$0xff] }
 0x384   : > { %9616 = vst [vmem:[#allocation17_spill] sm:$0xff] %v7229_v47  ;;  %v3045_v47 = vadd.f32 %v3017_v61, %v7111_v27  ;;  %v3055_v27 = vadd.f32 %v3027_v60, %v7134_v19  ;;  %v4627_v61 = vld [vmem:[%s4831_s26 + $0xb] ss:$0 sm:$0xff]  ;;  %v3065_v19 = vadd.f32 %v3037_v22, %v7175_v13  ;;  %v9631_v22 = vld [vmem:[#allocation12_spill] sm:$0xff] }
 0x385   : > { %9617 = vst [vmem:[#allocation31_spill] sm:$0xff] %v7239_v15  ;;  %v3046_v15 = vadd.f32 %v3018_v52, %v7113_v11  ;;  %v3056_v11 = vadd.f32 %v3028_v5, %v7136_v54  ;;  %v3066_v54 = vadd.f32 %v3038_v7, %v7178_v38  ;;  %v3080_v13 = vmul.f32 %v4627_v61, %v9628_v58  ;;  %v9632_v7 = vld [vmem:[#allocation13_spill] sm:$0xff]  ;;  %v9635_v5 = vld [vmem:[#allocation23_spill] sm:$0xff]  ;;  %v9642_v60 = vld [vmem:[#allocation26_spill] sm:$0xff] }
 0x386   : > { %9618 = vst [vmem:[#allocation33_spill] sm:$0xff] %v7241_v36  ;;  %v3048_v36 = vadd.f32 %v3020_v39, %v7117_v16  ;;  %v3058_v16 = vadd.f32 %v3030_v40, %v7144_v8  ;;  %v3068_v8 = vadd.f32 %v3040_v6, %v7184_v56  ;;  %v9624_v40 = vld [vmem:[#allocation27_spill] sm:$0xff]  ;;  %v3082_v53 = vmul.f32 %v4627_v61, %v9630_v29 }
 0x387   : > { %9619 = vst [vmem:[#allocation20_spill] sm:$0xff] %v7243_v2  ;;  %v3049_v2 = vadd.f32 %v3021_v3, %v7119_v50  ;;  %v3059_v50 = vadd.f32 %v3031_v35, %v7146_v33  ;;  %v3069_v33 = vadd.f32 %v3041_v21, %v7193_v48  ;;  %v9625_v35 = vld [vmem:[#allocation28_spill] sm:$0xff]  ;;  %v3083_v56 = vmul.f32 %v4627_v61, %v9631_v22  ;;  %v9634_v21 = vld [vmem:[#allocation19_spill] sm:$0xff] }
 0x388   : > { %9620 = vst [vmem:[#allocation21_spill] sm:$0xff] %v7253_v9  ;;  %v3051_v9 = vadd.f32 %v3023_v49, %v7123_v23  ;;  %v3061_v23 = vadd.f32 %v3033_v28, %v7159_v24  ;;  %v3071_v24 = vadd.f32 %v3043_v62, %v9624_v40  ;;  %v3072_v37 = vadd.f32 %v3044_v41, %v9625_v35  ;;  %v9629_v28 = vld [vmem:[#allocation10_spill] sm:$0xff]  ;;  %v9637_v62 = vld [vmem:[#allocation32_spill] sm:$0xff]  ;;  %v9643_v40 = vld [vmem:[#allocation29_spill] sm:$0xff] }
 0x389   : > { %9621 = vst [vmem:[#allocation22_spill] sm:$0xff] %v7255_v32  ;;  %v3053_v32 = vadd.f32 %v3025_v34, %v7130_v10  ;;  %v3063_v10 = vadd.f32 %v3035_v26, %v7165_v25  ;;  %v3078_v26 = vmul.f32 %v4627_v61, %v9626_v45  ;;  %v9627_v25 = vld [vmem:[#allocation7_spill] sm:$0xff]  ;;  %v3081_v38 = vmul.f32 %v4627_v61, %v9629_v28  ;;  %v9640_v49 = vld [vmem:[#allocation36_spill] sm:$0xff]  ;;  %v9641_v34 = vld [vmem:[#allocation37_spill] sm:$0xff] }
 0x38a   : > { %9622 = vst [vmem:[#allocation34_spill] sm:$0xff] %v7257_v63  ;;  %v3079_v57 = vmul.f32 %v4627_v61, %v9627_v25  ;;  %v3084_v48 = vmul.f32 %v4627_v61, %v9632_v7  ;;  %v3085_v6 = vmul.f32 %v4627_v61, %v9633_v44  ;;  %v3086_v31 = vmul.f32 %v4627_v61, %v9634_v21  ;;  %v7332_v3 = vld [vmem:[#allocation3 + $0x1e0] sm:$0xff]  ;;  %v9644_v45 = vld [vmem:[#allocation16_spill] sm:$0xff] }
 0x38b   : > { %v3087_v52 = vmul.f32 %v4627_v61, %v9635_v5  ;;  %v3088_v39 = vmul.f32 %v4627_v61, %v9636_v43  ;;  %v3089_v41 = vmul.f32 %v4627_v61, %v9637_v62  ;;  %9638 = vst [vmem:[#allocation35_spill] sm:$0xff] %v7332_v3  ;;  %v3090_v4 = vmul.f32 %v4627_v61, %v9640_v49  ;;  %v9645_v21 = vld [vmem:[#allocation14_spill] sm:$0xff]  ;;  %v9646_v44 = vld [vmem:[#allocation15_spill] sm:$0xff]  ;;  %v9647_v7 = vld [vmem:[#allocation17_spill] sm:$0xff] }
 0x38c   : > { %9639 = vst [vmem:[#allocation25_spill] sm:$0xff] %v7334_v0  ;;  %v3091_v59 = vmul.f32 %v4627_v61, %v9641_v34  ;;  %v3092_v46 = vmul.f32 %v4627_v61, %v9642_v60  ;;  %v3093_v35 = vmul.f32 %v4627_v61, %v9643_v40  ;;  %v3094_v25 = vmul.f32 %v4627_v61, %v9644_v45  ;;  %v9648_v22 = vld [vmem:[#allocation31_spill] sm:$0xff] }
 0x38d   : > { %v3095_v5 = vmul.f32 %v4627_v61, %v9645_v21  ;;  %v3096_v43 = vmul.f32 %v4627_v61, %v9646_v44  ;;  %v3097_v62 = vmul.f32 %v4627_v61, %v9647_v7  ;;  %v3098_v29 = vmul.f32 %v4627_v61, %v9648_v22  ;;  %v9649_v28 = vld [vmem:[#allocation33_spill] sm:$0xff] }
 0x38e   : > { %v3099_v58 = vmul.f32 %v4627_v61, %v9649_v28  ;;  %v9650_v0 = vld [vmem:[#allocation20_spill] sm:$0xff]  ;;  %v3106_v28 = vadd.f32 %v3078_v26, %v3045_v47  ;;  %v3114_v26 = vadd.f32 %v3086_v31, %v3053_v32  ;;  %v3115_v47 = vadd.f32 %v3087_v52, %v3054_v55 }
 0x38f   : > { %v3100_v49 = vmul.f32 %v4627_v61, %v9650_v0  ;;  %v9651_v3 = vld [vmem:[#allocation21_spill] sm:$0xff]  ;;  %v3107_v0 = vadd.f32 %v3079_v57, %v3046_v15  ;;  %v3116_v15 = vadd.f32 %v3088_v39, %v3055_v27  ;;  %v3117_v57 = vadd.f32 %v3089_v41, %v3056_v11  ;;  %v9672_v41 = vld [vmem:[#allocation26_spill] sm:$0xff] }
 0x390   : > { %v3101_v34 = vmul.f32 %v4627_v61, %v9651_v3  ;;  %v9652_v63 = vld [vmem:[#allocation22_spill] sm:$0xff]  ;;  %v3108_v3 = vadd.f32 %v3080_v13, %v3047_v30  ;;  %v3118_v30 = vadd.f32 %v3090_v4, %v3057_v1  ;;  %v9673_v4 = vld [vmem:[#allocation29_spill] sm:$0xff] }
 0x391   : > { %v3102_v60 = vmul.f32 %v4627_v61, %v9652_v63  ;;  %v9653_v40 = vld [vmem:[#allocation34_spill] sm:$0xff]  ;;  %v3109_v63 = vadd.f32 %v3081_v38, %v3048_v36  ;;  %v3119_v36 = vadd.f32 %v3091_v59, %v3058_v16  ;;  %v3120_v38 = vadd.f32 %v3092_v46, %v3059_v50  ;;  %v9660_v50 = vld [vmem:[#allocation9_spill] sm:$0xff]  ;;  %v9674_v59 = vld [vmem:[#allocation16_spill] sm:$0xff] }
 0x392   : > { %v3103_v45 = vmul.f32 %v4627_v61, %v9653_v40  ;;  %v9654_v21 = vld [vmem:[#allocation35_spill] sm:$0xff]  ;;  %v3110_v40 = vadd.f32 %v3082_v53, %v3049_v2  ;;  %v3121_v2 = vadd.f32 %v3093_v35, %v3060_v17  ;;  %v7353_v53 = vadd.f32 %v3094_v25, %v3061_v23  ;;  %v9661_v23 = vld [vmem:[#allocation10_spill] sm:$0xff] }
 0x393   : > { %v3104_v44 = vmul.f32 %v4627_v61, %v9654_v21  ;;  %v9655_v7 = vld [vmem:[#allocation25_spill] sm:$0xff]  ;;  %v3111_v21 = vadd.f32 %v3083_v56, %v3050_v14  ;;  %v4628_v13 = vld [vmem:[%s4831_s26 + $0x15] ss:$0 sm:$0xff]  ;;  %v7355_v14 = vadd.f32 %v3095_v5, %v3062_v42  ;;  %v7357_v56 = vadd.f32 %v3096_v43, %v3063_v10  ;;  %v9670_v5 = vld [vmem:[#allocation36_spill] sm:$0xff] }
 0x394   : > { %v3105_v22 = vmul.f32 %v4627_v61, %v9655_v7  ;;  %v3112_v7 = vadd.f32 %v3084_v48, %v3051_v9  ;;  %v3113_v61 = vadd.f32 %v3085_v6, %v3052_v51  ;;  %v7359_v9 = vadd.f32 %v3097_v62, %v3064_v20  ;;  %v9662_v10 = vld [vmem:[#allocation11_spill] sm:$0xff]  ;;  %v9671_v43 = vld [vmem:[#allocation37_spill] sm:$0xff]  ;;  %v9675_v46 = vld [vmem:[#allocation14_spill] sm:$0xff] }
 0x395   : > { %v7361_v48 = vadd.f32 %v3098_v29, %v3065_v19  ;;  %v7363_v51 = vadd.f32 %v3099_v58, %v3066_v54  ;;  %v7365_v32 = vadd.f32 %v3100_v49, %v3067_v12  ;;  %v7367_v55 = vadd.f32 %v3101_v34, %v3068_v8  ;;  %v9663_v19 = vld [vmem:[#allocation12_spill] sm:$0xff]  ;;  %v9664_v12 = vld [vmem:[#allocation13_spill] sm:$0xff]  ;;  %v9665_v8 = vld [vmem:[#allocation18_spill] sm:$0xff] }
 0x396   : > { %v7369_v27 = vadd.f32 %v3102_v60, %v3069_v33  ;;  %v7371_v11 = vadd.f32 %v3103_v45, %v3070_v18  ;;  %v7373_v1 = vadd.f32 %v3104_v44, %v3071_v24  ;;  %v7375_v16 = vadd.f32 %v3105_v22, %v3072_v37  ;;  %v9666_v33 = vld [vmem:[#allocation19_spill] sm:$0xff]  ;;  %v9668_v24 = vld [vmem:[#allocation24_spill] sm:$0xff]  ;;  %v3011_v62 = vld [vmem:[#allocation3 + $0x1f8] sm:$0x3f] }
 0x397   : > { %v3139_v17 = vmul.f32 %v4628_v13, %v9660_v50  ;;  %v3140_v42 = vmul.f32 %v4628_v13, %v9661_v23  ;;  %v3141_v20 = vmul.f32 %v4628_v13, %v9662_v10  ;;  %v3142_v54 = vmul.f32 %v4628_v13, %v9663_v19  ;;  %v9667_v18 = vld [vmem:[#allocation23_spill] sm:$0xff]  ;;  %v9669_v37 = vld [vmem:[#allocation32_spill] sm:$0xff]  ;;  %v9677_v50 = vld [vmem:[#allocation17_spill] sm:$0xff] }
 0x398   : > { %9656 = vst [vmem:[#allocation27_spill] sm:$0xff] %v7369_v27  ;;  %v3143_v58 = vmul.f32 %v4628_v13, %v9664_v12  ;;  %v3144_v29 = vmul.f32 %v4628_v13, %v9665_v8  ;;  %v3145_v6 = vmul.f32 %v4628_v13, %v9666_v33  ;;  %v3146_v31 = vmul.f32 %v4628_v13, %v9667_v18  ;;  %v9676_v45 = vld [vmem:[#allocation15_spill] sm:$0xff]  ;;  %v9679_v12 = vld [vmem:[#allocation33_spill] sm:$0xff]  ;;  %v9680_v33 = vld [vmem:[#allocation20_spill] sm:$0xff] }
 0x399   : > { %9657 = vst [vmem:[#allocation28_spill] sm:$0xff] %v7371_v11  ;;  %v3147_v44 = vmul.f32 %v4628_v13, %v9668_v24  ;;  %v3148_v22 = vmul.f32 %v4628_v13, %v9669_v37  ;;  %v3149_v52 = vmul.f32 %v4628_v13, %v9670_v5  ;;  %v3150_v39 = vmul.f32 %v4628_v13, %v9671_v43  ;;  %v9678_v10 = vld [vmem:[#allocation31_spill] sm:$0xff]  ;;  %v9681_v24 = vld [vmem:[#allocation21_spill] sm:$0xff]  ;;  %v9682_v5 = vld [vmem:[#allocation22_spill] sm:$0xff] }
 0x39a   : > { %9658 = vst [vmem:[#allocation8_spill] sm:$0xff] %v7373_v1  ;;  %v3151_v49 = vmul.f32 %v4628_v13, %v9672_v41  ;;  %v3152_v34 = vmul.f32 %v4628_v13, %v9673_v4  ;;  %v3153_v60 = vmul.f32 %v4628_v13, %v9674_v59  ;;  %v3154_v35 = vmul.f32 %v4628_v13, %v9675_v46  ;;  %v9683_v41 = vld [vmem:[#allocation34_spill] sm:$0xff]  ;;  %v9684_v59 = vld [vmem:[#allocation35_spill] sm:$0xff]  ;;  %v9685_v46 = vld [vmem:[#allocation25_spill] sm:$0xff] }
 0x39b   : > { %9659 = vst [vmem:[#allocation7_spill] sm:$0xff] %v7375_v16  ;;  %v3155_v25 = vmul.f32 %v4628_v13, %v9676_v45  ;;  %v3156_v23 = vmul.f32 %v4628_v13, %v9677_v50  ;;  %v3157_v19 = vmul.f32 %v4628_v13, %v9678_v10  ;;  %v3158_v8 = vmul.f32 %v4628_v13, %v9679_v12  ;;  %v9686_v45 = vld [vmem:[#allocation30_spill] sm:$0xff] }
 0x39c   : > { %v3159_v18 = vmul.f32 %v4628_v13, %v9680_v33  ;;  %v3160_v37 = vmul.f32 %v4628_v13, %v9681_v24  ;;  %v3161_v43 = vmul.f32 %v4628_v13, %v9682_v5  ;;  %v3162_v4 = vmul.f32 %v4628_v13, %v9683_v41 }
 0x39d   : > { %v3163_v16 = vmul.f32 %v4628_v13, %v9684_v59  ;;  %v3164_v1 = vmul.f32 %v4628_v13, %v9685_v46  ;;  %v3165_v11 = vmul.f32 %v9686_v45, %v4628_v13  ;;  %v3166_v50 = vmul.f32 %v4628_v13, %v3011_v62  ;;  %v7421_v46 = vld [vmem:[%s4831_s26 + $0x3] ss:$0 sm:$0xff] }
 0x39e   : > { %v7404_v27 = vadd.f32 %v3139_v17, %v3106_v28  ;;  %v7406_v10 = vadd.f32 %v3140_v42, %v3107_v0  ;;  %v7408_v12 = vadd.f32 %v3141_v20, %v3108_v3  ;;  %v7410_v33 = vadd.f32 %v3142_v54, %v3109_v63  ;;  %v7431_v63 = vld [vmem:[#allocation3 + $0x111] sm:$0xff]  ;;  %v3196_v42 = vld [vmem:[#allocation3 + $0x109] sm:$0x3f]  ;;  %v7463_v20 = vld [vmem:[#allocation3 + $0x141] sm:$0xff] }
 0x39f   : > { %v7412_v24 = vadd.f32 %v3143_v58, %v3110_v40  ;;  %v7414_v5 = vadd.f32 %v3144_v29, %v3111_v21  ;;  %v7416_v41 = vadd.f32 %v3145_v6, %v3112_v7  ;;  %v7418_v59 = vadd.f32 %v3146_v31, %v3113_v61  ;;  %9687 = vst [vmem:[#allocation9_spill] sm:$0xff] %v7431_v63  ;;  %v7433_v40 = vld [vmem:[#allocation3 + $0x119] sm:$0x3f]  ;;  %v7465_v54 = vld [vmem:[#allocation3 + $0x149] sm:$0x3f]  ;;  %v7483_v6 = vld [vmem:[#allocation3 + $0x161] sm:$0xff] }
 0x3a0   : > { %v7423_v45 = vadd.f32 %v3147_v44, %v3114_v26  ;;  %v7425_v28 = vadd.f32 %v3148_v22, %v3115_v47  ;;  %v7427_v0 = vadd.f32 %v3149_v52, %v3116_v15  ;;  %v7429_v3 = vadd.f32 %v3150_v39, %v3117_v57  ;;  %9688 = vst [vmem:[#allocation10_spill] sm:$0xff] %v7433_v40  ;;  %v7443_v26 = vld [vmem:[#allocation3 + $0x121] sm:$0xff]  ;;  %v7445_v47 = vld [vmem:[#allocation3 + $0x129] sm:$0x3f]  ;;  %v7447_v15 = vld [vmem:[#allocation3 + $0x131] sm:$0xff] }
 0x3a1   : > { %v7435_v21 = vadd.f32 %v3151_v49, %v3118_v30  ;;  %v7437_v7 = vadd.f32 %v3152_v34, %v3119_v36  ;;  %v7439_v61 = vadd.f32 %v3153_v60, %v3120_v38  ;;  %v7441_v13 = vadd.f32 %v3154_v35, %v3121_v2  ;;  %9689 = vst [vmem:[#allocation11_spill] sm:$0xff] %v7443_v26  ;;  %v7449_v57 = vld [vmem:[#allocation3 + $0x139] sm:$0x3f]  ;;  %v3195_v2 = vld [vmem:[#allocation3 + $0x101] sm:$0xff]  ;;  %v7499_v62 = vld [vmem:[#allocation3 + $0x171] sm:$0xff] }
 0x3a2   : > { %9690 = vst [vmem:[#allocation12_spill] sm:$0xff] %v7445_v47  ;;  %v7452_v17 = vadd.f32 %v3155_v25, %v7353_v53  ;;  %v7455_v30 = vadd.f32 %v3156_v23, %v7355_v14  ;;  %v7458_v36 = vadd.f32 %v3157_v19, %v7357_v56  ;;  %v7461_v38 = vadd.f32 %v3158_v8, %v7359_v9  ;;  %v7479_v9 = vld [vmem:[#allocation3 + $0x151] sm:$0xff]  ;;  %v7481_v29 = vld [vmem:[#allocation3 + $0x159] sm:$0x3f]  ;;  %v9698_v31 = vld [vmem:[#allocation27_spill] sm:$0xff] }
 0x3a3   : > { %9691 = vst [vmem:[#allocation13_spill] sm:$0xff] %v7447_v15  ;;  %v7468_v58 = vadd.f32 %v3159_v18, %v7361_v48  ;;  %v7471_v53 = vadd.f32 %v3160_v37, %v7363_v51  ;;  %v7474_v14 = vadd.f32 %v3161_v43, %v7365_v32  ;;  %v7477_v56 = vadd.f32 %v3162_v4, %v7367_v55  ;;  %v9699_v48 = vld [vmem:[#allocation28_spill] sm:$0xff]  ;;  %v9703_v32 = vld [vmem:[#allocation7_spill] sm:$0xff]  ;;  %v7501_v49 = vld [vmem:[#allocation3 + $0x179] sm:$0x3f] }
 0x3a4   : > { %9692 = vst [vmem:[#allocation18_spill] sm:$0xff] %v7449_v57  ;;  %v7486_v44 = vadd.f32 %v3163_v16, %v9698_v31  ;;  %v7489_v22 = vadd.f32 %v3164_v1, %v9699_v48  ;;  %v9701_v51 = vld [vmem:[#allocation8_spill] sm:$0xff]  ;;  %v7495_v39 = vadd.f32 %v3166_v50, %v9703_v32  ;;  %v7503_v34 = vld [vmem:[#allocation3 + $0x181] sm:$0xff]  ;;  %v3232_v1 = vmul.f32 %v7421_v46, %v3195_v2  ;;  %v7515_v23 = vld [vmem:[#allocation3 + $0x199] sm:$0x3f] }
 0x3a5   : > { %9693 = vst [vmem:[#allocation19_spill] sm:$0xff] %v7463_v20  ;;  %v7492_v52 = vadd.f32 %v3165_v11, %v9701_v51  ;;  %v7497_v55 = vld [vmem:[#allocation3 + $0x169] sm:$0x3f]  ;;  %v7507_v16 = vld [vmem:[#allocation3 + $0x191] sm:$0xff]  ;;  %v3233_v11 = vmul.f32 %v7421_v46, %v3196_v42  ;;  %v3234_v35 = vmul.f32 %v7421_v46, %v7431_v63  ;;  %v3235_v25 = vmul.f32 %v7421_v46, %v7433_v40  ;;  %v7517_v19 = vld [vmem:[#allocation3 + $0x1a1] sm:$0xff] }
 0x3a6   : > { %9694 = vst [vmem:[#allocation23_spill] sm:$0xff] %v7465_v54  ;;  %v7505_v60 = vld [vmem:[#allocation3 + $0x189] sm:$0x3f]  ;;  %v3236_v18 = vmul.f32 %v7421_v46, %v7443_v26  ;;  %v3237_v37 = vmul.f32 %v7421_v46, %v7445_v47  ;;  %v3238_v43 = vmul.f32 %v7421_v46, %v7447_v15  ;;  %v3239_v4 = vmul.f32 %v7421_v46, %v7449_v57  ;;  %v7529_v50 = vld [vmem:[#allocation3 + $0x1b1] sm:$0xff]  ;;  %v7531_v2 = vld [vmem:[#allocation3 + $0x1b9] sm:$0x3f] }
 0x3a7   : > { %9695 = vst [vmem:[#allocation24_spill] sm:$0xff] %v7479_v9  ;;  %v7519_v8 = vld [vmem:[#allocation3 + $0x1a9] sm:$0x3f]  ;;  %v7533_v42 = vld [vmem:[#allocation3 + $0x1c1] sm:$0xff]  ;;  %v3240_v31 = vmul.f32 %v7421_v46, %v7463_v20  ;;  %v3241_v48 = vmul.f32 %v7421_v46, %v7465_v54  ;;  %v3242_v51 = vmul.f32 %v7421_v46, %v7479_v9  ;;  %v3243_v32 = vmul.f32 %v7421_v46, %v7481_v29  ;;  %v7545_v57 = vld [vmem:[#allocation3 + $0x1d1] sm:$0xff] }
 0x3a8   : > { %9696 = vst [vmem:[#allocation32_spill] sm:$0xff] %v7481_v29  ;;  %v7543_v15 = vld [vmem:[#allocation3 + $0x1c9] sm:$0x3f]  ;;  %v7547_v47 = vld [vmem:[#allocation3 + $0x1d9] sm:$0x3f]  ;;  %v3244_v26 = vmul.f32 %v7421_v46, %v7483_v6  ;;  %v3245_v20 = vmul.f32 %v7421_v46, %v7497_v55  ;;  %v3246_v54 = vmul.f32 %v7421_v46, %v7499_v62  ;;  %v3247_v9 = vmul.f32 %v7421_v46, %v7501_v49 }
 0x3a9   : > { %9697 = vst [vmem:[#allocation36_spill] sm:$0xff] %v7483_v6  ;;  %v3248_v29 = vmul.f32 %v7421_v46, %v7503_v34  ;;  %v3249_v40 = vmul.f32 %v7421_v46, %v7505_v60  ;;  %v3250_v63 = vmul.f32 %v7421_v46, %v7507_v16  ;;  %v3251_v6 = vmul.f32 %v7421_v46, %v7515_v23 }
 0x3aa   : > { %9700 = vst [vmem:[#allocation37_spill] sm:$0xff] %v7489_v22  ;;  %v3267_v22 = vadd.f32 %v3239_v4, %v7418_v59 }
 0x3ab   : > { %9702 = vst [vmem:[#allocation26_spill] sm:$0xff] %v7492_v52  ;;  %v3265_v52 = vadd.f32 %v3237_v37, %v7414_v5  ;;  %v3275_v5 = vadd.f32 %v3247_v9, %v7441_v13  ;;  %v3277_v59 = vadd.f32 %v3249_v40, %v7455_v30  ;;  %v9723_v30 = vld [vmem:[#allocation9_spill] sm:$0xff]  ;;  %v9725_v9 = vld [vmem:[#allocation11_spill] sm:$0xff] }
 0x3ac   : > { %9704 = vst [vmem:[#allocation29_spill] sm:$0xff] %v7495_v39  ;;  %v3262_v39 = vadd.f32 %v3234_v35, %v7408_v12  ;;  %v3272_v12 = vadd.f32 %v3244_v26, %v7435_v21  ;;  %v7622_v37 = vld [vmem:[#allocation3 + $0x1e1] sm:$0xff] }
 0x3ad   : > { %9705 = vst [vmem:[#allocation16_spill] sm:$0xff] %v7497_v55  ;;  %v3252_v55 = vmul.f32 %v7421_v46, %v7517_v19 }
 0x3ae   : > { %9706 = vst [vmem:[#allocation14_spill] sm:$0xff] %v7499_v62  ;;  %v3253_v62 = vmul.f32 %v7421_v46, %v7519_v8 }
 0x3af   : > { %9707 = vst [vmem:[#allocation15_spill] sm:$0xff] %v7501_v49  ;;  %v3254_v49 = vmul.f32 %v7421_v46, %v7529_v50 }
 0x3b0   : > { %9708 = vst [vmem:[#allocation17_spill] sm:$0xff] %v7503_v34  ;;  %v3255_v34 = vmul.f32 %v7421_v46, %v7531_v2 }
 0x3b1   : > { %9709 = vst [vmem:[#allocation31_spill] sm:$0xff] %v7505_v60  ;;  %v3256_v60 = vmul.f32 %v7421_v46, %v7533_v42  ;;  %v3282_v21 = vadd.f32 %v3254_v49, %v7474_v14  ;;  %v9720_v26 = vld [vmem:[#allocation37_spill] sm:$0xff]  ;;  %v9730_v49 = vld [vmem:[#allocation23_spill] sm:$0xff] }
 0x3b2   : > { %9710 = vst [vmem:[#allocation33_spill] sm:$0xff] %v7507_v16  ;;  %v3257_v16 = vmul.f32 %v7421_v46, %v7543_v15 }
 0x3b3   : > { %9711 = vst [vmem:[#allocation20_spill] sm:$0xff] %v7515_v23  ;;  %v3258_v23 = vmul.f32 %v7421_v46, %v7545_v57 }
 0x3b4   : > { %9712 = vst [vmem:[#allocation21_spill] sm:$0xff] %v7517_v19  ;;  %v3259_v19 = vmul.f32 %v7421_v46, %v7547_v47  ;;  %v3269_v46 = vadd.f32 %v3241_v48, %v7425_v28  ;;  %v3279_v28 = vadd.f32 %v3251_v6, %v7461_v38  ;;  %v3285_v13 = vadd.f32 %v3257_v16, %v9720_v26  ;;  %v9727_v6 = vld [vmem:[#allocation13_spill] sm:$0xff] }
 0x3b5   : > { %9713 = vst [vmem:[#allocation22_spill] sm:$0xff] %v7519_v8  ;;  %v3260_v8 = vadd.f32 %v3232_v1, %v7404_v27  ;;  %v3270_v27 = vadd.f32 %v3242_v51, %v7427_v0  ;;  %v4630_v1 = vld [vmem:[%s4831_s26 + $0xd] ss:$0 sm:$0xff]  ;;  %v3280_v0 = vadd.f32 %v3252_v55, %v7468_v58 }
 0x3b6   : > { %9714 = vst [vmem:[#allocation34_spill] sm:$0xff] %v7529_v50  ;;  %v3261_v50 = vadd.f32 %v3233_v11, %v7406_v10  ;;  %v3271_v10 = vadd.f32 %v3243_v32, %v7429_v3  ;;  %v3281_v3 = vadd.f32 %v3253_v62, %v7471_v53  ;;  %v3295_v58 = vmul.f32 %v4630_v1, %v9725_v9  ;;  %v9728_v55 = vld [vmem:[#allocation18_spill] sm:$0xff]  ;;  %v9729_v62 = vld [vmem:[#allocation19_spill] sm:$0xff]  ;;  %v9732_v11 = vld [vmem:[#allocation32_spill] sm:$0xff] }
 0x3b7   : > { %9715 = vst [vmem:[#allocation35_spill] sm:$0xff] %v7531_v2  ;;  %v3263_v2 = vadd.f32 %v3235_v25, %v7410_v33  ;;  %v3273_v33 = vadd.f32 %v3245_v20, %v7437_v7  ;;  %v3283_v7 = vadd.f32 %v3255_v34, %v7477_v56  ;;  %v9721_v20 = vld [vmem:[#allocation26_spill] sm:$0xff]  ;;  %v3297_v14 = vmul.f32 %v4630_v1, %v9727_v6  ;;  %v9733_v25 = vld [vmem:[#allocation36_spill] sm:$0xff]  ;;  %v9738_v48 = vld [vmem:[#allocation15_spill] sm:$0xff] }
 0x3b8   : > { %9716 = vst [vmem:[#allocation25_spill] sm:$0xff] %v7533_v42  ;;  %v3264_v42 = vadd.f32 %v3236_v18, %v7412_v24  ;;  %v3274_v24 = vadd.f32 %v3246_v54, %v7439_v61  ;;  %v3284_v61 = vadd.f32 %v3256_v60, %v7486_v44  ;;  %v9722_v54 = vld [vmem:[#allocation29_spill] sm:$0xff]  ;;  %v3298_v56 = vmul.f32 %v4630_v1, %v9728_v55  ;;  %v9731_v60 = vld [vmem:[#allocation24_spill] sm:$0xff]  ;;  %v9737_v4 = vld [vmem:[#allocation14_spill] sm:$0xff] }
 0x3b9   : > { %9717 = vst [vmem:[#allocation27_spill] sm:$0xff] %v7543_v15  ;;  %v3266_v15 = vadd.f32 %v3238_v43, %v7416_v41  ;;  %v3276_v41 = vadd.f32 %v3248_v29, %v7452_v17  ;;  %v3286_v17 = vadd.f32 %v3258_v23, %v9721_v20  ;;  %v3287_v40 = vadd.f32 %v3259_v19, %v9722_v54  ;;  %v9726_v29 = vld [vmem:[#allocation12_spill] sm:$0xff]  ;;  %v9739_v32 = vld [vmem:[#allocation17_spill] sm:$0xff]  ;;  %v9740_v20 = vld [vmem:[#allocation31_spill] sm:$0xff] }
 0x3ba   : > { %9718 = vst [vmem:[#allocation28_spill] sm:$0xff] %v7545_v57  ;;  %v3268_v57 = vadd.f32 %v3240_v31, %v7423_v45  ;;  %v3278_v45 = vadd.f32 %v3250_v63, %v7458_v36  ;;  %v3293_v63 = vmul.f32 %v4630_v1, %v9723_v30  ;;  %v9724_v36 = vld [vmem:[#allocation10_spill] sm:$0xff]  ;;  %v3296_v53 = vmul.f32 %v4630_v1, %v9726_v29  ;;  %v9734_v19 = vld [vmem:[#allocation16_spill] sm:$0xff]  ;;  %v9741_v30 = vld [vmem:[#allocation33_spill] sm:$0xff] }
 0x3bb   : > { %9719 = vst [vmem:[#allocation8_spill] sm:$0xff] %v7547_v47  ;;  %v3294_v38 = vmul.f32 %v4630_v1, %v9724_v36  ;;  %v3299_v44 = vmul.f32 %v4630_v1, %v9729_v62  ;;  %v3300_v34 = vmul.f32 %v4630_v1, %v9730_v49  ;;  %v3301_v16 = vmul.f32 %v4630_v1, %v9731_v60  ;;  %v7624_v43 = vld [vmem:[#allocation3 + $0x1e9] sm:$0x3f]  ;;  %v9743_v49 = vld [vmem:[#allocation21_spill] sm:$0xff] }
 0x3bc   : > { %v3302_v35 = vmul.f32 %v4630_v1, %v9732_v11  ;;  %v3303_v23 = vmul.f32 %v4630_v1, %v9733_v25  ;;  %v3304_v18 = vmul.f32 %v4630_v1, %v9734_v19  ;;  %9735 = vst [vmem:[#allocation7_spill] sm:$0xff] %v7622_v37  ;;  %v3305_v31 = vmul.f32 %v4630_v1, %v9737_v4  ;;  %v9742_v60 = vld [vmem:[#allocation20_spill] sm:$0xff]  ;;  %v9744_v62 = vld [vmem:[#allocation22_spill] sm:$0xff] }
 0x3bd   : > { %9736 = vst [vmem:[#allocation37_spill] sm:$0xff] %v7624_v43  ;;  %v3306_v51 = vmul.f32 %v4630_v1, %v9738_v48  ;;  %v3307_v26 = vmul.f32 %v4630_v1, %v9739_v32  ;;  %v3308_v54 = vmul.f32 %v4630_v1, %v9740_v20  ;;  %v3309_v36 = vmul.f32 %v4630_v1, %v9741_v30  ;;  %v9745_v55 = vld [vmem:[#allocation34_spill] sm:$0xff] }
 0x3be   : > { %v3310_v11 = vmul.f32 %v4630_v1, %v9742_v60  ;;  %v3311_v25 = vmul.f32 %v4630_v1, %v9743_v49  ;;  %v3312_v19 = vmul.f32 %v4630_v1, %v9744_v62  ;;  %v3313_v6 = vmul.f32 %v4630_v1, %v9745_v55  ;;  %v9746_v29 = vld [vmem:[#allocation35_spill] sm:$0xff] }
 0x3bf   : > { %v3314_v9 = vmul.f32 %v4630_v1, %v9746_v29  ;;  %v9747_v43 = vld [vmem:[#allocation25_spill] sm:$0xff]  ;;  %v3321_v29 = vadd.f32 %v3293_v63, %v3260_v8  ;;  %v3329_v8 = vadd.f32 %v3301_v16, %v3268_v57  ;;  %v3330_v63 = vadd.f32 %v3302_v35, %v3269_v46 }
 0x3c0   : > { %v3315_v4 = vmul.f32 %v4630_v1, %v9747_v43  ;;  %v9748_v37 = vld [vmem:[#allocation27_spill] sm:$0xff]  ;;  %v3322_v43 = vadd.f32 %v3294_v38, %v3261_v50  ;;  %v3331_v38 = vadd.f32 %v3303_v23, %v3270_v27  ;;  %v3332_v50 = vadd.f32 %v3304_v18, %v3271_v10  ;;  %v3226_v18 = vld [vmem:[#allocation3 + $0x1f9] sm:$0x3f] }
 0x3c1   : > { %v3316_v48 = vmul.f32 %v4630_v1, %v9748_v37  ;;  %v9749_v47 = vld [vmem:[#allocation28_spill] sm:$0xff]  ;;  %v3323_v37 = vadd.f32 %v3295_v58, %v3262_v39  ;;  %v4631_v39 = vld [vmem:[%s4831_s26 + $0x17] ss:$0 sm:$0xff]  ;;  %v3333_v58 = vadd.f32 %v3305_v31, %v3272_v12 }
 0x3c2   : > { %v3317_v32 = vmul.f32 %v4630_v1, %v9749_v47  ;;  %v9750_v20 = vld [vmem:[#allocation8_spill] sm:$0xff]  ;;  %v3324_v47 = vadd.f32 %v3296_v53, %v3263_v2  ;;  %v3334_v2 = vadd.f32 %v3306_v51, %v3273_v33  ;;  %v3335_v53 = vadd.f32 %v3307_v26, %v3274_v24  ;;  %v9758_v24 = vld [vmem:[#allocation11_spill] sm:$0xff] }
 0x3c3   : > { %v3318_v30 = vmul.f32 %v4630_v1, %v9750_v20  ;;  %v9751_v60 = vld [vmem:[#allocation7_spill] sm:$0xff]  ;;  %v3325_v20 = vadd.f32 %v3297_v14, %v3264_v42  ;;  %v3336_v14 = vadd.f32 %v3308_v54, %v3275_v5  ;;  %v7643_v42 = vadd.f32 %v3309_v36, %v3276_v41  ;;  %v9759_v41 = vld [vmem:[#allocation12_spill] sm:$0xff]  ;;  %v9774_v36 = vld [vmem:[#allocation21_spill] sm:$0xff] }
 0x3c4   : > { %v3319_v49 = vmul.f32 %v4630_v1, %v9751_v60  ;;  %v9752_v62 = vld [vmem:[#allocation37_spill] sm:$0xff]  ;;  %v3326_v60 = vadd.f32 %v3298_v56, %v3265_v52  ;;  %v7645_v52 = vadd.f32 %v3310_v11, %v3277_v59  ;;  %v7647_v56 = vadd.f32 %v3311_v25, %v3278_v45  ;;  %v9768_v11 = vld [vmem:[#allocation14_spill] sm:$0xff]  ;;  %v9769_v25 = vld [vmem:[#allocation15_spill] sm:$0xff] }
 0x3c5   : > { %v3320_v55 = vmul.f32 %v4630_v1, %v9752_v62  ;;  %v3327_v1 = vadd.f32 %v3299_v44, %v3266_v15  ;;  %v3328_v62 = vadd.f32 %v3300_v34, %v3267_v22  ;;  %v7649_v15 = vadd.f32 %v3312_v19, %v3279_v28  ;;  %v9760_v45 = vld [vmem:[#allocation13_spill] sm:$0xff]  ;;  %v9773_v54 = vld [vmem:[#allocation20_spill] sm:$0xff] }
 0x3c6   : > { %v7651_v44 = vadd.f32 %v3313_v6, %v3280_v0  ;;  %v7653_v22 = vadd.f32 %v3314_v9, %v3281_v3  ;;  %v7655_v57 = vadd.f32 %v3315_v4, %v3282_v21  ;;  %v7657_v46 = vadd.f32 %v3316_v48, %v3283_v7  ;;  %v9761_v0 = vld [vmem:[#allocation18_spill] sm:$0xff]  ;;  %v9762_v21 = vld [vmem:[#allocation19_spill] sm:$0xff]  ;;  %v3225_v19 = vld [vmem:[#allocation3 + $0x1f1] sm:$0xff] }
 0x3c7   : > { %v7659_v27 = vadd.f32 %v3317_v32, %v3284_v61  ;;  %v7661_v10 = vadd.f32 %v3318_v30, %v3285_v13  ;;  %v7663_v12 = vadd.f32 %v3319_v49, %v3286_v17  ;;  %v7665_v33 = vadd.f32 %v3320_v55, %v3287_v40  ;;  %v9763_v7 = vld [vmem:[#allocation23_spill] sm:$0xff]  ;;  %v9764_v61 = vld [vmem:[#allocation24_spill] sm:$0xff]  ;;  %v9770_v4 = vld [vmem:[#allocation17_spill] sm:$0xff] }
 0x3c8   : > { %9753 = vst [vmem:[#allocation26_spill] sm:$0xff] %v7657_v46  ;;  %v3354_v5 = vmul.f32 %v4631_v39, %v9758_v24  ;;  %v3355_v59 = vmul.f32 %v4631_v39, %v9759_v41  ;;  %v3356_v28 = vmul.f32 %v4631_v39, %v9760_v45  ;;  %v3357_v3 = vmul.f32 %v4631_v39, %v9761_v0  ;;  %v9765_v13 = vld [vmem:[#allocation32_spill] sm:$0xff]  ;;  %v9771_v48 = vld [vmem:[#allocation31_spill] sm:$0xff]  ;;  %v9772_v32 = vld [vmem:[#allocation33_spill] sm:$0xff] }
 0x3c9   : > { %9754 = vst [vmem:[#allocation29_spill] sm:$0xff] %v7659_v27  ;;  %v3358_v9 = vmul.f32 %v4631_v39, %v9762_v21  ;;  %v3359_v6 = vmul.f32 %v4631_v39, %v9763_v7  ;;  %v3360_v34 = vmul.f32 %v4631_v39, %v9764_v61  ;;  %v3361_v16 = vmul.f32 %v4631_v39, %v9765_v13  ;;  %v9766_v17 = vld [vmem:[#allocation36_spill] sm:$0xff]  ;;  %v9775_v41 = vld [vmem:[#allocation22_spill] sm:$0xff]  ;;  %v9777_v7 = vld [vmem:[#allocation35_spill] sm:$0xff] }
 0x3ca   : > { %9755 = vst [vmem:[#allocation9_spill] sm:$0xff] %v7661_v10  ;;  %v3362_v49 = vmul.f32 %v4631_v39, %v9766_v17  ;;  %v9767_v40 = vld [vmem:[#allocation16_spill] sm:$0xff]  ;;  %v3364_v35 = vmul.f32 %v4631_v39, %v9768_v11  ;;  %v3365_v23 = vmul.f32 %v4631_v39, %v9769_v25  ;;  %v3366_v31 = vmul.f32 %v4631_v39, %v9770_v4  ;;  %v9776_v0 = vld [vmem:[#allocation34_spill] sm:$0xff]  ;;  %v9778_v13 = vld [vmem:[#allocation25_spill] sm:$0xff] }
 0x3cb   : > { %9756 = vst [vmem:[#allocation10_spill] sm:$0xff] %v7663_v12  ;;  %v3363_v55 = vmul.f32 %v4631_v39, %v9767_v40  ;;  %v3367_v51 = vmul.f32 %v4631_v39, %v9771_v48  ;;  %v3368_v26 = vmul.f32 %v4631_v39, %v9772_v32  ;;  %v3369_v30 = vmul.f32 %v4631_v39, %v9773_v54  ;;  %v9779_v40 = vld [vmem:[#allocation27_spill] sm:$0xff]  ;;  %v9780_v25 = vld [vmem:[#allocation28_spill] sm:$0xff]  ;;  %v9783_v54 = vld [vmem:[#allocation37_spill] sm:$0xff] }
 0x3cc   : > { %9757 = vst [vmem:[#allocation38_spill] sm:$0xff] %v7665_v33  ;;  %v3370_v24 = vmul.f32 %v4631_v39, %v9774_v36  ;;  %v3371_v45 = vmul.f32 %v4631_v39, %v9775_v41  ;;  %v3372_v21 = vmul.f32 %v4631_v39, %v9776_v0  ;;  %v3373_v61 = vmul.f32 %v4631_v39, %v9777_v7  ;;  %v9781_v48 = vld [vmem:[#allocation8_spill] sm:$0xff]  ;;  %v9782_v32 = vld [vmem:[#allocation7_spill] sm:$0xff] }
 0x3cd   : > { %v3374_v17 = vmul.f32 %v4631_v39, %v9778_v13  ;;  %v3375_v11 = vmul.f32 %v4631_v39, %v9779_v40  ;;  %v3376_v4 = vmul.f32 %v4631_v39, %v9780_v25  ;;  %v3377_v33 = vmul.f32 %v4631_v39, %v9781_v48 }
 0x3ce   : > { %v3378_v12 = vmul.f32 %v4631_v39, %v9782_v32  ;;  %v3379_v10 = vmul.f32 %v4631_v39, %v9783_v54  ;;  %v3380_v36 = vmul.f32 %v4631_v39, %v3225_v19  ;;  %v3381_v27 = vmul.f32 %v4631_v39, %v3226_v18  ;;  %v7710_v32 = vld [vmem:[%s4831_s26 + $0x5] ss:$0 sm:$0xff] }
 0x3cf   : > { %v7693_v41 = vadd.f32 %v3354_v5, %v3321_v29  ;;  %v7695_v0 = vadd.f32 %v3355_v59, %v3322_v43  ;;  %v7697_v7 = vadd.f32 %v3356_v28, %v3323_v37  ;;  %v7699_v13 = vadd.f32 %v3357_v3, %v3324_v47  ;;  %v7720_v47 = vld [vmem:[#allocation3 + $0x210] sm:$0xff]  ;;  %v7752_v59 = vld [vmem:[#allocation3 + $0x240] sm:$0xff]  ;;  %v7754_v28 = vld [vmem:[#allocation3 + $0x248] sm:$0x3f] }
 0x3d0   : > { %v7701_v46 = vadd.f32 %v3358_v9, %v3325_v20  ;;  %v7703_v40 = vadd.f32 %v3359_v6, %v3326_v60  ;;  %v7705_v25 = vadd.f32 %v3360_v34, %v3327_v1  ;;  %v7707_v48 = vadd.f32 %v3361_v16, %v3328_v62  ;;  %9784 = vst [vmem:[#allocation11_spill] sm:$0xff] %v7720_v47  ;;  %v7722_v20 = vld [vmem:[#allocation3 + $0x218] sm:$0x3f]  ;;  %v7768_v6 = vld [vmem:[#allocation3 + $0x250] sm:$0xff]  ;;  %v7772_v34 = vld [vmem:[#allocation3 + $0x260] sm:$0xff] }
 0x3d1   : > { %v7712_v19 = vadd.f32 %v3362_v49, %v3329_v8  ;;  %v7714_v29 = vadd.f32 %v3363_v55, %v3330_v63  ;;  %v7716_v43 = vadd.f32 %v3364_v35, %v3331_v38  ;;  %v7718_v37 = vadd.f32 %v3365_v23, %v3332_v50  ;;  %9785 = vst [vmem:[#allocation12_spill] sm:$0xff] %v7722_v20  ;;  %v7732_v8 = vld [vmem:[#allocation3 + $0x220] sm:$0xff]  ;;  %v7734_v63 = vld [vmem:[#allocation3 + $0x228] sm:$0x3f]  ;;  %v7736_v38 = vld [vmem:[#allocation3 + $0x230] sm:$0xff] }
 0x3d2   : > { %v7724_v60 = vadd.f32 %v3366_v31, %v3333_v58  ;;  %v7726_v1 = vadd.f32 %v3367_v51, %v3334_v2  ;;  %v7728_v62 = vadd.f32 %v3368_v26, %v3335_v53  ;;  %v7730_v39 = vadd.f32 %v3369_v30, %v3336_v14  ;;  %9786 = vst [vmem:[#allocation13_spill] sm:$0xff] %v7732_v8  ;;  %v7738_v50 = vld [vmem:[#allocation3 + $0x238] sm:$0x3f]  ;;  %v3412_v14 = vld [vmem:[#allocation3 + $0x208] sm:$0x3f]  ;;  %v7788_v18 = vld [vmem:[#allocation3 + $0x270] sm:$0xff] }
 0x3d3   : > { %9787 = vst [vmem:[#allocation18_spill] sm:$0xff] %v7734_v63  ;;  %v7741_v5 = vadd.f32 %v3370_v24, %v7643_v42  ;;  %v7744_v58 = vadd.f32 %v3371_v45, %v7645_v52  ;;  %v7747_v2 = vadd.f32 %v3372_v21, %v7647_v56  ;;  %v7750_v53 = vadd.f32 %v3373_v61, %v7649_v15  ;;  %v9792_v9 = vld [vmem:[#allocation26_spill] sm:$0xff]  ;;  %v9796_v16 = vld [vmem:[#allocation29_spill] sm:$0xff]  ;;  %v7794_v26 = vld [vmem:[#allocation3 + $0x288] sm:$0x3f] }
 0x3d4   : > { %9788 = vst [vmem:[#allocation19_spill] sm:$0xff] %v7736_v38  ;;  %v7757_v3 = vadd.f32 %v3374_v17, %v7651_v44  ;;  %v7760_v42 = vadd.f32 %v3375_v11, %v7653_v22  ;;  %v7763_v52 = vadd.f32 %v3376_v4, %v7655_v57  ;;  %v7766_v56 = vadd.f32 %v3377_v33, %v9792_v9  ;;  %v7770_v15 = vld [vmem:[#allocation3 + $0x258] sm:$0x3f]  ;;  %v7786_v33 = vld [vmem:[#allocation3 + $0x268] sm:$0x3f]  ;;  %v7792_v51 = vld [vmem:[#allocation3 + $0x280] sm:$0xff] }
 0x3d5   : > { %9789 = vst [vmem:[#allocation23_spill] sm:$0xff] %v7738_v50  ;;  %v7775_v49 = vadd.f32 %v3378_v12, %v9796_v16  ;;  %v9797_v44 = vld [vmem:[#allocation9_spill] sm:$0xff]  ;;  %v9799_v22 = vld [vmem:[#allocation10_spill] sm:$0xff]  ;;  %v3447_v24 = vmul.f32 %v7710_v32, %v3412_v14  ;;  %v3449_v45 = vmul.f32 %v7710_v32, %v7722_v20  ;;  %v7809_v17 = vld [vmem:[#allocation3 + $0x2a8] sm:$0x3f]  ;;  %v3450_v11 = vmul.f32 %v7710_v32, %v7732_v8 }
 0x3d6   : > { %9790 = vst [vmem:[#allocation24_spill] sm:$0xff] %v7752_v59  ;;  %v7778_v55 = vadd.f32 %v3379_v10, %v9797_v44  ;;  %v7781_v35 = vadd.f32 %v3380_v36, %v9799_v22  ;;  %v9801_v57 = vld [vmem:[#allocation38_spill] sm:$0xff]  ;;  %v7796_v12 = vld [vmem:[#allocation3 + $0x290] sm:$0xff]  ;;  %v3451_v4 = vmul.f32 %v7710_v32, %v7734_v63  ;;  %v3452_v54 = vmul.f32 %v7710_v32, %v7736_v38  ;;  %v7833_v38 = vld [vmem:[#allocation3 + $0x2c8] sm:$0x3f] }
 0x3d7   : > { %9791 = vst [vmem:[#allocation32_spill] sm:$0xff] %v7754_v28  ;;  %v7784_v23 = vadd.f32 %v3381_v27, %v9801_v57  ;;  %v7790_v31 = vld [vmem:[#allocation3 + $0x278] sm:$0x3f]  ;;  %v3448_v27 = vmul.f32 %v7710_v32, %v7720_v47  ;;  %v7807_v61 = vld [vmem:[#allocation3 + $0x2a0] sm:$0xff]  ;;  %v3453_v36 = vmul.f32 %v7710_v32, %v7738_v50  ;;  %v7819_v14 = vld [vmem:[#allocation3 + $0x2b0] sm:$0xff]  ;;  %v3454_v44 = vmul.f32 %v7710_v32, %v7752_v59 }
 0x3d8   : > { %9793 = vst [vmem:[#allocation36_spill] sm:$0xff] %v7768_v6  ;;  %v9809_v10 = vld [vmem:[#allocation30_spill] sm:$0xff]  ;;  %v3455_v22 = vmul.f32 %v7710_v32, %v7754_v28  ;;  %v3456_v57 = vmul.f32 %v7710_v32, %v7768_v6  ;;  %v7835_v50 = vld [vmem:[#allocation3 + $0x2d0] sm:$0xff]  ;;  %v3458_v8 = vmul.f32 %v7710_v32, %v7772_v34  ;;  %v3459_v59 = vmul.f32 %v7710_v32, %v7786_v33 }
 0x3d9   : > { %9794 = vst [vmem:[#allocation16_spill] sm:$0xff] %v7770_v15  ;;  %v3446_v30 = vmul.f32 %v9809_v10, %v7710_v32  ;;  %v7805_v21 = vld [vmem:[#allocation3 + $0x298] sm:$0x3f]  ;;  %v7823_v16 = vld [vmem:[#allocation3 + $0x2c0] sm:$0xff]  ;;  %v3457_v10 = vmul.f32 %v7710_v32, %v7770_v15  ;;  %v3460_v28 = vmul.f32 %v7710_v32, %v7788_v18  ;;  %v3461_v6 = vmul.f32 %v7710_v32, %v7790_v31 }
 0x3da   : > { %9795 = vst [vmem:[#allocation14_spill] sm:$0xff] %v7772_v34  ;;  %v7821_v9 = vld [vmem:[#allocation3 + $0x2b8] sm:$0x3f]  ;;  %v3462_v15 = vmul.f32 %v7710_v32, %v7792_v51  ;;  %v3463_v20 = vmul.f32 %v7710_v32, %v7794_v26  ;;  %v3464_v47 = vmul.f32 %v7710_v32, %v7796_v12  ;;  %v3465_v34 = vmul.f32 %v7710_v32, %v7805_v21 }
 0x3db   : > { %9798 = vst [vmem:[#allocation15_spill] sm:$0xff] %v7778_v55  ;;  %v7837_v63 = vld [vmem:[#allocation3 + $0x2d8] sm:$0x3f]  ;;  %v3481_v55 = vadd.f32 %v3453_v36, %v7707_v48 }
 0x3dc   : > { %9800 = vst [vmem:[#allocation17_spill] sm:$0xff] %v7781_v35  ;;  %v3479_v35 = vadd.f32 %v3451_v4, %v7703_v40  ;;  %v3489_v40 = vadd.f32 %v3461_v6, %v7730_v39  ;;  %v7892_v48 = vadd.f32 %v3463_v20, %v7744_v58  ;;  %v9830_v6 = vld [vmem:[#allocation19_spill] sm:$0xff] }
 0x3dd   : > { %9802 = vst [vmem:[#allocation31_spill] sm:$0xff] %v7784_v23  ;;  %v3476_v23 = vadd.f32 %v3448_v27, %v7697_v7  ;;  %v3486_v7 = vadd.f32 %v3458_v8, %v7724_v60  ;;  %v3439_v4 = vld [vmem:[#allocation3 + $0x2e0] sm:$0xff] }
 0x3de   : > { %9803 = vst [vmem:[#allocation33_spill] sm:$0xff] %v7786_v33  ;;  %v3466_v33 = vmul.f32 %v7710_v32, %v7807_v61 }
 0x3df   : > { %9804 = vst [vmem:[#allocation20_spill] sm:$0xff] %v7788_v18  ;;  %v3467_v18 = vmul.f32 %v7710_v32, %v7809_v17 }
 0x3e0   : > { %9805 = vst [vmem:[#allocation21_spill] sm:$0xff] %v7790_v31  ;;  %v3468_v31 = vmul.f32 %v7710_v32, %v7819_v14 }
 0x3e1   : > { %9806 = vst [vmem:[#allocation22_spill] sm:$0xff] %v7792_v51  ;;  %v3469_v51 = vmul.f32 %v7710_v32, %v7821_v9 }
 0x3e2   : > { %9807 = vst [vmem:[#allocation34_spill] sm:$0xff] %v7794_v26  ;;  %v3470_v26 = vmul.f32 %v7710_v32, %v7823_v16  ;;  %v7907_v60 = vadd.f32 %v3468_v31, %v7763_v52  ;;  %v9829_v52 = vld [vmem:[#allocation18_spill] sm:$0xff]  ;;  %v9833_v31 = vld [vmem:[#allocation32_spill] sm:$0xff] }
 0x3e3   : > { %9808 = vst [vmem:[#allocation35_spill] sm:$0xff] %v7796_v12  ;;  %v3471_v12 = vmul.f32 %v7710_v32, %v7833_v38  ;;  %v9822_v39 = vld [vmem:[#allocation17_spill] sm:$0xff] }
 0x3e4   : > { %9810 = vst [vmem:[#allocation25_spill] sm:$0xff] %v7805_v21  ;;  %v3472_v21 = vmul.f32 %v7710_v32, %v7835_v50  ;;  %v7913_v20 = vadd.f32 %v3470_v26, %v7775_v49  ;;  %v9834_v26 = vld [vmem:[#allocation36_spill] sm:$0xff] }
 0x3e5   : > { %9811 = vst [vmem:[#allocation27_spill] sm:$0xff] %v7807_v61  ;;  %v3473_v61 = vmul.f32 %v7710_v32, %v7837_v63  ;;  %v3483_v32 = vadd.f32 %v3455_v22, %v7714_v29  ;;  %v7898_v29 = vadd.f32 %v3465_v34, %v7750_v53  ;;  %v9831_v34 = vld [vmem:[#allocation23_spill] sm:$0xff] }
 0x3e6   : > { %9812 = vst [vmem:[#allocation28_spill] sm:$0xff] %v7809_v17  ;;  %v3474_v17 = vadd.f32 %v3446_v30, %v7693_v41  ;;  %v3484_v41 = vadd.f32 %v3456_v57, %v7716_v43  ;;  %v4633_v30 = vld [vmem:[%s4831_s26 + $0xf] ss:$0 sm:$0xff]  ;;  %v7901_v43 = vadd.f32 %v3466_v33, %v7757_v3  ;;  %v7919_v8 = vadd.f32 %v3472_v21, %v9822_v39  ;;  %v9832_v33 = vld [vmem:[#allocation24_spill] sm:$0xff] }
 0x3e7   : > { %9813 = vst [vmem:[#allocation8_spill] sm:$0xff] %v7819_v14  ;;  %v3475_v14 = vadd.f32 %v3447_v24, %v7695_v0  ;;  %v3485_v0 = vadd.f32 %v3457_v10, %v7718_v37  ;;  %v7904_v37 = vadd.f32 %v3467_v18, %v7760_v42  ;;  %v9828_v3 = vld [vmem:[#allocation13_spill] sm:$0xff]  ;;  %v3512_v49 = vmul.f32 %v4633_v30, %v9831_v34  ;;  %v9835_v24 = vld [vmem:[#allocation16_spill] sm:$0xff] }
 0x3e8   : > { %9814 = vst [vmem:[#allocation7_spill] sm:$0xff] %v7821_v9  ;;  %v3477_v9 = vadd.f32 %v3449_v45, %v7699_v13  ;;  %v3487_v13 = vadd.f32 %v3459_v59, %v7726_v1  ;;  %v7910_v1 = vadd.f32 %v3469_v51, %v7766_v56  ;;  %v9827_v59 = vld [vmem:[#allocation12_spill] sm:$0xff]  ;;  %v3509_v42 = vmul.f32 %v4633_v30, %v9828_v3  ;;  %v9836_v45 = vld [vmem:[#allocation14_spill] sm:$0xff]  ;;  %v9839_v22 = vld [vmem:[#allocation21_spill] sm:$0xff] }
 0x3e9   : > { %9815 = vst [vmem:[#allocation37_spill] sm:$0xff] %v7823_v16  ;;  %v3478_v16 = vadd.f32 %v3450_v11, %v7701_v46  ;;  %v3488_v46 = vadd.f32 %v3460_v28, %v7728_v62  ;;  %v3508_v28 = vmul.f32 %v4633_v30, %v9827_v59  ;;  %v3510_v56 = vmul.f32 %v4633_v30, %v9829_v52  ;;  %v9838_v36 = vld [vmem:[#allocation20_spill] sm:$0xff]  ;;  %v9840_v10 = vld [vmem:[#allocation22_spill] sm:$0xff] }
 0x3ea   : > { %9816 = vst [vmem:[#allocation26_spill] sm:$0xff] %v7833_v38  ;;  %v3480_v38 = vadd.f32 %v3452_v54, %v7705_v25  ;;  %v7889_v25 = vadd.f32 %v3462_v15, %v7741_v5  ;;  %v9824_v5 = vld [vmem:[#allocation31_spill] sm:$0xff]  ;;  %v3511_v15 = vmul.f32 %v4633_v30, %v9830_v6  ;;  %v3513_v18 = vmul.f32 %v4633_v30, %v9832_v33  ;;  %v9841_v39 = vld [vmem:[#allocation34_spill] sm:$0xff] }
 0x3eb   : > { %9817 = vst [vmem:[#allocation29_spill] sm:$0xff] %v7835_v50  ;;  %v3482_v50 = vadd.f32 %v3454_v44, %v7712_v19  ;;  %v7895_v19 = vadd.f32 %v3464_v47, %v7747_v2  ;;  %v9820_v47 = vld [vmem:[#allocation15_spill] sm:$0xff]  ;;  %v7922_v58 = vadd.f32 %v3473_v61, %v9824_v5  ;;  %v3514_v51 = vmul.f32 %v4633_v30, %v9833_v31  ;;  %v9837_v61 = vld [vmem:[#allocation33_spill] sm:$0xff] }
 0x3ec   : > { %9818 = vst [vmem:[#allocation9_spill] sm:$0xff] %v7910_v1  ;;  %v7916_v62 = vadd.f32 %v3471_v12, %v9820_v47  ;;  %v9826_v2 = vld [vmem:[#allocation11_spill] sm:$0xff]  ;;  %v3515_v12 = vmul.f32 %v4633_v30, %v9834_v26  ;;  %v3516_v27 = vmul.f32 %v4633_v30, %v9835_v24  ;;  %v3517_v21 = vmul.f32 %v4633_v30, %v9836_v45  ;;  %v9843_v3 = vld [vmem:[#allocation25_spill] sm:$0xff] }
 0x3ed   : > { %9819 = vst [vmem:[#allocation10_spill] sm:$0xff] %v7913_v20  ;;  %v3507_v53 = vmul.f32 %v4633_v30, %v9826_v2  ;;  %v3518_v11 = vmul.f32 %v4633_v30, %v9837_v61  ;;  %v3440_v54 = vld [vmem:[#allocation3 + $0x2e8] sm:$0x3f]  ;;  %v3519_v44 = vmul.f32 %v4633_v30, %v9838_v36  ;;  %v3520_v57 = vmul.f32 %v4633_v30, %v9839_v22 }
 0x3ee   : > { %9821 = vst [vmem:[#allocation38_spill] sm:$0xff] %v7916_v62  ;;  %v3521_v47 = vmul.f32 %v4633_v30, %v9840_v10  ;;  %v3522_v5 = vmul.f32 %v4633_v30, %v9841_v39  ;;  %v9842_v2 = vld [vmem:[#allocation35_spill] sm:$0xff]  ;;  %v3524_v52 = vmul.f32 %v4633_v30, %v9843_v3  ;;  %v9845_v33 = vld [vmem:[#allocation28_spill] sm:$0xff]  ;;  %v3532_v39 = vmul.f32 %v4633_v30, %v7837_v63 }
 0x3ef   : > { %9823 = vst [vmem:[#allocation30_spill] sm:$0xff] %v7919_v8  ;;  %v3523_v59 = vmul.f32 %v4633_v30, %v9842_v2  ;;  %v9844_v6 = vld [vmem:[#allocation27_spill] sm:$0xff]  ;;  %v3526_v31 = vmul.f32 %v4633_v30, %v9845_v33  ;;  %v9846_v26 = vld [vmem:[#allocation8_spill] sm:$0xff]  ;;  %v3533_v2 = vmul.f32 %v4633_v30, %v3439_v4  ;;  %v3534_v20 = vmul.f32 %v4633_v30, %v3440_v54  ;;  %v8047_v54 = vld [vmem:[#allocation3 + $0x279] sm:$0x3f] }
 0x3f0   : > { %9825 = vst [vmem:[#allocation15_spill] sm:$0xff] %v7922_v58  ;;  %v3525_v34 = vmul.f32 %v4633_v30, %v9844_v6  ;;  %v3527_v24 = vmul.f32 %v4633_v30, %v9846_v26  ;;  %v9847_v45 = vld [vmem:[#allocation7_spill] sm:$0xff]  ;;  %v9848_v36 = vld [vmem:[#allocation37_spill] sm:$0xff]  ;;  %v7950_v3 = vadd.f32 %v3507_v53, %v3474_v17  ;;  %v7952_v6 = vadd.f32 %v3508_v28, %v3475_v14 }
 0x3f1   : > { %v3528_v61 = vmul.f32 %v4633_v30, %v9847_v45  ;;  %v3529_v58 = vmul.f32 %v4633_v30, %v9848_v36  ;;  %v9849_v22 = vld [vmem:[#allocation26_spill] sm:$0xff]  ;;  %v7954_v33 = vadd.f32 %v3509_v42, %v3476_v23  ;;  %v7956_v26 = vadd.f32 %v3510_v56, %v3477_v9  ;;  %v7977_v9 = vld [vmem:[#allocation3 + $0x211] sm:$0xff]  ;;  %v3564_v28 = vld [vmem:[#allocation3 + $0x209] sm:$0x3f]  ;;  %9872 = vst [vmem:[#allocation22_spill] sm:$0xff] %v8047_v54 }
 0x3f2   : > { %v3530_v8 = vmul.f32 %v4633_v30, %v9849_v22  ;;  %v9850_v10 = vld [vmem:[#allocation29_spill] sm:$0xff]  ;;  %v7958_v1 = vadd.f32 %v3511_v15, %v3478_v16  ;;  %v7960_v45 = vadd.f32 %v3512_v49, %v3479_v35  ;;  %v7962_v36 = vadd.f32 %v3513_v18, %v3480_v38  ;;  %9851 = vst [vmem:[#allocation17_spill] sm:$0xff] %v7977_v9  ;;  %v8009_v42 = vld [vmem:[#allocation3 + $0x241] sm:$0xff]  ;;  %v8011_v56 = vld [vmem:[#allocation3 + $0x249] sm:$0x3f] }
 0x3f3   : > { %v3531_v62 = vmul.f32 %v4633_v30, %v9850_v10  ;;  %v7964_v22 = vadd.f32 %v3514_v51, %v3481_v55  ;;  %v7967_v10 = vld [vmem:[%s4831_s26 + $0x7] ss:$0 sm:$0xff]  ;;  %v7969_v63 = vadd.f32 %v3515_v12, %v3482_v50  ;;  %v7971_v17 = vadd.f32 %v3516_v27, %v3483_v32  ;;  %v7979_v16 = vld [vmem:[#allocation3 + $0x219] sm:$0x3f]  ;;  %v7989_v50 = vld [vmem:[#allocation3 + $0x221] sm:$0xff]  ;;  %9857 = vst [vmem:[#allocation19_spill] sm:$0xff] %v8009_v42 }
 0x3f4   : > { %v7973_v14 = vadd.f32 %v3517_v21, %v3484_v41  ;;  %v7975_v23 = vadd.f32 %v3518_v11, %v3485_v0  ;;  %9852 = vst [vmem:[#allocation31_spill] sm:$0xff] %v7979_v16  ;;  %v7981_v35 = vadd.f32 %v3519_v44, %v3486_v7  ;;  %v7983_v38 = vadd.f32 %v3520_v57, %v3487_v13  ;;  %v7991_v32 = vld [vmem:[#allocation3 + $0x229] sm:$0x3f]  ;;  %v7993_v41 = vld [vmem:[#allocation3 + $0x231] sm:$0xff]  ;;  %v7995_v0 = vld [vmem:[#allocation3 + $0x239] sm:$0x3f] }
 0x3f5   : > { %v7985_v55 = vadd.f32 %v3521_v47, %v3488_v46  ;;  %v7987_v30 = vadd.f32 %v3522_v5, %v3489_v40  ;;  %9853 = vst [vmem:[#allocation11_spill] sm:$0xff] %v7989_v50  ;;  %v7998_v53 = vadd.f32 %v3523_v59, %v7889_v25  ;;  %v8001_v7 = vadd.f32 %v3524_v52, %v7892_v48  ;;  %v3563_v40 = vld [vmem:[#allocation3 + $0x201] sm:$0xff]  ;;  %v8027_v18 = vld [vmem:[#allocation3 + $0x259] sm:$0x3f]  ;;  %v8045_v4 = vld [vmem:[#allocation3 + $0x271] sm:$0xff] }
 0x3f6   : > { %9854 = vst [vmem:[#allocation12_spill] sm:$0xff] %v7991_v32  ;;  %v8004_v13 = vadd.f32 %v3525_v34, %v7895_v19  ;;  %v8007_v46 = vadd.f32 %v3526_v31, %v7898_v29  ;;  %v8014_v15 = vadd.f32 %v3527_v24, %v7901_v43  ;;  %v8017_v25 = vadd.f32 %v3528_v61, %v7904_v37  ;;  %v9859_v19 = vld [vmem:[#allocation9_spill] sm:$0xff]  ;;  %v8029_v51 = vld [vmem:[#allocation3 + $0x261] sm:$0xff]  ;;  %v8051_v57 = vld [vmem:[#allocation3 + $0x289] sm:$0x3f] }
 0x3f7   : > { %9855 = vst [vmem:[#allocation13_spill] sm:$0xff] %v7993_v41  ;;  %v8020_v48 = vadd.f32 %v3529_v58, %v7907_v60  ;;  %v8023_v49 = vadd.f32 %v3530_v8, %v9859_v19  ;;  %v8025_v29 = vld [vmem:[#allocation3 + $0x251] sm:$0xff]  ;;  %v9863_v12 = vld [vmem:[#allocation10_spill] sm:$0xff]  ;;  %v9868_v60 = vld [vmem:[#allocation15_spill] sm:$0xff]  ;;  %v3598_v47 = vmul.f32 %v7967_v10, %v3563_v40  ;;  %v3599_v5 = vmul.f32 %v7967_v10, %v3564_v28 }
 0x3f8   : > { %9856 = vst [vmem:[#allocation18_spill] sm:$0xff] %v7995_v0  ;;  %v8032_v27 = vadd.f32 %v3531_v62, %v9863_v12  ;;  %v9864_v43 = vld [vmem:[#allocation38_spill] sm:$0xff]  ;;  %v8041_v58 = vadd.f32 %v3534_v20, %v9868_v60  ;;  %v8043_v8 = vld [vmem:[#allocation3 + $0x269] sm:$0x3f]  ;;  %v8053_v62 = vld [vmem:[#allocation3 + $0x291] sm:$0xff]  ;;  %v3600_v20 = vmul.f32 %v7967_v10, %v7977_v9  ;;  %v3601_v59 = vmul.f32 %v7967_v10, %v7979_v16 }
 0x3f9   : > { %9858 = vst [vmem:[#allocation23_spill] sm:$0xff] %v8011_v56  ;;  %v8035_v21 = vadd.f32 %v3532_v39, %v9864_v43  ;;  %v9866_v37 = vld [vmem:[#allocation30_spill] sm:$0xff]  ;;  %v8065_v31 = vld [vmem:[#allocation3 + $0x2a9] sm:$0x3f]  ;;  %v3602_v24 = vmul.f32 %v7967_v10, %v7989_v50  ;;  %v3603_v61 = vmul.f32 %v7967_v10, %v7991_v32  ;;  %v3604_v39 = vmul.f32 %v7967_v10, %v7993_v41  ;;  %v8075_v40 = vld [vmem:[#allocation3 + $0x2b1] sm:$0xff] }
 0x3fa   : > { %9860 = vst [vmem:[#allocation24_spill] sm:$0xff] %v8025_v29  ;;  %v8038_v11 = vadd.f32 %v3533_v2, %v9866_v37  ;;  %v8049_v44 = vld [vmem:[#allocation3 + $0x281] sm:$0xff]  ;;  %v8061_v52 = vld [vmem:[#allocation3 + $0x299] sm:$0x3f]  ;;  %v3605_v2 = vmul.f32 %v7967_v10, %v7995_v0  ;;  %v3606_v12 = vmul.f32 %v7967_v10, %v8009_v42  ;;  %v3607_v43 = vmul.f32 %v7967_v10, %v8011_v56  ;;  %v8089_v41 = vld [vmem:[#allocation3 + $0x2c9] sm:$0x3f] }
 0x3fb   : > { %9861 = vst [vmem:[#allocation32_spill] sm:$0xff] %v8027_v18  ;;  %v8063_v34 = vld [vmem:[#allocation3 + $0x2a1] sm:$0xff]  ;;  %v8077_v28 = vld [vmem:[#allocation3 + $0x2b9] sm:$0x3f]  ;;  %v3608_v37 = vmul.f32 %v7967_v10, %v8025_v29  ;;  %v3609_v60 = vmul.f32 %v7967_v10, %v8027_v18  ;;  %v8091_v0 = vld [vmem:[#allocation3 + $0x2d1] sm:$0xff]  ;;  %v3610_v50 = vmul.f32 %v7967_v10, %v8029_v51  ;;  %v3611_v42 = vmul.f32 %v7967_v10, %v8043_v8 }
 0x3fc   : > { %9862 = vst [vmem:[#allocation36_spill] sm:$0xff] %v8029_v51  ;;  %v8079_v19 = vld [vmem:[#allocation3 + $0x2c1] sm:$0xff]  ;;  %v8093_v32 = vld [vmem:[#allocation3 + $0x2d9] sm:$0x3f]  ;;  %v3612_v56 = vmul.f32 %v7967_v10, %v8045_v4  ;;  %v3613_v29 = vmul.f32 %v7967_v10, %v8047_v54  ;;  %v3614_v18 = vmul.f32 %v7967_v10, %v8049_v44  ;;  %v3615_v16 = vmul.f32 %v7967_v10, %v8051_v57 }
 0x3fd   : > { %9865 = vst [vmem:[#allocation16_spill] sm:$0xff] %v8035_v21  ;;  %v3616_v9 = vmul.f32 %v7967_v10, %v8053_v62  ;;  %v3617_v51 = vmul.f32 %v7967_v10, %v8061_v52  ;;  %v3620_v54 = vmul.f32 %v7967_v10, %v8075_v40  ;;  %v3633_v21 = vadd.f32 %v3605_v2, %v7964_v22 }
 0x3fe   : > { %9867 = vst [vmem:[#allocation14_spill] sm:$0xff] %v8038_v11  ;;  %v3631_v11 = vadd.f32 %v3603_v61, %v7960_v45  ;;  %v3641_v45 = vadd.f32 %v3613_v29, %v7987_v30  ;;  %v8148_v22 = vadd.f32 %v3615_v16, %v8001_v7  ;;  %v9896_v29 = vld [vmem:[#allocation13_spill] sm:$0xff]  ;;  %v3591_v61 = vld [vmem:[#allocation3 + $0x2e1] sm:$0xff] }
 0x3ff   : > { %9869 = vst [vmem:[#allocation33_spill] sm:$0xff] %v8041_v58  ;;  %v3628_v58 = vadd.f32 %v3600_v20, %v7954_v33  ;;  %v3638_v33 = vadd.f32 %v3610_v50, %v7981_v35  ;;  %v8163_v35 = vadd.f32 %v3620_v54, %v8020_v48  ;;  %v9895_v48 = vld [vmem:[#allocation12_spill] sm:$0xff] }
 0x400   : > { %9870 = vst [vmem:[#allocation20_spill] sm:$0xff] %v8043_v8  ;;  %v3618_v8 = vmul.f32 %v7967_v10, %v8063_v34  ;;  %v9899_v54 = vld [vmem:[#allocation23_spill] sm:$0xff] }
 0x401   : > { %9871 = vst [vmem:[#allocation21_spill] sm:$0xff] %v8045_v4  ;;  %v3619_v4 = vmul.f32 %v7967_v10, %v8065_v31 }
 0x402   : > { %9873 = vst [vmem:[#allocation34_spill] sm:$0xff] %v8049_v44  ;;  %v3621_v44 = vmul.f32 %v7967_v10, %v8077_v28 }
 0x403   : > { %9874 = vst [vmem:[#allocation35_spill] sm:$0xff] %v8051_v57  ;;  %v3622_v57 = vmul.f32 %v7967_v10, %v8079_v19 }
 0x404   : > { %9875 = vst [vmem:[#allocation25_spill] sm:$0xff] %v8053_v62  ;;  %v3623_v62 = vmul.f32 %v7967_v10, %v8089_v41 }
 0x405   : > { %9876 = vst [vmem:[#allocation27_spill] sm:$0xff] %v8061_v52  ;;  %v3624_v52 = vmul.f32 %v7967_v10, %v8091_v0  ;;  %v8169_v16 = vadd.f32 %v3622_v57, %v8032_v27  ;;  %v9888_v30 = vld [vmem:[#allocation14_spill] sm:$0xff]  ;;  %v9900_v57 = vld [vmem:[#allocation24_spill] sm:$0xff] }
 0x406   : > { %9877 = vst [vmem:[#allocation28_spill] sm:$0xff] %v8063_v34  ;;  %v3625_v34 = vmul.f32 %v7967_v10, %v8093_v32  ;;  %v3635_v10 = vadd.f32 %v3607_v43, %v7971_v17  ;;  %v8154_v17 = vadd.f32 %v3617_v51, %v8007_v46  ;;  %v9897_v51 = vld [vmem:[#allocation18_spill] sm:$0xff] }
 0x407   : > { %9878 = vst [vmem:[#allocation8_spill] sm:$0xff] %v8065_v31  ;;  %v3626_v31 = vadd.f32 %v3598_v47, %v7950_v3  ;;  %v3636_v3 = vadd.f32 %v3608_v37, %v7973_v14  ;;  %v4635_v47 = vld [vmem:[%s4831_s26 + $0x11] ss:$0 sm:$0xff]  ;;  %v8157_v14 = vadd.f32 %v3618_v8, %v8014_v15  ;;  %v8175_v50 = vadd.f32 %v3624_v52, %v9888_v30  ;;  %v9894_v15 = vld [vmem:[#allocation11_spill] sm:$0xff] }
 0x408   : > { %9879 = vst [vmem:[#allocation7_spill] sm:$0xff] %v8075_v40  ;;  %v3627_v40 = vadd.f32 %v3599_v5, %v7952_v6  ;;  %v3637_v6 = vadd.f32 %v3609_v60, %v7975_v23  ;;  %v8160_v23 = vadd.f32 %v3619_v4, %v8017_v25  ;;  %v3661_v25 = vmul.f32 %v4635_v47, %v9894_v15  ;;  %v9898_v8 = vld [vmem:[#allocation19_spill] sm:$0xff]  ;;  %v9901_v5 = vld [vmem:[#allocation32_spill] sm:$0xff]  ;;  %v9904_v2 = vld [vmem:[#allocation21_spill] sm:$0xff] }
 0x409   : > { %9880 = vst [vmem:[#allocation37_spill] sm:$0xff] %v8077_v28  ;;  %v3629_v28 = vadd.f32 %v3601_v59, %v7956_v26  ;;  %v3639_v26 = vadd.f32 %v3611_v42, %v7983_v38  ;;  %v8166_v38 = vadd.f32 %v3621_v44, %v8023_v49  ;;  %v9893_v42 = vld [vmem:[#allocation31_spill] sm:$0xff]  ;;  %v3662_v49 = vmul.f32 %v4635_v47, %v9895_v48  ;;  %v9902_v59 = vld [vmem:[#allocation36_spill] sm:$0xff]  ;;  %v9905_v43 = vld [vmem:[#allocation22_spill] sm:$0xff] }
 0x40a   : > { %9881 = vst [vmem:[#allocation26_spill] sm:$0xff] %v8079_v19  ;;  %v3630_v19 = vadd.f32 %v3602_v24, %v7958_v1  ;;  %v3640_v1 = vadd.f32 %v3612_v56, %v7985_v55  ;;  %v3660_v56 = vmul.f32 %v4635_v47, %v9893_v42  ;;  %v3664_v27 = vmul.f32 %v4635_v47, %v9897_v51  ;;  %v9906_v60 = vld [vmem:[#allocation34_spill] sm:$0xff]  ;;  %v9907_v30 = vld [vmem:[#allocation35_spill] sm:$0xff] }
 0x40b   : > { %9882 = vst [vmem:[#allocation29_spill] sm:$0xff] %v8089_v41  ;;  %v3632_v41 = vadd.f32 %v3604_v39, %v7962_v36  ;;  %v8145_v36 = vadd.f32 %v3614_v18, %v7998_v53  ;;  %v9890_v53 = vld [vmem:[#allocation33_spill] sm:$0xff]  ;;  %v3663_v18 = vmul.f32 %v4635_v47, %v9896_v29  ;;  %v3665_v4 = vmul.f32 %v4635_v47, %v9898_v8  ;;  %v3592_v39 = vld [vmem:[#allocation3 + $0x2e9] sm:$0x3f] }
 0x40c   : > { %9883 = vst [vmem:[#allocation9_spill] sm:$0xff] %v8091_v0  ;;  %v3634_v0 = vadd.f32 %v3606_v12, %v7969_v63  ;;  %v8151_v63 = vadd.f32 %v3616_v9, %v8004_v13  ;;  %v9886_v9 = vld [vmem:[#allocation16_spill] sm:$0xff]  ;;  %v8178_v7 = vadd.f32 %v3625_v34, %v9890_v53  ;;  %v9892_v13 = vld [vmem:[#allocation17_spill] sm:$0xff]  ;;  %v3666_v44 = vmul.f32 %v4635_v47, %v9899_v54  ;;  %v9909_v15 = vld [vmem:[#allocation27_spill] sm:$0xff] }
 0x40d   : > { %9884 = vst [vmem:[#allocation10_spill] sm:$0xff] %v8166_v38  ;;  %v8172_v55 = vadd.f32 %v3623_v62, %v9886_v9  ;;  %v3659_v46 = vmul.f32 %v4635_v47, %v9892_v13  ;;  %v3667_v62 = vmul.f32 %v4635_v47, %v9900_v57  ;;  %v3668_v20 = vmul.f32 %v4635_v47, %v9901_v5  ;;  %v9903_v34 = vld [vmem:[#allocation20_spill] sm:$0xff]  ;;  %v9908_v13 = vld [vmem:[#allocation25_spill] sm:$0xff] }
 0x40e   : > { %9885 = vst [vmem:[#allocation38_spill] sm:$0xff] %v8169_v16  ;;  %v3669_v52 = vmul.f32 %v4635_v47, %v9902_v59  ;;  %v3670_v24 = vmul.f32 %v4635_v47, %v9903_v34  ;;  %v3671_v12 = vmul.f32 %v4635_v47, %v9904_v2  ;;  %v3672_v37 = vmul.f32 %v4635_v47, %v9905_v43  ;;  %v9910_v29 = vld [vmem:[#allocation28_spill] sm:$0xff] }
 0x40f   : > { %9887 = vst [vmem:[#allocation30_spill] sm:$0xff] %v8172_v55  ;;  %v3673_v9 = vmul.f32 %v4635_v47, %v9906_v60  ;;  %v3674_v53 = vmul.f32 %v4635_v47, %v9907_v30  ;;  %v3675_v42 = vmul.f32 %v4635_v47, %v9908_v13  ;;  %v3676_v48 = vmul.f32 %v4635_v47, %v9909_v15  ;;  %v9911_v8 = vld [vmem:[#allocation8_spill] sm:$0xff]  ;;  %v9912_v57 = vld [vmem:[#allocation7_spill] sm:$0xff] }
 0x410   : > { %9889 = vst [vmem:[#allocation15_spill] sm:$0xff] %v8175_v50  ;;  %v3677_v51 = vmul.f32 %v4635_v47, %v9910_v29  ;;  %v3678_v54 = vmul.f32 %v4635_v47, %v9911_v8  ;;  %v3679_v5 = vmul.f32 %v4635_v47, %v9912_v57  ;;  %v9913_v59 = vld [vmem:[#allocation37_spill] sm:$0xff]  ;;  %v3684_v30 = vmul.f32 %v4635_v47, %v8093_v32 }
 0x411   : > { %9891 = vst [vmem:[#allocation16_spill] sm:$0xff] %v8178_v7  ;;  %v3680_v34 = vmul.f32 %v4635_v47, %v9913_v59  ;;  %v9914_v2 = vld [vmem:[#allocation26_spill] sm:$0xff]  ;;  %v3685_v13 = vmul.f32 %v4635_v47, %v3591_v61  ;;  %v3686_v16 = vmul.f32 %v4635_v47, %v3592_v39  ;;  %v8206_v15 = vadd.f32 %v3659_v46, %v3626_v31  ;;  %v8301_v61 = vld [vmem:[#allocation3 + $0x272] sm:$0xff] }
 0x412   : > { %v3681_v7 = vmul.f32 %v4635_v47, %v9914_v2  ;;  %v9915_v43 = vld [vmem:[#allocation29_spill] sm:$0xff]  ;;  %v8208_v29 = vadd.f32 %v3660_v56, %v3627_v40  ;;  %v8210_v8 = vadd.f32 %v3661_v25, %v3628_v58  ;;  %v8212_v57 = vadd.f32 %v3662_v49, %v3629_v28  ;;  %v3716_v56 = vld [vmem:[#allocation3 + $0x20a] sm:$0x3f]  ;;  %v8265_v25 = vld [vmem:[#allocation3 + $0x242] sm:$0xff]  ;;  %9937 = vst [vmem:[#allocation22_spill] sm:$0xff] %v8301_v61 }
 0x413   : > { %v3682_v50 = vmul.f32 %v4635_v47, %v9915_v43  ;;  %v9916_v60 = vld [vmem:[#allocation9_spill] sm:$0xff]  ;;  %v8214_v38 = vadd.f32 %v3663_v18, %v3630_v19  ;;  %v8216_v59 = vadd.f32 %v3664_v27, %v3631_v11  ;;  %v8218_v2 = vadd.f32 %v3665_v4, %v3632_v41  ;;  %v8235_v19 = vld [vmem:[#allocation3 + $0x21a] sm:$0x3f]  ;;  %9923 = vst [vmem:[#allocation13_spill] sm:$0xff] %v8265_v25  ;;  %v8267_v49 = vld [vmem:[#allocation3 + $0x24a] sm:$0x3f] }
 0x414   : > { %v3683_v55 = vmul.f32 %v4635_v47, %v9916_v60  ;;  %v8220_v43 = vadd.f32 %v3666_v44, %v3633_v21  ;;  %v8223_v60 = vld [vmem:[%s4831_s26 + $0x9] ss:$0 sm:$0xff]  ;;  %v8225_v32 = vadd.f32 %v3667_v62, %v3634_v0  ;;  %v8227_v31 = vadd.f32 %v3668_v20, %v3635_v10  ;;  %9918 = vst [vmem:[#allocation33_spill] sm:$0xff] %v8235_v19  ;;  %v8245_v0 = vld [vmem:[#allocation3 + $0x222] sm:$0xff]  ;;  %v8247_v10 = vld [vmem:[#allocation3 + $0x22a] sm:$0x3f] }
 0x415   : > { %v8229_v40 = vadd.f32 %v3669_v52, %v3636_v3  ;;  %v8231_v58 = vadd.f32 %v3670_v24, %v3637_v6  ;;  %v8233_v28 = vld [vmem:[#allocation3 + $0x212] sm:$0xff]  ;;  %v8237_v11 = vadd.f32 %v3671_v12, %v3638_v33  ;;  %v8239_v41 = vadd.f32 %v3672_v37, %v3639_v26  ;;  %9919 = vst [vmem:[#allocation17_spill] sm:$0xff] %v8245_v0  ;;  %v8251_v6 = vld [vmem:[#allocation3 + $0x23a] sm:$0x3f]  ;;  %v8285_v44 = vld [vmem:[#allocation3 + $0x262] sm:$0xff] }
 0x416   : > { %9917 = vst [vmem:[#allocation14_spill] sm:$0xff] %v8233_v28  ;;  %v8241_v21 = vadd.f32 %v3673_v9, %v3640_v1  ;;  %v8243_v47 = vadd.f32 %v3674_v53, %v3641_v45  ;;  %v8249_v3 = vld [vmem:[#allocation3 + $0x232] sm:$0xff]  ;;  %v8254_v46 = vadd.f32 %v3675_v42, %v8145_v36  ;;  %v8257_v33 = vadd.f32 %v3676_v48, %v8148_v22  ;;  %v3715_v45 = vld [vmem:[#allocation3 + $0x202] sm:$0xff]  ;;  %v8283_v4 = vld [vmem:[#allocation3 + $0x25a] sm:$0x3f] }
 0x417   : > { %9920 = vst [vmem:[#allocation31_spill] sm:$0xff] %v8247_v10  ;;  %v8260_v26 = vadd.f32 %v3677_v51, %v8151_v63  ;;  %v8263_v1 = vadd.f32 %v3678_v54, %v8154_v17  ;;  %v8270_v18 = vadd.f32 %v3679_v5, %v8157_v14  ;;  %v8273_v36 = vadd.f32 %v3680_v34, %v8160_v23  ;;  %v9925_v63 = vld [vmem:[#allocation10_spill] sm:$0xff]  ;;  %v8281_v17 = vld [vmem:[#allocation3 + $0x252] sm:$0xff]  ;;  %v9932_v23 = vld [vmem:[#allocation15_spill] sm:$0xff] }
 0x418   : > { %9921 = vst [vmem:[#allocation11_spill] sm:$0xff] %v8249_v3  ;;  %v8276_v22 = vadd.f32 %v3681_v7, %v8163_v35  ;;  %v8279_v27 = vadd.f32 %v3682_v50, %v9925_v63  ;;  %v9929_v62 = vld [vmem:[#allocation38_spill] sm:$0xff]  ;;  %v8294_v24 = vadd.f32 %v3685_v13, %v9932_v23  ;;  %v9934_v35 = vld [vmem:[#allocation16_spill] sm:$0xff]  ;;  %v8305_v12 = vld [vmem:[#allocation3 + $0x282] sm:$0xff]  ;;  %v3750_v9 = vmul.f32 %v8223_v60, %v3715_v45 }
 0x419   : > { %9922 = vst [vmem:[#allocation12_spill] sm:$0xff] %v8251_v6  ;;  %v8288_v20 = vadd.f32 %v3683_v55, %v9929_v62  ;;  %v9930_v14 = vld [vmem:[#allocation30_spill] sm:$0xff]  ;;  %v8297_v7 = vadd.f32 %v3686_v16, %v9934_v35  ;;  %v8299_v50 = vld [vmem:[#allocation3 + $0x26a] sm:$0x3f]  ;;  %v8309_v55 = vld [vmem:[#allocation3 + $0x292] sm:$0xff]  ;;  %v3751_v53 = vmul.f32 %v8223_v60, %v3716_v56  ;;  %v3752_v16 = vmul.f32 %v8223_v60, %v8233_v28 }
 0x41a   : > { %9924 = vst [vmem:[#allocation18_spill] sm:$0xff] %v8267_v49  ;;  %v8291_v52 = vadd.f32 %v3684_v30, %v9930_v14  ;;  %v8303_v39 = vld [vmem:[#allocation3 + $0x27a] sm:$0x3f]  ;;  %v8307_v37 = vld [vmem:[#allocation3 + $0x28a] sm:$0x3f]  ;;  %v3753_v42 = vmul.f32 %v8223_v60, %v8235_v19  ;;  %v8319_v51 = vld [vmem:[#allocation3 + $0x2a2] sm:$0xff]  ;;  %v3754_v5 = vmul.f32 %v8223_v60, %v8245_v0  ;;  %v3755_v34 = vmul.f32 %v8223_v60, %v8247_v10 }
 0x41b   : > { %9926 = vst [vmem:[#allocation19_spill] sm:$0xff] %v8281_v17  ;;  %v8317_v48 = vld [vmem:[#allocation3 + $0x29a] sm:$0x3f]  ;;  %v8321_v54 = vld [vmem:[#allocation3 + $0x2aa] sm:$0x3f]  ;;  %v3756_v30 = vmul.f32 %v8223_v60, %v8249_v3  ;;  %v3757_v13 = vmul.f32 %v8223_v60, %v8251_v6  ;;  %v8331_v45 = vld [vmem:[#allocation3 + $0x2b2] sm:$0xff]  ;;  %v3758_v62 = vmul.f32 %v8223_v60, %v8265_v25  ;;  %v3759_v14 = vmul.f32 %v8223_v60, %v8267_v49 }
 0x41c   : > { %9927 = vst [vmem:[#allocation23_spill] sm:$0xff] %v8283_v4  ;;  %v8333_v56 = vld [vmem:[#allocation3 + $0x2ba] sm:$0x3f]  ;;  %v8335_v63 = vld [vmem:[#allocation3 + $0x2c2] sm:$0xff]  ;;  %v3760_v23 = vmul.f32 %v8223_v60, %v8281_v17  ;;  %v3761_v35 = vmul.f32 %v8223_v60, %v8283_v4  ;;  %v8345_v3 = vld [vmem:[#allocation3 + $0x2ca] sm:$0x3f]  ;;  %v3762_v0 = vmul.f32 %v8223_v60, %v8285_v44  ;;  %v3763_v25 = vmul.f32 %v8223_v60, %v8299_v50 }
 0x41d   : > { %9928 = vst [vmem:[#allocation24_spill] sm:$0xff] %v8285_v44  ;;  %v8347_v6 = vld [vmem:[#allocation3 + $0x2d2] sm:$0xff]  ;;  %v8349_v10 = vld [vmem:[#allocation3 + $0x2da] sm:$0x3f]  ;;  %v3764_v49 = vmul.f32 %v8223_v60, %v8301_v61  ;;  %v3765_v17 = vmul.f32 %v8223_v60, %v8303_v39  ;;  %v3766_v4 = vmul.f32 %v8223_v60, %v8305_v12  ;;  %v3767_v19 = vmul.f32 %v8223_v60, %v8307_v37 }
 0x41e   : > { %9931 = vst [vmem:[#allocation32_spill] sm:$0xff] %v8291_v52  ;;  %v3768_v28 = vmul.f32 %v8223_v60, %v8309_v55  ;;  %v3769_v44 = vmul.f32 %v8223_v60, %v8317_v48  ;;  %v3771_v61 = vmul.f32 %v8223_v60, %v8321_v54  ;;  %v3785_v52 = vadd.f32 %v3757_v13, %v8220_v43  ;;  %v9970_v13 = vld [vmem:[#allocation22_spill] sm:$0xff] }
 0x41f   : > { %9933 = vst [vmem:[#allocation36_spill] sm:$0xff] %v8294_v24  ;;  %v3783_v24 = vadd.f32 %v3755_v34, %v8216_v59  ;;  %v3793_v59 = vadd.f32 %v3765_v17, %v8243_v47  ;;  %v8404_v43 = vadd.f32 %v3767_v19, %v8257_v33  ;;  %v9962_v17 = vld [vmem:[#allocation11_spill] sm:$0xff] }
 0x420   : > { %9935 = vst [vmem:[#allocation20_spill] sm:$0xff] %v8297_v7  ;;  %v3780_v7 = vadd.f32 %v3752_v16, %v8210_v8  ;;  %v3790_v8 = vadd.f32 %v3762_v0, %v8237_v11  ;;  %v3743_v34 = vld [vmem:[#allocation3 + $0x2e2] sm:$0xff] }
 0x421   : > { %9936 = vst [vmem:[#allocation21_spill] sm:$0xff] %v8299_v50  ;;  %v3770_v50 = vmul.f32 %v8223_v60, %v8319_v51 }
 0x422   : > { %9938 = vst [vmem:[#allocation34_spill] sm:$0xff] %v8303_v39  ;;  %v3772_v39 = vmul.f32 %v8223_v60, %v8331_v45 }
 0x423   : > { %9939 = vst [vmem:[#allocation35_spill] sm:$0xff] %v8305_v12  ;;  %v3773_v12 = vmul.f32 %v8223_v60, %v8333_v56 }
 0x424   : > { %9940 = vst [vmem:[#allocation25_spill] sm:$0xff] %v8307_v37  ;;  %v3774_v37 = vmul.f32 %v8223_v60, %v8335_v63  ;;  %v8419_v11 = vadd.f32 %v3772_v39, %v8276_v22  ;;  %v9961_v22 = vld [vmem:[#allocation31_spill] sm:$0xff]  ;;  %v9965_v39 = vld [vmem:[#allocation18_spill] sm:$0xff] }
 0x425   : > { %9941 = vst [vmem:[#allocation27_spill] sm:$0xff] %v8309_v55  ;;  %v3775_v55 = vmul.f32 %v8223_v60, %v8345_v3 }
 0x426   : > { %9942 = vst [vmem:[#allocation28_spill] sm:$0xff] %v8317_v48  ;;  %v3776_v48 = vmul.f32 %v8223_v60, %v8347_v6  ;;  %v8425_v19 = vadd.f32 %v3774_v37, %v8288_v20  ;;  %v9954_v47 = vld [vmem:[#allocation36_spill] sm:$0xff]  ;;  %v9966_v37 = vld [vmem:[#allocation19_spill] sm:$0xff] }
 0x427   : > { %9943 = vst [vmem:[#allocation8_spill] sm:$0xff] %v8319_v51  ;;  %v3777_v51 = vmul.f32 %v8223_v60, %v8349_v10  ;;  %v3787_v60 = vadd.f32 %v3759_v14, %v8227_v31  ;;  %v8410_v31 = vadd.f32 %v3769_v44, %v8263_v1  ;;  %v9963_v44 = vld [vmem:[#allocation12_spill] sm:$0xff] }
 0x428   : > { %9944 = vst [vmem:[#allocation7_spill] sm:$0xff] %v8321_v54  ;;  %v3778_v54 = vadd.f32 %v3750_v9, %v8206_v15  ;;  %v3788_v15 = vadd.f32 %v3760_v23, %v8229_v40  ;;  %v4637_v9 = vld [vmem:[%s4831_s26 + $0x13] ss:$0 sm:$0xff]  ;;  %v8413_v40 = vadd.f32 %v3770_v50, %v8270_v18  ;;  %v8431_v0 = vadd.f32 %v3776_v48, %v9954_v47  ;;  %v9960_v18 = vld [vmem:[#allocation17_spill] sm:$0xff] }
 0x429   : > { %9945 = vst [vmem:[#allocation37_spill] sm:$0xff] %v8331_v45  ;;  %v3779_v45 = vadd.f32 %v3751_v53, %v8208_v29  ;;  %v3789_v29 = vadd.f32 %v3761_v35, %v8231_v58  ;;  %v8416_v58 = vadd.f32 %v3771_v61, %v8273_v36  ;;  %v3813_v36 = vmul.f32 %v4637_v9, %v9960_v18  ;;  %v9964_v50 = vld [vmem:[#allocation13_spill] sm:$0xff]  ;;  %v9967_v53 = vld [vmem:[#allocation23_spill] sm:$0xff]  ;;  %v9971_v14 = vld [vmem:[#allocation34_spill] sm:$0xff] }
 0x42a   : > { %9946 = vst [vmem:[#allocation26_spill] sm:$0xff] %v8333_v56  ;;  %v3781_v56 = vadd.f32 %v3753_v42, %v8212_v57  ;;  %v3791_v57 = vadd.f32 %v3763_v25, %v8239_v41  ;;  %v8422_v41 = vadd.f32 %v3773_v12, %v8279_v27  ;;  %v9959_v25 = vld [vmem:[#allocation33_spill] sm:$0xff]  ;;  %v3814_v27 = vmul.f32 %v4637_v9, %v9961_v22  ;;  %v9968_v42 = vld [vmem:[#allocation24_spill] sm:$0xff]  ;;  %v9972_v35 = vld [vmem:[#allocation35_spill] sm:$0xff] }
 0x42b   : > { %9947 = vst [vmem:[#allocation29_spill] sm:$0xff] %v8335_v63  ;;  %v3782_v63 = vadd.f32 %v3754_v5, %v8214_v38  ;;  %v3792_v38 = vadd.f32 %v3764_v49, %v8241_v21  ;;  %v3812_v49 = vmul.f32 %v4637_v9, %v9959_v25  ;;  %v3816_v20 = vmul.f32 %v4637_v9, %v9963_v44  ;;  %v9973_v47 = vld [vmem:[#allocation25_spill] sm:$0xff] }
 0x42c   : > { %9948 = vst [vmem:[#allocation9_spill] sm:$0xff] %v8345_v3  ;;  %v3784_v3 = vadd.f32 %v3756_v30, %v8218_v2  ;;  %v8401_v2 = vadd.f32 %v3766_v4, %v8254_v46  ;;  %v9956_v46 = vld [vmem:[#allocation20_spill] sm:$0xff]  ;;  %v3815_v4 = vmul.f32 %v4637_v9, %v9962_v17  ;;  %v3817_v61 = vmul.f32 %v4637_v9, %v9964_v50 }
 0x42d   : > { %9949 = vst [vmem:[#allocation10_spill] sm:$0xff] %v8347_v6  ;;  %v3786_v6 = vadd.f32 %v3758_v62, %v8225_v32  ;;  %v8407_v32 = vadd.f32 %v3768_v28, %v8260_v26  ;;  %v9952_v28 = vld [vmem:[#allocation32_spill] sm:$0xff]  ;;  %v8434_v33 = vadd.f32 %v3777_v51, %v9956_v46  ;;  %v9958_v26 = vld [vmem:[#allocation14_spill] sm:$0xff]  ;;  %v3818_v12 = vmul.f32 %v4637_v9, %v9965_v39  ;;  %v9969_v51 = vld [vmem:[#allocation21_spill] sm:$0xff] }
 0x42e   : > { %9950 = vst [vmem:[#allocation38_spill] sm:$0xff] %v8422_v41  ;;  %v8428_v21 = vadd.f32 %v3775_v55, %v9952_v28  ;;  %v3811_v1 = vmul.f32 %v4637_v9, %v9958_v26  ;;  %v3819_v55 = vmul.f32 %v4637_v9, %v9966_v37  ;;  %v3820_v16 = vmul.f32 %v4637_v9, %v9967_v53  ;;  %v3744_v30 = vld [vmem:[#allocation3 + $0x2ea] sm:$0x3f]  ;;  %v9974_v26 = vld [vmem:[#allocation27_spill] sm:$0xff] }
 0x42f   : > { %9951 = vst [vmem:[#allocation30_spill] sm:$0xff] %v8425_v19  ;;  %v3821_v48 = vmul.f32 %v4637_v9, %v9968_v42  ;;  %v3822_v5 = vmul.f32 %v4637_v9, %v9969_v51  ;;  %v3823_v62 = vmul.f32 %v4637_v9, %v9970_v13  ;;  %v3824_v23 = vmul.f32 %v4637_v9, %v9971_v14  ;;  %v9975_v18 = vld [vmem:[#allocation28_spill] sm:$0xff]  ;;  %v9977_v50 = vld [vmem:[#allocation7_spill] sm:$0xff] }
 0x430   : > { %9953 = vst [vmem:[#allocation15_spill] sm:$0xff] %v8428_v21  ;;  %v3825_v28 = vmul.f32 %v4637_v9, %v9972_v35  ;;  %v3826_v46 = vmul.f32 %v4637_v9, %v9973_v47  ;;  %v3827_v25 = vmul.f32 %v4637_v9, %v9974_v26  ;;  %v3828_v22 = vmul.f32 %v4637_v9, %v9975_v18  ;;  %v9976_v17 = vld [vmem:[#allocation8_spill] sm:$0xff]  ;;  %v9978_v37 = vld [vmem:[#allocation37_spill] sm:$0xff] }
 0x431   : > { %9955 = vst [vmem:[#allocation16_spill] sm:$0xff] %v8431_v0  ;;  %v3829_v44 = vmul.f32 %v4637_v9, %v9976_v17  ;;  %v3830_v39 = vmul.f32 %v4637_v9, %v9977_v50  ;;  %v3831_v53 = vmul.f32 %v4637_v9, %v9978_v37  ;;  %v9979_v42 = vld [vmem:[#allocation26_spill] sm:$0xff]  ;;  %v3836_v47 = vmul.f32 %v4637_v9, %v8349_v10 }
 0x432   : > { %9957 = vst [vmem:[#allocation32_spill] sm:$0xff] %v8434_v33  ;;  %v3832_v51 = vmul.f32 %v4637_v9, %v9979_v42  ;;  %v9980_v13 = vld [vmem:[#allocation29_spill] sm:$0xff]  ;;  %v3837_v26 = vmul.f32 %v4637_v9, %v3743_v34  ;;  %v3838_v19 = vmul.f32 %v4637_v9, %v3744_v30  ;;  %v8462_v18 = vadd.f32 %v3811_v1, %v3778_v54  ;;  %v8561_v30 = vld [vmem:[#allocation3 + $0x380] sm:$0xff] }
 0x433   : > { %v3833_v33 = vmul.f32 %v4637_v9, %v9980_v13  ;;  %v9981_v14 = vld [vmem:[#allocation9_spill] sm:$0xff]  ;;  %v8464_v17 = vadd.f32 %v3812_v49, %v3779_v45  ;;  %v8466_v50 = vadd.f32 %v3813_v36, %v3780_v7  ;;  %v8468_v37 = vadd.f32 %v3814_v27, %v3781_v56  ;;  %v8521_v49 = vld [vmem:[#allocation3 + $0x340] sm:$0xff]  ;;  %v8523_v36 = vld [vmem:[#allocation3 + $0x348] sm:$0x3f]  ;;  %10005 = vst [vmem:[#allocation25_spill] sm:$0xff] %v8561_v30 }
 0x434   : > { %v3834_v0 = vmul.f32 %v4637_v9, %v9981_v14  ;;  %v9982_v35 = vld [vmem:[#allocation10_spill] sm:$0xff]  ;;  %v8470_v41 = vadd.f32 %v3815_v4, %v3782_v63  ;;  %v8472_v42 = vadd.f32 %v3816_v20, %v3783_v24  ;;  %v8474_v13 = vadd.f32 %v3817_v61, %v3784_v3  ;;  %v8489_v56 = vld [vmem:[#allocation3 + $0x310] sm:$0xff]  ;;  %9989 = vst [vmem:[#allocation11_spill] sm:$0xff] %v8521_v49 }
 0x435   : > { %v3835_v21 = vmul.f32 %v4637_v9, %v9982_v35  ;;  %v8476_v14 = vadd.f32 %v3818_v12, %v3785_v52  ;;  %v8479_v35 = vld [vmem:[%s4831_s26 + $0x6] ss:$0 sm:$0xff]  ;;  %v8481_v10 = vadd.f32 %v3819_v55, %v3786_v6  ;;  %v8483_v54 = vadd.f32 %v3820_v16, %v3787_v60  ;;  %9983 = vst [vmem:[#allocation36_spill] sm:$0xff] %v8489_v56  ;;  %v8491_v63 = vld [vmem:[#allocation3 + $0x318] sm:$0x3f]  ;;  %v8501_v6 = vld [vmem:[#allocation3 + $0x320] sm:$0xff] }
 0x436   : > { %v8485_v45 = vadd.f32 %v3821_v48, %v3788_v15  ;;  %v8487_v7 = vadd.f32 %v3822_v5, %v3789_v29  ;;  %9984 = vst [vmem:[#allocation20_spill] sm:$0xff] %v8491_v63  ;;  %v8493_v24 = vadd.f32 %v3823_v62, %v3790_v8  ;;  %v8495_v3 = vadd.f32 %v3824_v23, %v3791_v57  ;;  %v8503_v60 = vld [vmem:[#allocation3 + $0x328] sm:$0x3f]  ;;  %v8505_v15 = vld [vmem:[#allocation3 + $0x330] sm:$0xff]  ;;  %v8507_v29 = vld [vmem:[#allocation3 + $0x338] sm:$0x3f] }
 0x437   : > { %v8497_v52 = vadd.f32 %v3825_v28, %v3792_v38  ;;  %v8499_v9 = vadd.f32 %v3826_v46, %v3793_v59  ;;  %9985 = vst [vmem:[#allocation14_spill] sm:$0xff] %v8501_v6  ;;  %v8510_v1 = vadd.f32 %v3827_v25, %v8401_v2  ;;  %v8513_v8 = vadd.f32 %v3828_v22, %v8404_v43  ;;  %v3869_v59 = vld [vmem:[#allocation3 + $0x308] sm:$0x3f]  ;;  %v9991_v4 = vld [vmem:[#allocation38_spill] sm:$0xff]  ;;  %v8537_v20 = vld [vmem:[#allocation3 + $0x350] sm:$0xff] }
 0x438   : > { %9986 = vst [vmem:[#allocation33_spill] sm:$0xff] %v8503_v60  ;;  %v8516_v57 = vadd.f32 %v3829_v44, %v8407_v32  ;;  %v8519_v38 = vadd.f32 %v3830_v39, %v8410_v31  ;;  %v8526_v27 = vadd.f32 %v3831_v53, %v8413_v40  ;;  %v8529_v2 = vadd.f32 %v3832_v51, %v8416_v58  ;;  %v8539_v31 = vld [vmem:[#allocation3 + $0x358] sm:$0x3f]  ;;  %v8541_v61 = vld [vmem:[#allocation3 + $0x360] sm:$0xff]  ;;  %v9998_v58 = vld [vmem:[#allocation16_spill] sm:$0xff] }
 0x439   : > { %9987 = vst [vmem:[#allocation17_spill] sm:$0xff] %v8505_v15  ;;  %v8532_v43 = vadd.f32 %v3833_v33, %v8419_v11  ;;  %v8535_v32 = vadd.f32 %v3834_v0, %v9991_v4  ;;  %v9995_v12 = vld [vmem:[#allocation30_spill] sm:$0xff]  ;;  %v9996_v40 = vld [vmem:[#allocation15_spill] sm:$0xff]  ;;  %v8550_v48 = vadd.f32 %v3837_v26, %v9998_v58  ;;  %v10000_v11 = vld [vmem:[#allocation32_spill] sm:$0xff]  ;;  %v3904_v46 = vmul.f32 %v8479_v35, %v3869_v59 }
 0x43a   : > { %9988 = vst [vmem:[#allocation31_spill] sm:$0xff] %v8507_v29  ;;  %v8544_v55 = vadd.f32 %v3835_v21, %v9995_v12  ;;  %v8547_v16 = vadd.f32 %v3836_v47, %v9996_v40  ;;  %v8553_v33 = vadd.f32 %v3838_v19, %v10000_v11  ;;  %v8555_v0 = vld [vmem:[#allocation3 + $0x368] sm:$0x3f]  ;;  %v8557_v5 = vld [vmem:[#allocation3 + $0x370] sm:$0xff]  ;;  %v8559_v34 = vld [vmem:[#allocation3 + $0x378] sm:$0x3f]  ;;  %v3905_v19 = vmul.f32 %v8479_v35, %v8489_v56 }
 0x43b   : > { %9990 = vst [vmem:[#allocation12_spill] sm:$0xff] %v8523_v36  ;;  %v8563_v62 = vld [vmem:[#allocation3 + $0x388] sm:$0x3f]  ;;  %v8565_v21 = vld [vmem:[#allocation3 + $0x390] sm:$0xff]  ;;  %v4660_v23 = vld [vmem:[#allocation3] sm:$0xff]  ;;  %v3906_v25 = vmul.f32 %v8479_v35, %v8491_v63  ;;  %v3907_v53 = vmul.f32 %v8479_v35, %v8501_v6  ;;  %v3908_v51 = vmul.f32 %v8479_v35, %v8503_v60  ;;  %v3909_v47 = vmul.f32 %v8479_v35, %v8505_v15 }
 0x43c   : > { %9992 = vst [vmem:[#allocation13_spill] sm:$0xff] %v8537_v20  ;;  %v3903_v28 = vmul.f32 %v4660_v23, %v8479_v35  ;;  %v8573_v22 = vld [vmem:[#allocation3 + $0x398] sm:$0x3f]  ;;  %v8575_v44 = vld [vmem:[#allocation3 + $0x3a0] sm:$0xff]  ;;  %v8577_v39 = vld [vmem:[#allocation3 + $0x3a8] sm:$0x3f]  ;;  %v3910_v26 = vmul.f32 %v8479_v35, %v8507_v29  ;;  %v3911_v40 = vmul.f32 %v8479_v35, %v8521_v49  ;;  %v3912_v58 = vmul.f32 %v8479_v35, %v8523_v36 }
 0x43d   : > { %9993 = vst [vmem:[#allocation18_spill] sm:$0xff] %v8539_v31  ;;  %v8587_v59 = vld [vmem:[#allocation3 + $0x3b0] sm:$0xff]  ;;  %v8589_v4 = vld [vmem:[#allocation3 + $0x3b8] sm:$0x3f]  ;;  %v8591_v12 = vld [vmem:[#allocation3 + $0x3c0] sm:$0xff]  ;;  %v3913_v11 = vmul.f32 %v8479_v35, %v8537_v20  ;;  %v3914_v23 = vmul.f32 %v8479_v35, %v8539_v31  ;;  %v3915_v6 = vmul.f32 %v8479_v35, %v8541_v61  ;;  %v3916_v49 = vmul.f32 %v8479_v35, %v8555_v0 }
 0x43e   : > { %9994 = vst [vmem:[#allocation19_spill] sm:$0xff] %v8541_v61  ;;  %v8601_v15 = vld [vmem:[#allocation3 + $0x3c8] sm:$0x3f]  ;;  %v8603_v29 = vld [vmem:[#allocation3 + $0x3d0] sm:$0xff]  ;;  %v8605_v60 = vld [vmem:[#allocation3 + $0x3d8] sm:$0x3f]  ;;  %v3917_v36 = vmul.f32 %v8479_v35, %v8557_v5  ;;  %v3918_v20 = vmul.f32 %v8479_v35, %v8559_v34  ;;  %v3919_v31 = vmul.f32 %v8479_v35, %v8561_v30  ;;  %v3920_v63 = vmul.f32 %v8479_v35, %v8563_v62 }
 0x43f   : > { %9997 = vst [vmem:[#allocation23_spill] sm:$0xff] %v8547_v16  ;;  %v3921_v56 = vmul.f32 %v8479_v35, %v8565_v21  ;;  %v3922_v61 = vmul.f32 %v8479_v35, %v8573_v22  ;;  %v3926_v30 = vmul.f32 %v8479_v35, %v8589_v4  ;;  %v3938_v16 = vadd.f32 %v3910_v26, %v8476_v14 }
 0x440   : > { %9999 = vst [vmem:[#allocation24_spill] sm:$0xff] %v8550_v48  ;;  %v3936_v48 = vadd.f32 %v3908_v51, %v8472_v42  ;;  %v3946_v42 = vadd.f32 %v3918_v20, %v8499_v9  ;;  %v3948_v14 = vadd.f32 %v3920_v63, %v8513_v8  ;;  %v10033_v20 = vld [vmem:[#allocation17_spill] sm:$0xff]  ;;  %v3896_v51 = vld [vmem:[#allocation3 + $0x3e0] sm:$0xff] }
 0x441   : > { %10001 = vst [vmem:[#allocation21_spill] sm:$0xff] %v8553_v33  ;;  %v3933_v33 = vadd.f32 %v3905_v19, %v8466_v50  ;;  %v3943_v50 = vadd.f32 %v3915_v6, %v8493_v24 }
 0x442   : > { %10002 = vst [vmem:[#allocation22_spill] sm:$0xff] %v8555_v0  ;;  %v3923_v0 = vmul.f32 %v8479_v35, %v8575_v44 }
 0x443   : > { %10003 = vst [vmem:[#allocation34_spill] sm:$0xff] %v8557_v5  ;;  %v3924_v5 = vmul.f32 %v8479_v35, %v8577_v39 }
 0x444   : > { %10004 = vst [vmem:[#allocation35_spill] sm:$0xff] %v8559_v34  ;;  %v3925_v34 = vmul.f32 %v8479_v35, %v8587_v59 }
 0x445   : > { %10006 = vst [vmem:[#allocation27_spill] sm:$0xff] %v8563_v62  ;;  %v3927_v62 = vmul.f32 %v8479_v35, %v8591_v12 }
 0x446   : > { %10007 = vst [vmem:[#allocation28_spill] sm:$0xff] %v8565_v21  ;;  %v3928_v21 = vmul.f32 %v8479_v35, %v8601_v15  ;;  %v8671_v24 = vadd.f32 %v3925_v34, %v8532_v43  ;;  %v10032_v43 = vld [vmem:[#allocation33_spill] sm:$0xff]  ;;  %v10036_v34 = vld [vmem:[#allocation12_spill] sm:$0xff] }
 0x447   : > { %10008 = vst [vmem:[#allocation8_spill] sm:$0xff] %v8573_v22  ;;  %v3929_v22 = vmul.f32 %v8479_v35, %v8603_v29  ;;  %v8677_v63 = vadd.f32 %v3927_v62, %v8544_v55  ;;  %v10025_v9 = vld [vmem:[#allocation24_spill] sm:$0xff]  ;;  %v10037_v62 = vld [vmem:[#allocation13_spill] sm:$0xff] }
 0x448   : > { %10009 = vst [vmem:[#allocation7_spill] sm:$0xff] %v8575_v44  ;;  %v3930_v44 = vmul.f32 %v8479_v35, %v8605_v60  ;;  %v3940_v35 = vadd.f32 %v3912_v58, %v8483_v54  ;;  %v8662_v54 = vadd.f32 %v3922_v61, %v8519_v38  ;;  %v10034_v61 = vld [vmem:[#allocation31_spill] sm:$0xff] }
 0x449   : > { %10010 = vst [vmem:[#allocation37_spill] sm:$0xff] %v8577_v39  ;;  %v3931_v39 = vadd.f32 %v3903_v28, %v8462_v18  ;;  %v3941_v18 = vadd.f32 %v3913_v11, %v8485_v45  ;;  %v4639_v28 = vld [vmem:[%s4831_s26 + $0x10] ss:$0 sm:$0xff]  ;;  %v8665_v45 = vadd.f32 %v3923_v0, %v8526_v27  ;;  %v8683_v6 = vadd.f32 %v3929_v22, %v10025_v9  ;;  %v10035_v0 = vld [vmem:[#allocation11_spill] sm:$0xff] }
 0x44a   : > { %10011 = vst [vmem:[#allocation26_spill] sm:$0xff] %v8587_v59  ;;  %v3932_v59 = vadd.f32 %v3904_v46, %v8464_v17  ;;  %v3942_v17 = vadd.f32 %v3914_v23, %v8487_v7  ;;  %v8668_v7 = vadd.f32 %v3924_v5, %v8529_v2  ;;  %v10031_v27 = vld [vmem:[#allocation14_spill] sm:$0xff]  ;;  %v3969_v55 = vmul.f32 %v4639_v28, %v10034_v61  ;;  %v10043_v23 = vld [vmem:[#allocation25_spill] sm:$0xff] }
 0x44b   : > { %10012 = vst [vmem:[#allocation29_spill] sm:$0xff] %v8589_v4  ;;  %v3934_v4 = vadd.f32 %v3906_v25, %v8468_v37  ;;  %v3944_v37 = vadd.f32 %v3916_v49, %v8495_v3  ;;  %v8674_v3 = vadd.f32 %v3926_v30, %v8535_v32  ;;  %v10030_v49 = vld [vmem:[#allocation20_spill] sm:$0xff]  ;;  %v3966_v2 = vmul.f32 %v4639_v28, %v10031_v27  ;;  %v10038_v46 = vld [vmem:[#allocation18_spill] sm:$0xff]  ;;  %v10039_v25 = vld [vmem:[#allocation19_spill] sm:$0xff] }
 0x44c   : > { %10013 = vst [vmem:[#allocation9_spill] sm:$0xff] %v8591_v12  ;;  %v3935_v12 = vadd.f32 %v3907_v53, %v8470_v41  ;;  %v3945_v41 = vadd.f32 %v3917_v36, %v8497_v52  ;;  %v3965_v36 = vmul.f32 %v4639_v28, %v10030_v49  ;;  %v3967_v32 = vmul.f32 %v4639_v28, %v10032_v43  ;;  %v10041_v26 = vld [vmem:[#allocation34_spill] sm:$0xff]  ;;  %v10042_v58 = vld [vmem:[#allocation35_spill] sm:$0xff] }
 0x44d   : > { %10014 = vst [vmem:[#allocation10_spill] sm:$0xff] %v8601_v15  ;;  %v3937_v15 = vadd.f32 %v3909_v47, %v8474_v13  ;;  %v3947_v13 = vadd.f32 %v3919_v31, %v8510_v1  ;;  %v10027_v1 = vld [vmem:[#allocation21_spill] sm:$0xff]  ;;  %v3968_v31 = vmul.f32 %v4639_v28, %v10033_v20  ;;  %v3970_v5 = vmul.f32 %v4639_v28, %v10035_v0  ;;  %v3897_v47 = vld [vmem:[#allocation3 + $0x3e8] sm:$0x3f] }
 0x44e   : > { %10015 = vst [vmem:[#allocation38_spill] sm:$0xff] %v8603_v29  ;;  %v3939_v29 = vadd.f32 %v3911_v40, %v8481_v10  ;;  %v8659_v10 = vadd.f32 %v3921_v56, %v8516_v57  ;;  %v10023_v56 = vld [vmem:[#allocation23_spill] sm:$0xff]  ;;  %v8686_v8 = vadd.f32 %v3930_v44, %v10027_v1  ;;  %v10029_v57 = vld [vmem:[#allocation36_spill] sm:$0xff]  ;;  %v3971_v30 = vmul.f32 %v4639_v28, %v10036_v34  ;;  %v10040_v44 = vld [vmem:[#allocation22_spill] sm:$0xff] }
 0x44f   : > { %10017 = vst [vmem:[#allocation15_spill] sm:$0xff] %v8662_v54  ;;  %v8680_v52 = vadd.f32 %v3928_v21, %v10023_v56  ;;  %v3964_v38 = vmul.f32 %v4639_v28, %v10029_v57  ;;  %v3972_v21 = vmul.f32 %v4639_v28, %v10037_v62  ;;  %v3973_v19 = vmul.f32 %v4639_v28, %v10038_v46  ;;  %v10044_v9 = vld [vmem:[#allocation27_spill] sm:$0xff]  ;;  %v10045_v57 = vld [vmem:[#allocation28_spill] sm:$0xff] }
 0x450   : > { %10016 = vst [vmem:[#allocation30_spill] sm:$0xff] %v8659_v10  ;;  %v3974_v22 = vmul.f32 %v4639_v28, %v10039_v25  ;;  %v3975_v53 = vmul.f32 %v4639_v28, %v10040_v44  ;;  %v3976_v40 = vmul.f32 %v4639_v28, %v10041_v26  ;;  %v3977_v11 = vmul.f32 %v4639_v28, %v10042_v58  ;;  %v10046_v27 = vld [vmem:[#allocation8_spill] sm:$0xff]  ;;  %v10047_v20 = vld [vmem:[#allocation7_spill] sm:$0xff]  ;;  %v10048_v0 = vld [vmem:[#allocation37_spill] sm:$0xff] }
 0x451   : > { %10018 = vst [vmem:[#allocation16_spill] sm:$0xff] %v8665_v45  ;;  %v3978_v56 = vmul.f32 %v4639_v28, %v10043_v23  ;;  %v3979_v1 = vmul.f32 %v4639_v28, %v10044_v9  ;;  %v3980_v49 = vmul.f32 %v4639_v28, %v10045_v57  ;;  %v3981_v43 = vmul.f32 %v4639_v28, %v10046_v27  ;;  %v10049_v62 = vld [vmem:[#allocation26_spill] sm:$0xff]  ;;  %v4021_v54 = vld [vmem:[#allocation3 + $0x309] sm:$0x3f] }
 0x452   : > { %10019 = vst [vmem:[#allocation32_spill] sm:$0xff] %v8668_v7  ;;  %v3982_v61 = vmul.f32 %v4639_v28, %v10047_v20  ;;  %v3983_v34 = vmul.f32 %v4639_v28, %v10048_v0  ;;  %v3984_v46 = vmul.f32 %v4639_v28, %v10049_v62  ;;  %v10050_v25 = vld [vmem:[#allocation29_spill] sm:$0xff]  ;;  %v3989_v9 = vmul.f32 %v4639_v28, %v8605_v60 }
 0x453   : > { %10020 = vst [vmem:[#allocation39_spill] sm:$0xff] %v8671_v24  ;;  %v3985_v44 = vmul.f32 %v4639_v28, %v10050_v25  ;;  %v3990_v57 = vmul.f32 %v4639_v28, %v3896_v51  ;;  %v3992_v27 = vadd.f32 %v3964_v38, %v3931_v39  ;;  %v3994_v20 = vadd.f32 %v3966_v2, %v3933_v33  ;;  %v4020_v25 = vld [vmem:[#allocation3 + $0x301] sm:$0xff]  ;;  %v4025_v38 = vld [vmem:[#allocation3 + $0x329] sm:$0x3f] }
 0x454   : > { %10021 = vst [vmem:[#allocation40_spill] sm:$0xff] %v8674_v3  ;;  %v3993_v3 = vadd.f32 %v3965_v36, %v3932_v59  ;;  %v3995_v24 = vadd.f32 %v3967_v32, %v3934_v4  ;;  %v3996_v0 = vadd.f32 %v3968_v31, %v3935_v12  ;;  %v3997_v7 = vadd.f32 %v3969_v55, %v3936_v48  ;;  %v4023_v4 = vld [vmem:[#allocation3 + $0x319] sm:$0x3f] }
 0x455   : > { %10022 = vst [vmem:[#allocation41_spill] sm:$0xff] %v8677_v63  ;;  %v10053_v23 = vld [vmem:[#allocation38_spill] sm:$0xff]  ;;  %v3991_v63 = vmul.f32 %v4639_v28, %v3897_v47  ;;  %v3998_v62 = vadd.f32 %v3970_v5, %v3937_v15  ;;  %v3999_v45 = vadd.f32 %v3971_v30, %v3938_v16  ;;  %v8717_v10 = vadd.f32 %v3972_v21, %v3939_v29  ;;  %v4022_v29 = vld [vmem:[#allocation3 + $0x311] sm:$0xff] }
 0x456   : > { %10024 = vst [vmem:[#allocation23_spill] sm:$0xff] %v8680_v52  ;;  %v3988_v52 = vmul.f32 %v4639_v28, %v10053_v23  ;;  %v8721_v23 = vadd.f32 %v3974_v22, %v3941_v18  ;;  %v8723_v60 = vadd.f32 %v3975_v53, %v3942_v17  ;;  %v8725_v39 = vadd.f32 %v3976_v40, %v3943_v50  ;;  %v8752_v36 = vld [vmem:[%s4831_s26 + $0x12] ss:$0 sm:$0xff] }
 0x457   : > { %10026 = vst [vmem:[#allocation24_spill] sm:$0xff] %v8683_v6  ;;  %v10052_v6 = vld [vmem:[#allocation10_spill] sm:$0xff]  ;;  %v8727_v33 = vadd.f32 %v3977_v11, %v3944_v37  ;;  %v8729_v48 = vadd.f32 %v3978_v56, %v3945_v41  ;;  %v8731_v15 = vadd.f32 %v3979_v1, %v3946_v42  ;;  %v8733_v16 = vadd.f32 %v3980_v49, %v3947_v13  ;;  %v4029_v49 = vld [vmem:[#allocation3 + $0x349] sm:$0x3f] }
 0x458   : > { %10028 = vst [vmem:[#allocation21_spill] sm:$0xff] %v8686_v8  ;;  %v10051_v8 = vld [vmem:[#allocation9_spill] sm:$0xff]  ;;  %v3987_v58 = vmul.f32 %v4639_v28, %v10052_v6  ;;  %v8719_v6 = vadd.f32 %v3973_v19, %v3940_v35  ;;  %v8735_v59 = vadd.f32 %v3981_v43, %v3948_v14  ;;  %v10054_v18 = vld [vmem:[#allocation30_spill] sm:$0xff]  ;;  %v10056_v37 = vld [vmem:[#allocation16_spill] sm:$0xff] }
 0x459   : > { %v3986_v26 = vmul.f32 %v4639_v28, %v10051_v8  ;;  %v8715_v8 = vld [vmem:[%s4831_s26 + $0x8] ss:$0 sm:$0xff]  ;;  %v8740_v17 = vadd.f32 %v3982_v61, %v10054_v18  ;;  %v10055_v28 = vld [vmem:[#allocation15_spill] sm:$0xff]  ;;  %v8746_v41 = vadd.f32 %v3984_v46, %v10056_v37  ;;  %v4027_v22 = vld [vmem:[#allocation3 + $0x339] sm:$0x3f]  ;;  %s8792_s26 = scalar_lea.vmem [#allocation6], %s4591_s6 }
 0x45a   : > { %v4055_v12 = vmul.f32 %v8715_v8, %v4020_v25  ;;  %v4056_v35 = vmul.f32 %v8715_v8, %v4021_v54  ;;  %v8743_v50 = vadd.f32 %v3983_v34, %v10055_v28  ;;  %v10057_v42 = vld [vmem:[#allocation32_spill] sm:$0xff]  ;;  %v4024_v14 = vld [vmem:[#allocation3 + $0x321] sm:$0xff]  ;;  %v4057_v56 = vmul.f32 %v8715_v8, %v4022_v29 }
 0x45b   : > { %v8749_v13 = vadd.f32 %v3985_v44, %v10057_v42  ;;  %v10058_v2 = vld [vmem:[#allocation39_spill] sm:$0xff]  ;;  %v10059_v54 = vld [vmem:[#allocation40_spill] sm:$0xff]  ;;  %v4058_v1 = vmul.f32 %v8715_v8, %v4023_v4  ;;  %v4060_v43 = vmul.f32 %v8715_v8, %v4025_v38  ;;  %v4062_v44 = vmul.f32 %v8715_v8, %v4027_v22 }
 0x45c   : > { %v8755_v32 = vadd.f32 %v3986_v26, %v10058_v2  ;;  %v8758_v31 = vadd.f32 %v3987_v58, %v10059_v54  ;;  %v10060_v55 = vld [vmem:[#allocation41_spill] sm:$0xff]  ;;  %v4028_v11 = vld [vmem:[#allocation3 + $0x341] sm:$0xff]  ;;  %v4083_v61 = vadd.f32 %v4055_v12, %v3992_v27  ;;  %v4084_v34 = vadd.f32 %v4056_v35, %v3993_v3 }
 0x45d   : > { %v8761_v5 = vadd.f32 %v3988_v52, %v10060_v55  ;;  %v10061_v30 = vld [vmem:[#allocation23_spill] sm:$0xff]  ;;  %v4026_v19 = vld [vmem:[#allocation3 + $0x331] sm:$0xff]  ;;  %v4059_v52 = vmul.f32 %v8715_v8, %v4024_v14  ;;  %v4085_v26 = vadd.f32 %v4057_v56, %v3994_v20  ;;  %v4086_v58 = vadd.f32 %v4058_v1, %v3995_v24  ;;  %v4031_v12 = vld [vmem:[#allocation3 + $0x359] sm:$0x3f] }
 0x45e   : > { %v8764_v21 = vadd.f32 %v3989_v9, %v10061_v30  ;;  %v10062_v53 = vld [vmem:[#allocation24_spill] sm:$0xff]  ;;  %v4061_v46 = vmul.f32 %v8715_v8, %v4026_v19  ;;  %v4117_v25 = vmul.f32 %v8752_v36, %v4023_v4  ;;  %v4064_v28 = vmul.f32 %v8715_v8, %v4029_v49 }
 0x45f   : > { %v8768_v51 = vadd.f32 %v3990_v57, %v10062_v53  ;;  %v10063_v47 = vld [vmem:[#allocation21_spill] sm:$0xff]  ;;  %v4087_v9 = vadd.f32 %v4059_v52, %v3996_v0  ;;  %v4116_v57 = vmul.f32 %v8752_v36, %v4022_v29  ;;  %v4088_v37 = vadd.f32 %v4060_v43, %v3997_v7  ;;  %v4032_v0 = vld [vmem:[#allocation3 + $0x361] sm:$0xff]  ;;  %v4033_v55 = vld [vmem:[#allocation3 + $0x369] sm:$0x3f] }
 0x460   : > { %v8771_v40 = vadd.f32 %v3991_v63, %v10063_v47  ;;  %v4063_v63 = vmul.f32 %v8715_v8, %v4028_v11  ;;  %v4030_v18 = vld [vmem:[#allocation3 + $0x351] sm:$0xff]  ;;  %v4118_v27 = vmul.f32 %v8752_v36, %v4024_v14  ;;  %v4119_v3 = vmul.f32 %v8752_v36, %v4025_v38  ;;  %v4036_v52 = vld [vmem:[#allocation3 + $0x381] sm:$0xff] }
 0x461   : > { %v4089_v35 = vadd.f32 %v4061_v46, %v3998_v62  ;;  %v4120_v24 = vmul.f32 %v8752_v36, %v4026_v19  ;;  %v4144_v20 = vadd.f32 %v4116_v57, %v4083_v61  ;;  %v4145_v42 = vadd.f32 %v4117_v25, %v4084_v34  ;;  %v4037_v34 = vld [vmem:[#allocation3 + $0x389] sm:$0x3f]  ;;  %v4039_v25 = vld [vmem:[#allocation3 + $0x399] sm:$0x3f] }
 0x462   : > { %v4090_v2 = vadd.f32 %v4062_v44, %v3999_v45  ;;  %v4121_v29 = vmul.f32 %v8752_v36, %v4027_v22  ;;  %v4146_v4 = vadd.f32 %v4118_v27, %v4085_v26  ;;  %v4147_v54 = vadd.f32 %v4119_v3, %v4086_v58  ;;  %v4034_v45 = vld [vmem:[#allocation3 + $0x371] sm:$0xff]  ;;  %v4040_v27 = vld [vmem:[#allocation3 + $0x3a1] sm:$0xff] }
 0x463   : > { %v4065_v7 = vmul.f32 %v8715_v8, %v4030_v18  ;;  %v4091_v14 = vadd.f32 %v4063_v63, %v8717_v10  ;;  %v4122_v38 = vmul.f32 %v8752_v36, %v4028_v11  ;;  %v4148_v30 = vadd.f32 %v4120_v24, %v4087_v9  ;;  %4172 = vst [vmem:[%s8792_s26] sm:$0xff] %v4144_v20  ;;  %v4035_v10 = vld [vmem:[#allocation3 + $0x379] sm:$0x3f]  ;;  %v4038_v58 = vld [vmem:[#allocation3 + $0x391] sm:$0xff]  ;;  %v4041_v24 = vld [vmem:[#allocation3 + $0x3a9] sm:$0x3f] }
 0x464   : > { %v4066_v62 = vmul.f32 %v8715_v8, %v4031_v12  ;;  %v4092_v19 = vadd.f32 %v4064_v28, %v8719_v6  ;;  %v4123_v22 = vmul.f32 %v8752_v36, %v4029_v49  ;;  %v4149_v53 = vadd.f32 %v4121_v29, %v4088_v37  ;;  %4173 = vst [vmem:[%s8792_s26 + $0x8] sm:$0x3f] %v4145_v42 }
 0x465   : > { %v4067_v47 = vmul.f32 %v8715_v8, %v4032_v0  ;;  %v4093_v11 = vadd.f32 %v4065_v7, %v8721_v23  ;;  %v4124_v56 = vmul.f32 %v8752_v36, %v4030_v18  ;;  %v4150_v1 = vadd.f32 %v4122_v38, %v4089_v35  ;;  %4174 = vst [vmem:[%s8792_s26 + $0x10] sm:$0xff] %v4146_v4 }
 0x466   : > { %v4068_v43 = vmul.f32 %v8715_v8, %v4033_v55  ;;  %v4094_v6 = vadd.f32 %v4066_v62, %v8723_v60  ;;  %v4125_v49 = vmul.f32 %v8752_v36, %v4031_v12  ;;  %v4151_v61 = vadd.f32 %v4123_v22, %v4090_v2  ;;  %4175 = vst [vmem:[%s8792_s26 + $0x18] sm:$0x3f] %v4147_v54  ;;  %v4042_v2 = vld [vmem:[#allocation3 + $0x3b1] sm:$0xff]  ;;  %v4045_v22 = vld [vmem:[#allocation3 + $0x3c9] sm:$0x3f] }
 0x467   : > { %v4069_v46 = vmul.f32 %v8715_v8, %v4034_v45  ;;  %v4095_v23 = vadd.f32 %v4067_v47, %v8725_v39  ;;  %v4126_v44 = vmul.f32 %v8752_v36, %v4032_v0  ;;  %v4152_v26 = vadd.f32 %v4124_v56, %v4091_v14  ;;  %4176 = vst [vmem:[%s8792_s26 + $0x20] sm:$0xff] %v4148_v30  ;;  %v4044_v30 = vld [vmem:[#allocation3 + $0x3c1] sm:$0xff] }
 0x468   : > { %v4070_v63 = vmul.f32 %v8715_v8, %v4035_v10  ;;  %v4096_v60 = vadd.f32 %v4068_v43, %v8727_v33  ;;  %v4127_v9 = vmul.f32 %v8752_v36, %v4033_v55  ;;  %v4153_v57 = vadd.f32 %v4125_v49, %v4092_v19  ;;  %4177 = vst [vmem:[%s8792_s26 + $0x28] sm:$0x3f] %v4149_v53  ;;  %v4043_v55 = vld [vmem:[#allocation3 + $0x3b9] sm:$0x3f] }
 0x469   : > { %v4071_v18 = vmul.f32 %v8715_v8, %v4036_v52  ;;  %v4097_v39 = vadd.f32 %v4069_v46, %v8729_v48  ;;  %v4128_v28 = vmul.f32 %v8752_v36, %v4034_v45  ;;  %v4154_v37 = vadd.f32 %v4126_v44, %v4093_v11  ;;  %4178 = vst [vmem:[%s8792_s26 + $0x30] sm:$0xff] %v4150_v1  ;;  %v4046_v11 = vld [vmem:[#allocation3 + $0x3d1] sm:$0xff]  ;;  %v4047_v43 = vld [vmem:[#allocation3 + $0x3d9] sm:$0x3f] }
 0x46a   : > { %v4072_v3 = vmul.f32 %v8715_v8, %v4037_v34  ;;  %v4098_v33 = vadd.f32 %v4070_v63, %v8731_v15  ;;  %v4129_v12 = vmul.f32 %v8752_v36, %v4035_v10  ;;  %v4155_v35 = vadd.f32 %v4127_v9, %v4094_v6  ;;  %4179 = vst [vmem:[%s8792_s26 + $0x38] sm:$0x3f] %v4151_v61  ;;  %v4048_v63 = vld [vmem:[#allocation3 + $0x3e1] sm:$0xff] }
 0x46b   : > { %v4073_v20 = vmul.f32 %v8715_v8, %v4038_v58  ;;  %v4099_v48 = vadd.f32 %v4071_v18, %v8733_v16  ;;  %v4130_v42 = vmul.f32 %v8752_v36, %v4036_v52  ;;  %v4156_v0 = vadd.f32 %v4128_v28, %v4095_v23  ;;  %4180 = vst [vmem:[%s8792_s26 + $0x40] sm:$0xff] %v4152_v26 }
 0x46c   : > { %v4074_v29 = vmul.f32 %v8715_v8, %v4039_v25  ;;  %v4100_v15 = vadd.f32 %v4072_v3, %v8735_v59  ;;  %v4131_v4 = vmul.f32 %v8752_v36, %v4037_v34  ;;  %v4157_v54 = vadd.f32 %v4129_v12, %v4096_v60  ;;  %4181 = vst [vmem:[%s8792_s26 + $0x48] sm:$0x3f] %v4153_v57 }
 0x46d   : > { %v4075_v7 = vmul.f32 %v8715_v8, %v4040_v27  ;;  %v4101_v16 = vadd.f32 %v4073_v20, %v8740_v17  ;;  %v4132_v14 = vmul.f32 %v8752_v36, %v4038_v58  ;;  %v4158_v38 = vadd.f32 %v4130_v42, %v4097_v39  ;;  %4182 = vst [vmem:[%s8792_s26 + $0x50] sm:$0xff] %v4154_v37 }
 0x46e   : > { %v4076_v45 = vmul.f32 %v8715_v8, %v4041_v24  ;;  %v4102_v59 = vadd.f32 %v4074_v29, %v8743_v50  ;;  %v4133_v62 = vmul.f32 %v8752_v36, %v4039_v25  ;;  %v4159_v19 = vadd.f32 %v4131_v4, %v4098_v33  ;;  %4183 = vst [vmem:[%s8792_s26 + $0x58] sm:$0x3f] %v4155_v35  ;;  %v4049_v25 = vld [vmem:[#allocation3 + $0x3e9] sm:$0x3f]  ;;  %v4295_v35 = vld [vmem:[%s8792_s26 + $0x10] sm:$0xff] (%p4751_p5) }
 0x46f   : > { %v4077_v53 = vmul.f32 %v8715_v8, %v4042_v2  ;;  %v4103_v17 = vadd.f32 %v4075_v7, %v8746_v41  ;;  %v4134_v10 = vmul.f32 %v8752_v36, %v4040_v27  ;;  %v4160_v47 = vadd.f32 %v4132_v14, %v4099_v48  ;;  %4184 = vst [vmem:[%s8792_s26 + $0x60] sm:$0xff] %v4156_v0  ;;  %v4299_v20 = vld [vmem:[%s8792_s26 + $0x20] sm:$0xff] (%p4751_p5)  ;;  %v4301_v48 = vld [vmem:[%s8792_s26 + $0x28] sm:$0xff] (%p4751_p5) }
 0x470   : > { %v4078_v56 = vmul.f32 %v8715_v8, %v4043_v55  ;;  %v4104_v50 = vadd.f32 %v4076_v45, %v8749_v13  ;;  %v4135_v1 = vmul.f32 %v8752_v36, %v4041_v24  ;;  %v4161_v52 = vadd.f32 %v4133_v62, %v4100_v15  ;;  %4185 = vst [vmem:[%s8792_s26 + $0x68] sm:$0x3f] %v4157_v54  ;;  %v4297_v24 = vld [vmem:[%s8792_s26 + $0x18] sm:$0xff] (%p4751_p5)  ;;  %v4303_v42 = vld [vmem:[%s8792_s26 + $0x30] sm:$0xff] (%p4751_p5) }
 0x471   : > { %v4079_v6 = vmul.f32 %v8715_v8, %v4044_v30  ;;  %v4105_v41 = vadd.f32 %v4077_v53, %v8755_v32  ;;  %v4136_v49 = vmul.f32 %v8752_v36, %v4042_v2  ;;  %v4162_v61 = vadd.f32 %v4134_v10, %v4101_v16  ;;  %4186 = vst [vmem:[%s8792_s26 + $0x70] sm:$0xff] %v4158_v38  ;;  %v4305_v0 = vld [vmem:[%s8792_s26 + $0x38] sm:$0xff] (%p4751_p5) }
 0x472   : > { %v4080_v34 = vmul.f32 %v8715_v8, %v4045_v22  ;;  %v4106_v46 = vadd.f32 %v4078_v56, %v8758_v31  ;;  %v4137_v13 = vmul.f32 %v8752_v36, %v4043_v55  ;;  %v4163_v23 = vadd.f32 %v4135_v1, %v4102_v59  ;;  %4187 = vst [vmem:[%s8792_s26 + $0x78] sm:$0x3f] %v4159_v19  ;;  %v4307_v2 = vld [vmem:[%s8792_s26 + $0x40] sm:$0xff] (%p4751_p5) }
 0x473   : > { %v4081_v44 = vmul.f32 %v8715_v8, %v4046_v11  ;;  %v4107_v26 = vadd.f32 %v4079_v6, %v8761_v5  ;;  %v4138_v32 = vmul.f32 %v8752_v36, %v4044_v30  ;;  %v4164_v58 = vadd.f32 %v4136_v49, %v4103_v17  ;;  %4188 = vst [vmem:[%s8792_s26 + $0x80] sm:$0xff] %v4160_v47  ;;  %v4309_v29 = vld [vmem:[%s8792_s26 + $0x48] sm:$0xff] (%p4751_p5) }
 0x474   : > { %v4082_v60 = vmul.f32 %v8715_v8, %v4047_v43  ;;  %v4108_v31 = vadd.f32 %v4080_v34, %v8764_v21  ;;  %v4139_v9 = vmul.f32 %v8752_v36, %v4045_v22  ;;  %v4165_v57 = vadd.f32 %v4137_v13, %v4104_v50  ;;  %4189 = vst [vmem:[%s8792_s26 + $0x88] sm:$0x3f] %v4161_v52  ;;  %v4311_v15 = vld [vmem:[%s8792_s26 + $0x50] sm:$0xff] (%p4751_p5) }
 0x475   : > { %v4109_v5 = vadd.f32 %v4081_v44, %v8768_v51  ;;  %v4140_v18 = vmul.f32 %v8752_v36, %v4046_v11  ;;  %v4166_v39 = vadd.f32 %v4138_v32, %v4105_v41  ;;  %4190 = vst [vmem:[%s8792_s26 + $0x90] sm:$0xff] %v4162_v61  ;;  %v4141_v21 = vmul.f32 %v8752_v36, %v4047_v43  ;;  %v4313_v4 = vld [vmem:[%s8792_s26 + $0x58] sm:$0xff] (%p4751_p5) }
 0x476   : > { %v4110_v8 = vadd.f32 %v4082_v60, %v8771_v40  ;;  %v4167_v28 = vadd.f32 %v4139_v9, %v4106_v46  ;;  %4191 = vst [vmem:[%s8792_s26 + $0x98] sm:$0x3f] %v4163_v23  ;;  %v4142_v37 = vmul.f32 %v8752_v36, %v4048_v63  ;;  %v4143_v51 = vmul.f32 %v8752_v36, %v4049_v25  ;;  %v4291_v36 = vld [vmem:[%s8792_s26] sm:$0xff] (%p4751_p5)  ;;  %v4293_v40 = vld [vmem:[%s8792_s26 + $0x8] sm:$0xff] (%p4751_p5) }
 0x477   : > { %v4168_v27 = vadd.f32 %v4140_v18, %v4107_v26  ;;  %4192 = vst [vmem:[%s8792_s26 + $0xa0] sm:$0xff] %v4164_v58  ;;  %v4169_v3 = vadd.f32 %v4141_v21, %v4108_v31  ;;  %v4315_v54 = vld [vmem:[%s8792_s26 + $0x60] sm:$0xff] (%p4751_p5)  ;;  %v4317_v55 = vld [vmem:[%s8792_s26 + $0x68] sm:$0xff] (%p4751_p5) }
 0x478   : > { %4193 = vst [vmem:[%s8792_s26 + $0xa8] sm:$0x3f] %v4165_v57  ;;  %v4170_v33 = vadd.f32 %v4142_v37, %v4109_v5  ;;  %v4171_v12 = vadd.f32 %v4143_v51, %v4110_v8  ;;  %v4319_v7 = vld [vmem:[%s8792_s26 + $0x70] sm:$0xff] (%p4751_p5) }
 0x479   : > { %4194 = vst [vmem:[%s8792_s26 + $0xb0] sm:$0xff] %v4166_v39  ;;  %v4321_v16 = vld [vmem:[%s8792_s26 + $0x78] sm:$0xff] (%p4751_p5) }
 0x47a   : > { %4195 = vst [vmem:[%s8792_s26 + $0xb8] sm:$0x3f] %v4167_v28  ;;  %4206 = sbr.rel (!%p4751_p5) target bundleno = 1179 (0x49b), region = 123  ;;  %v4323_v14 = vld [vmem:[%s8792_s26 + $0x80] sm:$0xff] (%p4751_p5) }
 0x47b   : > { %4196 = vst [vmem:[%s8792_s26 + $0xc0] sm:$0xff] %v4168_v27  ;;  %v4325_v38 = vld [vmem:[%s8792_s26 + $0x88] sm:$0xff] (%p4751_p5) }
 0x47c   : > { %4197 = vst [vmem:[%s8792_s26 + $0xc8] sm:$0x3f] %v4169_v3  ;;  %v4327_v30 = vld [vmem:[%s8792_s26 + $0x90] sm:$0xff] (%p4751_p5) }
 0x47d   : > { %4198 = vst [vmem:[%s8792_s26 + $0xd0] sm:$0xff] %v4170_v33  ;;  %v4329_v45 = vld [vmem:[%s8792_s26 + $0x98] sm:$0xff] (%p4751_p5) }
 0x47e   : > { %4199 = vst [vmem:[%s8792_s26 + $0xd8] sm:$0x3f] %v4171_v12  ;;  %v4331_v59 = vld [vmem:[%s8792_s26 + $0xa0] sm:$0xff] (%p4751_p5) }
 0x47f   : > { %4292 = vst [vmem:[%s8887_s9] sm:$0xff] %v4291_v36  ;;  %v4333_v62 = vld [vmem:[%s8792_s26 + $0xa8] sm:$0xff] }
 0x480   : > { %4294 = vst [vmem:[%s8887_s9 + $0x10] sm:$0xff] %v4293_v40  ;;  %v4335_v19 = vld [vmem:[%s8792_s26 + $0xb0] sm:$0xff] }
 0x481   : > { %4296 = vst [vmem:[%s8887_s9 + $0x20] sm:$0xff] %v4295_v35  ;;  %v4337_v22 = vld [vmem:[%s8792_s26 + $0xb8] sm:$0xff] }
 0x482   : > { %4298 = vst [vmem:[%s8887_s9 + $0x30] sm:$0xff] %v4297_v24  ;;  %v4339_v53 = vld [vmem:[%s8792_s26 + $0xc0] sm:$0xff] }
 0x483   : > { %4300 = vst [vmem:[%s8887_s9 + $0x40] sm:$0xff] %v4299_v20  ;;  %v4341_v17 = vld [vmem:[%s8792_s26 + $0xc8] sm:$0xff] }
 0x484   : > { %4302 = vst [vmem:[%s8887_s9 + $0x50] sm:$0xff] %v4301_v48  ;;  %v4343_v10 = vld [vmem:[%s8792_s26 + $0xd0] sm:$0xff] }
 0x485   : > { %4304 = vst [vmem:[%s8887_s9 + $0x60] sm:$0xff] %v4303_v42  ;;  %v4345_v47 = vld [vmem:[%s8792_s26 + $0xd8] sm:$0xff] }
 0x486   : > { %4306 = vst [vmem:[%s8887_s9 + $0x70] sm:$0xff] %v4305_v0 }
 0x487   : > { %4308 = vst [vmem:[%s8887_s9 + $0x80] sm:$0xff] %v4307_v2 }
 0x488   : > { %4310 = vst [vmem:[%s8887_s9 + $0x90] sm:$0xff] %v4309_v29 }
 0x489   : > { %4312 = vst [vmem:[%s8887_s9 + $0xa0] sm:$0xff] %v4311_v15 }
 0x48a   : > { %4314 = vst [vmem:[%s8887_s9 + $0xb0] sm:$0xff] %v4313_v4 }
 0x48b   : > { %4316 = vst [vmem:[%s8887_s9 + $0xc0] sm:$0xff] %v4315_v54 }
 0x48c   : > { %4318 = vst [vmem:[%s8887_s9 + $0xd0] sm:$0xff] %v4317_v55 }
 0x48d   : > { %4320 = vst [vmem:[%s8887_s9 + $0xe0] sm:$0xff] %v4319_v7 }
 0x48e   : > { %4322 = vst [vmem:[%s8887_s9 + $0xf0] sm:$0xff] %v4321_v16 }
 0x48f   : > { %4324 = vst [vmem:[%s8887_s9 + $0x100] sm:$0xff] %v4323_v14 }
 0x490   : > { %4326 = vst [vmem:[%s8887_s9 + $0x110] sm:$0xff] %v4325_v38 }
 0x491   : > { %4328 = vst [vmem:[%s8887_s9 + $0x120] sm:$0xff] %v4327_v30 }
 0x492   : > { %4330 = vst [vmem:[%s8887_s9 + $0x130] sm:$0xff] %v4329_v45 }
 0x493   : > { %4332 = vst [vmem:[%s8887_s9 + $0x140] sm:$0xff] %v4331_v59 }
 0x494   : > { %4334 = vst [vmem:[%s8887_s9 + $0x150] sm:$0xff] %v4333_v62 }
 0x495   : > { %4336 = vst [vmem:[%s8887_s9 + $0x160] sm:$0xff] %v4335_v19 }
 0x496   : > { %4338 = vst [vmem:[%s8887_s9 + $0x170] sm:$0xff] %v4337_v22 }
 0x497   : > { %4340 = vst [vmem:[%s8887_s9 + $0x180] sm:$0xff] %v4339_v53 }
 0x498   : > { %4342 = vst [vmem:[%s8887_s9 + $0x190] sm:$0xff] %v4341_v17 }
 0x499   : > { %4344 = vst [vmem:[%s8887_s9 + $0x1a0] sm:$0xff] %v4343_v10 }
 0x49a   : > { %4346 = vst [vmem:[%s8887_s9 + $0x1b0] sm:$0xff] %v4345_v47 }
 0x49b PF: > { %p12_p11 = scmp.ge.s32.totalorder %s4735_s22, 4   ;;  %s10064_s18 = smov %s4679_s19 }
 0x49c   : > { %s10065_s19 = smov %s4745_s25  ;;  %s10066_s20 = smov %s4735_s22 }
 0x49d   :  { %14 = sbr.rel (!%p12_p11) target bundleno = 2 (0x2), region = 289 }

</bundles_post_ra>
